<compile_context>
chip_gen: v6e
topology: v6e:2x2x1
jax: 0.10.0
libtpu: 0.0.40
codegen_flags: <defaults>
</compile_context>

<pallas_src>
import functools
import math

import jax
import jax.numpy as jnp
from jax.experimental import pallas as pl
from jax.experimental.pallas import tpu as pltpu


def _cross_attention_kernel(hs_ref, ctx_ref, dww_ref, dwb_ref, pww_ref,
                            pwb_ref, o_ref, *, tile_h, C, W, scale):
    f32 = jnp.float32
    bf16 = jnp.bfloat16

    t = pl.program_id(1)
    row0 = pl.multiple_of(t * tile_h, tile_h)

    # 0/1 shift matrices for the W (lane) axis: the kx = -1/+1 taps of the 3x3
    # depthwise conv become tiny MXU matmuls instead of unaligned lane slices.
    src = jax.lax.broadcasted_iota(jnp.int32, (W, W), 0)
    dst = jax.lax.broadcasted_iota(jnp.int32, (W, W), 1)
    s_prev = (dst == src + 1).astype(f32)          # y[w] = x[w-1], y[0]   = 0
    s_next = (dst == src - 1).astype(f32)          # y[w] = x[w+1], y[W-1] = 0

    def shift_w(rows, smat):
        r2 = rows.reshape(tile_h * C, W)           # free reshape (major dims)
        y = jnp.dot(r2, smat, preferred_element_type=f32)
        return y.reshape(tile_h, C, W)

    def depthwise(x_halo, projs):
        """3x3 depthwise conv of the (tile_h+2, C, W) halo tile, per proj."""
        accs = [None] * len(projs)
        for ky in range(3):
            row = x_halo[ky:ky + tile_h]                       # (tile_h, C, W)
            taps = (shift_w(row, s_prev), row, shift_w(row, s_next))
            for kx in range(3):
                tap = taps[kx]
                for n, p in enumerate(projs):
                    wt = dww_ref[p, ky, kx]                    # (C, W) pre-bcast
                    if accs[n] is None:
                        # first tap initialises the accumulator; bias folded in
                        accs[n] = tap * wt + dwb_ref[p]
                    else:
                        accs[n] = accs[n] + tap * wt
        return accs

    def pointwise(x, p, post_scale=None):
        """1x1 conv: tH (C,C)@(C,W) MXU dots, bf16 operands, f32 accumulate."""
        wmat = pww_ref[p].astype(bf16)                         # (C, C)
        bias = pwb_ref[p]                                      # (C, W)
        rows = []
        for h in range(tile_h):
            y = jnp.dot(wmat, x[h].astype(bf16),
                        preferred_element_type=f32) + bias
            if post_scale is not None:
                y = y * post_scale
            rows.append(y.astype(bf16))
        return jnp.stack(rows, axis=0)                         # (tile_h, C, W)

    # --- Q projection (hidden_states halo tile); 1/sqrt(head) folded into q --
    hs = hs_ref[0, pl.ds(row0, tile_h + 2)]                    # (tile_h+2, C, W)
    (q_dw,) = depthwise(hs, (0,))
    q = pointwise(q_dw, 0, post_scale=scale)

    # --- K / V projections share the ctx halo tile and its shifted taps ------
    cx = ctx_ref[0, pl.ds(row0, tile_h + 2)]
    k_dw, v_dw = depthwise(cx, (1, 2))
    k = pointwise(k_dw, 1)
    v = pointwise(v_dw, 2)

    # --- attention over the channel axis, batched over the tile's H rows -----
    s = jnp.einsum('hiw,hjw->hij', q, k, preferred_element_type=f32)
    s = s - jnp.max(s, axis=-1, keepdims=True)
    e = jnp.exp(s)
    probs = e * pl.reciprocal(jnp.sum(e, axis=-1, keepdims=True), approx=True)
    # nn.Dropout(p=0.0) is the identity at inference time.
    out = jnp.einsum('hij,hjw->hiw', probs.astype(bf16), v,
                     preferred_element_type=f32)
    o_ref[0] = out.astype(o_ref.dtype)


@functools.partial(jax.jit, static_argnames=("num_heads", "tile_h"))
def cross_attention_forward(hidden_states, ctx, params, num_heads, tile_h=8):
    """hidden_states, ctx: (B, C, H, W) float32.  Returns (B, C, H, W)."""
    B, C, H, W = hidden_states.shape
    if C % num_heads != 0:
        raise ValueError("dim must be a multiple of num_heads")
    scale = 1.0 / math.sqrt(C // num_heads)

    # Largest H tile <= tile_h that divides H (grid stays exact).
    th = min(tile_h, H)
    while H % th != 0:
        th -= 1
    n_h = H // th

    # NCHW -> (B, H, C, W) (the layout the attention math wants), plus a 1-row
    # zero halo along H so the kernel needs no padded scratch / zeroing.
    hs_t = jnp.pad(jnp.transpose(hidden_states, (0, 2, 1, 3)),
                   ((0, 0), (1, 1), (0, 0), (0, 0)))
    ctx_t = jnp.pad(jnp.transpose(ctx, (0, 2, 1, 3)),
                    ((0, 0), (1, 1), (0, 0), (0, 0)))

    # Pre-broadcast per-channel depthwise weights / biases along the lane (W)
    # axis so the kernel never re-broadcasts (C,1) tiles per tap.
    dww = jnp.broadcast_to(params['dw_w'].reshape(3, 3, 3, C, 1), (3, 3, 3, C, W))
    dwb = jnp.broadcast_to(params['dw_b'].reshape(3, C, 1), (3, C, W))
    pww = params['pw_w']                                   # (proj, C_out, C_in)
    pwb = jnp.broadcast_to(params['pw_b'].reshape(3, C, 1), (3, C, W))

    kernel = functools.partial(_cross_attention_kernel,
                               tile_h=th, C=C, W=W, scale=scale)

    # VMEM budget: double-buffered blocks + headroom for live f32 temporaries.
    itemsize = 4
    in_blk = (H + 2) * C * W * itemsize
    w_blk = (27 * C * W + 3 * C * W + 3 * C * C + 3 * C * W) * itemsize
    out_blk = th * C * W * itemsize
    live = (4 * th * C * W + 2 * th * C * C) * itemsize
    vmem_limit = int(min(100 * 2 ** 20,
                         max(16 * 2 ** 20,
                             4 * in_blk + 2 * w_blk + 2 * out_blk + 4 * live)))

    out = pl.pallas_call(
        kernel,
        out_shape=jax.ShapeDtypeStruct((B, H, C, W), jnp.float32),
        grid=(B, n_h),
        in_specs=[
            pl.BlockSpec((1, H + 2, C, W), lambda b, t: (b, 0, 0, 0)),
            pl.BlockSpec((1, H + 2, C, W), lambda b, t: (b, 0, 0, 0)),
            pl.BlockSpec((3, 3, 3, C, W), lambda b, t: (0, 0, 0, 0, 0)),
            pl.BlockSpec((3, C, W), lambda b, t: (0, 0, 0)),
            pl.BlockSpec((3, C, C), lambda b, t: (0, 0, 0)),
            pl.BlockSpec((3, C, W), lambda b, t: (0, 0, 0)),
        ],
        out_specs=pl.BlockSpec((1, th, C, W), lambda b, t: (b, t, 0, 0)),
        compiler_params=pltpu.CompilerParams(
            dimension_semantics=("parallel", "parallel"),
            vmem_limit_bytes=vmem_limit),
    )(hs_t, ctx_t, dww, dwb, pww, pwb)

    return jnp.transpose(out, (0, 2, 1, 3))        # (B, H, C, W) -> (B, C, H, W)


def init_params(key, dim):
    """Deterministic PyTorch-style uniform init.

    dw_w: (3, 3, 3, dim)  [proj(q,k,v), ky, kx, channel]
    dw_b: (3, dim)
    pw_w: (3, dim, dim)   [proj, out_ch, in_ch]  (PyTorch 1x1 conv layout)
    pw_b: (3, dim)
    """
    keys = jax.random.split(key, 12)

    def u(k, shape, bound):
        return jax.random.uniform(k, shape, jnp.float32, -bound, bound)

    dw_bound = 1.0 / math.sqrt(9.0)          # depthwise fan_in = 1 * 3 * 3
    pw_bound = 1.0 / math.sqrt(float(dim))   # pointwise fan_in = dim
    dw_w = jnp.stack([u(keys[i], (3, 3, dim), dw_bound) for i in range(3)])
    dw_b = jnp.stack([u(keys[3 + i], (dim,), dw_bound) for i in range(3)])
    pw_w = jnp.stack([u(keys[6 + i], (dim, dim), pw_bound) for i in range(3)])
    pw_b = jnp.stack([u(keys[9 + i], (dim,), pw_bound) for i in range(3)])
    return {'dw_w': dw_w, 'dw_b': dw_b, 'pw_w': pw_w, 'pw_b': pw_b}


def cross_attention_reference(hidden_states, ctx, params, num_heads):
    """Pure-JAX f32 reference mirroring the PyTorch forward (for validation)."""
    B, C, H, W = hidden_states.shape
    head = C // num_heads
    hi = jax.lax.Precision.HIGHEST

    def depth_conv(x, p):
        dw_w = params['dw_w'][p]   # (3, 3, C)
        dw_b = params['dw_b'][p]   # (C,)
        pw_w = params['pw_w'][p]   # (C_out, C_in)
        pw_b = params['pw_b'][p]   # (C,)
        xp = jnp.pad(x, ((0, 0), (0, 0), (1, 1), (1, 1)))
        y = jnp.zeros_like(x)
        for ky in range(3):
            for kx in range(3):
                y = y + xp[:, :, ky:ky + H, kx:kx + W] * dw_w[ky, kx].reshape(1, C, 1, 1)
        y = y + dw_b.reshape(1, C, 1, 1)
        z = jnp.einsum('oi,bihw->bohw', pw_w, y, precision=hi)
        return z + pw_b.reshape(1, C, 1, 1)

    q = jnp.transpose(depth_conv(hidden_states, 0), (0, 2, 1, 3))  # (B,H,C,W)
    k = jnp.transpose(depth_conv(ctx, 1), (0, 2, 1, 3))
    v = jnp.transpose(depth_conv(ctx, 2), (0, 2, 1, 3))
    scores = jnp.einsum('bhiw,bhjw->bhij', q, k, precision=hi) / math.sqrt(head)
    probs = jax.nn.softmax(scores, axis=-1)
    out = jnp.einsum('bhij,bhjw->bhiw', probs, v, precision=hi)
    return jnp.transpose(out, (0, 2, 1, 3))        # (B, C, H, W)


if __name__ == "__main__":
    key = jax.random.PRNGKey(0)
    k_h, k_c, k_p = jax.random.split(key, 3)

    B, dim, H, W = 2, 32, 8, 16
    num_heads = 4
    hidden = jax.random.normal(k_h, (B, dim, H, W), jnp.float32)
    ctx = jax.random.normal(k_c, (B, dim, H, W), jnp.float32)
    params = init_params(k_p, dim)

    out = cross_attention_forward(hidden, ctx, params, num_heads=num_heads)
    out = jax.block_until_ready(out)

    ref = cross_attention_reference(hidden, ctx, params, num_heads)
    assert out.shape == (B, dim, H, W)
    max_err = float(jnp.max(jnp.abs(out - ref)))
    # bf16 MXU operands (1x1 conv, QK^T, probs@V) vs. an all-f32 reference.
    assert jnp.allclose(out, ref, atol=3e-2, rtol=3e-2), \
        f"mismatch vs reference (max abs err = {max_err})"

    print("KERNEL_OK")
</pallas_src>

<mosaic_0001>
module attributes {stable_mosaic.version = 11 : i64} {
  func.func @_cross_attention_kernel(%arg0: i32, %arg1: i32, %arg2: memref<1x10x32x16xf32, #tpu.memory_space<vmem>>, %arg3: memref<1x10x32x16xf32, #tpu.memory_space<vmem>>, %arg4: memref<3x3x3x32x16xf32, #tpu.memory_space<vmem>>, %arg5: memref<3x32x16xf32, #tpu.memory_space<vmem>>, %arg6: memref<3x32x32xf32, #tpu.memory_space<vmem>>, %arg7: memref<3x32x16xf32, #tpu.memory_space<vmem>>, %arg8: memref<1x8x32x16xf32, #tpu.memory_space<vmem>>) attributes {dimension_semantics = [#tpu.dimension_semantics<parallel>, #tpu.dimension_semantics<parallel>], iteration_bounds = array<i64: 2, 1>, scalar_prefetch = 0 : i64, scratch_operands = 0 : i64, tpu.core_type = #tpu.core_type<tc>, window_params = [{transform_indices = @transform_0, window_bounds = array<i64: 1, 10, 32, 16>}, {transform_indices = @transform_1, window_bounds = array<i64: 1, 10, 32, 16>}, {pipeline_mode = #tpu.pipeline_mode<synchronous>, transform_indices = @transform_2, window_bounds = array<i64: 3, 3, 3, 32, 16>}, {pipeline_mode = #tpu.pipeline_mode<synchronous>, transform_indices = @transform_3, window_bounds = array<i64: 3, 32, 16>}, {pipeline_mode = #tpu.pipeline_mode<synchronous>, transform_indices = @transform_4, window_bounds = array<i64: 3, 32, 32>}, {pipeline_mode = #tpu.pipeline_mode<synchronous>, transform_indices = @transform_5, window_bounds = array<i64: 3, 32, 16>}, {transform_indices = @transform_6, window_bounds = array<i64: 1, 8, 32, 16>}]} {
    %c8_i32 = arith.constant 8 : i32
    %0 = arith.muli %arg1, %c8_i32 : i32
    %1 = tpu.assume_multiple %0, 8 : i32
    %2 = tpu.iota {dimensions = array<i32: 0>} : vector<16x16xi32>
    %3 = tpu.iota {dimensions = array<i32: 1>} : vector<16x16xi32>
    %c1_i32 = arith.constant 1 : i32
    %4 = vector.broadcast %c1_i32 : i32 to vector<16x16xi32>
    %5 = arith.addi %2, %4 : vector<16x16xi32>
    %6 = arith.cmpi eq, %3, %5 : vector<16x16xi32>
    %7 = arith.extui %6 : vector<16x16xi1> to vector<16x16xi32>
    %8 = arith.sitofp %7 : vector<16x16xi32> to vector<16x16xf32>
    %c1_i32_0 = arith.constant 1 : i32
    %9 = vector.broadcast %c1_i32_0 : i32 to vector<16x16xi32>
    %10 = arith.subi %2, %9 : vector<16x16xi32>
    %11 = arith.cmpi eq, %3, %10 : vector<16x16xi32>
    %12 = arith.extui %11 : vector<16x16xi1> to vector<16x16xi32>
    %13 = arith.sitofp %12 : vector<16x16xi32> to vector<16x16xf32>
    %c0 = arith.constant 0 : index
    %14 = arith.index_cast %1 : i32 to index
    %c0_1 = arith.constant 0 : index
    %c0_2 = arith.constant 0 : index
    %15 = vector.load %arg2[%c0, %14, %c0_1, %c0_2] : memref<1x10x32x16xf32, #tpu.memory_space<vmem>>, vector<1x10x32x16xf32>
    %16 = vector.shape_cast %15 : vector<1x10x32x16xf32> to vector<10x32x16xf32>
    %17 = vector.extract_strided_slice %16 {offsets = [0, 0, 0], sizes = [8, 32, 16], strides = [1, 1, 1]} : vector<10x32x16xf32> to vector<8x32x16xf32>
    %18 = vector.shape_cast %17 : vector<8x32x16xf32> to vector<256x16xf32>
    %cst = arith.constant dense<0.000000e+00> : vector<256x16xf32>
    %19 = tpu.matmul %18, %8, %cst {dimension_numbers = #tpu.dot_dimension_numbers<[1], [0], [0], [1], [0, 0, 1, 1], [], []>} : vector<256x16xf32>, vector<16x16xf32>, vector<256x16xf32> -> vector<256x16xf32>
    %20 = vector.shape_cast %19 : vector<256x16xf32> to vector<8x32x16xf32>
    %21 = vector.shape_cast %17 : vector<8x32x16xf32> to vector<256x16xf32>
    %cst_3 = arith.constant dense<0.000000e+00> : vector<256x16xf32>
    %22 = tpu.matmul %21, %13, %cst_3 {dimension_numbers = #tpu.dot_dimension_numbers<[1], [0], [0], [1], [0, 0, 1, 1], [], []>} : vector<256x16xf32>, vector<16x16xf32>, vector<256x16xf32> -> vector<256x16xf32>
    %23 = vector.shape_cast %22 : vector<256x16xf32> to vector<8x32x16xf32>
    %c0_4 = arith.constant 0 : index
    %c0_5 = arith.constant 0 : index
    %c0_6 = arith.constant 0 : index
    %c0_7 = arith.constant 0 : index
    %c0_8 = arith.constant 0 : index
    %24 = vector.load %arg4[%c0_4, %c0_5, %c0_6, %c0_7, %c0_8] : memref<3x3x3x32x16xf32, #tpu.memory_space<vmem>>, vector<1x1x1x32x16xf32>
    %25 = vector.shape_cast %24 : vector<1x1x1x32x16xf32> to vector<32x16xf32>
    %26 = vector.shape_cast %25 : vector<32x16xf32> to vector<1x32x16xf32>
    %27 = vector.broadcast %26 : vector<1x32x16xf32> to vector<8x32x16xf32>
    %28 = arith.mulf %20, %27 : vector<8x32x16xf32>
    %c0_9 = arith.constant 0 : index
    %c0_10 = arith.constant 0 : index
    %c0_11 = arith.constant 0 : index
    %29 = vector.load %arg5[%c0_9, %c0_10, %c0_11] : memref<3x32x16xf32, #tpu.memory_space<vmem>>, vector<1x32x16xf32>
    %30 = vector.shape_cast %29 : vector<1x32x16xf32> to vector<32x16xf32>
    %31 = vector.shape_cast %30 : vector<32x16xf32> to vector<1x32x16xf32>
    %32 = vector.broadcast %31 : vector<1x32x16xf32> to vector<8x32x16xf32>
    %33 = arith.addf %28, %32 : vector<8x32x16xf32>
    %c0_12 = arith.constant 0 : index
    %c0_13 = arith.constant 0 : index
    %c1 = arith.constant 1 : index
    %c0_14 = arith.constant 0 : index
    %c0_15 = arith.constant 0 : index
    %34 = vector.load %arg4[%c0_12, %c0_13, %c1, %c0_14, %c0_15] : memref<3x3x3x32x16xf32, #tpu.memory_space<vmem>>, vector<1x1x1x32x16xf32>
    %35 = vector.shape_cast %34 : vector<1x1x1x32x16xf32> to vector<32x16xf32>
    %36 = vector.shape_cast %35 : vector<32x16xf32> to vector<1x32x16xf32>
    %37 = vector.broadcast %36 : vector<1x32x16xf32> to vector<8x32x16xf32>
    %38 = arith.mulf %17, %37 : vector<8x32x16xf32>
    %39 = arith.addf %33, %38 : vector<8x32x16xf32>
    %c0_16 = arith.constant 0 : index
    %c0_17 = arith.constant 0 : index
    %c2 = arith.constant 2 : index
    %c0_18 = arith.constant 0 : index
    %c0_19 = arith.constant 0 : index
    %40 = vector.load %arg4[%c0_16, %c0_17, %c2, %c0_18, %c0_19] : memref<3x3x3x32x16xf32, #tpu.memory_space<vmem>>, vector<1x1x1x32x16xf32>
    %41 = vector.shape_cast %40 : vector<1x1x1x32x16xf32> to vector<32x16xf32>
    %42 = vector.shape_cast %41 : vector<32x16xf32> to vector<1x32x16xf32>
    %43 = vector.broadcast %42 : vector<1x32x16xf32> to vector<8x32x16xf32>
    %44 = arith.mulf %23, %43 : vector<8x32x16xf32>
    %45 = arith.addf %39, %44 : vector<8x32x16xf32>
    %46 = vector.extract_strided_slice %16 {offsets = [1, 0, 0], sizes = [8, 32, 16], strides = [1, 1, 1]} : vector<10x32x16xf32> to vector<8x32x16xf32>
    %47 = vector.shape_cast %46 : vector<8x32x16xf32> to vector<256x16xf32>
    %cst_20 = arith.constant dense<0.000000e+00> : vector<256x16xf32>
    %48 = tpu.matmul %47, %8, %cst_20 {dimension_numbers = #tpu.dot_dimension_numbers<[1], [0], [0], [1], [0, 0, 1, 1], [], []>} : vector<256x16xf32>, vector<16x16xf32>, vector<256x16xf32> -> vector<256x16xf32>
    %49 = vector.shape_cast %48 : vector<256x16xf32> to vector<8x32x16xf32>
    %50 = vector.shape_cast %46 : vector<8x32x16xf32> to vector<256x16xf32>
    %cst_21 = arith.constant dense<0.000000e+00> : vector<256x16xf32>
    %51 = tpu.matmul %50, %13, %cst_21 {dimension_numbers = #tpu.dot_dimension_numbers<[1], [0], [0], [1], [0, 0, 1, 1], [], []>} : vector<256x16xf32>, vector<16x16xf32>, vector<256x16xf32> -> vector<256x16xf32>
    %52 = vector.shape_cast %51 : vector<256x16xf32> to vector<8x32x16xf32>
    %c0_22 = arith.constant 0 : index
    %c1_23 = arith.constant 1 : index
    %c0_24 = arith.constant 0 : index
    %c0_25 = arith.constant 0 : index
    %c0_26 = arith.constant 0 : index
    %53 = vector.load %arg4[%c0_22, %c1_23, %c0_24, %c0_25, %c0_26] : memref<3x3x3x32x16xf32, #tpu.memory_space<vmem>>, vector<1x1x1x32x16xf32>
    %54 = vector.shape_cast %53 : vector<1x1x1x32x16xf32> to vector<32x16xf32>
    %55 = vector.shape_cast %54 : vector<32x16xf32> to vector<1x32x16xf32>
    %56 = vector.broadcast %55 : vector<1x32x16xf32> to vector<8x32x16xf32>
    %57 = arith.mulf %49, %56 : vector<8x32x16xf32>
    %58 = arith.addf %45, %57 : vector<8x32x16xf32>
    %c0_27 = arith.constant 0 : index
    %c1_28 = arith.constant 1 : index
    %c1_29 = arith.constant 1 : index
    %c0_30 = arith.constant 0 : index
    %c0_31 = arith.constant 0 : index
    %59 = vector.load %arg4[%c0_27, %c1_28, %c1_29, %c0_30, %c0_31] : memref<3x3x3x32x16xf32, #tpu.memory_space<vmem>>, vector<1x1x1x32x16xf32>
    %60 = vector.shape_cast %59 : vector<1x1x1x32x16xf32> to vector<32x16xf32>
    %61 = vector.shape_cast %60 : vector<32x16xf32> to vector<1x32x16xf32>
    %62 = vector.broadcast %61 : vector<1x32x16xf32> to vector<8x32x16xf32>
    %63 = arith.mulf %46, %62 : vector<8x32x16xf32>
    %64 = arith.addf %58, %63 : vector<8x32x16xf32>
    %c0_32 = arith.constant 0 : index
    %c1_33 = arith.constant 1 : index
    %c2_34 = arith.constant 2 : index
    %c0_35 = arith.constant 0 : index
    %c0_36 = arith.constant 0 : index
    %65 = vector.load %arg4[%c0_32, %c1_33, %c2_34, %c0_35, %c0_36] : memref<3x3x3x32x16xf32, #tpu.memory_space<vmem>>, vector<1x1x1x32x16xf32>
    %66 = vector.shape_cast %65 : vector<1x1x1x32x16xf32> to vector<32x16xf32>
    %67 = vector.shape_cast %66 : vector<32x16xf32> to vector<1x32x16xf32>
    %68 = vector.broadcast %67 : vector<1x32x16xf32> to vector<8x32x16xf32>
    %69 = arith.mulf %52, %68 : vector<8x32x16xf32>
    %70 = arith.addf %64, %69 : vector<8x32x16xf32>
    %71 = vector.extract_strided_slice %16 {offsets = [2, 0, 0], sizes = [8, 32, 16], strides = [1, 1, 1]} : vector<10x32x16xf32> to vector<8x32x16xf32>
    %72 = vector.shape_cast %71 : vector<8x32x16xf32> to vector<256x16xf32>
    %cst_37 = arith.constant dense<0.000000e+00> : vector<256x16xf32>
    %73 = tpu.matmul %72, %8, %cst_37 {dimension_numbers = #tpu.dot_dimension_numbers<[1], [0], [0], [1], [0, 0, 1, 1], [], []>} : vector<256x16xf32>, vector<16x16xf32>, vector<256x16xf32> -> vector<256x16xf32>
    %74 = vector.shape_cast %73 : vector<256x16xf32> to vector<8x32x16xf32>
    %75 = vector.shape_cast %71 : vector<8x32x16xf32> to vector<256x16xf32>
    %cst_38 = arith.constant dense<0.000000e+00> : vector<256x16xf32>
    %76 = tpu.matmul %75, %13, %cst_38 {dimension_numbers = #tpu.dot_dimension_numbers<[1], [0], [0], [1], [0, 0, 1, 1], [], []>} : vector<256x16xf32>, vector<16x16xf32>, vector<256x16xf32> -> vector<256x16xf32>
    %77 = vector.shape_cast %76 : vector<256x16xf32> to vector<8x32x16xf32>
    %c0_39 = arith.constant 0 : index
    %c2_40 = arith.constant 2 : index
    %c0_41 = arith.constant 0 : index
    %c0_42 = arith.constant 0 : index
    %c0_43 = arith.constant 0 : index
    %78 = vector.load %arg4[%c0_39, %c2_40, %c0_41, %c0_42, %c0_43] : memref<3x3x3x32x16xf32, #tpu.memory_space<vmem>>, vector<1x1x1x32x16xf32>
    %79 = vector.shape_cast %78 : vector<1x1x1x32x16xf32> to vector<32x16xf32>
    %80 = vector.shape_cast %79 : vector<32x16xf32> to vector<1x32x16xf32>
    %81 = vector.broadcast %80 : vector<1x32x16xf32> to vector<8x32x16xf32>
    %82 = arith.mulf %74, %81 : vector<8x32x16xf32>
    %83 = arith.addf %70, %82 : vector<8x32x16xf32>
    %c0_44 = arith.constant 0 : index
    %c2_45 = arith.constant 2 : index
    %c1_46 = arith.constant 1 : index
    %c0_47 = arith.constant 0 : index
    %c0_48 = arith.constant 0 : index
    %84 = vector.load %arg4[%c0_44, %c2_45, %c1_46, %c0_47, %c0_48] : memref<3x3x3x32x16xf32, #tpu.memory_space<vmem>>, vector<1x1x1x32x16xf32>
    %85 = vector.shape_cast %84 : vector<1x1x1x32x16xf32> to vector<32x16xf32>
    %86 = vector.shape_cast %85 : vector<32x16xf32> to vector<1x32x16xf32>
    %87 = vector.broadcast %86 : vector<1x32x16xf32> to vector<8x32x16xf32>
    %88 = arith.mulf %71, %87 : vector<8x32x16xf32>
    %89 = arith.addf %83, %88 : vector<8x32x16xf32>
    %c0_49 = arith.constant 0 : index
    %c2_50 = arith.constant 2 : index
    %c2_51 = arith.constant 2 : index
    %c0_52 = arith.constant 0 : index
    %c0_53 = arith.constant 0 : index
    %90 = vector.load %arg4[%c0_49, %c2_50, %c2_51, %c0_52, %c0_53] : memref<3x3x3x32x16xf32, #tpu.memory_space<vmem>>, vector<1x1x1x32x16xf32>
    %91 = vector.shape_cast %90 : vector<1x1x1x32x16xf32> to vector<32x16xf32>
    %92 = vector.shape_cast %91 : vector<32x16xf32> to vector<1x32x16xf32>
    %93 = vector.broadcast %92 : vector<1x32x16xf32> to vector<8x32x16xf32>
    %94 = arith.mulf %77, %93 : vector<8x32x16xf32>
    %95 = arith.addf %89, %94 : vector<8x32x16xf32>
    %c0_54 = arith.constant 0 : index
    %c0_55 = arith.constant 0 : index
    %c0_56 = arith.constant 0 : index
    %96 = vector.load %arg6[%c0_54, %c0_55, %c0_56] : memref<3x32x32xf32, #tpu.memory_space<vmem>>, vector<1x32x32xf32>
    %97 = vector.shape_cast %96 : vector<1x32x32xf32> to vector<32x32xf32>
    %98 = arith.truncf %97 : vector<32x32xf32> to vector<32x32xbf16>
    %c0_57 = arith.constant 0 : index
    %c0_58 = arith.constant 0 : index
    %c0_59 = arith.constant 0 : index
    %99 = vector.load %arg7[%c0_57, %c0_58, %c0_59] : memref<3x32x16xf32, #tpu.memory_space<vmem>>, vector<1x32x16xf32>
    %100 = vector.shape_cast %99 : vector<1x32x16xf32> to vector<32x16xf32>
    %101 = vector.extract_strided_slice %95 {offsets = [0, 0, 0], sizes = [1, 32, 16], strides = [1, 1, 1]} : vector<8x32x16xf32> to vector<1x32x16xf32>
    %102 = vector.shape_cast %101 : vector<1x32x16xf32> to vector<32x16xf32>
    %103 = arith.truncf %102 : vector<32x16xf32> to vector<32x16xbf16>
    %cst_60 = arith.constant dense<0.000000e+00> : vector<32x16xf32>
    %104 = tpu.matmul %98, %103, %cst_60 {dimension_numbers = #tpu.dot_dimension_numbers<[1], [0], [0], [1], [0, 0, 1, 1], [], []>} : vector<32x32xbf16>, vector<32x16xbf16>, vector<32x16xf32> -> vector<32x16xf32>
    %105 = arith.addf %104, %100 : vector<32x16xf32>
    %cst_61 = arith.constant 0.353553385 : f32
    %106 = vector.broadcast %cst_61 : f32 to vector<32x16xf32>
    %107 = arith.mulf %105, %106 : vector<32x16xf32>
    %108 = arith.truncf %107 : vector<32x16xf32> to vector<32x16xbf16>
    %109 = vector.extract_strided_slice %95 {offsets = [1, 0, 0], sizes = [1, 32, 16], strides = [1, 1, 1]} : vector<8x32x16xf32> to vector<1x32x16xf32>
    %110 = vector.shape_cast %109 : vector<1x32x16xf32> to vector<32x16xf32>
    %111 = arith.truncf %110 : vector<32x16xf32> to vector<32x16xbf16>
    %cst_62 = arith.constant dense<0.000000e+00> : vector<32x16xf32>
    %112 = tpu.matmul %98, %111, %cst_62 {dimension_numbers = #tpu.dot_dimension_numbers<[1], [0], [0], [1], [0, 0, 1, 1], [], []>} : vector<32x32xbf16>, vector<32x16xbf16>, vector<32x16xf32> -> vector<32x16xf32>
    %113 = arith.addf %112, %100 : vector<32x16xf32>
    %cst_63 = arith.constant 0.353553385 : f32
    %114 = vector.broadcast %cst_63 : f32 to vector<32x16xf32>
    %115 = arith.mulf %113, %114 : vector<32x16xf32>
    %116 = arith.truncf %115 : vector<32x16xf32> to vector<32x16xbf16>
    %117 = vector.extract_strided_slice %95 {offsets = [2, 0, 0], sizes = [1, 32, 16], strides = [1, 1, 1]} : vector<8x32x16xf32> to vector<1x32x16xf32>
    %118 = vector.shape_cast %117 : vector<1x32x16xf32> to vector<32x16xf32>
    %119 = arith.truncf %118 : vector<32x16xf32> to vector<32x16xbf16>
    %cst_64 = arith.constant dense<0.000000e+00> : vector<32x16xf32>
    %120 = tpu.matmul %98, %119, %cst_64 {dimension_numbers = #tpu.dot_dimension_numbers<[1], [0], [0], [1], [0, 0, 1, 1], [], []>} : vector<32x32xbf16>, vector<32x16xbf16>, vector<32x16xf32> -> vector<32x16xf32>
    %121 = arith.addf %120, %100 : vector<32x16xf32>
    %cst_65 = arith.constant 0.353553385 : f32
    %122 = vector.broadcast %cst_65 : f32 to vector<32x16xf32>
    %123 = arith.mulf %121, %122 : vector<32x16xf32>
    %124 = arith.truncf %123 : vector<32x16xf32> to vector<32x16xbf16>
    %125 = vector.extract_strided_slice %95 {offsets = [3, 0, 0], sizes = [1, 32, 16], strides = [1, 1, 1]} : vector<8x32x16xf32> to vector<1x32x16xf32>
    %126 = vector.shape_cast %125 : vector<1x32x16xf32> to vector<32x16xf32>
    %127 = arith.truncf %126 : vector<32x16xf32> to vector<32x16xbf16>
    %cst_66 = arith.constant dense<0.000000e+00> : vector<32x16xf32>
    %128 = tpu.matmul %98, %127, %cst_66 {dimension_numbers = #tpu.dot_dimension_numbers<[1], [0], [0], [1], [0, 0, 1, 1], [], []>} : vector<32x32xbf16>, vector<32x16xbf16>, vector<32x16xf32> -> vector<32x16xf32>
    %129 = arith.addf %128, %100 : vector<32x16xf32>
    %cst_67 = arith.constant 0.353553385 : f32
    %130 = vector.broadcast %cst_67 : f32 to vector<32x16xf32>
    %131 = arith.mulf %129, %130 : vector<32x16xf32>
    %132 = arith.truncf %131 : vector<32x16xf32> to vector<32x16xbf16>
    %133 = vector.extract_strided_slice %95 {offsets = [4, 0, 0], sizes = [1, 32, 16], strides = [1, 1, 1]} : vector<8x32x16xf32> to vector<1x32x16xf32>
    %134 = vector.shape_cast %133 : vector<1x32x16xf32> to vector<32x16xf32>
    %135 = arith.truncf %134 : vector<32x16xf32> to vector<32x16xbf16>
    %cst_68 = arith.constant dense<0.000000e+00> : vector<32x16xf32>
    %136 = tpu.matmul %98, %135, %cst_68 {dimension_numbers = #tpu.dot_dimension_numbers<[1], [0], [0], [1], [0, 0, 1, 1], [], []>} : vector<32x32xbf16>, vector<32x16xbf16>, vector<32x16xf32> -> vector<32x16xf32>
    %137 = arith.addf %136, %100 : vector<32x16xf32>
    %cst_69 = arith.constant 0.353553385 : f32
    %138 = vector.broadcast %cst_69 : f32 to vector<32x16xf32>
    %139 = arith.mulf %137, %138 : vector<32x16xf32>
    %140 = arith.truncf %139 : vector<32x16xf32> to vector<32x16xbf16>
    %141 = vector.extract_strided_slice %95 {offsets = [5, 0, 0], sizes = [1, 32, 16], strides = [1, 1, 1]} : vector<8x32x16xf32> to vector<1x32x16xf32>
    %142 = vector.shape_cast %141 : vector<1x32x16xf32> to vector<32x16xf32>
    %143 = arith.truncf %142 : vector<32x16xf32> to vector<32x16xbf16>
    %cst_70 = arith.constant dense<0.000000e+00> : vector<32x16xf32>
    %144 = tpu.matmul %98, %143, %cst_70 {dimension_numbers = #tpu.dot_dimension_numbers<[1], [0], [0], [1], [0, 0, 1, 1], [], []>} : vector<32x32xbf16>, vector<32x16xbf16>, vector<32x16xf32> -> vector<32x16xf32>
    %145 = arith.addf %144, %100 : vector<32x16xf32>
    %cst_71 = arith.constant 0.353553385 : f32
    %146 = vector.broadcast %cst_71 : f32 to vector<32x16xf32>
    %147 = arith.mulf %145, %146 : vector<32x16xf32>
    %148 = arith.truncf %147 : vector<32x16xf32> to vector<32x16xbf16>
    %149 = vector.extract_strided_slice %95 {offsets = [6, 0, 0], sizes = [1, 32, 16], strides = [1, 1, 1]} : vector<8x32x16xf32> to vector<1x32x16xf32>
    %150 = vector.shape_cast %149 : vector<1x32x16xf32> to vector<32x16xf32>
    %151 = arith.truncf %150 : vector<32x16xf32> to vector<32x16xbf16>
    %cst_72 = arith.constant dense<0.000000e+00> : vector<32x16xf32>
    %152 = tpu.matmul %98, %151, %cst_72 {dimension_numbers = #tpu.dot_dimension_numbers<[1], [0], [0], [1], [0, 0, 1, 1], [], []>} : vector<32x32xbf16>, vector<32x16xbf16>, vector<32x16xf32> -> vector<32x16xf32>
    %153 = arith.addf %152, %100 : vector<32x16xf32>
    %cst_73 = arith.constant 0.353553385 : f32
    %154 = vector.broadcast %cst_73 : f32 to vector<32x16xf32>
    %155 = arith.mulf %153, %154 : vector<32x16xf32>
    %156 = arith.truncf %155 : vector<32x16xf32> to vector<32x16xbf16>
    %157 = vector.extract_strided_slice %95 {offsets = [7, 0, 0], sizes = [1, 32, 16], strides = [1, 1, 1]} : vector<8x32x16xf32> to vector<1x32x16xf32>
    %158 = vector.shape_cast %157 : vector<1x32x16xf32> to vector<32x16xf32>
    %159 = arith.truncf %158 : vector<32x16xf32> to vector<32x16xbf16>
    %cst_74 = arith.constant dense<0.000000e+00> : vector<32x16xf32>
    %160 = tpu.matmul %98, %159, %cst_74 {dimension_numbers = #tpu.dot_dimension_numbers<[1], [0], [0], [1], [0, 0, 1, 1], [], []>} : vector<32x32xbf16>, vector<32x16xbf16>, vector<32x16xf32> -> vector<32x16xf32>
    %161 = arith.addf %160, %100 : vector<32x16xf32>
    %cst_75 = arith.constant 0.353553385 : f32
    %162 = vector.broadcast %cst_75 : f32 to vector<32x16xf32>
    %163 = arith.mulf %161, %162 : vector<32x16xf32>
    %164 = arith.truncf %163 : vector<32x16xf32> to vector<32x16xbf16>
    %165 = vector.shape_cast %108 : vector<32x16xbf16> to vector<1x32x16xbf16>
    %166 = vector.shape_cast %116 : vector<32x16xbf16> to vector<1x32x16xbf16>
    %167 = vector.shape_cast %124 : vector<32x16xbf16> to vector<1x32x16xbf16>
    %168 = vector.shape_cast %132 : vector<32x16xbf16> to vector<1x32x16xbf16>
    %169 = vector.shape_cast %140 : vector<32x16xbf16> to vector<1x32x16xbf16>
    %170 = vector.shape_cast %148 : vector<32x16xbf16> to vector<1x32x16xbf16>
    %171 = vector.shape_cast %156 : vector<32x16xbf16> to vector<1x32x16xbf16>
    %172 = vector.shape_cast %164 : vector<32x16xbf16> to vector<1x32x16xbf16>
    %173 = tpu.concatenate %165, %166, %167, %168, %169, %170, %171, %172 in 0 : vector<1x32x16xbf16>, vector<1x32x16xbf16>, vector<1x32x16xbf16>, vector<1x32x16xbf16>, vector<1x32x16xbf16>, vector<1x32x16xbf16>, vector<1x32x16xbf16>, vector<1x32x16xbf16> -> vector<8x32x16xbf16>
    %c0_76 = arith.constant 0 : index
    %174 = arith.index_cast %1 : i32 to index
    %c0_77 = arith.constant 0 : index
    %c0_78 = arith.constant 0 : index
    %175 = vector.load %arg3[%c0_76, %174, %c0_77, %c0_78] : memref<1x10x32x16xf32, #tpu.memory_space<vmem>>, vector<1x10x32x16xf32>
    %176 = vector.shape_cast %175 : vector<1x10x32x16xf32> to vector<10x32x16xf32>
    %177 = vector.extract_strided_slice %176 {offsets = [0, 0, 0], sizes = [8, 32, 16], strides = [1, 1, 1]} : vector<10x32x16xf32> to vector<8x32x16xf32>
    %178 = vector.shape_cast %177 : vector<8x32x16xf32> to vector<256x16xf32>
    %cst_79 = arith.constant dense<0.000000e+00> : vector<256x16xf32>
    %179 = tpu.matmul %178, %8, %cst_79 {dimension_numbers = #tpu.dot_dimension_numbers<[1], [0], [0], [1], [0, 0, 1, 1], [], []>} : vector<256x16xf32>, vector<16x16xf32>, vector<256x16xf32> -> vector<256x16xf32>
    %180 = vector.shape_cast %179 : vector<256x16xf32> to vector<8x32x16xf32>
    %181 = vector.shape_cast %177 : vector<8x32x16xf32> to vector<256x16xf32>
    %cst_80 = arith.constant dense<0.000000e+00> : vector<256x16xf32>
    %182 = tpu.matmul %181, %13, %cst_80 {dimension_numbers = #tpu.dot_dimension_numbers<[1], [0], [0], [1], [0, 0, 1, 1], [], []>} : vector<256x16xf32>, vector<16x16xf32>, vector<256x16xf32> -> vector<256x16xf32>
    %183 = vector.shape_cast %182 : vector<256x16xf32> to vector<8x32x16xf32>
    %c1_81 = arith.constant 1 : index
    %c0_82 = arith.constant 0 : index
    %c0_83 = arith.constant 0 : index
    %c0_84 = arith.constant 0 : index
    %c0_85 = arith.constant 0 : index
    %184 = vector.load %arg4[%c1_81, %c0_82, %c0_83, %c0_84, %c0_85] : memref<3x3x3x32x16xf32, #tpu.memory_space<vmem>>, vector<1x1x1x32x16xf32>
    %185 = vector.shape_cast %184 : vector<1x1x1x32x16xf32> to vector<32x16xf32>
    %186 = vector.shape_cast %185 : vector<32x16xf32> to vector<1x32x16xf32>
    %187 = vector.broadcast %186 : vector<1x32x16xf32> to vector<8x32x16xf32>
    %188 = arith.mulf %180, %187 : vector<8x32x16xf32>
    %c1_86 = arith.constant 1 : index
    %c0_87 = arith.constant 0 : index
    %c0_88 = arith.constant 0 : index
    %189 = vector.load %arg5[%c1_86, %c0_87, %c0_88] : memref<3x32x16xf32, #tpu.memory_space<vmem>>, vector<1x32x16xf32>
    %190 = vector.shape_cast %189 : vector<1x32x16xf32> to vector<32x16xf32>
    %191 = vector.shape_cast %190 : vector<32x16xf32> to vector<1x32x16xf32>
    %192 = vector.broadcast %191 : vector<1x32x16xf32> to vector<8x32x16xf32>
    %193 = arith.addf %188, %192 : vector<8x32x16xf32>
    %c2_89 = arith.constant 2 : index
    %c0_90 = arith.constant 0 : index
    %c0_91 = arith.constant 0 : index
    %c0_92 = arith.constant 0 : index
    %c0_93 = arith.constant 0 : index
    %194 = vector.load %arg4[%c2_89, %c0_90, %c0_91, %c0_92, %c0_93] : memref<3x3x3x32x16xf32, #tpu.memory_space<vmem>>, vector<1x1x1x32x16xf32>
    %195 = vector.shape_cast %194 : vector<1x1x1x32x16xf32> to vector<32x16xf32>
    %196 = vector.shape_cast %195 : vector<32x16xf32> to vector<1x32x16xf32>
    %197 = vector.broadcast %196 : vector<1x32x16xf32> to vector<8x32x16xf32>
    %198 = arith.mulf %180, %197 : vector<8x32x16xf32>
    %c2_94 = arith.constant 2 : index
    %c0_95 = arith.constant 0 : index
    %c0_96 = arith.constant 0 : index
    %199 = vector.load %arg5[%c2_94, %c0_95, %c0_96] : memref<3x32x16xf32, #tpu.memory_space<vmem>>, vector<1x32x16xf32>
    %200 = vector.shape_cast %199 : vector<1x32x16xf32> to vector<32x16xf32>
    %201 = vector.shape_cast %200 : vector<32x16xf32> to vector<1x32x16xf32>
    %202 = vector.broadcast %201 : vector<1x32x16xf32> to vector<8x32x16xf32>
    %203 = arith.addf %198, %202 : vector<8x32x16xf32>
    %c1_97 = arith.constant 1 : index
    %c0_98 = arith.constant 0 : index
    %c1_99 = arith.constant 1 : index
    %c0_100 = arith.constant 0 : index
    %c0_101 = arith.constant 0 : index
    %204 = vector.load %arg4[%c1_97, %c0_98, %c1_99, %c0_100, %c0_101] : memref<3x3x3x32x16xf32, #tpu.memory_space<vmem>>, vector<1x1x1x32x16xf32>
    %205 = vector.shape_cast %204 : vector<1x1x1x32x16xf32> to vector<32x16xf32>
    %206 = vector.shape_cast %205 : vector<32x16xf32> to vector<1x32x16xf32>
    %207 = vector.broadcast %206 : vector<1x32x16xf32> to vector<8x32x16xf32>
    %208 = arith.mulf %177, %207 : vector<8x32x16xf32>
    %209 = arith.addf %193, %208 : vector<8x32x16xf32>
    %c2_102 = arith.constant 2 : index
    %c0_103 = arith.constant 0 : index
    %c1_104 = arith.constant 1 : index
    %c0_105 = arith.constant 0 : index
    %c0_106 = arith.constant 0 : index
    %210 = vector.load %arg4[%c2_102, %c0_103, %c1_104, %c0_105, %c0_106] : memref<3x3x3x32x16xf32, #tpu.memory_space<vmem>>, vector<1x1x1x32x16xf32>
    %211 = vector.shape_cast %210 : vector<1x1x1x32x16xf32> to vector<32x16xf32>
    %212 = vector.shape_cast %211 : vector<32x16xf32> to vector<1x32x16xf32>
    %213 = vector.broadcast %212 : vector<1x32x16xf32> to vector<8x32x16xf32>
    %214 = arith.mulf %177, %213 : vector<8x32x16xf32>
    %215 = arith.addf %203, %214 : vector<8x32x16xf32>
    %c1_107 = arith.constant 1 : index
    %c0_108 = arith.constant 0 : index
    %c2_109 = arith.constant 2 : index
    %c0_110 = arith.constant 0 : index
    %c0_111 = arith.constant 0 : index
    %216 = vector.load %arg4[%c1_107, %c0_108, %c2_109, %c0_110, %c0_111] : memref<3x3x3x32x16xf32, #tpu.memory_space<vmem>>, vector<1x1x1x32x16xf32>
    %217 = vector.shape_cast %216 : vector<1x1x1x32x16xf32> to vector<32x16xf32>
    %218 = vector.shape_cast %217 : vector<32x16xf32> to vector<1x32x16xf32>
    %219 = vector.broadcast %218 : vector<1x32x16xf32> to vector<8x32x16xf32>
    %220 = arith.mulf %183, %219 : vector<8x32x16xf32>
    %221 = arith.addf %209, %220 : vector<8x32x16xf32>
    %c2_112 = arith.constant 2 : index
    %c0_113 = arith.constant 0 : index
    %c2_114 = arith.constant 2 : index
    %c0_115 = arith.constant 0 : index
    %c0_116 = arith.constant 0 : index
    %222 = vector.load %arg4[%c2_112, %c0_113, %c2_114, %c0_115, %c0_116] : memref<3x3x3x32x16xf32, #tpu.memory_space<vmem>>, vector<1x1x1x32x16xf32>
    %223 = vector.shape_cast %222 : vector<1x1x1x32x16xf32> to vector<32x16xf32>
    %224 = vector.shape_cast %223 : vector<32x16xf32> to vector<1x32x16xf32>
    %225 = vector.broadcast %224 : vector<1x32x16xf32> to vector<8x32x16xf32>
    %226 = arith.mulf %183, %225 : vector<8x32x16xf32>
    %227 = arith.addf %215, %226 : vector<8x32x16xf32>
    %228 = vector.extract_strided_slice %176 {offsets = [1, 0, 0], sizes = [8, 32, 16], strides = [1, 1, 1]} : vector<10x32x16xf32> to vector<8x32x16xf32>
    %229 = vector.shape_cast %228 : vector<8x32x16xf32> to vector<256x16xf32>
    %cst_117 = arith.constant dense<0.000000e+00> : vector<256x16xf32>
    %230 = tpu.matmul %229, %8, %cst_117 {dimension_numbers = #tpu.dot_dimension_numbers<[1], [0], [0], [1], [0, 0, 1, 1], [], []>} : vector<256x16xf32>, vector<16x16xf32>, vector<256x16xf32> -> vector<256x16xf32>
    %231 = vector.shape_cast %230 : vector<256x16xf32> to vector<8x32x16xf32>
    %232 = vector.shape_cast %228 : vector<8x32x16xf32> to vector<256x16xf32>
    %cst_118 = arith.constant dense<0.000000e+00> : vector<256x16xf32>
    %233 = tpu.matmul %232, %13, %cst_118 {dimension_numbers = #tpu.dot_dimension_numbers<[1], [0], [0], [1], [0, 0, 1, 1], [], []>} : vector<256x16xf32>, vector<16x16xf32>, vector<256x16xf32> -> vector<256x16xf32>
    %234 = vector.shape_cast %233 : vector<256x16xf32> to vector<8x32x16xf32>
    %c1_119 = arith.constant 1 : index
    %c1_120 = arith.constant 1 : index
    %c0_121 = arith.constant 0 : index
    %c0_122 = arith.constant 0 : index
    %c0_123 = arith.constant 0 : index
    %235 = vector.load %arg4[%c1_119, %c1_120, %c0_121, %c0_122, %c0_123] : memref<3x3x3x32x16xf32, #tpu.memory_space<vmem>>, vector<1x1x1x32x16xf32>
    %236 = vector.shape_cast %235 : vector<1x1x1x32x16xf32> to vector<32x16xf32>
    %237 = vector.shape_cast %236 : vector<32x16xf32> to vector<1x32x16xf32>
    %238 = vector.broadcast %237 : vector<1x32x16xf32> to vector<8x32x16xf32>
    %239 = arith.mulf %231, %238 : vector<8x32x16xf32>
    %240 = arith.addf %221, %239 : vector<8x32x16xf32>
    %c2_124 = arith.constant 2 : index
    %c1_125 = arith.constant 1 : index
    %c0_126 = arith.constant 0 : index
    %c0_127 = arith.constant 0 : index
    %c0_128 = arith.constant 0 : index
    %241 = vector.load %arg4[%c2_124, %c1_125, %c0_126, %c0_127, %c0_128] : memref<3x3x3x32x16xf32, #tpu.memory_space<vmem>>, vector<1x1x1x32x16xf32>
    %242 = vector.shape_cast %241 : vector<1x1x1x32x16xf32> to vector<32x16xf32>
    %243 = vector.shape_cast %242 : vector<32x16xf32> to vector<1x32x16xf32>
    %244 = vector.broadcast %243 : vector<1x32x16xf32> to vector<8x32x16xf32>
    %245 = arith.mulf %231, %244 : vector<8x32x16xf32>
    %246 = arith.addf %227, %245 : vector<8x32x16xf32>
    %c1_129 = arith.constant 1 : index
    %c1_130 = arith.constant 1 : index
    %c1_131 = arith.constant 1 : index
    %c0_132 = arith.constant 0 : index
    %c0_133 = arith.constant 0 : index
    %247 = vector.load %arg4[%c1_129, %c1_130, %c1_131, %c0_132, %c0_133] : memref<3x3x3x32x16xf32, #tpu.memory_space<vmem>>, vector<1x1x1x32x16xf32>
    %248 = vector.shape_cast %247 : vector<1x1x1x32x16xf32> to vector<32x16xf32>
    %249 = vector.shape_cast %248 : vector<32x16xf32> to vector<1x32x16xf32>
    %250 = vector.broadcast %249 : vector<1x32x16xf32> to vector<8x32x16xf32>
    %251 = arith.mulf %228, %250 : vector<8x32x16xf32>
    %252 = arith.addf %240, %251 : vector<8x32x16xf32>
    %c2_134 = arith.constant 2 : index
    %c1_135 = arith.constant 1 : index
    %c1_136 = arith.constant 1 : index
    %c0_137 = arith.constant 0 : index
    %c0_138 = arith.constant 0 : index
    %253 = vector.load %arg4[%c2_134, %c1_135, %c1_136, %c0_137, %c0_138] : memref<3x3x3x32x16xf32, #tpu.memory_space<vmem>>, vector<1x1x1x32x16xf32>
    %254 = vector.shape_cast %253 : vector<1x1x1x32x16xf32> to vector<32x16xf32>
    %255 = vector.shape_cast %254 : vector<32x16xf32> to vector<1x32x16xf32>
    %256 = vector.broadcast %255 : vector<1x32x16xf32> to vector<8x32x16xf32>
    %257 = arith.mulf %228, %256 : vector<8x32x16xf32>
    %258 = arith.addf %246, %257 : vector<8x32x16xf32>
    %c1_139 = arith.constant 1 : index
    %c1_140 = arith.constant 1 : index
    %c2_141 = arith.constant 2 : index
    %c0_142 = arith.constant 0 : index
    %c0_143 = arith.constant 0 : index
    %259 = vector.load %arg4[%c1_139, %c1_140, %c2_141, %c0_142, %c0_143] : memref<3x3x3x32x16xf32, #tpu.memory_space<vmem>>, vector<1x1x1x32x16xf32>
    %260 = vector.shape_cast %259 : vector<1x1x1x32x16xf32> to vector<32x16xf32>
    %261 = vector.shape_cast %260 : vector<32x16xf32> to vector<1x32x16xf32>
    %262 = vector.broadcast %261 : vector<1x32x16xf32> to vector<8x32x16xf32>
    %263 = arith.mulf %234, %262 : vector<8x32x16xf32>
    %264 = arith.addf %252, %263 : vector<8x32x16xf32>
    %c2_144 = arith.constant 2 : index
    %c1_145 = arith.constant 1 : index
    %c2_146 = arith.constant 2 : index
    %c0_147 = arith.constant 0 : index
    %c0_148 = arith.constant 0 : index
    %265 = vector.load %arg4[%c2_144, %c1_145, %c2_146, %c0_147, %c0_148] : memref<3x3x3x32x16xf32, #tpu.memory_space<vmem>>, vector<1x1x1x32x16xf32>
    %266 = vector.shape_cast %265 : vector<1x1x1x32x16xf32> to vector<32x16xf32>
    %267 = vector.shape_cast %266 : vector<32x16xf32> to vector<1x32x16xf32>
    %268 = vector.broadcast %267 : vector<1x32x16xf32> to vector<8x32x16xf32>
    %269 = arith.mulf %234, %268 : vector<8x32x16xf32>
    %270 = arith.addf %258, %269 : vector<8x32x16xf32>
    %271 = vector.extract_strided_slice %176 {offsets = [2, 0, 0], sizes = [8, 32, 16], strides = [1, 1, 1]} : vector<10x32x16xf32> to vector<8x32x16xf32>
    %272 = vector.shape_cast %271 : vector<8x32x16xf32> to vector<256x16xf32>
    %cst_149 = arith.constant dense<0.000000e+00> : vector<256x16xf32>
    %273 = tpu.matmul %272, %8, %cst_149 {dimension_numbers = #tpu.dot_dimension_numbers<[1], [0], [0], [1], [0, 0, 1, 1], [], []>} : vector<256x16xf32>, vector<16x16xf32>, vector<256x16xf32> -> vector<256x16xf32>
    %274 = vector.shape_cast %273 : vector<256x16xf32> to vector<8x32x16xf32>
    %275 = vector.shape_cast %271 : vector<8x32x16xf32> to vector<256x16xf32>
    %cst_150 = arith.constant dense<0.000000e+00> : vector<256x16xf32>
    %276 = tpu.matmul %275, %13, %cst_150 {dimension_numbers = #tpu.dot_dimension_numbers<[1], [0], [0], [1], [0, 0, 1, 1], [], []>} : vector<256x16xf32>, vector<16x16xf32>, vector<256x16xf32> -> vector<256x16xf32>
    %277 = vector.shape_cast %276 : vector<256x16xf32> to vector<8x32x16xf32>
    %c1_151 = arith.constant 1 : index
    %c2_152 = arith.constant 2 : index
    %c0_153 = arith.constant 0 : index
    %c0_154 = arith.constant 0 : index
    %c0_155 = arith.constant 0 : index
    %278 = vector.load %arg4[%c1_151, %c2_152, %c0_153, %c0_154, %c0_155] : memref<3x3x3x32x16xf32, #tpu.memory_space<vmem>>, vector<1x1x1x32x16xf32>
    %279 = vector.shape_cast %278 : vector<1x1x1x32x16xf32> to vector<32x16xf32>
    %280 = vector.shape_cast %279 : vector<32x16xf32> to vector<1x32x16xf32>
    %281 = vector.broadcast %280 : vector<1x32x16xf32> to vector<8x32x16xf32>
    %282 = arith.mulf %274, %281 : vector<8x32x16xf32>
    %283 = arith.addf %264, %282 : vector<8x32x16xf32>
    %c2_156 = arith.constant 2 : index
    %c2_157 = arith.constant 2 : index
    %c0_158 = arith.constant 0 : index
    %c0_159 = arith.constant 0 : index
    %c0_160 = arith.constant 0 : index
    %284 = vector.load %arg4[%c2_156, %c2_157, %c0_158, %c0_159, %c0_160] : memref<3x3x3x32x16xf32, #tpu.memory_space<vmem>>, vector<1x1x1x32x16xf32>
    %285 = vector.shape_cast %284 : vector<1x1x1x32x16xf32> to vector<32x16xf32>
    %286 = vector.shape_cast %285 : vector<32x16xf32> to vector<1x32x16xf32>
    %287 = vector.broadcast %286 : vector<1x32x16xf32> to vector<8x32x16xf32>
    %288 = arith.mulf %274, %287 : vector<8x32x16xf32>
    %289 = arith.addf %270, %288 : vector<8x32x16xf32>
    %c1_161 = arith.constant 1 : index
    %c2_162 = arith.constant 2 : index
    %c1_163 = arith.constant 1 : index
    %c0_164 = arith.constant 0 : index
    %c0_165 = arith.constant 0 : index
    %290 = vector.load %arg4[%c1_161, %c2_162, %c1_163, %c0_164, %c0_165] : memref<3x3x3x32x16xf32, #tpu.memory_space<vmem>>, vector<1x1x1x32x16xf32>
    %291 = vector.shape_cast %290 : vector<1x1x1x32x16xf32> to vector<32x16xf32>
    %292 = vector.shape_cast %291 : vector<32x16xf32> to vector<1x32x16xf32>
    %293 = vector.broadcast %292 : vector<1x32x16xf32> to vector<8x32x16xf32>
    %294 = arith.mulf %271, %293 : vector<8x32x16xf32>
    %295 = arith.addf %283, %294 : vector<8x32x16xf32>
    %c2_166 = arith.constant 2 : index
    %c2_167 = arith.constant 2 : index
    %c1_168 = arith.constant 1 : index
    %c0_169 = arith.constant 0 : index
    %c0_170 = arith.constant 0 : index
    %296 = vector.load %arg4[%c2_166, %c2_167, %c1_168, %c0_169, %c0_170] : memref<3x3x3x32x16xf32, #tpu.memory_space<vmem>>, vector<1x1x1x32x16xf32>
    %297 = vector.shape_cast %296 : vector<1x1x1x32x16xf32> to vector<32x16xf32>
    %298 = vector.shape_cast %297 : vector<32x16xf32> to vector<1x32x16xf32>
    %299 = vector.broadcast %298 : vector<1x32x16xf32> to vector<8x32x16xf32>
    %300 = arith.mulf %271, %299 : vector<8x32x16xf32>
    %301 = arith.addf %289, %300 : vector<8x32x16xf32>
    %c1_171 = arith.constant 1 : index
    %c2_172 = arith.constant 2 : index
    %c2_173 = arith.constant 2 : index
    %c0_174 = arith.constant 0 : index
    %c0_175 = arith.constant 0 : index
    %302 = vector.load %arg4[%c1_171, %c2_172, %c2_173, %c0_174, %c0_175] : memref<3x3x3x32x16xf32, #tpu.memory_space<vmem>>, vector<1x1x1x32x16xf32>
    %303 = vector.shape_cast %302 : vector<1x1x1x32x16xf32> to vector<32x16xf32>
    %304 = vector.shape_cast %303 : vector<32x16xf32> to vector<1x32x16xf32>
    %305 = vector.broadcast %304 : vector<1x32x16xf32> to vector<8x32x16xf32>
    %306 = arith.mulf %277, %305 : vector<8x32x16xf32>
    %307 = arith.addf %295, %306 : vector<8x32x16xf32>
    %c2_176 = arith.constant 2 : index
    %c2_177 = arith.constant 2 : index
    %c2_178 = arith.constant 2 : index
    %c0_179 = arith.constant 0 : index
    %c0_180 = arith.constant 0 : index
    %308 = vector.load %arg4[%c2_176, %c2_177, %c2_178, %c0_179, %c0_180] : memref<3x3x3x32x16xf32, #tpu.memory_space<vmem>>, vector<1x1x1x32x16xf32>
    %309 = vector.shape_cast %308 : vector<1x1x1x32x16xf32> to vector<32x16xf32>
    %310 = vector.shape_cast %309 : vector<32x16xf32> to vector<1x32x16xf32>
    %311 = vector.broadcast %310 : vector<1x32x16xf32> to vector<8x32x16xf32>
    %312 = arith.mulf %277, %311 : vector<8x32x16xf32>
    %313 = arith.addf %301, %312 : vector<8x32x16xf32>
    %c1_181 = arith.constant 1 : index
    %c0_182 = arith.constant 0 : index
    %c0_183 = arith.constant 0 : index
    %314 = vector.load %arg6[%c1_181, %c0_182, %c0_183] : memref<3x32x32xf32, #tpu.memory_space<vmem>>, vector<1x32x32xf32>
    %315 = vector.shape_cast %314 : vector<1x32x32xf32> to vector<32x32xf32>
    %316 = arith.truncf %315 : vector<32x32xf32> to vector<32x32xbf16>
    %c1_184 = arith.constant 1 : index
    %c0_185 = arith.constant 0 : index
    %c0_186 = arith.constant 0 : index
    %317 = vector.load %arg7[%c1_184, %c0_185, %c0_186] : memref<3x32x16xf32, #tpu.memory_space<vmem>>, vector<1x32x16xf32>
    %318 = vector.shape_cast %317 : vector<1x32x16xf32> to vector<32x16xf32>
    %319 = vector.extract_strided_slice %307 {offsets = [0, 0, 0], sizes = [1, 32, 16], strides = [1, 1, 1]} : vector<8x32x16xf32> to vector<1x32x16xf32>
    %320 = vector.shape_cast %319 : vector<1x32x16xf32> to vector<32x16xf32>
    %321 = arith.truncf %320 : vector<32x16xf32> to vector<32x16xbf16>
    %cst_187 = arith.constant dense<0.000000e+00> : vector<32x16xf32>
    %322 = tpu.matmul %316, %321, %cst_187 {dimension_numbers = #tpu.dot_dimension_numbers<[1], [0], [0], [1], [0, 0, 1, 1], [], []>} : vector<32x32xbf16>, vector<32x16xbf16>, vector<32x16xf32> -> vector<32x16xf32>
    %323 = arith.addf %322, %318 : vector<32x16xf32>
    %324 = arith.truncf %323 : vector<32x16xf32> to vector<32x16xbf16>
    %325 = vector.extract_strided_slice %307 {offsets = [1, 0, 0], sizes = [1, 32, 16], strides = [1, 1, 1]} : vector<8x32x16xf32> to vector<1x32x16xf32>
    %326 = vector.shape_cast %325 : vector<1x32x16xf32> to vector<32x16xf32>
    %327 = arith.truncf %326 : vector<32x16xf32> to vector<32x16xbf16>
    %cst_188 = arith.constant dense<0.000000e+00> : vector<32x16xf32>
    %328 = tpu.matmul %316, %327, %cst_188 {dimension_numbers = #tpu.dot_dimension_numbers<[1], [0], [0], [1], [0, 0, 1, 1], [], []>} : vector<32x32xbf16>, vector<32x16xbf16>, vector<32x16xf32> -> vector<32x16xf32>
    %329 = arith.addf %328, %318 : vector<32x16xf32>
    %330 = arith.truncf %329 : vector<32x16xf32> to vector<32x16xbf16>
    %331 = vector.extract_strided_slice %307 {offsets = [2, 0, 0], sizes = [1, 32, 16], strides = [1, 1, 1]} : vector<8x32x16xf32> to vector<1x32x16xf32>
    %332 = vector.shape_cast %331 : vector<1x32x16xf32> to vector<32x16xf32>
    %333 = arith.truncf %332 : vector<32x16xf32> to vector<32x16xbf16>
    %cst_189 = arith.constant dense<0.000000e+00> : vector<32x16xf32>
    %334 = tpu.matmul %316, %333, %cst_189 {dimension_numbers = #tpu.dot_dimension_numbers<[1], [0], [0], [1], [0, 0, 1, 1], [], []>} : vector<32x32xbf16>, vector<32x16xbf16>, vector<32x16xf32> -> vector<32x16xf32>
    %335 = arith.addf %334, %318 : vector<32x16xf32>
    %336 = arith.truncf %335 : vector<32x16xf32> to vector<32x16xbf16>
    %337 = vector.extract_strided_slice %307 {offsets = [3, 0, 0], sizes = [1, 32, 16], strides = [1, 1, 1]} : vector<8x32x16xf32> to vector<1x32x16xf32>
    %338 = vector.shape_cast %337 : vector<1x32x16xf32> to vector<32x16xf32>
    %339 = arith.truncf %338 : vector<32x16xf32> to vector<32x16xbf16>
    %cst_190 = arith.constant dense<0.000000e+00> : vector<32x16xf32>
    %340 = tpu.matmul %316, %339, %cst_190 {dimension_numbers = #tpu.dot_dimension_numbers<[1], [0], [0], [1], [0, 0, 1, 1], [], []>} : vector<32x32xbf16>, vector<32x16xbf16>, vector<32x16xf32> -> vector<32x16xf32>
    %341 = arith.addf %340, %318 : vector<32x16xf32>
    %342 = arith.truncf %341 : vector<32x16xf32> to vector<32x16xbf16>
    %343 = vector.extract_strided_slice %307 {offsets = [4, 0, 0], sizes = [1, 32, 16], strides = [1, 1, 1]} : vector<8x32x16xf32> to vector<1x32x16xf32>
    %344 = vector.shape_cast %343 : vector<1x32x16xf32> to vector<32x16xf32>
    %345 = arith.truncf %344 : vector<32x16xf32> to vector<32x16xbf16>
    %cst_191 = arith.constant dense<0.000000e+00> : vector<32x16xf32>
    %346 = tpu.matmul %316, %345, %cst_191 {dimension_numbers = #tpu.dot_dimension_numbers<[1], [0], [0], [1], [0, 0, 1, 1], [], []>} : vector<32x32xbf16>, vector<32x16xbf16>, vector<32x16xf32> -> vector<32x16xf32>
    %347 = arith.addf %346, %318 : vector<32x16xf32>
    %348 = arith.truncf %347 : vector<32x16xf32> to vector<32x16xbf16>
    %349 = vector.extract_strided_slice %307 {offsets = [5, 0, 0], sizes = [1, 32, 16], strides = [1, 1, 1]} : vector<8x32x16xf32> to vector<1x32x16xf32>
    %350 = vector.shape_cast %349 : vector<1x32x16xf32> to vector<32x16xf32>
    %351 = arith.truncf %350 : vector<32x16xf32> to vector<32x16xbf16>
    %cst_192 = arith.constant dense<0.000000e+00> : vector<32x16xf32>
    %352 = tpu.matmul %316, %351, %cst_192 {dimension_numbers = #tpu.dot_dimension_numbers<[1], [0], [0], [1], [0, 0, 1, 1], [], []>} : vector<32x32xbf16>, vector<32x16xbf16>, vector<32x16xf32> -> vector<32x16xf32>
    %353 = arith.addf %352, %318 : vector<32x16xf32>
    %354 = arith.truncf %353 : vector<32x16xf32> to vector<32x16xbf16>
    %355 = vector.extract_strided_slice %307 {offsets = [6, 0, 0], sizes = [1, 32, 16], strides = [1, 1, 1]} : vector<8x32x16xf32> to vector<1x32x16xf32>
    %356 = vector.shape_cast %355 : vector<1x32x16xf32> to vector<32x16xf32>
    %357 = arith.truncf %356 : vector<32x16xf32> to vector<32x16xbf16>
    %cst_193 = arith.constant dense<0.000000e+00> : vector<32x16xf32>
    %358 = tpu.matmul %316, %357, %cst_193 {dimension_numbers = #tpu.dot_dimension_numbers<[1], [0], [0], [1], [0, 0, 1, 1], [], []>} : vector<32x32xbf16>, vector<32x16xbf16>, vector<32x16xf32> -> vector<32x16xf32>
    %359 = arith.addf %358, %318 : vector<32x16xf32>
    %360 = arith.truncf %359 : vector<32x16xf32> to vector<32x16xbf16>
    %361 = vector.extract_strided_slice %307 {offsets = [7, 0, 0], sizes = [1, 32, 16], strides = [1, 1, 1]} : vector<8x32x16xf32> to vector<1x32x16xf32>
    %362 = vector.shape_cast %361 : vector<1x32x16xf32> to vector<32x16xf32>
    %363 = arith.truncf %362 : vector<32x16xf32> to vector<32x16xbf16>
    %cst_194 = arith.constant dense<0.000000e+00> : vector<32x16xf32>
    %364 = tpu.matmul %316, %363, %cst_194 {dimension_numbers = #tpu.dot_dimension_numbers<[1], [0], [0], [1], [0, 0, 1, 1], [], []>} : vector<32x32xbf16>, vector<32x16xbf16>, vector<32x16xf32> -> vector<32x16xf32>
    %365 = arith.addf %364, %318 : vector<32x16xf32>
    %366 = arith.truncf %365 : vector<32x16xf32> to vector<32x16xbf16>
    %367 = vector.shape_cast %324 : vector<32x16xbf16> to vector<1x32x16xbf16>
    %368 = vector.shape_cast %330 : vector<32x16xbf16> to vector<1x32x16xbf16>
    %369 = vector.shape_cast %336 : vector<32x16xbf16> to vector<1x32x16xbf16>
    %370 = vector.shape_cast %342 : vector<32x16xbf16> to vector<1x32x16xbf16>
    %371 = vector.shape_cast %348 : vector<32x16xbf16> to vector<1x32x16xbf16>
    %372 = vector.shape_cast %354 : vector<32x16xbf16> to vector<1x32x16xbf16>
    %373 = vector.shape_cast %360 : vector<32x16xbf16> to vector<1x32x16xbf16>
    %374 = vector.shape_cast %366 : vector<32x16xbf16> to vector<1x32x16xbf16>
    %375 = tpu.concatenate %367, %368, %369, %370, %371, %372, %373, %374 in 0 : vector<1x32x16xbf16>, vector<1x32x16xbf16>, vector<1x32x16xbf16>, vector<1x32x16xbf16>, vector<1x32x16xbf16>, vector<1x32x16xbf16>, vector<1x32x16xbf16>, vector<1x32x16xbf16> -> vector<8x32x16xbf16>
    %c2_195 = arith.constant 2 : index
    %c0_196 = arith.constant 0 : index
    %c0_197 = arith.constant 0 : index
    %376 = vector.load %arg6[%c2_195, %c0_196, %c0_197] : memref<3x32x32xf32, #tpu.memory_space<vmem>>, vector<1x32x32xf32>
    %377 = vector.shape_cast %376 : vector<1x32x32xf32> to vector<32x32xf32>
    %378 = arith.truncf %377 : vector<32x32xf32> to vector<32x32xbf16>
    %c2_198 = arith.constant 2 : index
    %c0_199 = arith.constant 0 : index
    %c0_200 = arith.constant 0 : index
    %379 = vector.load %arg7[%c2_198, %c0_199, %c0_200] : memref<3x32x16xf32, #tpu.memory_space<vmem>>, vector<1x32x16xf32>
    %380 = vector.shape_cast %379 : vector<1x32x16xf32> to vector<32x16xf32>
    %381 = vector.extract_strided_slice %313 {offsets = [0, 0, 0], sizes = [1, 32, 16], strides = [1, 1, 1]} : vector<8x32x16xf32> to vector<1x32x16xf32>
    %382 = vector.shape_cast %381 : vector<1x32x16xf32> to vector<32x16xf32>
    %383 = arith.truncf %382 : vector<32x16xf32> to vector<32x16xbf16>
    %cst_201 = arith.constant dense<0.000000e+00> : vector<32x16xf32>
    %384 = tpu.matmul %378, %383, %cst_201 {dimension_numbers = #tpu.dot_dimension_numbers<[1], [0], [0], [1], [0, 0, 1, 1], [], []>} : vector<32x32xbf16>, vector<32x16xbf16>, vector<32x16xf32> -> vector<32x16xf32>
    %385 = arith.addf %384, %380 : vector<32x16xf32>
    %386 = arith.truncf %385 : vector<32x16xf32> to vector<32x16xbf16>
    %387 = vector.extract_strided_slice %313 {offsets = [1, 0, 0], sizes = [1, 32, 16], strides = [1, 1, 1]} : vector<8x32x16xf32> to vector<1x32x16xf32>
    %388 = vector.shape_cast %387 : vector<1x32x16xf32> to vector<32x16xf32>
    %389 = arith.truncf %388 : vector<32x16xf32> to vector<32x16xbf16>
    %cst_202 = arith.constant dense<0.000000e+00> : vector<32x16xf32>
    %390 = tpu.matmul %378, %389, %cst_202 {dimension_numbers = #tpu.dot_dimension_numbers<[1], [0], [0], [1], [0, 0, 1, 1], [], []>} : vector<32x32xbf16>, vector<32x16xbf16>, vector<32x16xf32> -> vector<32x16xf32>
    %391 = arith.addf %390, %380 : vector<32x16xf32>
    %392 = arith.truncf %391 : vector<32x16xf32> to vector<32x16xbf16>
    %393 = vector.extract_strided_slice %313 {offsets = [2, 0, 0], sizes = [1, 32, 16], strides = [1, 1, 1]} : vector<8x32x16xf32> to vector<1x32x16xf32>
    %394 = vector.shape_cast %393 : vector<1x32x16xf32> to vector<32x16xf32>
    %395 = arith.truncf %394 : vector<32x16xf32> to vector<32x16xbf16>
    %cst_203 = arith.constant dense<0.000000e+00> : vector<32x16xf32>
    %396 = tpu.matmul %378, %395, %cst_203 {dimension_numbers = #tpu.dot_dimension_numbers<[1], [0], [0], [1], [0, 0, 1, 1], [], []>} : vector<32x32xbf16>, vector<32x16xbf16>, vector<32x16xf32> -> vector<32x16xf32>
    %397 = arith.addf %396, %380 : vector<32x16xf32>
    %398 = arith.truncf %397 : vector<32x16xf32> to vector<32x16xbf16>
    %399 = vector.extract_strided_slice %313 {offsets = [3, 0, 0], sizes = [1, 32, 16], strides = [1, 1, 1]} : vector<8x32x16xf32> to vector<1x32x16xf32>
    %400 = vector.shape_cast %399 : vector<1x32x16xf32> to vector<32x16xf32>
    %401 = arith.truncf %400 : vector<32x16xf32> to vector<32x16xbf16>
    %cst_204 = arith.constant dense<0.000000e+00> : vector<32x16xf32>
    %402 = tpu.matmul %378, %401, %cst_204 {dimension_numbers = #tpu.dot_dimension_numbers<[1], [0], [0], [1], [0, 0, 1, 1], [], []>} : vector<32x32xbf16>, vector<32x16xbf16>, vector<32x16xf32> -> vector<32x16xf32>
    %403 = arith.addf %402, %380 : vector<32x16xf32>
    %404 = arith.truncf %403 : vector<32x16xf32> to vector<32x16xbf16>
    %405 = vector.extract_strided_slice %313 {offsets = [4, 0, 0], sizes = [1, 32, 16], strides = [1, 1, 1]} : vector<8x32x16xf32> to vector<1x32x16xf32>
    %406 = vector.shape_cast %405 : vector<1x32x16xf32> to vector<32x16xf32>
    %407 = arith.truncf %406 : vector<32x16xf32> to vector<32x16xbf16>
    %cst_205 = arith.constant dense<0.000000e+00> : vector<32x16xf32>
    %408 = tpu.matmul %378, %407, %cst_205 {dimension_numbers = #tpu.dot_dimension_numbers<[1], [0], [0], [1], [0, 0, 1, 1], [], []>} : vector<32x32xbf16>, vector<32x16xbf16>, vector<32x16xf32> -> vector<32x16xf32>
    %409 = arith.addf %408, %380 : vector<32x16xf32>
    %410 = arith.truncf %409 : vector<32x16xf32> to vector<32x16xbf16>
    %411 = vector.extract_strided_slice %313 {offsets = [5, 0, 0], sizes = [1, 32, 16], strides = [1, 1, 1]} : vector<8x32x16xf32> to vector<1x32x16xf32>
    %412 = vector.shape_cast %411 : vector<1x32x16xf32> to vector<32x16xf32>
    %413 = arith.truncf %412 : vector<32x16xf32> to vector<32x16xbf16>
    %cst_206 = arith.constant dense<0.000000e+00> : vector<32x16xf32>
    %414 = tpu.matmul %378, %413, %cst_206 {dimension_numbers = #tpu.dot_dimension_numbers<[1], [0], [0], [1], [0, 0, 1, 1], [], []>} : vector<32x32xbf16>, vector<32x16xbf16>, vector<32x16xf32> -> vector<32x16xf32>
    %415 = arith.addf %414, %380 : vector<32x16xf32>
    %416 = arith.truncf %415 : vector<32x16xf32> to vector<32x16xbf16>
    %417 = vector.extract_strided_slice %313 {offsets = [6, 0, 0], sizes = [1, 32, 16], strides = [1, 1, 1]} : vector<8x32x16xf32> to vector<1x32x16xf32>
    %418 = vector.shape_cast %417 : vector<1x32x16xf32> to vector<32x16xf32>
    %419 = arith.truncf %418 : vector<32x16xf32> to vector<32x16xbf16>
    %cst_207 = arith.constant dense<0.000000e+00> : vector<32x16xf32>
    %420 = tpu.matmul %378, %419, %cst_207 {dimension_numbers = #tpu.dot_dimension_numbers<[1], [0], [0], [1], [0, 0, 1, 1], [], []>} : vector<32x32xbf16>, vector<32x16xbf16>, vector<32x16xf32> -> vector<32x16xf32>
    %421 = arith.addf %420, %380 : vector<32x16xf32>
    %422 = arith.truncf %421 : vector<32x16xf32> to vector<32x16xbf16>
    %423 = vector.extract_strided_slice %313 {offsets = [7, 0, 0], sizes = [1, 32, 16], strides = [1, 1, 1]} : vector<8x32x16xf32> to vector<1x32x16xf32>
    %424 = vector.shape_cast %423 : vector<1x32x16xf32> to vector<32x16xf32>
    %425 = arith.truncf %424 : vector<32x16xf32> to vector<32x16xbf16>
    %cst_208 = arith.constant dense<0.000000e+00> : vector<32x16xf32>
    %426 = tpu.matmul %378, %425, %cst_208 {dimension_numbers = #tpu.dot_dimension_numbers<[1], [0], [0], [1], [0, 0, 1, 1], [], []>} : vector<32x32xbf16>, vector<32x16xbf16>, vector<32x16xf32> -> vector<32x16xf32>
    %427 = arith.addf %426, %380 : vector<32x16xf32>
    %428 = arith.truncf %427 : vector<32x16xf32> to vector<32x16xbf16>
    %429 = vector.shape_cast %386 : vector<32x16xbf16> to vector<1x32x16xbf16>
    %430 = vector.shape_cast %392 : vector<32x16xbf16> to vector<1x32x16xbf16>
    %431 = vector.shape_cast %398 : vector<32x16xbf16> to vector<1x32x16xbf16>
    %432 = vector.shape_cast %404 : vector<32x16xbf16> to vector<1x32x16xbf16>
    %433 = vector.shape_cast %410 : vector<32x16xbf16> to vector<1x32x16xbf16>
    %434 = vector.shape_cast %416 : vector<32x16xbf16> to vector<1x32x16xbf16>
    %435 = vector.shape_cast %422 : vector<32x16xbf16> to vector<1x32x16xbf16>
    %436 = vector.shape_cast %428 : vector<32x16xbf16> to vector<1x32x16xbf16>
    %437 = tpu.concatenate %429, %430, %431, %432, %433, %434, %435, %436 in 0 : vector<1x32x16xbf16>, vector<1x32x16xbf16>, vector<1x32x16xbf16>, vector<1x32x16xbf16>, vector<1x32x16xbf16>, vector<1x32x16xbf16>, vector<1x32x16xbf16>, vector<1x32x16xbf16> -> vector<8x32x16xbf16>
    "tpu.trace_start"() <{level = 10 : i32, message = "hiw,hjw->hij"}> : () -> ()
    %cst_209 = arith.constant dense<0.000000e+00> : vector<8x32x32xf32>
    %438 = tpu.matmul %173, %375, %cst_209 {dimension_numbers = #tpu.dot_dimension_numbers<[2], [2], [1], [1], [0, 0, 0, 1, 1, 1], [0], [0]>} : vector<8x32x16xbf16>, vector<8x32x16xbf16>, vector<8x32x32xf32> -> vector<8x32x32xf32>
    "tpu.trace_stop"() : () -> ()
    %cst_210 = arith.constant dense<0xFF800000> : vector<8x32xf32>
    %439 = vector.multi_reduction <maximumf>, %438, %cst_210 [2] : vector<8x32x32xf32> to vector<8x32xf32>
    %440 = vector.shape_cast %439 : vector<8x32xf32> to vector<8x32x1xf32>
    %441 = vector.broadcast %440 : vector<8x32x1xf32> to vector<8x32x32xf32>
    %442 = arith.subf %438, %441 : vector<8x32x32xf32>
    %443 = math.exp %442 : vector<8x32x32xf32>
    %cst_211 = arith.constant dense<0.000000e+00> : vector<8x32xf32>
    %444 = vector.multi_reduction <add>, %443, %cst_211 [2] : vector<8x32x32xf32> to vector<8x32xf32>
    %445 = vector.shape_cast %444 : vector<8x32xf32> to vector<8x32x1xf32>
    %446 = tpu.reciprocal %445 {approx = true} : vector<8x32x1xf32> -> vector<8x32x1xf32>
    %447 = vector.broadcast %446 : vector<8x32x1xf32> to vector<8x32x32xf32>
    %448 = arith.mulf %443, %447 : vector<8x32x32xf32>
    %449 = arith.truncf %448 : vector<8x32x32xf32> to vector<8x32x32xbf16>
    "tpu.trace_start"() <{level = 10 : i32, message = "hij,hjw->hiw"}> : () -> ()
    %cst_212 = arith.constant dense<0.000000e+00> : vector<8x32x16xf32>
    %450 = tpu.matmul %449, %437, %cst_212 {dimension_numbers = #tpu.dot_dimension_numbers<[2], [1], [1], [2], [0, 0, 0, 1, 1, 2], [0], [0]>} : vector<8x32x32xbf16>, vector<8x32x16xbf16>, vector<8x32x16xf32> -> vector<8x32x16xf32>
    "tpu.trace_stop"() : () -> ()
    %c0_213 = arith.constant 0 : index
    %c0_214 = arith.constant 0 : index
    %c0_215 = arith.constant 0 : index
    %c0_216 = arith.constant 0 : index
    %451 = vector.load %arg8[%c0_213, %c0_214, %c0_215, %c0_216] : memref<1x8x32x16xf32, #tpu.memory_space<vmem>>, vector<1x8x32x16xf32>
    %452 = vector.shape_cast %451 : vector<1x8x32x16xf32> to vector<8x32x16xf32>
    %453 = vector.shape_cast %450 : vector<8x32x16xf32> to vector<1x8x32x16xf32>
    tpu.vector_store %arg8[%c0_213, %c0_214, %c0_215, %c0_216], %453 {strides = array<i32>} : memref<1x8x32x16xf32, #tpu.memory_space<vmem>>, vector<1x8x32x16xf32>,
    return
  }
  func.func @transform_0(%arg0: i32, %arg1: i32) -> (i32, i32, i32, i32) {
    %c0_i32 = arith.constant 0 : i32
    %c0_i32_0 = arith.constant 0 : i32
    %c0_i32_1 = arith.constant 0 : i32
    %c0_i32_2 = arith.constant 0 : i32
    return %arg0, %c0_i32, %c0_i32_0, %c0_i32_1 : i32, i32, i32, i32
  }
  func.func @transform_1(%arg0: i32, %arg1: i32) -> (i32, i32, i32, i32) {
    %c0_i32 = arith.constant 0 : i32
    %c0_i32_0 = arith.constant 0 : i32
    %c0_i32_1 = arith.constant 0 : i32
    %c0_i32_2 = arith.constant 0 : i32
    return %arg0, %c0_i32, %c0_i32_0, %c0_i32_1 : i32, i32, i32, i32
  }
  func.func @transform_2(%arg0: i32, %arg1: i32) -> (i32, i32, i32, i32, i32) {
    %c0_i32 = arith.constant 0 : i32
    %c0_i32_0 = arith.constant 0 : i32
    %c0_i32_1 = arith.constant 0 : i32
    %c0_i32_2 = arith.constant 0 : i32
    %c0_i32_3 = arith.constant 0 : i32
    %c0_i32_4 = arith.constant 0 : i32
    return %c0_i32, %c0_i32_0, %c0_i32_1, %c0_i32_2, %c0_i32_3 : i32, i32, i32, i32, i32
  }
  func.func @transform_3(%arg0: i32, %arg1: i32) -> (i32, i32, i32) {
    %c0_i32 = arith.constant 0 : i32
    %c0_i32_0 = arith.constant 0 : i32
    %c0_i32_1 = arith.constant 0 : i32
    %c0_i32_2 = arith.constant 0 : i32
    return %c0_i32, %c0_i32_0, %c0_i32_1 : i32, i32, i32
  }
  func.func @transform_4(%arg0: i32, %arg1: i32) -> (i32, i32, i32) {
    %c0_i32 = arith.constant 0 : i32
    %c0_i32_0 = arith.constant 0 : i32
    %c0_i32_1 = arith.constant 0 : i32
    %c0_i32_2 = arith.constant 0 : i32
    return %c0_i32, %c0_i32_0, %c0_i32_1 : i32, i32, i32
  }
  func.func @transform_5(%arg0: i32, %arg1: i32) -> (i32, i32, i32) {
    %c0_i32 = arith.constant 0 : i32
    %c0_i32_0 = arith.constant 0 : i32
    %c0_i32_1 = arith.constant 0 : i32
    %c0_i32_2 = arith.constant 0 : i32
    return %c0_i32, %c0_i32_0, %c0_i32_1 : i32, i32, i32
  }
  func.func @transform_6(%arg0: i32, %arg1: i32) -> (i32, i32, i32, i32) {
    %c0_i32 = arith.constant 0 : i32
    %c0_i32_0 = arith.constant 0 : i32
    %c0_i32_1 = arith.constant 0 : i32
    return %arg0, %arg1, %c0_i32, %c0_i32_0 : i32, i32, i32, i32
  }
}

</mosaic_0001>

<bundles_post_ra>
// kernel: cross_attention_forward.1
= control target key start
LH: loop header
LB: loop body
LE: loop exit
PB: predicated region body
PF: predicated region fallthrough
CT: control target
= control target key end

     0   :  { %s10459_s21 = smov 0   ;;  %s10461_s22 = smov 0   ;;  %s16619_s0 = inlined_call_operand.vmem [shape: f32[2,10,32,16], index: 0, kind: input, shape index: {}]   ;;  %s16620_s1 = inlined_call_operand.vmem [shape: f32[2,10,32,16], index: 1, kind: input, shape index: {}]   ;;  %s16621_s2 = inlined_call_operand.vmem [shape: f32[3,3,3,32,16], index: 2, kind: input, shape index: {}]   ;;  %s16622_s3 = inlined_call_operand.vmem [shape: f32[3,32,16], index: 3, kind: input, shape index: {}]   ;;  %s16623_s4 = inlined_call_operand.vmem [shape: f32[3,32,32], index: 4, kind: input, shape index: {}]   ;;  %s16624_s5 = inlined_call_operand.vmem [shape: f32[3,32,16], index: 5, kind: input, shape index: {}]   ;;  %s16625_s6 = inlined_call_operand.vmem [shape: f32[2,8,32,16], index: 6, kind: output, shape index: {}]  }
   0x1   :  { %s10463_s23 = smov 0  }
   0x2 LB: > { %s28_s24 = sadd.s32 1, %s10417_s22  ;;  %p8012_p0 = scmp.ge.s32.totalorder %s10421_s23, 1  ;;  %s10421_s23 = sphi %s10463_s23, %s16_s23   ;;  %s10417_s22 = sphi %s10461_s22, %s17784_s22   ;;  %s10413_s21 = sphi %s10459_s21, %s17783_s21  }
   0x3   : > { %p30_p1 = scmp.ge.s32.totalorder %s28_s24, 2  ;;  %p236_p2 = scmp.lt.s32.totalorder %s10421_s23, 3 }
   0x5   : > { %s17786_s24 = smov (%p30_p1, %s28_s24), 0  ;;  %p237_p3 = pnand %p8012_p0, %p236_p2 }
   0x7   : > { %240 = sbr.rel (%p237_p3) target bundleno = 1875 (0x753), region = 44 }
   0xc   : > { %v299_v0 = vlaneseq  ;;  %p276_p4 = scmp.lt.s32.totalorder %s10413_s21, 1  ;;  %vm362_vm0 = vcmask 130048   ;;  %v16754_v9 = vmov 0  ;;  %v16757_v10 = vmov 0  ;;  %v11074_v53 = vld [vmem:[%s16621_s2 + $0x28] sm:$0xff]  ;;  %v11097_v61 = vld [vmem:[%s16621_s2 + $0x38] sm:$0xff] }
   0xd   : > { %v16760_v11 = vmov 0  ;;  %v16763_v12 = vmov 0  ;;  %v16626_v13 = vmov 1.0   ;;  %v11079_v54 = vld [vmem:[%s16621_s2 + $0x8] sm:$0xff]  ;;  %v11104_v63 = vld [vmem:[%s16621_s2 + $0x18] sm:$0xff]  ;;  %vm2469_vm5 = vcmask 261120  }
   0xe   : > { %v300_v1 = vshrl.u32 %v299_v0, 7  ;;  %s17788_s21 = smov (!%p276_p4, %s10413_s21), 1  ;;  %v303_v3 = vand.u32 127, %v299_v0  ;;  %v11084_v56 = vld [vmem:[%s16622_s3 + $0x8] sm:$0xff] }
   0xf   : > { %s10170_s25 = smul.u32 320, %s17788_s21  ;;  %v11089_v57 = vld [vmem:[%s16621_s2 + $0x48] sm:$0xff] }
  0x10   : > { %v301_v2 = vadd.s32 8, %v300_v1  ;;  %v304_v4 = vadd.s32 1, %v300_v1  ;;  %v8019_v5 = vadd.s32 4294967295, %v300_v1 }
  0x11   : > { %s10485_s28 = scalar_lea.vmem %s16619_s0, %s10170_s25  ;;  %s12353_s8 = scalar_lea.vmem %s16620_s1, %s10170_s25 }
  0x12   : > { %v305_v6 = vadd.s32 1, %v301_v2  ;;  %v8020_v7 = vadd.s32 4294967295, %v301_v2  ;;  %v10488_v8 = vld [vmem:[%s10485_s28] sm:$0xff]  ;;  %vm10494_vm2 = vcmp.eq.s32.totalorder %v303_v3, %v304_v4  ;;  %vm10504_vm4 = vcmp.eq.s32.totalorder %v303_v3, %v8019_v5  ;;  %v10521_v14 = vld [vmem:[%s10485_s28 + $0x8] sm:$0xff]  ;;  %v10530_v15 = vld [vmem:[%s10485_s28 + $0x10] sm:$0xff] }
  0x13   : > { %v16758_v10 = vsel %vm10494_vm2, 4294967295, %v16757_v10  ;;  %9214 = vmatprep.mubr.msk.f32.mxu0 %vm362_vm0, %v10488_v8  ;;  %v16764_v12 = vsel %vm10504_vm4, 4294967295, %v16763_v12  ;;  %9266 = vmatprep.mubr.msk.f32.mxu1 %vm362_vm0, %v10488_v8  ;;  %v10547_v16 = vld [vmem:[%s10485_s28 + $0x18] sm:$0xff]  ;;  %v10552_v17 = vld [vmem:[%s10485_s28 + $0x20] sm:$0xff]  ;;  %v10573_v18 = vld [vmem:[%s10485_s28 + $0x28] sm:$0xff]  ;;  %v987_v58 = vmul.f32 %v11074_v53, %v10521_v14 }
  0x14   : > { %vm10490_vm1 = vcmp.eq.s32.totalorder %v303_v3, %v305_v6  ;;  %16759 = vst [vmem:[#allocation3_spill] sm:$0xff] %v16758_v10  ;;  %vm10498_vm3 = vcmp.eq.s32.totalorder %v303_v3, %v8020_v7  ;;  %16765 = vst [vmem:[#allocation5_spill] sm:$0xff] %v16764_v12  ;;  %v10578_v19 = vld [vmem:[%s10485_s28 + $0x30] sm:$0xff]  ;;  %v10599_v20 = vld [vmem:[%s10485_s28 + $0x38] sm:$0xff]  ;;  %v989_v6 = vmul.f32 %v11097_v61, %v10547_v16 }
  0x15   : > { %v16755_v9 = vsel %vm10490_vm1, 4294967295, %v16754_v9  ;;  %v16761_v11 = vsel %vm10498_vm3, 4294967295, %v16760_v11  ;;  %9210 = vmatprep.subr.msk.mxu0 %vm10490_vm1, %v16626_v13  ;;  %9262 = vmatprep.subr.msk.mxu1 %vm10498_vm3, %v16626_v13  ;;  %v10604_v21 = vld [vmem:[%s10485_s28 + $0x40] sm:$0xff]  ;;  %v10619_v22 = vld [vmem:[%s10485_s28 + $0x48] sm:$0xff]  ;;  %v10624_v23 = vld [vmem:[%s10485_s28 + $0x50] sm:$0xff] }
  0x16   : > { %16756 = vst [vmem:[#allocation2_spill] sm:$0xff] %v16755_v9  ;;  %16762 = vst [vmem:[#allocation4_spill] sm:$0xff] %v16761_v11  ;;  %9211 = vmatpush3.msk.msra.mxu0 %vm10490_vm1, %v16626_v13  ;;  %9263 = vmatpush3.msk.msra.mxu1 %vm10498_vm3, %v16626_v13  ;;  %v10633_v24 = vld [vmem:[%s10485_s28 + $0x58] sm:$0xff]  ;;  %v10638_v25 = vld [vmem:[%s10485_s28 + $0x60] sm:$0xff] }
  0x17   : > { %9212 = vmatprep.subr.msk.mxu0 %vm10494_vm2, %v16626_v13  ;;  %9264 = vmatprep.subr.msk.mxu1 %vm10504_vm4, %v16626_v13  ;;  %v10647_v26 = vld [vmem:[%s10485_s28 + $0x68] sm:$0xff]  ;;  %v10652_v27 = vld [vmem:[%s10485_s28 + $0x70] sm:$0xff]  ;;  %v10661_v28 = vld [vmem:[%s10485_s28 + $0x78] sm:$0xff] }
  0x18   : > { %9213 = vmatpush3.msk.msra.mxu0 %vm10494_vm2, %v16626_v13  ;;  %9265 = vmatpush3.msk.msra.mxu1 %vm10504_vm4, %v16626_v13  ;;  %v10666_v29 = vld [vmem:[%s10485_s28 + $0x80] sm:$0xff]  ;;  %v10675_v30 = vld [vmem:[%s10485_s28 + $0x88] sm:$0xff]  ;;  %v10680_v31 = vld [vmem:[%s10485_s28 + $0x90] sm:$0xff] }
  0x19   : > { %9215 = vmatmul.mubr.msk.f32.vlgmr.msra.gmra.mxu0 %vm362_vm0, %v10521_v14  ;;  %9267 = vmatmul.mubr.msk.f32.vlgmr.msra.gmra.mxu1 %vm362_vm0, %v10521_v14  ;;  %v10689_v32 = vld [vmem:[%s10485_s28 + $0x98] sm:$0xff]  ;;  %v10694_v33 = vld [vmem:[%s10485_s28 + $0xa0] sm:$0xff]  ;;  %v10703_v34 = vld [vmem:[%s10485_s28 + $0xa8] sm:$0xff] }
  0x1a   : > { %9217 = vmatprep.mubr.msk.f32.mxu0 %vm362_vm0, %v10530_v15  ;;  %9269 = vmatprep.mubr.msk.f32.mxu1 %vm362_vm0, %v10530_v15  ;;  %v10708_v35 = vld [vmem:[%s10485_s28 + $0xb0] sm:$0xff]  ;;  %v10717_v36 = vld [vmem:[%s10485_s28 + $0xb8] sm:$0xff]  ;;  %v10722_v37 = vld [vmem:[%s10485_s28 + $0xc0] sm:$0xff] }
  0x1b   : > { %9314 = vmatprep.subr.msk.mxu0 %vm10490_vm1, %v16626_v13  ;;  %9366 = vmatprep.subr.msk.mxu1 %vm10498_vm3, %v16626_v13  ;;  %v10731_v38 = vld [vmem:[%s10485_s28 + $0xc8] sm:$0xff]  ;;  %v10736_v39 = vld [vmem:[%s10485_s28 + $0xd0] sm:$0xff]  ;;  %v10745_v40 = vld [vmem:[%s10485_s28 + $0xd8] sm:$0xff] }
  0x1c   : > { %9315 = vmatpush3.msk.msra.mxu0 %vm10490_vm1, %v16626_v13  ;;  %9367 = vmatpush3.msk.msra.mxu1 %vm10498_vm3, %v16626_v13  ;;  %v10750_v41 = vld [vmem:[%s10485_s28 + $0xe0] sm:$0xff]  ;;  %v10759_v42 = vld [vmem:[%s10485_s28 + $0xe8] sm:$0xff]  ;;  %v10764_v43 = vld [vmem:[%s10485_s28 + $0xf0] sm:$0xff] }
  0x1d   : > { %9218 = vmatmul.mubr.msk.f32.gmra.mxu0 %vm362_vm0, %v10547_v16  ;;  %9270 = vmatmul.mubr.msk.f32.gmra.mxu1 %vm362_vm0, %v10547_v16  ;;  %v10773_v44 = vld [vmem:[%s10485_s28 + $0xf8] sm:$0xff]  ;;  %v10908_v45 = vld [vmem:[%s10485_s28 + $0x100] sm:$0xff]  ;;  %v10917_v46 = vld [vmem:[%s10485_s28 + $0x108] sm:$0xff]  ;;  %v991_v16 = vmul.f32 %v11074_v53, %v10573_v18 }
  0x1e   : > { %9220 = vmatprep.mubr.msk.f32.mxu0 %vm362_vm0, %v10552_v17  ;;  %9272 = vmatprep.mubr.msk.f32.mxu1 %vm362_vm0, %v10552_v17  ;;  %16766 = vst [vmem:[#allocation6_spill] sm:$0xff] %v10908_v45  ;;  %16767 = vst [vmem:[#allocation7_spill] sm:$0xff] %v10917_v46  ;;  %v10922_v47 = vld [vmem:[%s10485_s28 + $0x110] sm:$0xff]  ;;  %v10931_v48 = vld [vmem:[%s10485_s28 + $0x118] sm:$0xff] }
  0x1f   : > { %9316 = vmatprep.subr.msk.mxu0 %vm10494_vm2, %v16626_v13  ;;  %9368 = vmatprep.subr.msk.mxu1 %vm10504_vm4, %v16626_v13  ;;  %16768 = vst [vmem:[#allocation8_spill] sm:$0xff] %v10922_v47  ;;  %16769 = vst [vmem:[#allocation9_spill] sm:$0xff] %v10931_v48  ;;  %v11048_v49 = vld [vmem:[%s10485_s28 + $0x120] sm:$0xff]  ;;  %v359_v50 = vld [vmem:[%s10485_s28 + $0x128] sm:$0xff] }
  0x20   : > { %9317 = vmatpush3.msk.msra.mxu0 %vm10494_vm2, %v16626_v13  ;;  %9369 = vmatpush3.msk.msra.mxu1 %vm10504_vm4, %v16626_v13  ;;  %v360_v51 = vld [vmem:[%s10485_s28 + $0x130] sm:$0xff]  ;;  %v11064_v52 = vld [vmem:[%s10485_s28 + $0x138] sm:$0xff] }
  0x21   : > { %9221 = vmatmul.mubr.msk.f32.gmra.mxu0 %vm362_vm0, %v10573_v18  ;;  %9273 = vmatmul.mubr.msk.f32.gmra.mxu1 %vm362_vm0, %v10573_v18  ;;  %v11113_v4 = vld [vmem:[%s16622_s3 + $0x18] sm:$0xff] }
  0x22   : > { %9223 = vmatprep.mubr.msk.f32.mxu0 %vm362_vm0, %v10578_v19  ;;  %9275 = vmatprep.mubr.msk.f32.mxu1 %vm362_vm0, %v10578_v19  ;;  %v11118_v5 = vld [vmem:[%s16621_s2 + $0x58] sm:$0xff] }
  0x23   : > { %9418 = vmatprep.subr.msk.mxu0 %vm10490_vm1, %v16626_v13  ;;  %9470 = vmatprep.subr.msk.mxu1 %vm10498_vm3, %v16626_v13 }
  0x25   : > { %9224 = vmatmul.mubr.msk.f32.gmra.mxu0 %vm362_vm0, %v10599_v20  ;;  %9276 = vmatmul.mubr.msk.f32.gmra.mxu1 %vm362_vm0, %v10599_v20 }
  0x26   : > { %9226 = vmatprep.mubr.msk.f32.mxu0 %vm362_vm0, %v10604_v21  ;;  %9278 = vmatprep.mubr.msk.f32.mxu1 %vm362_vm0, %v10604_v21 }
  0x29   : > { %9227 = vmatmul.mubr.msk.f32.gmra.mxu0 %vm362_vm0, %v10619_v22  ;;  %9279 = vmatmul.mubr.msk.f32.gmra.mxu1 %vm362_vm0, %v10619_v22 }
  0x2a   : > { %9229 = vmatprep.mubr.msk.f32.mxu0 %vm362_vm0, %v10624_v23  ;;  %9281 = vmatprep.mubr.msk.f32.mxu1 %vm362_vm0, %v10624_v23 }
  0x2d   : > { %9230 = vmatmul.mubr.msk.f32.gmra.mxu0 %vm362_vm0, %v10633_v24  ;;  %9282 = vmatmul.mubr.msk.f32.gmra.mxu1 %vm362_vm0, %v10633_v24 }
  0x2e   : > { %9232 = vmatprep.mubr.msk.f32.mxu0 %vm362_vm0, %v10638_v25  ;;  %9284 = vmatprep.mubr.msk.f32.mxu1 %vm362_vm0, %v10638_v25 }
  0x31   : > { %9233 = vmatmul.mubr.msk.f32.gmra.mxu0 %vm362_vm0, %v10647_v26  ;;  %9285 = vmatmul.mubr.msk.f32.gmra.mxu1 %vm362_vm0, %v10647_v26 }
  0x32   : > { %9235 = vmatprep.mubr.msk.f32.mxu0 %vm362_vm0, %v10652_v27  ;;  %9287 = vmatprep.mubr.msk.f32.mxu1 %vm362_vm0, %v10652_v27 }
  0x35   : > { %9236 = vmatmul.mubr.msk.f32.gmra.mxu0 %vm362_vm0, %v10661_v28  ;;  %9288 = vmatmul.mubr.msk.f32.gmra.mxu1 %vm362_vm0, %v10661_v28 }
  0x36   : > { %9238 = vmatprep.mubr.msk.f32.mxu0 %vm362_vm0, %v10666_v29  ;;  %9290 = vmatprep.mubr.msk.f32.mxu1 %vm362_vm0, %v10666_v29 }
  0x39   : > { %9239 = vmatmul.mubr.msk.f32.gmra.mxu0 %vm362_vm0, %v10675_v30  ;;  %9291 = vmatmul.mubr.msk.f32.gmra.mxu1 %vm362_vm0, %v10675_v30 }
  0x3a   : > { %9241 = vmatprep.mubr.msk.f32.mxu0 %vm362_vm0, %v10680_v31  ;;  %9293 = vmatprep.mubr.msk.f32.mxu1 %vm362_vm0, %v10680_v31 }
  0x3d   : > { %9242 = vmatmul.mubr.msk.f32.gmra.mxu0 %vm362_vm0, %v10689_v32  ;;  %9294 = vmatmul.mubr.msk.f32.gmra.mxu1 %vm362_vm0, %v10689_v32 }
  0x3e   : > { %9244 = vmatprep.mubr.msk.f32.mxu0 %vm362_vm0, %v10694_v33  ;;  %9296 = vmatprep.mubr.msk.f32.mxu1 %vm362_vm0, %v10694_v33 }
  0x41   : > { %9245 = vmatmul.mubr.msk.f32.gmra.mxu0 %vm362_vm0, %v10703_v34  ;;  %9297 = vmatmul.mubr.msk.f32.gmra.mxu1 %vm362_vm0, %v10703_v34 }
  0x42   : > { %9247 = vmatprep.mubr.msk.f32.mxu0 %vm362_vm0, %v10708_v35  ;;  %9299 = vmatprep.mubr.msk.f32.mxu1 %vm362_vm0, %v10708_v35 }
  0x45   : > { %9248 = vmatmul.mubr.msk.f32.gmra.mxu0 %vm362_vm0, %v10717_v36  ;;  %9300 = vmatmul.mubr.msk.f32.gmra.mxu1 %vm362_vm0, %v10717_v36 }
  0x46   : > { %9250 = vmatprep.mubr.msk.f32.mxu0 %vm362_vm0, %v10722_v37  ;;  %9302 = vmatprep.mubr.msk.f32.mxu1 %vm362_vm0, %v10722_v37 }
  0x49   : > { %9251 = vmatmul.mubr.msk.f32.gmra.mxu0 %vm362_vm0, %v10731_v38  ;;  %9303 = vmatmul.mubr.msk.f32.gmra.mxu1 %vm362_vm0, %v10731_v38 }
  0x4a   : > { %9253 = vmatprep.mubr.msk.f32.mxu0 %vm362_vm0, %v10736_v39  ;;  %9305 = vmatprep.mubr.msk.f32.mxu1 %vm362_vm0, %v10736_v39 }
  0x4d   : > { %9254 = vmatmul.mubr.msk.f32.gmra.mxu0 %vm362_vm0, %v10745_v40  ;;  %9306 = vmatmul.mubr.msk.f32.gmra.mxu1 %vm362_vm0, %v10745_v40 }
  0x4e   : > { %9256 = vmatprep.mubr.msk.f32.mxu0 %vm362_vm0, %v10750_v41  ;;  %9308 = vmatprep.mubr.msk.f32.mxu1 %vm362_vm0, %v10750_v41 }
  0x51   : > { %9257 = vmatmul.mubr.msk.f32.gmra.mxu0 %vm362_vm0, %v10759_v42  ;;  %9309 = vmatmul.mubr.msk.f32.gmra.mxu1 %vm362_vm0, %v10759_v42 }
  0x52   : > { %9259 = vmatprep.mubr.msk.f32.mxu0 %vm362_vm0, %v10764_v43  ;;  %9311 = vmatprep.mubr.msk.f32.mxu1 %vm362_vm0, %v10764_v43 }
  0x55   : > { %9260 = vmatmul.mubr.msk.f32.gmra.mxu0 %vm362_vm0, %v10773_v44  ;;  %9312 = vmatmul.mubr.msk.f32.gmra.mxu1 %vm362_vm0, %v10773_v44 }
  0x56   : > { %9318 = vmatprep.mubr.msk.f32.mxu0 %vm362_vm0, %v10552_v17  ;;  %9370 = vmatprep.mubr.msk.f32.mxu1 %vm362_vm0, %v10552_v17 }
  0x59   : > { %9319 = vmatmul.mubr.msk.f32.vlgmr.msra.gmra.mxu0 %vm362_vm0, %v10573_v18  ;;  %9371 = vmatmul.mubr.msk.f32.vlgmr.msra.gmra.mxu1 %vm362_vm0, %v10573_v18 }
  0x5a   : > { %9321 = vmatprep.mubr.msk.f32.mxu0 %vm362_vm0, %v10578_v19  ;;  %9373 = vmatprep.mubr.msk.f32.mxu1 %vm362_vm0, %v10578_v19 }
  0x5b   : > { %9419 = vmatpush3.msk.msra.mxu0 %vm10490_vm1, %v16626_v13  ;;  %9471 = vmatpush3.msk.msra.mxu1 %vm10498_vm3, %v16626_v13 }
  0x5c   : > { %9420 = vmatprep.subr.msk.mxu0 %vm10494_vm2, %v16626_v13  ;;  %9472 = vmatprep.subr.msk.mxu1 %vm10504_vm4, %v16626_v13 }
  0x5d   : > { %9322 = vmatmul.mubr.msk.f32.gmra.mxu0 %vm362_vm0, %v10599_v20  ;;  %9374 = vmatmul.mubr.msk.f32.gmra.mxu1 %vm362_vm0, %v10599_v20 }
  0x5e   : > { %9324 = vmatprep.mubr.msk.f32.mxu0 %vm362_vm0, %v10604_v21  ;;  %9376 = vmatprep.mubr.msk.f32.mxu1 %vm362_vm0, %v10604_v21 }
  0x5f   : > { %9421 = vmatpush3.msk.msra.mxu0 %vm10494_vm2, %v16626_v13  ;;  %9473 = vmatpush3.msk.msra.mxu1 %vm10504_vm4, %v16626_v13 }
  0x61   : > { %9325 = vmatmul.mubr.msk.f32.gmra.mxu0 %vm362_vm0, %v10619_v22  ;;  %9377 = vmatmul.mubr.msk.f32.gmra.mxu1 %vm362_vm0, %v10619_v22 }
  0x62   : > { %9327 = vmatprep.mubr.msk.f32.mxu0 %vm362_vm0, %v10624_v23  ;;  %9379 = vmatprep.mubr.msk.f32.mxu1 %vm362_vm0, %v10624_v23 }
  0x65   : > { %9328 = vmatmul.mubr.msk.f32.gmra.mxu0 %vm362_vm0, %v10633_v24  ;;  %9380 = vmatmul.mubr.msk.f32.gmra.mxu1 %vm362_vm0, %v10633_v24 }
  0x66   : > { %9330 = vmatprep.mubr.msk.f32.mxu0 %vm362_vm0, %v10638_v25  ;;  %9382 = vmatprep.mubr.msk.f32.mxu1 %vm362_vm0, %v10638_v25 }
  0x69   : > { %9331 = vmatmul.mubr.msk.f32.gmra.mxu0 %vm362_vm0, %v10647_v26  ;;  %9383 = vmatmul.mubr.msk.f32.gmra.mxu1 %vm362_vm0, %v10647_v26 }
  0x6a   : > { %9333 = vmatprep.mubr.msk.f32.mxu0 %vm362_vm0, %v10652_v27  ;;  %9385 = vmatprep.mubr.msk.f32.mxu1 %vm362_vm0, %v10652_v27 }
  0x6d   : > { %9334 = vmatmul.mubr.msk.f32.gmra.mxu0 %vm362_vm0, %v10661_v28  ;;  %9386 = vmatmul.mubr.msk.f32.gmra.mxu1 %vm362_vm0, %v10661_v28 }
  0x6e   : > { %9336 = vmatprep.mubr.msk.f32.mxu0 %vm362_vm0, %v10666_v29  ;;  %9388 = vmatprep.mubr.msk.f32.mxu1 %vm362_vm0, %v10666_v29 }
  0x71   : > { %9337 = vmatmul.mubr.msk.f32.gmra.mxu0 %vm362_vm0, %v10675_v30  ;;  %9389 = vmatmul.mubr.msk.f32.gmra.mxu1 %vm362_vm0, %v10675_v30 }
  0x72   : > { %9339 = vmatprep.mubr.msk.f32.mxu0 %vm362_vm0, %v10680_v31  ;;  %9391 = vmatprep.mubr.msk.f32.mxu1 %vm362_vm0, %v10680_v31 }
  0x75   : > { %9340 = vmatmul.mubr.msk.f32.gmra.mxu0 %vm362_vm0, %v10689_v32  ;;  %9392 = vmatmul.mubr.msk.f32.gmra.mxu1 %vm362_vm0, %v10689_v32 }
  0x76   : > { %9342 = vmatprep.mubr.msk.f32.mxu0 %vm362_vm0, %v10694_v33  ;;  %9394 = vmatprep.mubr.msk.f32.mxu1 %vm362_vm0, %v10694_v33 }
  0x79   : > { %9343 = vmatmul.mubr.msk.f32.gmra.mxu0 %vm362_vm0, %v10703_v34  ;;  %9395 = vmatmul.mubr.msk.f32.gmra.mxu1 %vm362_vm0, %v10703_v34 }
  0x7a   : > { %9345 = vmatprep.mubr.msk.f32.mxu0 %vm362_vm0, %v10708_v35  ;;  %9397 = vmatprep.mubr.msk.f32.mxu1 %vm362_vm0, %v10708_v35 }
  0x7d   : > { %9346 = vmatmul.mubr.msk.f32.gmra.mxu0 %vm362_vm0, %v10717_v36  ;;  %9398 = vmatmul.mubr.msk.f32.gmra.mxu1 %vm362_vm0, %v10717_v36 }
  0x7e   : > { %9348 = vmatprep.mubr.msk.f32.mxu0 %vm362_vm0, %v10722_v37  ;;  %9400 = vmatprep.mubr.msk.f32.mxu1 %vm362_vm0, %v10722_v37 }
  0x81   : > { %9349 = vmatmul.mubr.msk.f32.gmra.mxu0 %vm362_vm0, %v10731_v38  ;;  %9401 = vmatmul.mubr.msk.f32.gmra.mxu1 %vm362_vm0, %v10731_v38 }
  0x82   : > { %9351 = vmatprep.mubr.msk.f32.mxu0 %vm362_vm0, %v10736_v39  ;;  %9403 = vmatprep.mubr.msk.f32.mxu1 %vm362_vm0, %v10736_v39 }
  0x85   : > { %9352 = vmatmul.mubr.msk.f32.gmra.mxu0 %vm362_vm0, %v10745_v40  ;;  %9404 = vmatmul.mubr.msk.f32.gmra.mxu1 %vm362_vm0, %v10745_v40 }
  0x86   : > { %9354 = vmatprep.mubr.msk.f32.mxu0 %vm362_vm0, %v10750_v41  ;;  %9406 = vmatprep.mubr.msk.f32.mxu1 %vm362_vm0, %v10750_v41 }
  0x89   : > { %9355 = vmatmul.mubr.msk.f32.gmra.mxu0 %vm362_vm0, %v10759_v42  ;;  %9407 = vmatmul.mubr.msk.f32.gmra.mxu1 %vm362_vm0, %v10759_v42 }
  0x8a   : > { %9357 = vmatprep.mubr.msk.f32.mxu0 %vm362_vm0, %v10764_v43  ;;  %9409 = vmatprep.mubr.msk.f32.mxu1 %vm362_vm0, %v10764_v43 }
  0x8d   : > { %9358 = vmatmul.mubr.msk.f32.gmra.mxu0 %vm362_vm0, %v10773_v44  ;;  %9410 = vmatmul.mubr.msk.f32.gmra.mxu1 %vm362_vm0, %v10773_v44 }
  0x8e   : > { %9360 = vmatprep.mubr.msk.f32.mxu0 %vm362_vm0, %v10908_v45  ;;  %9412 = vmatprep.mubr.msk.f32.mxu1 %vm362_vm0, %v10908_v45 }
  0x91   : > { %9361 = vmatmul.mubr.msk.f32.gmra.mxu0 %vm362_vm0, %v10917_v46  ;;  %9413 = vmatmul.mubr.msk.f32.gmra.mxu1 %vm362_vm0, %v10917_v46 }
  0x92   : > { %9363 = vmatprep.mubr.msk.f32.mxu0 %vm362_vm0, %v10922_v47  ;;  %9415 = vmatprep.mubr.msk.f32.mxu1 %vm362_vm0, %v10922_v47 }
  0x95   : > { %9364 = vmatmul.mubr.msk.f32.gmra.mxu0 %vm362_vm0, %v10931_v48  ;;  %9416 = vmatmul.mubr.msk.f32.gmra.mxu1 %vm362_vm0, %v10931_v48 }
  0x96   : > { %9422 = vmatprep.mubr.msk.f32.mxu0 %vm362_vm0, %v10604_v21  ;;  %9474 = vmatprep.mubr.msk.f32.mxu1 %vm362_vm0, %v10604_v21 }
  0x99   : > { %9423 = vmatmul.mubr.msk.f32.vlgmr.msra.gmra.mxu0 %vm362_vm0, %v10619_v22  ;;  %9475 = vmatmul.mubr.msk.f32.vlgmr.msra.gmra.mxu1 %vm362_vm0, %v10619_v22 }
  0x9a   : > { %9425 = vmatprep.mubr.msk.f32.mxu0 %vm362_vm0, %v10624_v23  ;;  %9477 = vmatprep.mubr.msk.f32.mxu1 %vm362_vm0, %v10624_v23 }
  0x9d   : > { %9426 = vmatmul.mubr.msk.f32.gmra.mxu0 %vm362_vm0, %v10633_v24  ;;  %9478 = vmatmul.mubr.msk.f32.gmra.mxu1 %vm362_vm0, %v10633_v24 }
  0x9e   : > { %9428 = vmatprep.mubr.msk.f32.mxu0 %vm362_vm0, %v10638_v25  ;;  %9480 = vmatprep.mubr.msk.f32.mxu1 %vm362_vm0, %v10638_v25 }
  0xa1   : > { %9429 = vmatmul.mubr.msk.f32.gmra.mxu0 %vm362_vm0, %v10647_v26  ;;  %9481 = vmatmul.mubr.msk.f32.gmra.mxu1 %vm362_vm0, %v10647_v26 }
  0xa2   : > { %9431 = vmatprep.mubr.msk.f32.mxu0 %vm362_vm0, %v10652_v27  ;;  %9483 = vmatprep.mubr.msk.f32.mxu1 %vm362_vm0, %v10652_v27 }
  0xa5   : > { %9432 = vmatmul.mubr.msk.f32.gmra.mxu0 %vm362_vm0, %v10661_v28  ;;  %9484 = vmatmul.mubr.msk.f32.gmra.mxu1 %vm362_vm0, %v10661_v28 }
  0xa6   : > { %9434 = vmatprep.mubr.msk.f32.mxu0 %vm362_vm0, %v10666_v29  ;;  %9486 = vmatprep.mubr.msk.f32.mxu1 %vm362_vm0, %v10666_v29 }
  0xa9   : > { %9435 = vmatmul.mubr.msk.f32.gmra.mxu0 %vm362_vm0, %v10675_v30  ;;  %9487 = vmatmul.mubr.msk.f32.gmra.mxu1 %vm362_vm0, %v10675_v30 }
  0xaa   : > { %9437 = vmatprep.mubr.msk.f32.mxu0 %vm362_vm0, %v10680_v31  ;;  %9489 = vmatprep.mubr.msk.f32.mxu1 %vm362_vm0, %v10680_v31 }
  0xad   : > { %9438 = vmatmul.mubr.msk.f32.gmra.mxu0 %vm362_vm0, %v10689_v32  ;;  %9490 = vmatmul.mubr.msk.f32.gmra.mxu1 %vm362_vm0, %v10689_v32 }
  0xae   : > { %9440 = vmatprep.mubr.msk.f32.mxu0 %vm362_vm0, %v10694_v33  ;;  %9492 = vmatprep.mubr.msk.f32.mxu1 %vm362_vm0, %v10694_v33 }
  0xb1   : > { %9441 = vmatmul.mubr.msk.f32.gmra.mxu0 %vm362_vm0, %v10703_v34  ;;  %9493 = vmatmul.mubr.msk.f32.gmra.mxu1 %vm362_vm0, %v10703_v34 }
  0xb2   : > { %9443 = vmatprep.mubr.msk.f32.mxu0 %vm362_vm0, %v10708_v35  ;;  %9495 = vmatprep.mubr.msk.f32.mxu1 %vm362_vm0, %v10708_v35 }
  0xb5   : > { %9444 = vmatmul.mubr.msk.f32.gmra.mxu0 %vm362_vm0, %v10717_v36  ;;  %9496 = vmatmul.mubr.msk.f32.gmra.mxu1 %vm362_vm0, %v10717_v36 }
  0xb6   : > { %9446 = vmatprep.mubr.msk.f32.mxu0 %vm362_vm0, %v10722_v37  ;;  %9498 = vmatprep.mubr.msk.f32.mxu1 %vm362_vm0, %v10722_v37 }
  0xb9   : > { %9447 = vmatmul.mubr.msk.f32.gmra.mxu0 %vm362_vm0, %v10731_v38  ;;  %9499 = vmatmul.mubr.msk.f32.gmra.mxu1 %vm362_vm0, %v10731_v38 }
  0xba   : > { %9449 = vmatprep.mubr.msk.f32.mxu0 %vm362_vm0, %v10736_v39  ;;  %9501 = vmatprep.mubr.msk.f32.mxu1 %vm362_vm0, %v10736_v39 }
  0xbd   : > { %9450 = vmatmul.mubr.msk.f32.gmra.mxu0 %vm362_vm0, %v10745_v40  ;;  %9502 = vmatmul.mubr.msk.f32.gmra.mxu1 %vm362_vm0, %v10745_v40 }
  0xbe   : > { %9452 = vmatprep.mubr.msk.f32.mxu0 %vm362_vm0, %v10750_v41  ;;  %9504 = vmatprep.mubr.msk.f32.mxu1 %vm362_vm0, %v10750_v41 }
  0xc1   : > { %9453 = vmatmul.mubr.msk.f32.gmra.mxu0 %vm362_vm0, %v10759_v42  ;;  %9505 = vmatmul.mubr.msk.f32.gmra.mxu1 %vm362_vm0, %v10759_v42 }
  0xc2   : > { %9455 = vmatprep.mubr.msk.f32.mxu0 %vm362_vm0, %v10764_v43  ;;  %9507 = vmatprep.mubr.msk.f32.mxu1 %vm362_vm0, %v10764_v43 }
  0xc5   : > { %9456 = vmatmul.mubr.msk.f32.gmra.mxu0 %vm362_vm0, %v10773_v44  ;;  %9508 = vmatmul.mubr.msk.f32.gmra.mxu1 %vm362_vm0, %v10773_v44 }
  0xc6   : > { %9458 = vmatprep.mubr.msk.f32.mxu0 %vm362_vm0, %v10908_v45  ;;  %9510 = vmatprep.mubr.msk.f32.mxu1 %vm362_vm0, %v10908_v45 }
  0xc9   : > { %9459 = vmatmul.mubr.msk.f32.gmra.mxu0 %vm362_vm0, %v10917_v46  ;;  %9511 = vmatmul.mubr.msk.f32.gmra.mxu1 %vm362_vm0, %v10917_v46 }
  0xca   : > { %9461 = vmatprep.mubr.msk.f32.mxu0 %vm362_vm0, %v10922_v47  ;;  %9513 = vmatprep.mubr.msk.f32.mxu1 %vm362_vm0, %v10922_v47 }
  0xcd   : > { %9462 = vmatmul.mubr.msk.f32.gmra.mxu0 %vm362_vm0, %v10931_v48  ;;  %9514 = vmatmul.mubr.msk.f32.gmra.mxu1 %vm362_vm0, %v10931_v48 }
  0xce   : > { %9464 = vmatprep.mubr.msk.f32.mxu0 %vm362_vm0, %v11048_v49  ;;  %9516 = vmatprep.mubr.msk.f32.mxu1 %vm362_vm0, %v11048_v49 }
  0xd1   : > { %9465 = vmatmul.mubr.msk.f32.gmra.mxu0 %vm362_vm0, %v359_v50  ;;  %9517 = vmatmul.mubr.msk.f32.gmra.mxu1 %vm362_vm0, %v359_v50 }
  0xd2   : > { %9467 = vmatprep.mubr.msk.f32.mxu0 %vm362_vm0, %v360_v51  ;;  %9519 = vmatprep.mubr.msk.f32.mxu1 %vm362_vm0, %v360_v51 }
  0xd5   : > { %9468 = vmatmul.mubr.msk.f32.gmra.mxu0 %vm362_vm0, %v11064_v52  ;;  %9520 = vmatmul.mubr.msk.f32.gmra.mxu1 %vm362_vm0, %v11064_v52 }
  0xd9   : > { %v9216_v55 = vpop.f32.mrf.mxu0  ;;  %v9268_v60 = vpop.f32.mrf.mxu1 }
  0xda   : > { %v914_v59 = vmul.f32 %v9216_v55, %v11079_v54  ;;  %v1056_v1 = vmul.f32 %v9268_v60, %v11089_v57 }
  0xdb   : > { %v11099_v62 = vpop.f32.mrf.mxu0  ;;  %v11108_v2 = vpop.f32.mrf.mxu1 }
  0xdc   : > { %v950_v0 = vadd.f32 %v11084_v56, %v914_v59  ;;  %16770 = vst [vmem:[#allocation10_spill] sm:$0xff] %v11108_v2 }
  0xdd   : > { %v9219_v3 = vpop.f32.mrf.mxu0  ;;  %v9271_v50 = vpop.f32.mrf.mxu1 }
  0xde   : > { %v1019_v7 = vadd.f32 %v987_v58, %v950_v0  ;;  %v916_v14 = vmul.f32 %v9219_v3, %v11104_v63  ;;  %v1058_v60 = vmul.f32 %v9271_v50, %v11118_v5 }
  0xdf   : > { %v11123_v51 = vpop.f32.mrf.mxu0  ;;  %v11129_v13 = vpop.f32.mrf.mxu1 }
  0xe0   : > { %v11125_v55 = vadd.f32 %v1056_v1, %v1019_v7  ;;  %v952_v59 = vadd.f32 %v11113_v4, %v916_v14  ;;  %16771 = vst [vmem:[#allocation11_spill] sm:$0xff] %v11129_v13 }
  0xe1   : > { %v9222_v12 = vpop.f32.mrf.mxu0  ;;  %v9274_v9 = vpop.f32.mrf.mxu1 }
  0xe2   : > { %v1021_v11 = vadd.f32 %v989_v6, %v952_v59  ;;  %v918_v10 = vmul.f32 %v9222_v12, %v11079_v54  ;;  %v1060_v3 = vmul.f32 %v9274_v9, %v11089_v57  ;;  %v993_v12 = vmul.f32 %v11097_v61, %v10599_v20 }
  0xe3   : > { %v11134_v58 = vpop.f32.mrf.mxu0  ;;  %v11140_v7 = vpop.f32.mrf.mxu1 }
  0xe4   : > { %v11136_v0 = vadd.f32 %v1058_v60, %v1021_v11  ;;  %v954_v1 = vadd.f32 %v11084_v56, %v918_v10  ;;  %16773 = vst [vmem:[#allocation13_spill] sm:$0xff] %v11140_v7 }
  0xe5   : > { %v9225_v14 = vpop.f32.mrf.mxu0  ;;  %v9277_v59 = vpop.f32.mrf.mxu1 }
  0xe6   : > { %16772 = vst [vmem:[#allocation12_spill] sm:$0xff] %v11136_v0  ;;  %v1023_v50 = vadd.f32 %v991_v16, %v954_v1  ;;  %v920_v6 = vmul.f32 %v9225_v14, %v11104_v63  ;;  %v1062_v10 = vmul.f32 %v9277_v59, %v11118_v5  ;;  %v995_v14 = vmul.f32 %v11074_v53, %v10619_v22 }
  0xe7   : > { %v11145_v13 = vpop.f32.mrf.mxu0  ;;  %v11151_v60 = vpop.f32.mrf.mxu1 }
  0xe8   : > { %v11147_v47 = vadd.f32 %v1060_v3, %v1023_v50  ;;  %v956_v11 = vadd.f32 %v11113_v4, %v920_v6  ;;  %16774 = vst [vmem:[#allocation14_spill] sm:$0xff] %v11151_v60 }
  0xe9   : > { %v9228_v9 = vpop.f32.mrf.mxu0  ;;  %v9280_v1 = vpop.f32.mrf.mxu1 }
  0xea   : > { %v1025_v0 = vadd.f32 %v993_v12, %v956_v11  ;;  %v922_v16 = vmul.f32 %v9228_v9, %v11079_v54  ;;  %v1064_v50 = vmul.f32 %v9280_v1, %v11089_v57  ;;  %v997_v9 = vmul.f32 %v11097_v61, %v10633_v24 }
  0xeb   : > { %v11156_v7 = vpop.f32.mrf.mxu0  ;;  %v11162_v6 = vpop.f32.mrf.mxu1 }
  0xec   : > { %16775 = vst [vmem:[#allocation15_spill] sm:$0xff] %v11156_v7  ;;  %v11158_v2 = vadd.f32 %v1062_v10, %v1025_v0  ;;  %v958_v3 = vadd.f32 %v11084_v56, %v922_v16  ;;  %16777 = vst [vmem:[#allocation17_spill] sm:$0xff] %v11162_v6 }
  0xed   : > { %v9231_v59 = vpop.f32.mrf.mxu0  ;;  %v9283_v11 = vpop.f32.mrf.mxu1 }
  0xee   : > { %16776 = vst [vmem:[#allocation16_spill] sm:$0xff] %v11158_v2  ;;  %v1027_v60 = vadd.f32 %v995_v14, %v958_v3  ;;  %v924_v12 = vmul.f32 %v9231_v59, %v11104_v63  ;;  %v1066_v10 = vmul.f32 %v9283_v11, %v11118_v5  ;;  %v999_v59 = vmul.f32 %v11074_v53, %v10647_v26 }
  0xef   : > { %v11167_v48 = vpop.f32.mrf.mxu0  ;;  %v11173_v16 = vpop.f32.mrf.mxu1 }
  0xf0   : > { %16778 = vst [vmem:[#allocation18_spill] sm:$0xff] %v11167_v48  ;;  %v11169_v45 = vadd.f32 %v1064_v50, %v1027_v60  ;;  %v960_v0 = vadd.f32 %v11113_v4, %v924_v12  ;;  %16779 = vst [vmem:[#allocation19_spill] sm:$0xff] %v11173_v16 }
  0xf1   : > { %v9234_v1 = vpop.f32.mrf.mxu0  ;;  %v9286_v3 = vpop.f32.mrf.mxu1 }
  0xf2   : > { %v1029_v2 = vadd.f32 %v997_v9, %v960_v0  ;;  %v926_v14 = vmul.f32 %v9234_v1, %v11079_v54  ;;  %v1068_v50 = vmul.f32 %v9286_v3, %v11089_v57  ;;  %v1001_v1 = vmul.f32 %v11097_v61, %v10661_v28  ;;  %v2457_v3 = vld [vmem:[%s16623_s4] sm:$0xff] }
  0xf3   : > { %v11178_v6 = vpop.f32.mrf.mxu0  ;;  %v11184_v12 = vpop.f32.mrf.mxu1 }
  0xf4   : > { %16780 = vst [vmem:[#allocation20_spill] sm:$0xff] %v11178_v6  ;;  %v11180_v46 = vadd.f32 %v1066_v10, %v1029_v2  ;;  %v962_v60 = vadd.f32 %v11084_v56, %v926_v14  ;;  %16782 = vst [vmem:[#allocation22_spill] sm:$0xff] %v11184_v12 }
  0xf5   : > { %v9237_v11 = vpop.f32.mrf.mxu0  ;;  %v9289_v0 = vpop.f32.mrf.mxu1 }
  0xf6   : > { %16781 = vst [vmem:[#allocation21_spill] sm:$0xff] %v11180_v46  ;;  %v1031_v16 = vadd.f32 %v999_v59, %v962_v60  ;;  %v928_v9 = vmul.f32 %v9237_v11, %v11104_v63  ;;  %v1070_v10 = vmul.f32 %v9289_v0, %v11118_v5  ;;  %v2458_v59 = vld [vmem:[%s16623_s4 + $0x8] sm:$0xff] }
  0xf7   : > { %v11189_v48 = vpop.f32.mrf.mxu0  ;;  %v11195_v14 = vpop.f32.mrf.mxu1  ;;  %v11203_v11 = vpack.c.bf16 %v2458_v59, %v2457_v3 }
  0xf8   : > { %16783 = vst [vmem:[#allocation23_spill] sm:$0xff] %v11189_v48  ;;  %v11191_v7 = vadd.f32 %v1068_v50, %v1031_v16  ;;  %v964_v2 = vadd.f32 %v11113_v4, %v928_v9  ;;  %16785 = vst [vmem:[#allocation25_spill] sm:$0xff] %v11195_v14  ;;  %v1003_v9 = vmul.f32 %v11074_v53, %v10675_v30 }
  0xf9   : > { %v9240_v60 = vpop.f32.mrf.mxu0  ;;  %16786 = vst [vmem:[#allocation26_spill] sm:$0xff] %v11203_v11  ;;  %v9292_v50 = vpop.f32.mrf.mxu1  ;;  %9526 = vmatprep.mubr.msk.bf16.mxu0 %vm2469_vm5, %v11203_v11  ;;  %9534 = vmatprep.mubr.msk.bf16.mxu1 %vm2469_vm5, %v11203_v11 }
  0xfa   : > { %16784 = vst [vmem:[#allocation24_spill] sm:$0xff] %v11191_v7  ;;  %v1033_v46 = vadd.f32 %v1001_v1, %v964_v2  ;;  %v930_v16 = vmul.f32 %v9240_v60, %v11079_v54  ;;  %v1072_v48 = vmul.f32 %v9292_v50, %v11089_v57 }
  0xfb   : > { %v11208_v0 = vpop.f32.mrf.mxu0  ;;  %v11214_v7 = vpop.f32.mrf.mxu1 }
  0xfc   : > { %16787 = vst [vmem:[#allocation27_spill] sm:$0xff] %v11208_v0  ;;  %v11210_v14 = vadd.f32 %v1070_v10, %v1033_v46  ;;  %v966_v12 = vadd.f32 %v11084_v56, %v930_v16  ;;  %16789 = vst [vmem:[#allocation29_spill] sm:$0xff] %v11214_v7  ;;  %v1005_v46 = vmul.f32 %v11097_v61, %v10689_v32 }
  0xfd   : > { %v9243_v1 = vpop.f32.mrf.mxu0  ;;  %v9295_v59 = vpop.f32.mrf.mxu1 }
  0xfe   : > { %16788 = vst [vmem:[#allocation28_spill] sm:$0xff] %v11210_v14  ;;  %v1035_v2 = vadd.f32 %v1003_v9, %v966_v12  ;;  %v932_v3 = vmul.f32 %v9243_v1, %v11104_v63  ;;  %v1074_v50 = vmul.f32 %v9295_v59, %v11118_v5  ;;  %v1007_v1 = vmul.f32 %v11074_v53, %v10703_v34 }
  0xff   : > { %v11223_v10 = vpop.f32.mrf.mxu0  ;;  %v11229_v14 = vpop.f32.mrf.mxu1 }
 0x100   : > { %16790 = vst [vmem:[#allocation30_spill] sm:$0xff] %v11223_v10  ;;  %v11225_v60 = vadd.f32 %v1072_v48, %v1035_v2  ;;  %v968_v16 = vadd.f32 %v11113_v4, %v932_v3  ;;  %16792 = vst [vmem:[#allocation32_spill] sm:$0xff] %v11229_v14 }
 0x101   : > { %v9246_v7 = vpop.f32.mrf.mxu0  ;;  %v9298_v9 = vpop.f32.mrf.mxu1 }
 0x102   : > { %16791 = vst [vmem:[#allocation31_spill] sm:$0xff] %v11225_v60  ;;  %v1037_v0 = vadd.f32 %v1005_v46, %v968_v16  ;;  %v934_v12 = vmul.f32 %v9246_v7, %v11079_v54  ;;  %v1076_v2 = vmul.f32 %v9298_v9, %v11089_v57  ;;  %v1009_v7 = vmul.f32 %v11097_v61, %v10717_v36 }
 0x103   : > { %v11234_v11 = vpop.f32.mrf.mxu0  ;;  %v11240_v3 = vpop.f32.mrf.mxu1 }
 0x104   : > { %16793 = vst [vmem:[#allocation33_spill] sm:$0xff] %v11234_v11  ;;  %v11236_v6 = vadd.f32 %v1074_v50, %v1037_v0  ;;  %v970_v48 = vadd.f32 %v11084_v56, %v934_v12  ;;  %16795 = vst [vmem:[#allocation35_spill] sm:$0xff] %v11240_v3 }
 0x105   : > { %v9249_v59 = vpop.f32.mrf.mxu0  ;;  %v9301_v16 = vpop.f32.mrf.mxu1 }
 0x106   : > { %16794 = vst [vmem:[#allocation34_spill] sm:$0xff] %v11236_v6  ;;  %v1039_v14 = vadd.f32 %v1007_v1, %v970_v48  ;;  %v936_v46 = vmul.f32 %v9249_v59, %v11104_v63  ;;  %v1078_v50 = vmul.f32 %v9301_v16, %v11118_v5  ;;  %v1011_v59 = vmul.f32 %v11074_v53, %v10731_v38 }
 0x107   : > { %v11245_v60 = vpop.f32.mrf.mxu0  ;;  %v11251_v12 = vpop.f32.mrf.mxu1 }
 0x108   : > { %16796 = vst [vmem:[#allocation36_spill] sm:$0xff] %v11245_v60  ;;  %v11247_v10 = vadd.f32 %v1076_v2, %v1039_v14  ;;  %v972_v0 = vadd.f32 %v11113_v4, %v936_v46  ;;  %16798 = vst [vmem:[#allocation38_spill] sm:$0xff] %v11251_v12 }
 0x109   : > { %v9252_v9 = vpop.f32.mrf.mxu0  ;;  %v9304_v48 = vpop.f32.mrf.mxu1 }
 0x10a   : > { %16797 = vst [vmem:[#allocation37_spill] sm:$0xff] %v11247_v10  ;;  %v1041_v6 = vadd.f32 %v1009_v7, %v972_v0  ;;  %v938_v1 = vmul.f32 %v9252_v9, %v11079_v54  ;;  %v1080_v2 = vmul.f32 %v9304_v48, %v11089_v57  ;;  %v1013_v9 = vmul.f32 %v11097_v61, %v10745_v40 }
 0x10b   : > { %v11256_v3 = vpop.f32.mrf.mxu0  ;;  %v11262_v46 = vpop.f32.mrf.mxu1 }
 0x10c   : > { %16799 = vst [vmem:[#allocation39_spill] sm:$0xff] %v11256_v3  ;;  %v11258_v11 = vadd.f32 %v1078_v50, %v1041_v6  ;;  %v974_v14 = vadd.f32 %v11084_v56, %v938_v1  ;;  %16801 = vst [vmem:[#allocation41_spill] sm:$0xff] %v11262_v46 }
 0x10d   : > { %v9255_v16 = vpop.f32.mrf.mxu0  ;;  %v9307_v0 = vpop.f32.mrf.mxu1 }
 0x10e   : > { %16800 = vst [vmem:[#allocation40_spill] sm:$0xff] %v11258_v11  ;;  %v1043_v12 = vadd.f32 %v1011_v59, %v974_v14  ;;  %v940_v7 = vmul.f32 %v9255_v16, %v11104_v63  ;;  %v1082_v50 = vmul.f32 %v9307_v0, %v11118_v5  ;;  %v1015_v16 = vmul.f32 %v11074_v53, %v10759_v42  ;;  %v11294_v53 = vld [vmem:[%s16621_s2 + $0x68] sm:$0xff] }
 0x10f   : > { %v11267_v10 = vpop.f32.mrf.mxu0  ;;  %v11273_v1 = vpop.f32.mrf.mxu1 }
 0x110   : > { %16802 = vst [vmem:[#allocation42_spill] sm:$0xff] %v11267_v10  ;;  %v11269_v60 = vadd.f32 %v1080_v2, %v1043_v12  ;;  %v976_v6 = vadd.f32 %v11113_v4, %v940_v7  ;;  %16804 = vst [vmem:[#allocation44_spill] sm:$0xff] %v11273_v1  ;;  %v11413_v1 = vld [vmem:[%s16621_s2] sm:$0xff] }
 0x111   : > { %v9258_v48 = vpop.f32.mrf.mxu0  ;;  %v9310_v14 = vpop.f32.mrf.mxu1 }
 0x112   : > { %16803 = vst [vmem:[#allocation43_spill] sm:$0xff] %v11269_v60  ;;  %v1045_v11 = vadd.f32 %v1013_v9, %v976_v6  ;;  %v942_v59 = vmul.f32 %v9258_v48, %v11079_v54  ;;  %v1084_v2 = vmul.f32 %v9310_v14, %v11089_v57  ;;  %v1017_v54 = vmul.f32 %v11097_v61, %v10773_v44 }
 0x113   : > { %v11278_v46 = vpop.f32.mrf.mxu0  ;;  %v11284_v7 = vpop.f32.mrf.mxu1 }
 0x114   : > { %16805 = vst [vmem:[#allocation45_spill] sm:$0xff] %v11278_v46  ;;  %v11280_v3 = vadd.f32 %v1082_v50, %v1045_v11  ;;  %v978_v12 = vadd.f32 %v11084_v56, %v942_v59  ;;  %16807 = vst [vmem:[#allocation47_spill] sm:$0xff] %v11284_v7  ;;  %v11299_v56 = vld [vmem:[%s16621_s2 + $0x88] sm:$0xff]  ;;  %v11406_v7 = vld [vmem:[%s16621_s2 + $0x90] sm:$0xff] }
 0x115   : > { %v9261_v0 = vpop.f32.mrf.mxu0  ;;  %v9313_v6 = vpop.f32.mrf.mxu1  ;;  %v11310_v59 = vld [vmem:[%s16621_s2 + $0xa8] sm:$0xff] }
 0x116   : > { %16806 = vst [vmem:[#allocation46_spill] sm:$0xff] %v11280_v3  ;;  %v1047_v60 = vadd.f32 %v1015_v16, %v978_v12  ;;  %v944_v9 = vmul.f32 %v9261_v0, %v11104_v63  ;;  %v1086_v11 = vmul.f32 %v9313_v6, %v11118_v5  ;;  %v8091_v6 = vld [vmem:[%s16621_s2 + $0x20] sm:$0xff] }
 0x117   : > { %v11289_v48 = vpop.f32.mrf.mxu0  ;;  %v11305_v50 = vpop.f32.mrf.mxu1 }
 0x118   : > { %16808 = vst [vmem:[#allocation48_spill] sm:$0xff] %v11289_v48  ;;  %v11301_v57 = vadd.f32 %v1084_v2, %v1047_v60  ;;  %v980_v63 = vadd.f32 %v11113_v4, %v944_v9  ;;  %16810 = vst [vmem:[#allocation50_spill] sm:$0xff] %v11305_v50  ;;  %v1656_v60 = vmul.f32 %v11299_v56, %v10573_v18 }
 0x119   : > { %v9320_v61 = vpop.f32.mrf.mxu0  ;;  %v9372_v12 = vpop.f32.mrf.mxu1  ;;  %v11396_v50 = vmul.f32 %v8091_v6, %v10694_v33 }
 0x11a   : > { %16809 = vst [vmem:[#allocation49_spill] sm:$0xff] %v11301_v57  ;;  %v1049_v14 = vadd.f32 %v1017_v54, %v980_v63  ;;  %v1587_v16 = vmul.f32 %v9320_v61, %v11294_v53  ;;  %v1725_v0 = vmul.f32 %v9372_v12, %v11310_v59  ;;  %v8093_v54 = vld [vmem:[%s16621_s2 + $0x30] sm:$0xff] }
 0x11b   : > { %v11315_v2 = vpop.f32.mrf.mxu0  ;;  %v11321_v9 = vpop.f32.mrf.mxu1  ;;  %v11367_v3 = vmul.f32 %v8093_v54, %v10578_v19  ;;  %v11373_v57 = vmul.f32 %v8093_v54, %v10624_v23  ;;  %16822 = vst [vmem:[#allocation62_spill] sm:$0xff] %v11396_v50  ;;  %v11426_v10 = vmul.f32 %v8093_v54, %v10736_v39 }
 0x11c   : > { %16811 = vst [vmem:[#allocation51_spill] sm:$0xff] %v11315_v2  ;;  %v11317_v4 = vadd.f32 %v1086_v11, %v1049_v14  ;;  %v1619_v5 = vadd.f32 %v1587_v16, %v11125_v55  ;;  %16813 = vst [vmem:[#allocation53_spill] sm:$0xff] %v11321_v9  ;;  %v11336_v55 = vld [vmem:[%s16621_s2 + $0xe0] sm:$0xff]  ;;  %v11341_v14 = vmul.f32 %v8091_v6, %v10488_v8 }
 0x11d   : > { %v11329_v63 = vpop.f32.mrf.mxu0  ;;  %v11331_v61 = vpop.f32.mrf.mxu1  ;;  %v11344_v16 = vmul.f32 %v8093_v54, %v10530_v15  ;;  %v11348_v12 = vmul.f32 %v11336_v55, %v11048_v49  ;;  %v11364_v15 = vmul.f32 %v8091_v6, %v10552_v17  ;;  %v11370_v49 = vmul.f32 %v8091_v6, %v10604_v21 }
 0x11e   : > { %16812 = vst [vmem:[#allocation52_spill] sm:$0xff] %v11317_v4  ;;  %16814 = vst [vmem:[#allocation54_spill] sm:$0xff] %v11329_v63  ;;  %v1688_v18 = vadd.f32 %v1656_v60, %v1619_v5  ;;  %v11353_v60 = vld [vmem:[%s16621_s2 + $0xf8] sm:$0xff]  ;;  %v11390_v9 = vmul.f32 %v8091_v6, %v10666_v29  ;;  %v11416_v63 = vmul.f32 %v8093_v54, %v10708_v35 }
 0x11f   : > { %16815 = vst [vmem:[#allocation55_spill] sm:$0xff] %v11331_v61  ;;  %v11338_v11 = vpop.f32.mrf.mxu0  ;;  %16817 = vst [vmem:[#allocation57_spill] sm:$0xff] %v11348_v12  ;;  %v11357_v4 = vpop.f32.mrf.mxu1  ;;  %v11361_v8 = vmul.f32 %v11353_v60, %v11064_v52  ;;  %v11381_v52 = vld [vmem:[%s16621_s2 + $0x80] sm:$0xff]  ;;  %v11393_v61 = vmul.f32 %v8093_v54, %v10680_v31  ;;  %v11419_v2 = vmul.f32 %v8091_v6, %v10722_v37 }
 0x120   : > { %16816 = vst [vmem:[#allocation56_spill] sm:$0xff] %v11338_v11  ;;  %v11355_v5 = vadd.f32 %v1725_v0, %v1688_v18  ;;  %16819 = vst [vmem:[#allocation59_spill] sm:$0xff] %v11357_v4  ;;  %v11376_v0 = vmul.f32 %v8091_v6, %v10638_v25  ;;  %v11387_v4 = vmul.f32 %v8093_v54, %v10652_v27 }
 0x121   : > { %16820 = vst [vmem:[#allocation60_spill] sm:$0xff] %v11361_v8  ;;  %v9326_v12 = vpop.f32.mrf.mxu0  ;;  %v9378_v8 = vpop.f32.mrf.mxu1  ;;  %16821 = vst [vmem:[#allocation61_spill] sm:$0xff] %v11393_v61  ;;  %v11432_v61 = vmul.f32 %v8093_v54, %v10764_v43 }
 0x122   : > { %16818 = vst [vmem:[#allocation58_spill] sm:$0xff] %v11355_v5  ;;  %v1591_v18 = vmul.f32 %v9326_v12, %v11294_v53  ;;  %v1660_v5 = vmul.f32 %v11299_v56, %v10619_v22  ;;  %v11401_v12 = vld [vmem:[%s16621_s2 + $0x98] sm:$0xff]  ;;  %16824 = vst [vmem:[#allocation64_spill] sm:$0xff] %v11416_v63  ;;  %v1729_v46 = vmul.f32 %v9378_v8, %v11310_v59 }
 0x123   : > { %v11408_v11 = vpop.f32.mrf.mxu0  ;;  %16825 = vst [vmem:[#allocation65_spill] sm:$0xff] %v11419_v2  ;;  %v11423_v50 = vpop.f32.mrf.mxu1  ;;  %v11436_v63 = vmul.f32 %v11381_v52, %v10552_v17  ;;  %v11446_v8 = vmul.f32 %v11406_v7, %v10578_v19  ;;  %v913_v17 = vmul.f32 %v11413_v1, %v11099_v62  ;;  %v11465_v19 = vmul.f32 %v11401_v12, %v10633_v24  ;;  %v11476_v62 = vld [vmem:[%s16622_s3] sm:$0xff] }
 0x124   : > { %16823 = vst [vmem:[#allocation63_spill] sm:$0xff] %v11408_v11  ;;  %v1623_v48 = vadd.f32 %v1591_v18, %v11147_v47  ;;  %16826 = vst [vmem:[#allocation66_spill] sm:$0xff] %v11423_v50  ;;  %v11429_v11 = vmul.f32 %v8091_v6, %v10750_v41  ;;  %v11442_v47 = vmul.f32 %v11401_v12, %v10599_v20  ;;  %v11459_v50 = vld [vmem:[%s16621_s2 + $0x10] sm:$0xff] }
 0x125   : > { %v11438_v2 = vpop.f32.mrf.mxu0  ;;  %v11450_v6 = vmul.f32 %v11381_v52, %v10604_v21  ;;  %v11452_v54 = vpop.f32.mrf.mxu1  ;;  %16829 = vst [vmem:[#allocation69_spill] sm:$0xff] %v11465_v19  ;;  %v11469_v21 = vmul.f32 %v11406_v7, %v10624_v23  ;;  %v11488_v23 = vmul.f32 %v11401_v12, %v10661_v28  ;;  %v11496_v19 = vmul.f32 %v11299_v56, %v10675_v30 }
 0x126   : > { %v1692_v18 = vadd.f32 %v1660_v5, %v1623_v48  ;;  %16828 = vst [vmem:[#allocation68_spill] sm:$0xff] %v11452_v54  ;;  %v1664_v48 = vmul.f32 %v11299_v56, %v10647_v26  ;;  %v11492_v26 = vmul.f32 %v11406_v7, %v10652_v27  ;;  %v11508_v28 = vmul.f32 %v11406_v7, %v10680_v31  ;;  %v11525_v31 = vld [vmem:[%s16622_s3 + $0x10] sm:$0xff] }
 0x127   : > { %16827 = vst [vmem:[#allocation67_spill] sm:$0xff] %v11450_v6  ;;  %v11461_v20 = vpop.f32.mrf.mxu0  ;;  %16830 = vst [vmem:[#allocation70_spill] sm:$0xff] %v11469_v21  ;;  %v11480_v54 = vpop.f32.mrf.mxu1  ;;  %v11484_v6 = vmul.f32 %v11381_v52, %v10638_v25  ;;  %v11504_v25 = vmul.f32 %v11401_v12, %v10689_v32  ;;  %v915_v27 = vmul.f32 %v11459_v50, %v11123_v51 }
 0x128   : > { %v11478_v5 = vadd.f32 %v1729_v46, %v1692_v18  ;;  %16832 = vst [vmem:[#allocation72_spill] sm:$0xff] %v11492_v26  ;;  %v11500_v46 = vmul.f32 %v11381_v52, %v10666_v29  ;;  %16835 = vst [vmem:[#allocation75_spill] sm:$0xff] %v11508_v28  ;;  %v11515_v30 = vmul.f32 %v11299_v56, %v10703_v34 }
 0x129   : > { %v9332_v21 = vpop.f32.mrf.mxu0  ;;  %16834 = vst [vmem:[#allocation74_spill] sm:$0xff] %v11504_v25  ;;  %v11519_v29 = vmul.f32 %v11381_v52, %v10694_v33  ;;  %v949_v32 = vadd.f32 %v11476_v62, %v913_v17  ;;  %v11531_v51 = vmul.f32 %v11401_v12, %v10717_v36  ;;  %v11535_v34 = vmul.f32 %v11406_v7, %v10708_v35 }
 0x12a   : > { %16831 = vst [vmem:[#allocation71_spill] sm:$0xff] %v11478_v5  ;;  %16833 = vst [vmem:[#allocation73_spill] sm:$0xff] %v11500_v46  ;;  %v1595_v18 = vmul.f32 %v9332_v21, %v11294_v53  ;;  %v9384_v5 = vpop.f32.mrf.mxu1  ;;  %v11539_v33 = vmul.f32 %v11299_v56, %v10731_v38  ;;  %v917_v17 = vmul.f32 %v11413_v1, %v11134_v58 }
 0x12b   : > { %16836 = vst [vmem:[#allocation76_spill] sm:$0xff] %v11519_v29  ;;  %v11527_v28 = vpop.f32.mrf.mxu0  ;;  %16837 = vst [vmem:[#allocation77_spill] sm:$0xff] %v11531_v51  ;;  %v1733_v29 = vmul.f32 %v9384_v5, %v11310_v59  ;;  %v11549_v36 = vmul.f32 %v11381_v52, %v10722_v37  ;;  %v919_v35 = vmul.f32 %v11459_v50, %v11145_v13  ;;  %v11570_v37 = vld [vmem:[%s16621_s2 + $0xe8] sm:$0xff]  ;;  %v11575_v13 = vld [vmem:[%s16621_s2 + $0x40] sm:$0xff] }
 0x12c   : > { %16838 = vst [vmem:[#allocation78_spill] sm:$0xff] %v11535_v34  ;;  %v1627_v21 = vadd.f32 %v1595_v18, %v11169_v45  ;;  %v11545_v25 = vpop.f32.mrf.mxu1  ;;  %v11557_v38 = vmul.f32 %v11401_v12, %v10745_v40  ;;  %v11561_v45 = vmul.f32 %v11406_v7, %v10736_v39  ;;  %v11565_v58 = vmul.f32 %v11299_v56, %v10759_v42 }
 0x12d   : > { %16839 = vst [vmem:[#allocation79_spill] sm:$0xff] %v11545_v25  ;;  %16840 = vst [vmem:[#allocation80_spill] sm:$0xff] %v11549_v36  ;;  %v11553_v34 = vpop.f32.mrf.mxu0  ;;  %v951_v40 = vadd.f32 %v11525_v31, %v915_v27  ;;  %v11582_v39 = vmul.f32 %v11381_v52, %v10750_v41  ;;  %v11586_v42 = vmul.f32 %v11401_v12, %v10773_v44  ;;  %v16847_v27 = vld [vmem:[#allocation7_spill] sm:$0xff]  ;;  %v11604_v41 = vld [vmem:[%s16621_s2 + $0x50] sm:$0xff] }
 0x12e   : > { %16841 = vst [vmem:[#allocation81_spill] sm:$0xff] %v11557_v38  ;;  %16842 = vst [vmem:[#allocation82_spill] sm:$0xff] %v11561_v45  ;;  %v1696_v5 = vadd.f32 %v1664_v48, %v1627_v21  ;;  %v11578_v18 = vpop.f32.mrf.mxu1  ;;  %v1018_v45 = vadd.f32 %v11341_v14, %v949_v32  ;;  %v16845_v38 = vld [vmem:[#allocation15_spill] sm:$0xff]  ;;  %v11595_v48 = vmul.f32 %v11406_v7, %v10764_v43  ;;  %v16855_v25 = vld [vmem:[#allocation8_spill] sm:$0xff] }
 0x12f   : > { %16843 = vst [vmem:[#allocation83_spill] sm:$0xff] %v11582_v39  ;;  %16844 = vst [vmem:[#allocation84_spill] sm:$0xff] %v11586_v42  ;;  %v921_v36 = vmul.f32 %v11413_v1, %v16845_v38  ;;  %v11591_v51 = vpop.f32.mrf.mxu0  ;;  %v11599_v21 = vmul.f32 %v11299_v56, %v16847_v27  ;;  %v953_v44 = vadd.f32 %v11476_v62, %v917_v17  ;;  %v16850_v38 = vld [vmem:[#allocation6_spill] sm:$0xff] }
 0x130   : > { %16846 = vst [vmem:[#allocation15_spill] sm:$0xff] %v11595_v48  ;;  %v11607_v14 = vadd.f32 %v1733_v29, %v1696_v5  ;;  %v11609_v32 = vpop.f32.mrf.mxu1  ;;  %v11613_v43 = vmul.f32 %v11381_v52, %v16850_v38  ;;  %v16852_v48 = vld [vmem:[#allocation9_spill] sm:$0xff]  ;;  %v16854_v42 = vld [vmem:[#allocation10_spill] sm:$0xff]  ;;  %v955_v46 = vadd.f32 %v11525_v31, %v919_v35  ;;  %v11624_v29 = vmul.f32 %v11406_v7, %v16855_v25  ;;  %v11633_v52 = vld [vmem:[%s16621_s2 + $0xf0] sm:$0xff] }
 0x131   : > { %16849 = vst [vmem:[#allocation85_spill] sm:$0xff] %v11609_v32  ;;  %v11617_v56 = vmul.f32 %v11401_v12, %v16852_v48  ;;  %v1055_v39 = vmul.f32 %v11575_v13, %v16854_v42  ;;  %v9338_v26 = vpop.f32.mrf.mxu0  ;;  %v11628_v17 = vmul.f32 %v11570_v37, %v10619_v22  ;;  %v1020_v12 = vadd.f32 %v11344_v16, %v951_v40  ;;  %v16858_v5 = vld [vmem:[#allocation18_spill] sm:$0xff] }
 0x132   : > { %16848 = vst [vmem:[#allocation7_spill] sm:$0xff] %v11607_v14  ;;  %16851 = vst [vmem:[#allocation6_spill] sm:$0xff] %v11613_v43  ;;  %v923_v42 = vmul.f32 %v11459_v50, %v16858_v5  ;;  %v1599_v35 = vmul.f32 %v9338_v26, %v11294_v53  ;;  %v10324_v7 = vld [vmem:[%s10485_s28 + $0x40] sm:$0xff]  ;;  %v957_v14 = vadd.f32 %v11476_v62, %v921_v36  ;;  %v16862_v5 = vld [vmem:[#allocation20_spill] sm:$0xff] }
 0x133   : > { %16853 = vst [vmem:[#allocation9_spill] sm:$0xff] %v11617_v56  ;;  %16856 = vst [vmem:[#allocation10_spill] sm:$0xff] %v11624_v29  ;;  %v9390_v56 = vpop.f32.mrf.mxu1  ;;  %v11641_v25 = vmul.f32 %v10324_v7, %v11336_v55  ;;  %v11643_v22 = vadd.f32 %v1055_v39, %v1018_v45  ;;  %v16860_v29 = vld [vmem:[#allocation11_spill] sm:$0xff]  ;;  %v11648_v16 = vpop.f32.mrf.mxu0  ;;  %v11652_v40 = vmul.f32 %v11353_v60, %v10633_v24 }
 0x134   : > { %16857 = vst [vmem:[#allocation8_spill] sm:$0xff] %v11628_v17  ;;  %v1057_v43 = vmul.f32 %v11604_v41, %v16860_v29  ;;  %v1022_v26 = vadd.f32 %v11364_v15, %v953_v44  ;;  %v925_v7 = vmul.f32 %v11413_v1, %v16862_v5  ;;  %v1737_v45 = vmul.f32 %v9390_v56, %v11310_v59  ;;  %v16865_v29 = vld [vmem:[#allocation13_spill] sm:$0xff]  ;;  %v10326_v44 = vld [vmem:[%s10485_s28 + $0x68] sm:$0xff] }
 0x135   : > { %16859 = vst [vmem:[#allocation18_spill] sm:$0xff] %v11641_v25  ;;  %16861 = vst [vmem:[#allocation11_spill] sm:$0xff] %v11652_v40  ;;  %v16863_v25 = vld [vmem:[#allocation24_spill] sm:$0xff]  ;;  %v11659_v39 = vpop.f32.mrf.mxu1  ;;  %v1059_v36 = vmul.f32 %v11575_v13, %v16865_v29  ;;  %v1024_v32 = vadd.f32 %v11367_v3, %v955_v46  ;;  %v11664_v24 = vpop.f32.mrf.mxu0  ;;  %v16869_v5 = vld [vmem:[#allocation23_spill] sm:$0xff] }
 0x136   : > { %v1631_v17 = vadd.f32 %v1599_v35, %v16863_v25  ;;  %16864 = vst [vmem:[#allocation20_spill] sm:$0xff] %v11659_v39  ;;  %16866 = vst [vmem:[#allocation24_spill] sm:$0xff] %v11664_v24  ;;  %v10325_v40 = vld [vmem:[%s10485_s28 + $0x50] sm:$0xff]  ;;  %v11672_v35 = vmul.f32 %v10326_v44, %v11570_v37  ;;  %v11674_v56 = vadd.f32 %v1057_v43, %v1020_v12  ;;  %v16871_v39 = vld [vmem:[#allocation14_spill] sm:$0xff] }
 0x137   : > { %v11668_v15 = vmul.f32 %v10325_v40, %v11633_v52  ;;  %v959_v25 = vadd.f32 %v11525_v31, %v923_v42  ;;  %v927_v29 = vmul.f32 %v11459_v50, %v16869_v5  ;;  %v11680_v46 = vpop.f32.mrf.mxu1  ;;  %v1061_v40 = vmul.f32 %v11604_v41, %v16871_v39  ;;  %v11685_v44 = vpop.f32.mrf.mxu0  ;;  %v10327_v43 = vld [vmem:[%s10485_s28 + $0x60] sm:$0xff]  ;;  %v10328_v42 = vld [vmem:[%s10485_s28 + $0x78] sm:$0xff] }
 0x138   : > { %16868 = vst [vmem:[#allocation86_spill] sm:$0xff] %v11672_v35  ;;  %v1700_v3 = vadd.f32 %v11496_v19, %v1631_v17  ;;  %16870 = vst [vmem:[#allocation23_spill] sm:$0xff] %v11680_v46  ;;  %v11689_v12 = vmul.f32 %v10327_v43, %v11336_v55  ;;  %v11693_v35 = vmul.f32 %v10328_v42, %v11353_v60  ;;  %v16878_v43 = vld [vmem:[#allocation17_spill] sm:$0xff] }
 0x139   : > { %16867 = vst [vmem:[#allocation13_spill] sm:$0xff] %v11668_v15  ;;  %v1026_v15 = vadd.f32 %v11370_v49, %v957_v14  ;;  %16872 = vst [vmem:[#allocation14_spill] sm:$0xff] %v11685_v44  ;;  %v11695_v5 = vadd.f32 %v1059_v36, %v1022_v26  ;;  %v961_v19 = vadd.f32 %v11476_v62, %v925_v7  ;;  %v11700_v39 = vpop.f32.mrf.mxu1  ;;  %v10329_v49 = vld [vmem:[%s10485_s28 + $0x70] sm:$0xff]  ;;  %v9344_v36 = vpop.f32.mrf.mxu0  ;;  %v10330_v7 = vld [vmem:[%s10485_s28 + $0x88] sm:$0xff] }
 0x13a   : > { %16873 = vst [vmem:[#allocation87_spill] sm:$0xff] %v11689_v12  ;;  %16874 = vst [vmem:[#allocation88_spill] sm:$0xff] %v11693_v35  ;;  %v11698_v17 = vadd.f32 %v1737_v45, %v1700_v3  ;;  %v11704_v14 = vmul.f32 %v10329_v49, %v11633_v52  ;;  %v11706_v46 = vadd.f32 %v1061_v40, %v1024_v32  ;;  %v16879_v35 = vld [vmem:[#allocation27_spill] sm:$0xff]  ;;  %v16881_v49 = vld [vmem:[#allocation30_spill] sm:$0xff] }
 0x13b   : > { %16876 = vst [vmem:[#allocation90_spill] sm:$0xff] %v11700_v39  ;;  %v1063_v42 = vmul.f32 %v11575_v13, %v16878_v43  ;;  %v929_v26 = vmul.f32 %v11413_v1, %v16879_v35  ;;  %v11714_v45 = vmul.f32 %v10330_v7, %v11570_v37  ;;  %v1028_v3 = vadd.f32 %v11373_v57, %v959_v25  ;;  %v16882_v12 = vld [vmem:[#allocation19_spill] sm:$0xff]  ;;  %v11725_v39 = vpop.f32.mrf.mxu0  ;;  %v10331_v7 = vld [vmem:[%s10485_s28 + $0x80] sm:$0xff]  ;;  %v10332_v25 = vld [vmem:[%s10485_s28 + $0x98] sm:$0xff] }
 0x13c   : > { %16875 = vst [vmem:[#allocation89_spill] sm:$0xff] %v11698_v17  ;;  %16877 = vst [vmem:[#allocation91_spill] sm:$0xff] %v11704_v14  ;;  %v963_v17 = vadd.f32 %v11525_v31, %v927_v29  ;;  %v931_v32 = vmul.f32 %v11459_v50, %v16881_v49  ;;  %v1603_v40 = vmul.f32 %v9344_v36, %v11294_v53  ;;  %v9396_v14 = vpop.f32.mrf.mxu1  ;;  %v16886_v49 = vld [vmem:[#allocation33_spill] sm:$0xff] }
 0x13d   : > { %16880 = vst [vmem:[#allocation17_spill] sm:$0xff] %v11714_v45  ;;  %v11721_v43 = vadd.f32 %v1063_v42, %v1026_v15  ;;  %v1065_v35 = vmul.f32 %v11604_v41, %v16882_v12  ;;  %16883 = vst [vmem:[#allocation27_spill] sm:$0xff] %v11725_v39  ;;  %v11729_v57 = vmul.f32 %v10331_v7, %v11336_v55  ;;  %v16887_v42 = vld [vmem:[#allocation31_spill] sm:$0xff]  ;;  %v16889_v39 = vld [vmem:[#allocation22_spill] sm:$0xff] }
 0x13e   : > { %v11733_v29 = vmul.f32 %v10332_v25, %v11353_v60  ;;  %v1030_v36 = vadd.f32 %v11376_v0, %v961_v19  ;;  %v933_v15 = vmul.f32 %v11413_v1, %v16886_v49  ;;  %v1635_v45 = vadd.f32 %v1603_v40, %v16887_v42  ;;  %v11740_v44 = vpop.f32.mrf.mxu1  ;;  %v10333_v25 = vld [vmem:[%s10485_s28 + $0x90] sm:$0xff]  ;;  %v10334_v19 = vld [vmem:[%s10485_s28 + $0xa8] sm:$0xff] }
 0x13f   : > { %16884 = vst [vmem:[#allocation30_spill] sm:$0xff] %v11729_v57  ;;  %v1741_v12 = vmul.f32 %v9396_v14, %v11310_v59  ;;  %16888 = vst [vmem:[#allocation33_spill] sm:$0xff] %v11740_v44  ;;  %v1067_v24 = vmul.f32 %v11575_v13, %v16889_v39  ;;  %v965_v7 = vadd.f32 %v11476_v62, %v929_v26  ;;  %v11745_v57 = vpop.f32.mrf.mxu0 }
 0x140   : > { %16885 = vst [vmem:[#allocation19_spill] sm:$0xff] %v11733_v29  ;;  %16890 = vst [vmem:[#allocation31_spill] sm:$0xff] %v11745_v57  ;;  %v11749_v0 = vmul.f32 %v10333_v25, %v11633_v52  ;;  %v11753_v40 = vmul.f32 %v10334_v19, %v11570_v37  ;;  %v11755_v14 = vadd.f32 %v1065_v35, %v1028_v3  ;;  %v11760_v42 = vpop.f32.mrf.mxu1  ;;  %v2459_v25 = vld [vmem:[%s16623_s4 + $0x10] sm:$0xff]  ;;  %v2460_v19 = vld [vmem:[%s16623_s4 + $0x18] sm:$0xff] }
 0x141   : > { %v1032_v49 = vadd.f32 %v11387_v4, %v963_v17  ;;  %v967_v39 = vadd.f32 %v11525_v31, %v931_v32  ;;  %v1704_v26 = vadd.f32 %v11515_v30, %v1635_v45  ;;  %16893 = vst [vmem:[#allocation93_spill] sm:$0xff] %v11760_v42  ;;  %v16895_v35 = vld [vmem:[#allocation36_spill] sm:$0xff]  ;;  %v11772_v17 = vpop.f32.mrf.mxu0  ;;  %v10335_v32 = vld [vmem:[%s10485_s28 + $0xa0] sm:$0xff]  ;;  %v10336_v45 = vld [vmem:[%s10485_s28 + $0xb8] sm:$0xff]  ;;  %v11782_v29 = vadd.f32 %v1067_v24, %v1030_v36 }
 0x142   : > { %16891 = vst [vmem:[#allocation22_spill] sm:$0xff] %v11749_v0  ;;  %16892 = vst [vmem:[#allocation92_spill] sm:$0xff] %v11753_v40  ;;  %v16894_v40 = vld [vmem:[#allocation25_spill] sm:$0xff]  ;;  %v935_v4 = vmul.f32 %v11459_v50, %v16895_v35  ;;  %v11776_v30 = vmul.f32 %v10335_v32, %v11336_v55  ;;  %v11780_v0 = vmul.f32 %v10336_v45, %v11353_v60  ;;  %v10337_v35 = vld [vmem:[%s10485_s28 + $0xb0] sm:$0xff] }
 0x143   : > { %v1069_v3 = vmul.f32 %v11604_v41, %v16894_v40  ;;  %16896 = vst [vmem:[#allocation25_spill] sm:$0xff] %v11772_v17  ;;  %v969_v42 = vadd.f32 %v11476_v62, %v933_v15  ;;  %v11785_v44 = vadd.f32 %v1741_v12, %v1704_v26  ;;  %v11787_v40 = vpop.f32.mrf.mxu1  ;;  %v11791_v17 = vmul.f32 %v10337_v35, %v11633_v52  ;;  %v9350_v36 = vpop.f32.mrf.mxu0  ;;  %v16906_v12 = vld [vmem:[#allocation61_spill] sm:$0xff] }
 0x144   : > { %16897 = vst [vmem:[#allocation36_spill] sm:$0xff] %v11776_v30  ;;  %16898 = vst [vmem:[#allocation94_spill] sm:$0xff] %v11780_v0  ;;  %v1034_v32 = vadd.f32 %v11390_v9, %v965_v7  ;;  %v16902_v30 = vld [vmem:[#allocation29_spill] sm:$0xff]  ;;  %v16903_v0 = vld [vmem:[#allocation39_spill] sm:$0xff]  ;;  %v11798_v57 = vpack.c.bf16 %v2460_v19, %v2459_v25  ;;  %v1036_v26 = vadd.f32 %v16906_v12, %v967_v39 }
 0x145   : > { %16899 = vst [vmem:[#allocation95_spill] sm:$0xff] %v11785_v44  ;;  %16900 = vst [vmem:[#allocation96_spill] sm:$0xff] %v11787_v40  ;;  %v1071_v45 = vmul.f32 %v11575_v13, %v16902_v30  ;;  %v937_v24 = vmul.f32 %v11413_v1, %v16903_v0  ;;  %v11800_v15 = vadd.f32 %v1069_v3, %v1032_v49  ;;  %v9402_v44 = vpop.f32.mrf.mxu1  ;;  %v16908_v7 = vld [vmem:[#allocation32_spill] sm:$0xff]  ;;  %v16909_v25 = vld [vmem:[#allocation42_spill] sm:$0xff]  ;;  %v11813_v19 = vpop.f32.mrf.mxu0 }
 0x146   : > { %16901 = vst [vmem:[#allocation97_spill] sm:$0xff] %v11791_v17  ;;  %16904 = vst [vmem:[#allocation29_spill] sm:$0xff] %v11798_v57  ;;  %v1607_v35 = vmul.f32 %v9350_v36, %v11294_v53  ;;  %v10338_v17 = vld [vmem:[%s10485_s28 + $0xc8] sm:$0xff]  ;;  %v1073_v30 = vmul.f32 %v11604_v41, %v16908_v7  ;;  %v971_v0 = vadd.f32 %v11525_v31, %v935_v4  ;;  %v10339_v3 = vld [vmem:[%s10485_s28 + $0xc0] sm:$0xff] }
 0x147   : > { %16905 = vst [vmem:[#allocation39_spill] sm:$0xff] %v11800_v15  ;;  %v11806_v9 = vmul.f32 %v10338_v17, %v11570_v37  ;;  %v939_v49 = vmul.f32 %v11459_v50, %v16909_v25  ;;  %16910 = vst [vmem:[#allocation32_spill] sm:$0xff] %v11813_v19  ;;  %v11817_v39 = vmul.f32 %v10339_v3, %v11336_v55  ;;  %v16912_v36 = vld [vmem:[#allocation62_spill] sm:$0xff]  ;;  %v16913_v57 = vld [vmem:[#allocation37_spill] sm:$0xff]  ;;  %v11822_v7 = vpop.f32.mrf.mxu1 }
 0x148   : > { %v1038_v12 = vadd.f32 %v16912_v36, %v969_v42  ;;  %v1639_v17 = vadd.f32 %v1607_v35, %v16913_v57  ;;  %16914 = vst [vmem:[#allocation62_spill] sm:$0xff] %v11822_v7  ;;  %v10340_v40 = vld [vmem:[%s10485_s28 + $0xd8] sm:$0xff]  ;;  %v11828_v25 = vadd.f32 %v1071_v45, %v1034_v32  ;;  %v973_v19 = vadd.f32 %v11476_v62, %v937_v24  ;;  %v11833_v42 = vpop.f32.mrf.mxu0  ;;  %v10341_v57 = vld [vmem:[%s10485_s28 + $0xd0] sm:$0xff]  ;;  %v16919_v36 = vld [vmem:[#allocation35_spill] sm:$0xff] }
 0x149   : > { %16907 = vst [vmem:[#allocation61_spill] sm:$0xff] %v11806_v9  ;;  %16911 = vst [vmem:[#allocation42_spill] sm:$0xff] %v11817_v39  ;;  %v1745_v9 = vmul.f32 %v9402_v44, %v11310_v59  ;;  %v11826_v4 = vmul.f32 %v10340_v40, %v11353_v60  ;;  %v16916_v15 = vld [vmem:[#allocation45_spill] sm:$0xff]  ;;  %v11837_v35 = vmul.f32 %v10341_v57, %v11633_v52  ;;  %v11846_v32 = vld [vmem:[%s16621_s2 + $0x60] sm:$0xff]  ;;  %v11849_v45 = vpop.f32.mrf.mxu1 }
 0x14a   : > { %v941_v3 = vmul.f32 %v11413_v1, %v16916_v15  ;;  %16917 = vst [vmem:[#allocation45_spill] sm:$0xff] %v11833_v42  ;;  %v11839_v44 = vadd.f32 %v1073_v30, %v1036_v26  ;;  %v1075_v40 = vmul.f32 %v11575_v13, %v16919_v36  ;;  %v1708_v1 = vadd.f32 %v11539_v33, %v1639_v17  ;;  %v10342_v24 = vld [vmem:[%s10485_s28 + $0xe8] sm:$0xff]  ;;  %v16922_v26 = vld [vmem:[#allocation64_spill] sm:$0xff]  ;;  %v16923_v57 = vld [vmem:[#allocation38_spill] sm:$0xff]  ;;  %v11864_v33 = vpop.f32.mrf.mxu0 }
 0x14b   : > { %16915 = vst [vmem:[#allocation37_spill] sm:$0xff] %v11826_v4  ;;  %16918 = vst [vmem:[#allocation98_spill] sm:$0xff] %v11837_v35  ;;  %v11853_v15 = vmul.f32 %v10342_v24, %v11570_v37  ;;  %v1040_v30 = vadd.f32 %v16922_v26, %v971_v0  ;;  %v1077_v36 = vmul.f32 %v11604_v41, %v16923_v57  ;;  %v11862_v4 = vld [vmem:[%s16621_s2 + $0x78] sm:$0xff]  ;;  %v10343_v17 = vld [vmem:[%s10485_s28 + $0xe0] sm:$0xff]  ;;  %v11874_v0 = vpop.f32.mrf.mxu1 }
 0x14c   : > { %16920 = vst [vmem:[#allocation35_spill] sm:$0xff] %v11849_v45  ;;  %v975_v35 = vadd.f32 %v11525_v31, %v939_v49  ;;  %16924 = vst [vmem:[#allocation64_spill] sm:$0xff] %v11864_v33  ;;  %v11868_v39 = vmul.f32 %v10343_v17, %v11336_v55  ;;  %v11870_v24 = vadd.f32 %v1075_v40, %v1038_v12  ;;  %v10344_v26 = vld [vmem:[%s10485_s28 + $0xf8] sm:$0xff]  ;;  %v10345_v57 = vld [vmem:[%s10485_s28 + $0xf0] sm:$0xff] }
 0x14d   : > { %16921 = vst [vmem:[#allocation99_spill] sm:$0xff] %v11853_v15  ;;  %v11872_v15 = vadd.f32 %v1745_v9, %v1708_v1  ;;  %16927 = vst [vmem:[#allocation101_spill] sm:$0xff] %v11874_v0  ;;  %v11878_v49 = vmul.f32 %v10344_v26, %v11353_v60  ;;  %v11882_v45 = vmul.f32 %v10345_v57, %v11633_v52  ;;  %v16930_v7 = vld [vmem:[#allocation65_spill] sm:$0xff]  ;;  %v16931_v17 = vld [vmem:[#allocation48_spill] sm:$0xff]  ;;  %v9356_v26 = vpop.f32.mrf.mxu0 }
 0x14e   : > { %16925 = vst [vmem:[#allocation38_spill] sm:$0xff] %v11868_v39  ;;  %v1042_v33 = vadd.f32 %v16930_v7, %v973_v19  ;;  %v977_v42 = vadd.f32 %v11476_v62, %v941_v3  ;;  %v943_v12 = vmul.f32 %v11459_v50, %v16931_v17  ;;  %v16932_v40 = vld [vmem:[#allocation51_spill] sm:$0xff]  ;;  %v11893_v1 = vld [vmem:[%s16621_s2 + $0x70] sm:$0xff]  ;;  %v1611_v62 = vmul.f32 %v9356_v26, %v11294_v53  ;;  %v9408_v7 = vpop.f32.mrf.mxu1 }
 0x14f   : > { %16926 = vst [vmem:[#allocation100_spill] sm:$0xff] %v11872_v15  ;;  %16928 = vst [vmem:[#allocation102_spill] sm:$0xff] %v11878_v49  ;;  %v1586_v9 = vmul.f32 %v11846_v32, %v16932_v40  ;;  %v16933_v49 = vld [vmem:[#allocation41_spill] sm:$0xff]  ;;  %v11902_v50 = vmul.f32 %v11570_v37, %v16847_v27  ;;  %v11904_v3 = vadd.f32 %v1077_v36, %v1040_v30  ;;  %v16936_v40 = vld [vmem:[#allocation44_spill] sm:$0xff]  ;;  %v11909_v15 = vpop.f32.mrf.mxu0 }
 0x150   : > { %16929 = vst [vmem:[#allocation103_spill] sm:$0xff] %v11882_v45  ;;  %v1079_v57 = vmul.f32 %v11575_v13, %v16933_v49  ;;  %v16934_v45 = vld [vmem:[#allocation54_spill] sm:$0xff]  ;;  %v1044_v17 = vadd.f32 %v11426_v10, %v975_v35  ;;  %v1081_v39 = vmul.f32 %v11604_v41, %v16936_v40  ;;  %v16938_v49 = vld [vmem:[#allocation56_spill] sm:$0xff]  ;;  %v16939_v0 = vld [vmem:[#allocation43_spill] sm:$0xff]  ;;  %v1749_v27 = vmul.f32 %v9408_v7, %v11310_v59  ;;  %v11919_v30 = vpop.f32.mrf.mxu1 }
 0x151   : > { %v1589_v19 = vmul.f32 %v16934_v45, %v11862_v4  ;;  %16935 = vst [vmem:[#allocation65_spill] sm:$0xff] %v11902_v50  ;;  %v11913_v45 = vmul.f32 %v11336_v55, %v16850_v38  ;;  %v1588_v26 = vmul.f32 %v11893_v1, %v16938_v49  ;;  %v1643_v37 = vadd.f32 %v1611_v62, %v16939_v0  ;;  %v11930_v40 = vpop.f32.mrf.mxu0  ;;  %v16941_v49 = vld [vmem:[#allocation47_spill] sm:$0xff]  ;;  %v16942_v62 = vld [vmem:[#allocation12_spill] sm:$0xff] }
 0x152   : > { %v11923_v10 = vmul.f32 %v11353_v60, %v16852_v48  ;;  %v11925_v35 = vadd.f32 %v1079_v57, %v1042_v33  ;;  %v1046_v36 = vadd.f32 %v11429_v11, %v977_v42  ;;  %v979_v55 = vadd.f32 %v11525_v31, %v943_v12  ;;  %v10346_v60 = vld [vmem:[%s10485_s28 + $0x110] sm:$0xff]  ;;  %v11947_v31 = vld [vmem:[%s16621_s2 + $0xb8] sm:$0xff]  ;;  %v11962_v12 = vld [vmem:[%s16621_s2 + $0xa0] sm:$0xff] }
 0x153   : > { %16937 = vst [vmem:[#allocation48_spill] sm:$0xff] %v11913_v45  ;;  %v1618_v38 = vadd.f32 %v1586_v9, %v11643_v22  ;;  %v1083_v0 = vmul.f32 %v11575_v13, %v16941_v49  ;;  %v1621_v7 = vadd.f32 %v1589_v19, %v16942_v62  ;;  %v1712_v50 = vadd.f32 %v11565_v58, %v1643_v37  ;;  %v11936_v45 = vpop.f32.mrf.mxu1  ;;  %v16944_v22 = vld [vmem:[#allocation63_spill] sm:$0xff]  ;;  %v11955_v33 = vpop.f32.mrf.mxu0 }
 0x154   : > { %16940 = vst [vmem:[#allocation51_spill] sm:$0xff] %v11923_v10  ;;  %v11940_v48 = vmul.f32 %v10346_v60, %v11633_v52  ;;  %v11942_v11 = vadd.f32 %v1081_v39, %v1044_v17  ;;  %v1590_v13 = vmul.f32 %v11846_v32, %v16944_v22  ;;  %v1593_v42 = vmul.f32 %v11438_v2, %v11862_v4  ;;  %v16945_v52 = vld [vmem:[#allocation50_spill] sm:$0xff]  ;;  %v16953_v22 = vld [vmem:[#allocation49_spill] sm:$0xff]  ;;  %v16980_v10 = vld [vmem:[#allocation8_spill] sm:$0xff] }
 0x155   : > { %v1592_v58 = vmul.f32 %v11893_v1, %v11461_v20  ;;  %v1085_v39 = vmul.f32 %v11604_v41, %v16945_v52  ;;  %v1620_v9 = vadd.f32 %v1588_v26, %v11674_v56  ;;  %v1594_v57 = vmul.f32 %v11846_v32, %v11527_v28  ;;  %v11969_v2 = vpop.f32.mrf.mxu1  ;;  %v9362_v49 = vpop.f32.mrf.mxu0  ;;  %v16949_v56 = vld [vmem:[#allocation55_spill] sm:$0xff]  ;;  %v11983_v28 = vld [vmem:[%s16621_s2 + $0xb0] sm:$0xff] }
 0x156   : > { %16943 = vst [vmem:[#allocation41_spill] sm:$0xff] %v11940_v48  ;;  %v11967_v19 = vadd.f32 %v1749_v27, %v1712_v50  ;;  %16947 = vst [vmem:[#allocation44_spill] sm:$0xff] %v11969_v2  ;;  %v11971_v20 = vadd.f32 %v1083_v0, %v1046_v36  ;;  %v1048_v17 = vadd.f32 %v11432_v61, %v979_v55  ;;  %v16950_v27 = vld [vmem:[#allocation53_spill] sm:$0xff] }
 0x157   : > { %v1687_v41 = vadd.f32 %v11436_v63, %v1618_v38  ;;  %v1597_v37 = vmul.f32 %v11553_v34, %v11862_v4  ;;  %v1690_v62 = vadd.f32 %v11442_v47, %v1621_v7  ;;  %v1727_v26 = vmul.f32 %v16949_v56, %v11947_v31  ;;  %v9414_v63 = vpop.f32.mrf.mxu1  ;;  %v16951_v47 = vld [vmem:[#allocation16_spill] sm:$0xff]  ;;  %v11993_v0 = vpop.f32.mrf.mxu0 }
 0x158   : > { %16946 = vst [vmem:[#allocation54_spill] sm:$0xff] %v11967_v19  ;;  %16948 = vst [vmem:[#allocation56_spill] sm:$0xff] %v11971_v20  ;;  %v1596_v50 = vmul.f32 %v11893_v1, %v11591_v51  ;;  %v1615_v61 = vmul.f32 %v9362_v49, %v11294_v53  ;;  %v1724_v34 = vmul.f32 %v11962_v12, %v16950_v27 }
 0x159   : > { %v1622_v36 = vadd.f32 %v1590_v13, %v11695_v5  ;;  %v1625_v55 = vadd.f32 %v1593_v42, %v16951_v47  ;;  %v1624_v38 = vadd.f32 %v1592_v58, %v11706_v46  ;;  %16952 = vst [vmem:[#allocation43_spill] sm:$0xff] %v11993_v0  ;;  %v1689_v7 = vadd.f32 %v11446_v8, %v1620_v9  ;;  %v11999_v52 = vpop.f32.mrf.mxu1  ;;  %v16956_v5 = vld [vmem:[#allocation59_spill] sm:$0xff]  ;;  %v16957_v42 = vld [vmem:[#allocation21_spill] sm:$0xff]  ;;  %v12006_v58 = vpop.f32.mrf.mxu0 }
 0x15a   : > { %v1626_v60 = vadd.f32 %v1594_v57, %v11721_v43  ;;  %v1647_v51 = vadd.f32 %v1615_v61, %v16953_v22  ;;  %v1753_v53 = vmul.f32 %v9414_v63, %v11310_v59  ;;  %16954 = vst [vmem:[#allocation47_spill] sm:$0xff] %v11999_v52  ;;  %v12001_v49 = vadd.f32 %v1085_v39, %v1048_v17  ;;  %v16960_v39 = vld [vmem:[#allocation67_spill] sm:$0xff]  ;;  %v16961_v17 = vld [vmem:[#allocation69_spill] sm:$0xff]  ;;  %v16962_v61 = vld [vmem:[#allocation68_spill] sm:$0xff] }
 0x15b   : > { %v1756_v56 = vadd.f32 %v1724_v34, %v1687_v41  ;;  %v1726_v13 = vmul.f32 %v11983_v28, %v16956_v5  ;;  %v1629_v46 = vadd.f32 %v1597_v37, %v16957_v42  ;;  %16958 = vst [vmem:[#allocation63_spill] sm:$0xff] %v12006_v58  ;;  %v1759_v27 = vadd.f32 %v1727_v26, %v1690_v62  ;;  %v12012_v9 = vpop.f32.mrf.mxu1  ;;  %v16963_v37 = vld [vmem:[#allocation70_spill] sm:$0xff]  ;;  %v12019_v47 = vpop.f32.mrf.mxu0  ;;  %v16988_v0 = vld [vmem:[#allocation13_spill] sm:$0xff] }
 0x15c   : > { %16955 = vst [vmem:[#allocation12_spill] sm:$0xff] %v12001_v49  ;;  %v1628_v8 = vadd.f32 %v1596_v50, %v11755_v14  ;;  %v1598_v43 = vmul.f32 %v11846_v32, %v11648_v16  ;;  %v1716_v59 = vadd.f32 %v11599_v21, %v1647_v51  ;;  %16959 = vst [vmem:[#allocation50_spill] sm:$0xff] %v12012_v9  ;;  %v12024_v14 = vld [vmem:[%s16621_s2 + $0xc8] sm:$0xff]  ;;  %v16965_v21 = vld [vmem:[#allocation66_spill] sm:$0xff] }
 0x15d   : > { %v1691_v57 = vadd.f32 %v16960_v39, %v1622_v36  ;;  %v1694_v41 = vadd.f32 %v16961_v17, %v1625_v55  ;;  %v1731_v63 = vmul.f32 %v16962_v61, %v11947_v31  ;;  %v1693_v34 = vadd.f32 %v16963_v37, %v1624_v38  ;;  %16964 = vst [vmem:[#allocation55_spill] sm:$0xff] %v12019_v47  ;;  %v12031_v36 = vpop.f32.mrf.mxu1  ;;  %v16968_v51 = vld [vmem:[#allocation24_spill] sm:$0xff]  ;;  %v9424_v5 = vpop.f32.mrf.mxu0  ;;  %v16971_v17 = vld [vmem:[#allocation14_spill] sm:$0xff] }
 0x15e   : > { %v1758_v16 = vadd.f32 %v1726_v13, %v1689_v7  ;;  %v1728_v62 = vmul.f32 %v11962_v12, %v16965_v21  ;;  %v1695_v26 = vadd.f32 %v11484_v6, %v1626_v60  ;;  %v12029_v50 = vadd.f32 %v1753_v53, %v1716_v59  ;;  %16967 = vst [vmem:[#allocation16_spill] sm:$0xff] %v12031_v36  ;;  %v12043_v6 = vld [vmem:[%s16621_s2 + $0xc0] sm:$0xff]  ;;  %v16969_v60 = vld [vmem:[#allocation79_spill] sm:$0xff]  ;;  %v16970_v13 = vld [vmem:[#allocation72_spill] sm:$0xff] }
 0x15f   : > { %v1730_v55 = vmul.f32 %v11983_v28, %v11480_v54  ;;  %v1698_v38 = vadd.f32 %v11488_v23, %v1629_v46  ;;  %v1735_v22 = vmul.f32 %v11578_v18, %v11947_v31  ;;  %v1601_v7 = vmul.f32 %v16968_v51, %v11862_v4  ;;  %v9476_v46 = vpop.f32.mrf.mxu1  ;;  %v1866_v37 = vpop.f32.mrf.mxu0  ;;  %v12061_v21 = vld [vmem:[%s16621_s2 + $0xd8] sm:$0xff]  ;;  %v16974_v51 = vld [vmem:[#allocation28_spill] sm:$0xff]  ;;  %v16981_v49 = vld [vmem:[#allocation18_spill] sm:$0xff] }
 0x160   : > { %16966 = vst [vmem:[#allocation53_spill] sm:$0xff] %v12029_v50  ;;  %v1732_v53 = vmul.f32 %v11962_v12, %v16969_v60  ;;  %v1697_v42 = vadd.f32 %v16970_v13, %v1628_v8  ;;  %v1630_v54 = vadd.f32 %v1598_v43, %v11782_v29  ;;  %v2256_v23 = vmul.f32 %v9424_v5, %v12024_v14  ;;  %v16972_v29 = vld [vmem:[#allocation85_spill] sm:$0xff]  ;;  %v16975_v60 = vld [vmem:[#allocation20_spill] sm:$0xff]  ;;  %v16979_v50 = vld [vmem:[#allocation23_spill] sm:$0xff] }
 0x161   : > { %v12050_v18 = vadd.f32 %v1728_v62, %v1691_v57  ;;  %v12052_v59 = vadd.f32 %v1731_v63, %v1694_v41  ;;  %v12054_v39 = vadd.f32 %v1730_v55, %v1693_v34  ;;  %v1600_v61 = vmul.f32 %v11893_v1, %v16971_v17  ;;  %v16973_v57 = vld [vmem:[#allocation58_spill] sm:$0xff]  ;;  %v12072_v63 = vld [vmem:[%s16621_s2 + $0x108] sm:$0xff]  ;;  %v2091_v34 = vpop.f32.mrf.mxu1  ;;  %v9427_v17 = vpop.f32.mrf.mxu0 }
 0x162   : > { %v12063_v8 = vadd.f32 %v1732_v53, %v1695_v26  ;;  %v1734_v43 = vmul.f32 %v11983_v28, %v16972_v29  ;;  %v2288_v62 = vadd.f32 %v2256_v23, %v16973_v57  ;;  %v2255_v41 = vmul.f32 %v12043_v6, %v1866_v37  ;;  %v16976_v53 = vld [vmem:[#allocation27_spill] sm:$0xff]  ;;  %v12084_v23 = vld [vmem:[%s16621_s2 + $0x100] sm:$0xff]  ;;  %v12089_v37 = vld [vmem:[%s16621_s2 + $0xd0] sm:$0xff] }
 0x163   : > { %v12074_v55 = vadd.f32 %v1735_v22, %v1698_v38  ;;  %v1633_v5 = vadd.f32 %v1601_v7, %v16974_v51  ;;  %v1736_v26 = vmul.f32 %v11962_v12, %v16975_v60  ;;  %v1602_v13 = vmul.f32 %v11846_v32, %v16976_v53  ;;  %v16977_v22 = vld [vmem:[#allocation73_spill] sm:$0xff]  ;;  %v9479_v51 = vpop.f32.mrf.mxu1  ;;  %v16978_v60 = vld [vmem:[#allocation39_spill] sm:$0xff]  ;;  %v1876_v9 = vpop.f32.mrf.mxu0 }
 0x164   : > { %v12091_v38 = vadd.f32 %v1734_v43, %v1697_v42  ;;  %v1699_v7 = vadd.f32 %v16977_v22, %v1630_v54  ;;  %v2287_v29 = vadd.f32 %v2255_v41, %v1756_v56  ;;  %v2258_v57 = vmul.f32 %v9427_v17, %v12061_v21  ;;  %v12106_v54 = vld [vmem:[%s16621_s2 + $0x118] sm:$0xff]  ;;  %v16982_v41 = vld [vmem:[#allocation74_spill] sm:$0xff] }
 0x165   : > { %v1632_v53 = vadd.f32 %v1600_v61, %v16978_v60  ;;  %v1739_v48 = vmul.f32 %v16979_v50, %v11947_v31  ;;  %v2357_v19 = vadd.f32 %v16980_v10, %v2288_v62  ;;  %v2394_v36 = vmul.f32 %v9476_v46, %v12072_v63  ;;  %v2101_v61 = vpop.f32.mrf.mxu1  ;;  %v16983_v17 = vld [vmem:[#allocation90_spill] sm:$0xff]  ;;  %v9430_v62 = vpop.f32.mrf.mxu0  ;;  %v16985_v22 = vld [vmem:[#allocation25_spill] sm:$0xff] }
 0x166   : > { %v2290_v52 = vadd.f32 %v2258_v57, %v1759_v27  ;;  %v2356_v42 = vadd.f32 %v16981_v49, %v2287_v29  ;;  %v2393_v43 = vmul.f32 %v12084_v23, %v2091_v34  ;;  %v2257_v56 = vmul.f32 %v12089_v37, %v1876_v9  ;;  %v16984_v27 = vld [vmem:[#allocation31_spill] sm:$0xff]  ;;  %v12117_v9 = vld [vmem:[%s16621_s2 + $0x110] sm:$0xff] }
 0x167   : > { %v1702_v50 = vadd.f32 %v16982_v41, %v1633_v5  ;;  %v1738_v10 = vmul.f32 %v11983_v28, %v16983_v17  ;;  %v1634_v46 = vadd.f32 %v1602_v13, %v11828_v25  ;;  %v1605_v49 = vmul.f32 %v16984_v27, %v11862_v4  ;;  %v9482_v60 = vpop.f32.mrf.mxu1  ;;  %v16986_v41 = vld [vmem:[#allocation75_spill] sm:$0xff]  ;;  %v1886_v58 = vpop.f32.mrf.mxu0 }
 0x168   : > { %v12119_v34 = vadd.f32 %v1736_v26, %v1699_v7  ;;  %v1604_v29 = vmul.f32 %v11893_v1, %v16985_v22  ;;  %v2425_v5 = vadd.f32 %v2393_v43, %v2356_v42  ;;  %v2289_v57 = vadd.f32 %v2257_v56, %v1758_v16  ;;  %v16987_v13 = vld [vmem:[#allocation11_spill] sm:$0xff]  ;;  %v16989_v16 = vld [vmem:[#allocation34_spill] sm:$0xff] }
 0x169   : > { %v1701_v17 = vadd.f32 %v16986_v41, %v1632_v53  ;;  %v2426_v25 = vadd.f32 %v2394_v36, %v2357_v19  ;;  %v2359_v47 = vadd.f32 %v16987_v13, %v2290_v52  ;;  %v2396_v27 = vmul.f32 %v9479_v51, %v12106_v54  ;;  %v2111_v22 = vpop.f32.mrf.mxu1  ;;  %v16990_v53 = vld [vmem:[#allocation76_spill] sm:$0xff]  ;;  %v9433_v36 = vpop.f32.mrf.mxu0 }
 0x16a   : > { %v2260_v20 = vmul.f32 %v9430_v62, %v12024_v14  ;;  %v2358_v2 = vadd.f32 %v16988_v0, %v2289_v57  ;;  %v2395_v26 = vmul.f32 %v12117_v9, %v2101_v61  ;;  %v2259_v7 = vmul.f32 %v12043_v6, %v1886_v58  ;;  %v16991_v58 = vld [vmem:[#allocation33_spill] sm:$0xff]  ;;  %v16993_v13 = vld [vmem:[#allocation96_spill] sm:$0xff] }
 0x16b   : > { %v12130_v42 = vadd.f32 %v1739_v48, %v1702_v50  ;;  %v1637_v43 = vadd.f32 %v1605_v49, %v16989_v16  ;;  %v1703_v19 = vadd.f32 %v16990_v53, %v1634_v46  ;;  %v2467_v52 = vpack.c.bf16 %v2426_v25, %v2425_v5  ;;  %v9485_v57 = vpop.f32.mrf.mxu1  ;;  %v16992_v50 = vld [vmem:[#allocation93_spill] sm:$0xff]  ;;  %v1896_v46 = vpop.f32.mrf.mxu0 }
 0x16c   : > { %v1636_v51 = vadd.f32 %v1604_v29, %v11839_v44  ;;  %v2427_v56 = vadd.f32 %v2395_v26, %v2358_v2  ;;  %v2291_v62 = vadd.f32 %v2259_v7, %v12050_v18  ;;  %v2262_v0 = vmul.f32 %v9433_v36, %v12061_v21  ;;  %v16994_v44 = vld [vmem:[#allocation71_spill] sm:$0xff]  ;;  %v16996_v7 = vld [vmem:[#allocation32_spill] sm:$0xff] }
 0x16d   : > { %v12137_v61 = vadd.f32 %v1738_v10, %v1701_v17  ;;  %v1740_v48 = vmul.f32 %v11962_v12, %v16991_v58  ;;  %v1743_v49 = vmul.f32 %v16992_v50, %v11947_v31  ;;  %v2428_v41 = vadd.f32 %v2396_v27, %v2359_v47  ;;  %v2121_v25 = vpop.f32.mrf.mxu1  ;;  %v16995_v17 = vld [vmem:[#allocation77_spill] sm:$0xff]  ;;  %v9436_v53 = vpop.f32.mrf.mxu0  ;;  %v16997_v27 = vld [vmem:[#allocation78_spill] sm:$0xff] }
 0x16e   : > { %v1742_v5 = vmul.f32 %v11983_v28, %v16993_v13  ;;  %v2292_v2 = vadd.f32 %v2260_v20, %v16994_v44  ;;  %v2294_v18 = vadd.f32 %v2262_v0, %v12052_v59  ;;  %v2261_v29 = vmul.f32 %v12089_v37, %v1896_v46  ;;  %v16998_v58 = vld [vmem:[#allocation45_spill] sm:$0xff]  ;;  %v16999_v20 = vld [vmem:[#allocation87_spill] sm:$0xff] }
 0x16f   : > { %v12148_v10 = vadd.f32 %v1740_v48, %v1703_v19  ;;  %v1706_v26 = vadd.f32 %v16995_v17, %v1637_v43  ;;  %v1606_v16 = vmul.f32 %v11846_v32, %v16996_v7  ;;  %v2468_v47 = vpack.c.bf16 %v2428_v41, %v2427_v56  ;;  %v9488_v0 = vpop.f32.mrf.mxu1  ;;  %v17000_v43 = vld [vmem:[#allocation88_spill] sm:$0xff]  ;;  %v1906_v56 = vpop.f32.mrf.mxu0  ;;  %v17001_v41 = vld [vmem:[#allocation86_spill] sm:$0xff]  ;;  %v17002_v17 = vld [vmem:[#allocation91_spill] sm:$0xff] }
 0x170   : > { %v1705_v36 = vadd.f32 %v16997_v27, %v1636_v51  ;;  %v1609_v50 = vmul.f32 %v16998_v58, %v11862_v4  ;;  %v2360_v13 = vadd.f32 %v16999_v20, %v2291_v62  ;;  %v2293_v59 = vadd.f32 %v2261_v29, %v12054_v39 }
 0x171   : > { %v2398_v19 = vmul.f32 %v9482_v60, %v12072_v63  ;;  %v2397_v48 = vmul.f32 %v12084_v23, %v2111_v22  ;;  %v2363_v46 = vadd.f32 %v17000_v43, %v2294_v18  ;;  %v2400_v44 = vmul.f32 %v9485_v57, %v12106_v54  ;;  %9522 = vmatprep.subr.bf16.mxu0 %v2468_v47  ;;  %v2131_v39 = vpop.f32.mrf.mxu1  ;;  %v17003_v22 = vld [vmem:[#allocation64_spill] sm:$0xff]  ;;  %v9439_v58 = vpop.f32.mrf.mxu0 }
 0x172   : > { %v2361_v51 = vadd.f32 %v17001_v41, %v2292_v2  ;;  %v2362_v7 = vadd.f32 %v17002_v17, %v2293_v59  ;;  %v2399_v27 = vmul.f32 %v12117_v9, %v2121_v25  ;;  %v2263_v62 = vmul.f32 %v12043_v6, %v1906_v56  ;;  %9523 = vmatpush3.bf16.msra.mxu0 %v2468_v47  ;;  %v17004_v2 = vld [vmem:[#allocation40_spill] sm:$0xff] }
 0x173   : > { %v12166_v29 = vadd.f32 %v1743_v49, %v1706_v26  ;;  %v1638_v60 = vadd.f32 %v1606_v16, %v11870_v24  ;;  %v1608_v18 = vmul.f32 %v11893_v1, %v17003_v22  ;;  %v2264_v57 = vmul.f32 %v9436_v53, %v12024_v14  ;;  %9524 = vmatprep.subr.bf16.mxu0 %v2467_v52  ;;  %v9491_v56 = vpop.f32.mrf.mxu1  ;;  %v17005_v49 = vld [vmem:[#allocation62_spill] sm:$0xff]  ;;  %v1916_v41 = vpop.f32.mrf.mxu0  ;;  %v17006_v53 = vld [vmem:[#allocation35_spill] sm:$0xff] }
 0x174   : > { %v1641_v20 = vadd.f32 %v1609_v50, %v17004_v2  ;;  %v2429_v59 = vadd.f32 %v2397_v48, %v2360_v13  ;;  %v2431_v43 = vadd.f32 %v2399_v27, %v2362_v7  ;;  %v2266_v25 = vmul.f32 %v9439_v58, %v12061_v21  ;;  %v17007_v7 = vld [vmem:[#allocation80_spill] sm:$0xff]  ;;  %v17008_v27 = vld [vmem:[#allocation7_spill] sm:$0xff] }
 0x175   : > { %v12174_v47 = vadd.f32 %v1742_v5, %v1705_v36  ;;  %v1744_v26 = vmul.f32 %v11962_v12, %v17005_v49  ;;  %v2432_v24 = vadd.f32 %v2400_v44, %v2363_v46  ;;  %v2295_v16 = vadd.f32 %v2263_v62, %v12063_v8  ;;  %v2141_v48 = vpop.f32.mrf.mxu1  ;;  %v9442_v46 = vpop.f32.mrf.mxu0  ;;  %v17009_v8 = vld [vmem:[#allocation81_spill] sm:$0xff]  ;;  %v17011_v49 = vld [vmem:[#allocation19_spill] sm:$0xff] }
 0x176   : > { %v1747_v17 = vmul.f32 %v17006_v53, %v11947_v31  ;;  %v2430_v22 = vadd.f32 %v2398_v19, %v2361_v51  ;;  %v2298_v50 = vadd.f32 %v2266_v25, %v12074_v55  ;;  %v2265_v13 = vmul.f32 %v12089_v37, %v1916_v41  ;;  %9525 = vmatpush3.bf16.msra.mxu0 %v2467_v52  ;;  %v17010_v25 = vld [vmem:[#allocation30_spill] sm:$0xff] }
 0x177   : > { %v1707_v5 = vadd.f32 %v17007_v7, %v1638_v60  ;;  %v1640_v36 = vadd.f32 %v1608_v18, %v11904_v3  ;;  %v2296_v58 = vadd.f32 %v2264_v57, %v17008_v27  ;;  %v2532_v44 = vpack.c.bf16 %v2432_v24, %v2431_v43  ;;  %v9494_v55 = vpop.f32.mrf.mxu1  ;;  %v1926_v3 = vpop.f32.mrf.mxu0  ;;  %v17012_v18 = vld [vmem:[#allocation29_spill] sm:$0xff] }
 0x178   : > { %v1710_v62 = vadd.f32 %v17009_v8, %v1641_v20  ;;  %v1610_v2 = vmul.f32 %v11846_v32, %v11909_v15  ;;  %v2297_v19 = vadd.f32 %v2265_v13, %v12091_v38  ;;  %v2531_v51 = vpack.c.bf16 %v2430_v22, %v2429_v59  ;;  %v17013_v20 = vld [vmem:[#allocation22_spill] sm:$0xff]  ;;  %v17014_v24 = vld [vmem:[#allocation17_spill] sm:$0xff] }
 0x179   : > { %v2364_v52 = vadd.f32 %v17010_v25, %v2295_v16  ;;  %v2367_v41 = vadd.f32 %v17011_v49, %v2298_v50  ;;  %v2404_v60 = vmul.f32 %v9491_v56, %v12106_v54  ;;  %9530 = vmatprep.subr.bf16.mxu1 %v2532_v44  ;;  %9527 = vmatmul.mubr.msk.bf16.vlgmr.msra.gmra.mxu0 %vm2469_vm5, %v17012_v18  ;;  %v2151_v59 = vpop.f32.mrf.mxu1  ;;  %v9445_v22 = vpop.f32.mrf.mxu0  ;;  %v17015_v50 = vld [vmem:[#allocation26_spill] sm:$0xff]  ;;  %v17016_v13 = vld [vmem:[#allocation101_spill] sm:$0xff] }
 0x17a   : > { %v2268_v57 = vmul.f32 %v9442_v46, %v12024_v14  ;;  %v2366_v43 = vadd.f32 %v17013_v20, %v2297_v19  ;;  %v2403_v15 = vmul.f32 %v12117_v9, %v2141_v48  ;;  %v2267_v38 = vmul.f32 %v12043_v6, %v1926_v3  ;;  %9531 = vmatpush3.bf16.msra.mxu1 %v2532_v44  ;;  %v17017_v25 = vld [vmem:[#allocation82_spill] sm:$0xff]  ;;  %v17018_v3 = vld [vmem:[#allocation89_spill] sm:$0xff] }
 0x17b   : > { %v2365_v16 = vadd.f32 %v17014_v24, %v2296_v58  ;;  %v2402_v53 = vmul.f32 %v9488_v0, %v12072_v63  ;;  %v2401_v56 = vmul.f32 %v12084_v23, %v2131_v39  ;;  %9532 = vmatprep.subr.bf16.mxu1 %v2531_v51  ;;  %9542 = vmatprep.mubr.msk.bf16.mxu0 %vm2469_vm5, %v17015_v50  ;;  %v9497_v44 = vpop.f32.mrf.mxu1  ;;  %v1936_v19 = vpop.f32.mrf.mxu0 }
 0x17c   : > { %v1746_v7 = vmul.f32 %v11983_v28, %v17016_v13  ;;  %v2435_v27 = vadd.f32 %v2403_v15, %v2366_v43  ;;  %v2299_v48 = vadd.f32 %v2267_v38, %v12119_v34  ;;  %v2270_v46 = vmul.f32 %v9445_v22, %v12061_v21  ;;  %v17020_v38 = vld [vmem:[#allocation94_spill] sm:$0xff] }
 0x17d   : > { %v12208_v8 = vadd.f32 %v1744_v26, %v1707_v5  ;;  %v12210_v58 = vadd.f32 %v1747_v17, %v1710_v62  ;;  %v2433_v0 = vadd.f32 %v2401_v56, %v2364_v52  ;;  %v2436_v39 = vadd.f32 %v2404_v60, %v2367_v41  ;;  %v2161_v34 = vpop.f32.mrf.mxu1  ;;  %v9448_v5 = vpop.f32.mrf.mxu0  ;;  %v17019_v41 = vld [vmem:[#allocation36_spill] sm:$0xff] }
 0x17e   : > { %v1709_v49 = vadd.f32 %v17017_v25, %v1640_v36  ;;  %v2300_v20 = vadd.f32 %v2268_v57, %v17018_v3  ;;  %v2302_v24 = vadd.f32 %v2270_v46, %v12130_v42  ;;  %v2269_v43 = vmul.f32 %v12089_v37, %v1936_v19  ;;  %9533 = vmatpush3.bf16.msra.mxu1 %v2531_v51 }
 0x17f   : > { %v1642_v15 = vadd.f32 %v1610_v2, %v11925_v35  ;;  %v1613_v26 = vmul.f32 %v11930_v40, %v11862_v4  ;;  %v2434_v17 = vadd.f32 %v2402_v53, %v2365_v16  ;;  %v2589_v62 = vpack.c.bf16 %v2436_v39, %v2435_v27  ;;  %v9500_v57 = vpop.f32.mrf.mxu1  ;;  %v1946_v35 = vpop.f32.mrf.mxu0  ;;  %v17021_v40 = vld [vmem:[#allocation92_spill] sm:$0xff] }
 0x180   : > { %v2406_v52 = vmul.f32 %v9494_v55, %v12072_v63  ;;  %v2368_v36 = vadd.f32 %v17019_v41, %v2299_v48  ;;  %v2405_v60 = vmul.f32 %v12084_v23, %v2151_v59  ;;  %v2301_v42 = vadd.f32 %v2269_v43, %v12137_v61  ;;  %v17022_v55 = vld [vmem:[#allocation97_spill] sm:$0xff] }
 0x181   : > { %v2371_v51 = vadd.f32 %v17020_v38, %v2302_v24  ;;  %v2408_v56 = vmul.f32 %v9497_v44, %v12106_v54  ;;  %9538 = vmatprep.subr.bf16.mxu0 %v2589_v62  ;;  %v2588_v2 = vpack.c.bf16 %v2434_v17, %v2433_v0  ;;  %9535 = vmatmul.mubr.msk.bf16.vlgmr.msra.gmra.mxu1 %vm2469_vm5, %v17012_v18  ;;  %v2171_v61 = vpop.f32.mrf.mxu1  ;;  %v9451_v46 = vpop.f32.mrf.mxu0  ;;  %v17023_v44 = vld [vmem:[#allocation46_spill] sm:$0xff]  ;;  %v17027_v38 = vld [vmem:[#allocation84_spill] sm:$0xff] }
 0x182   : > { %v2369_v16 = vadd.f32 %v17021_v40, %v2300_v20  ;;  %v2370_v53 = vadd.f32 %v17022_v55, %v2301_v42  ;;  %v2407_v22 = vmul.f32 %v12117_v9, %v2161_v34  ;;  %v2271_v59 = vmul.f32 %v12043_v6, %v1946_v35  ;;  %9539 = vmatpush3.bf16.msra.mxu0 %v2589_v62  ;;  %v17024_v34 = vld [vmem:[#allocation83_spill] sm:$0xff] }
 0x183   : > { %v1748_v13 = vmul.f32 %v11962_v12, %v11919_v30  ;;  %v1612_v27 = vmul.f32 %v11893_v1, %v11955_v33  ;;  %v2272_v48 = vmul.f32 %v9448_v5, %v12024_v14  ;;  %9540 = vmatprep.subr.bf16.mxu0 %v2588_v2  ;;  %9550 = vmatprep.mubr.msk.bf16.mxu1 %vm2469_vm5, %v17015_v50  ;;  %v9503_v3 = vpop.f32.mrf.mxu1  ;;  %v1956_v43 = vpop.f32.mrf.mxu0 }
 0x184   : > { %v1645_v0 = vadd.f32 %v1613_v26, %v17023_v44  ;;  %v2437_v39 = vadd.f32 %v2405_v60, %v2368_v36  ;;  %v2439_v19 = vadd.f32 %v2407_v22, %v2370_v53  ;;  %v2274_v25 = vmul.f32 %v9451_v46, %v12061_v21  ;;  %v17032_v46 = vld [vmem:[#allocation61_spill] sm:$0xff] }
 0x185   : > { %v12240_v20 = vadd.f32 %v1746_v7, %v1709_v49  ;;  %v1751_v30 = vmul.f32 %v11936_v45, %v11947_v31  ;;  %v2440_v33 = vadd.f32 %v2408_v56, %v2371_v51  ;;  %v2303_v24 = vadd.f32 %v2271_v59, %v12148_v10  ;;  %v2181_v41 = vpop.f32.mrf.mxu1  ;;  %v17025_v7 = vld [vmem:[#allocation44_spill] sm:$0xff]  ;;  %v17026_v45 = vld [vmem:[#allocation95_spill] sm:$0xff]  ;;  %v9454_v42 = vpop.f32.mrf.mxu0  ;;  %v17031_v59 = vld [vmem:[#allocation98_spill] sm:$0xff] }
 0x186   : > { %v1711_v17 = vadd.f32 %v17024_v34, %v1642_v15  ;;  %v2438_v5 = vadd.f32 %v2406_v52, %v2369_v16  ;;  %v2306_v62 = vadd.f32 %v2274_v25, %v12166_v29  ;;  %v2273_v26 = vmul.f32 %v12089_v37, %v1956_v43  ;;  %9541 = vmatpush3.bf16.msra.mxu0 %v2588_v2  ;;  %v17028_v15 = vld [vmem:[#allocation43_spill] sm:$0xff]  ;;  %v17029_v2 = vld [vmem:[#allocation42_spill] sm:$0xff] }
 0x187   : > { %v1644_v36 = vadd.f32 %v1612_v27, %v11942_v11  ;;  %v12251_v49 = vmul.f32 %v11983_v28, %v17025_v7  ;;  %v2304_v60 = vadd.f32 %v2272_v48, %v17026_v45  ;;  %v2646_v10 = vpack.c.bf16 %v2440_v33, %v2439_v19  ;;  %v9506_v56 = vpop.f32.mrf.mxu1  ;;  %v17030_v11 = vld [vmem:[#allocation37_spill] sm:$0xff]  ;;  %v1966_v53 = vpop.f32.mrf.mxu0  ;;  %v17034_v7 = vld [vmem:[#allocation56_spill] sm:$0xff] }
 0x188   : > { %v1714_v51 = vadd.f32 %v17027_v38, %v1645_v0  ;;  %v1614_v52 = vmul.f32 %v11846_v32, %v17028_v15  ;;  %v2305_v29 = vadd.f32 %v2273_v26, %v12174_v47  ;;  %v2645_v35 = vpack.c.bf16 %v2438_v5, %v2437_v39  ;;  %v17033_v5 = vld [vmem:[#allocation15_spill] sm:$0xff]  ;;  %v17035_v45 = vld [vmem:[#allocation100_spill] sm:$0xff] }
 0x189   : > { %v2372_v40 = vadd.f32 %v17029_v2, %v2303_v24  ;;  %v2375_v16 = vadd.f32 %v17030_v11, %v2306_v62  ;;  %v2412_v55 = vmul.f32 %v9503_v3, %v12106_v54  ;;  %9546 = vmatprep.subr.bf16.mxu1 %v2646_v10  ;;  %9543 = vmatmul.mubr.msk.bf16.vlgmr.msra.gmra.mxu0 %vm2469_vm5, %v17012_v18  ;;  %v2191_v48 = vpop.f32.mrf.mxu1  ;;  %v9457_v19 = vpop.f32.mrf.mxu0  ;;  %v17037_v38 = vld [vmem:[#allocation55_spill] sm:$0xff] }
 0x18a   : > { %v2276_v22 = vmul.f32 %v9454_v42, %v12024_v14  ;;  %v2374_v27 = vadd.f32 %v17031_v59, %v2305_v29  ;;  %v2411_v32 = vmul.f32 %v12117_v9, %v2181_v41  ;;  %v2275_v47 = vmul.f32 %v12043_v6, %v1966_v53  ;;  %9547 = vmatpush3.bf16.msra.mxu1 %v2646_v10 }
 0x18b   : > { %v2373_v44 = vadd.f32 %v17032_v46, %v2304_v60  ;;  %v2410_v0 = vmul.f32 %v9500_v57, %v12072_v63  ;;  %v2409_v39 = vmul.f32 %v12084_v23, %v2171_v61  ;;  %9548 = vmatprep.subr.bf16.mxu1 %v2645_v35  ;;  %9558 = vmatprep.mubr.msk.bf16.mxu0 %vm2469_vm5, %v17015_v50  ;;  %v9509_v43 = vpop.f32.mrf.mxu1  ;;  %v1976_v57 = vpop.f32.mrf.mxu0  ;;  %v17043_v46 = vld [vmem:[#allocation6_spill] sm:$0xff] }
 0x18c   : > { %v1780_v25 = vadd.f32 %v1748_v13, %v1711_v17  ;;  %v2443_v3 = vadd.f32 %v2411_v32, %v2374_v27  ;;  %v2307_v33 = vadd.f32 %v2275_v47, %v12208_v8  ;;  %v2278_v24 = vmul.f32 %v9457_v19, %v12061_v21  ;;  %v17036_v8 = vld [vmem:[#allocation63_spill] sm:$0xff]  ;;  %v17042_v47 = vld [vmem:[#allocation52_spill] sm:$0xff] }
 0x18d   : > { %v1783_v34 = vadd.f32 %v1751_v30, %v1714_v51  ;;  %v1713_v62 = vadd.f32 %v17033_v5, %v1644_v36  ;;  %v2441_v26 = vadd.f32 %v2409_v39, %v2372_v40  ;;  %v2444_v41 = vadd.f32 %v2412_v55, %v2375_v16  ;;  %v2201_v17 = vpop.f32.mrf.mxu1  ;;  %v9460_v51 = vpop.f32.mrf.mxu0  ;;  %v17044_v19 = vld [vmem:[#allocation12_spill] sm:$0xff] }
 0x18e   : > { %v1646_v61 = vadd.f32 %v1614_v52, %v17034_v7  ;;  %v2308_v60 = vadd.f32 %v2276_v22, %v17035_v45  ;;  %v2310_v42 = vadd.f32 %v2278_v24, %v12210_v58  ;;  %v2277_v13 = vmul.f32 %v12089_v37, %v1976_v57  ;;  %9549 = vmatpush3.bf16.msra.mxu1 %v2645_v35  ;;  %v17038_v52 = vld [vmem:[#allocation38_spill] sm:$0xff] }
 0x18f   : > { %v1617_v10 = vmul.f32 %v17036_v8, %v11862_v4  ;;  %v1616_v30 = vmul.f32 %v11893_v1, %v17037_v38  ;;  %v2442_v36 = vadd.f32 %v2410_v0, %v2373_v44  ;;  %v2703_v15 = vpack.c.bf16 %v2444_v41, %v2443_v3  ;;  %v9512_v11 = vpop.f32.mrf.mxu1  ;;  %v17039_v35 = vld [vmem:[#allocation102_spill] sm:$0xff]  ;;  %v1986_v4 = vpop.f32.mrf.mxu0  ;;  %v17040_v1 = vld [vmem:[#allocation99_spill] sm:$0xff] }
 0x190   : > { %v2414_v29 = vmul.f32 %v9506_v56, %v12072_v63  ;;  %v2376_v2 = vadd.f32 %v17038_v52, %v2307_v33  ;;  %v2413_v40 = vmul.f32 %v12084_v23, %v2191_v48  ;;  %v2309_v58 = vadd.f32 %v2277_v13, %v12240_v20  ;;  %v17041_v56 = vld [vmem:[#allocation103_spill] sm:$0xff]  ;;  %v17050_v52 = vld [vmem:[#allocation10_spill] sm:$0xff] }
 0x191   : > { %v2379_v16 = vadd.f32 %v17039_v35, %v2310_v42  ;;  %v2416_v55 = vmul.f32 %v9509_v43, %v12106_v54  ;;  %9554 = vmatprep.subr.bf16.mxu0 %v2703_v15  ;;  %v2702_v53 = vpack.c.bf16 %v2442_v36, %v2441_v26  ;;  %9551 = vmatmul.mubr.msk.bf16.vlgmr.msra.gmra.mxu1 %vm2469_vm5, %v17012_v18  ;;  %v2211_v20 = vpop.f32.mrf.mxu1  ;;  %v9463_v39 = vpop.f32.mrf.mxu0  ;;  %v17045_v41 = vld [vmem:[#allocation47_spill] sm:$0xff] }
 0x192   : > { %v2377_v22 = vadd.f32 %v17040_v1, %v2308_v60  ;;  %v2378_v59 = vadd.f32 %v17041_v56, %v2309_v58  ;;  %v2415_v27 = vmul.f32 %v12117_v9, %v2201_v17  ;;  %v2279_v32 = vmul.f32 %v12043_v6, %v1986_v4  ;;  %9555 = vmatpush3.bf16.msra.mxu0 %v2703_v15  ;;  %v17046_v60 = vld [vmem:[#allocation50_spill] sm:$0xff]  ;;  %v17049_v15 = vld [vmem:[#allocation9_spill] sm:$0xff]  ;;  %v17052_v35 = vld [vmem:[#allocation51_spill] sm:$0xff] }
 0x193   : > { %v1649_v48 = vadd.f32 %v1617_v10, %v17042_v47  ;;  %v1715_v44 = vadd.f32 %v17043_v46, %v1646_v61  ;;  %v2280_v0 = vmul.f32 %v9460_v51, %v12024_v14  ;;  %9556 = vmatprep.subr.bf16.mxu0 %v2702_v53  ;;  %9566 = vmatprep.mubr.msk.bf16.mxu1 %vm2469_vm5, %v17015_v50  ;;  %v9515_v5 = vpop.f32.mrf.mxu1  ;;  %v1996_v45 = vpop.f32.mrf.mxu0 }
 0x194   : > { %v1648_v3 = vadd.f32 %v1616_v30, %v17044_v19  ;;  %v2445_v33 = vadd.f32 %v2413_v40, %v2376_v2  ;;  %v2447_v24 = vadd.f32 %v2415_v27, %v2378_v59  ;;  %v2282_v43 = vmul.f32 %v9463_v39, %v12061_v21  ;;  %v17047_v30 = vld [vmem:[#allocation16_spill] sm:$0xff]  ;;  %v17054_v27 = vld [vmem:[#allocation65_spill] sm:$0xff]  ;;  %v10347_v19 = vld [vmem:[%s10485_s28 + $0x128] sm:$0xff] }
 0x195   : > { %v1782_v26 = vadd.f32 %v12251_v49, %v1713_v62  ;;  %v1752_v57 = vmul.f32 %v11962_v12, %v17045_v41  ;;  %v2448_v7 = vadd.f32 %v2416_v55, %v2379_v16  ;;  %v2311_v61 = vadd.f32 %v2279_v32, %v1780_v25  ;;  %v2221_v10 = vpop.f32.mrf.mxu1  ;;  %v17048_v49 = vld [vmem:[#allocation54_spill] sm:$0xff]  ;;  %v9466_v51 = vpop.f32.mrf.mxu0 }
 0x196   : > { %v1755_v42 = vmul.f32 %v17046_v60, %v11947_v31  ;;  %v2446_v13 = vadd.f32 %v2414_v29, %v2377_v22  ;;  %v2314_v17 = vadd.f32 %v2282_v43, %v1783_v34  ;;  %v2281_v8 = vmul.f32 %v12089_v37, %v1996_v45  ;;  %9557 = vmatpush3.bf16.msra.mxu0 %v2702_v53  ;;  %v17051_v34 = vld [vmem:[#allocation48_spill] sm:$0xff]  ;;  %v17053_v53 = vld [vmem:[#allocation41_spill] sm:$0xff] }
 0x197   : > { %v1784_v38 = vadd.f32 %v1752_v57, %v1715_v44  ;;  %v1754_v36 = vmul.f32 %v11983_v28, %v17047_v30  ;;  %v2312_v62 = vadd.f32 %v2280_v0, %v17048_v49  ;;  %v2760_v12 = vpack.c.bf16 %v2448_v7, %v2447_v24  ;;  %v9518_v31 = vpop.f32.mrf.mxu1  ;;  %v2006_v4 = vpop.f32.mrf.mxu0  ;;  %v17055_v57 = vld [vmem:[#allocation53_spill] sm:$0xff] }
 0x198   : > { %v1718_v25 = vadd.f32 %v17049_v15, %v1649_v48  ;;  %v1717_v2 = vadd.f32 %v17050_v52, %v1648_v3  ;;  %v2313_v40 = vadd.f32 %v2281_v8, %v1782_v26  ;;  %v2759_v29 = vpack.c.bf16 %v2446_v13, %v2445_v33  ;;  %v10348_v3 = vld [vmem:[%s16621_s2 + $0xe8] sm:$0xff]  ;;  %v17056_v13 = vld [vmem:[#allocation57_spill] sm:$0xff] }
 0x199   : > { %v2380_v58 = vadd.f32 %v17051_v34, %v2311_v61  ;;  %v2383_v16 = vadd.f32 %v17052_v35, %v2314_v17  ;;  %v2420_v55 = vmul.f32 %v9515_v5, %v12106_v54  ;;  %9562 = vmatprep.subr.bf16.mxu1 %v2760_v12  ;;  %9559 = vmatmul.mubr.msk.bf16.vlgmr.msra.gmra.mxu0 %vm2469_vm5, %v17012_v18  ;;  %v2231_v59 = vpop.f32.mrf.mxu1  ;;  %v9469_v46 = vpop.f32.mrf.mxu0  ;;  %v12384_v34 = vld [vmem:[%s12353_s8 + $0x10] sm:$0xff]  ;;  %v12902_v35 = vld [vmem:[%s16621_s2 + $0x260] sm:$0xff] }
 0x19a   : > { %v2284_v28 = vmul.f32 %v9466_v51, %v12024_v14  ;;  %v2382_v1 = vadd.f32 %v17053_v53, %v2313_v40  ;;  %v2419_v22 = vmul.f32 %v12117_v9, %v2221_v10  ;;  %v2283_v56 = vmul.f32 %v12043_v6, %v2006_v4  ;;  %9563 = vmatpush3.bf16.msra.mxu1 %v2760_v12  ;;  %v17057_v10 = vld [vmem:[#allocation60_spill] sm:$0xff]  ;;  %v12443_v4 = vld [vmem:[%s12353_s8 + $0x38] sm:$0xff]  ;;  %v12463_v53 = vld [vmem:[%s12353_s8 + $0x48] sm:$0xff] }
 0x19b   : > { %v2381_v32 = vadd.f32 %v17054_v27, %v2312_v62  ;;  %v2418_v47 = vmul.f32 %v9512_v11, %v12072_v63  ;;  %v2417_v48 = vmul.f32 %v12084_v23, %v2211_v20  ;;  %9564 = vmatprep.subr.bf16.mxu1 %v2759_v29  ;;  %9574 = vmatprep.mubr.msk.bf16.mxu0 %vm2469_vm5, %v17015_v50  ;;  %v9521_v6 = vpop.f32.mrf.mxu1  ;;  %v10349_v11 = vld [vmem:[%s10485_s28 + $0x130] sm:$0xff]  ;;  %v2016_v26 = vpop.f32.mrf.mxu0 }
 0x19c   : > { %v1787_v14 = vadd.f32 %v1755_v42, %v1718_v25  ;;  %v2451_v44 = vadd.f32 %v2419_v22, %v2382_v1  ;;  %v2315_v0 = vadd.f32 %v2283_v56, %v1784_v38  ;;  %v2286_v39 = vmul.f32 %v9469_v46, %v12061_v21  ;;  %v10350_v20 = vld [vmem:[%s16621_s2 + $0xf0] sm:$0xff]  ;;  %v12483_v22 = vld [vmem:[%s12353_s8 + $0x58] sm:$0xff]  ;;  %v12486_v56 = vld [vmem:[%s12353_s8 + $0x60] sm:$0xff] }
 0x19d   : > { %v2353_v33 = vmul.f32 %v10348_v3, %v10347_v19  ;;  %v2354_v24 = vmul.f32 %v10350_v20, %v10349_v11  ;;  %v2449_v43 = vadd.f32 %v2417_v48, %v2380_v58  ;;  %v2452_v5 = vadd.f32 %v2420_v55, %v2383_v16  ;;  %v2241_v60 = vpop.f32.mrf.mxu1  ;;  %v12396_v58 = vld [vmem:[%s12353_s8 + $0x18] sm:$0xff]  ;;  %v12402_v16 = vld [vmem:[%s12353_s8 + $0x20] sm:$0xff]  ;;  %v12429_v55 = vld [vmem:[%s12353_s8 + $0x30] sm:$0xff] }
 0x19e   : > { %v1786_v41 = vadd.f32 %v1754_v36, %v1717_v2  ;;  %v2316_v7 = vadd.f32 %v2284_v28, %v17055_v57  ;;  %v2318_v21 = vadd.f32 %v2286_v39, %v1787_v14  ;;  %v2285_v61 = vmul.f32 %v12089_v37, %v2016_v26  ;;  %9565 = vmatpush3.bf16.msra.mxu1 %v2759_v29  ;;  %v12359_v2 = vld [vmem:[%s12353_s8] sm:$0xff]  ;;  %v12469_v1 = vld [vmem:[%s12353_s8 + $0x50] sm:$0xff]  ;;  %v12525_v48 = vld [vmem:[%s12353_s8 + $0x88] sm:$0xff] }
 0x19f   : > { %v2450_v45 = vadd.f32 %v2418_v47, %v2381_v32  ;;  %v2817_v42 = vpack.c.bf16 %v2452_v5, %v2451_v44  ;;  %v2384_v17 = vadd.f32 %v17056_v13, %v2315_v0  ;;  %v2424_v30 = vmul.f32 %v9521_v6, %v12106_v54  ;;  %v12449_v28 = vld [vmem:[%s12353_s8 + $0x40] sm:$0xff]  ;;  %v12500_v27 = vld [vmem:[%s12353_s8 + $0x70] sm:$0xff]  ;;  %v12511_v32 = vld [vmem:[%s12353_s8 + $0x78] sm:$0xff] }
 0x1a0   : > { %v2317_v8 = vadd.f32 %v2285_v61, %v1786_v41  ;;  %v2387_v38 = vadd.f32 %v17057_v10, %v2318_v21  ;;  %v2422_v49 = vmul.f32 %v9518_v31, %v12072_v63  ;;  %v2421_v36 = vmul.f32 %v12084_v23, %v2231_v59  ;;  %v12378_v31 = vld [vmem:[%s12353_s8 + $0x8] sm:$0xff]  ;;  %v12514_v47 = vld [vmem:[%s12353_s8 + $0x80] sm:$0xff]  ;;  %v12528_v46 = vld [vmem:[%s12353_s8 + $0x90] sm:$0xff] }
 0x1a1   : > { %9570 = vmatprep.subr.bf16.mxu0 %v2817_v42  ;;  %9567 = vmatmul.mubr.msk.bf16.vlgmr.msra.gmra.mxu1 %vm2469_vm5, %v17012_v18  ;;  %v2816_v37 = vpack.c.bf16 %v2450_v45, %v2449_v43  ;;  %v2385_v62 = vadd.f32 %v2353_v33, %v2316_v7  ;;  %v2423_v12 = vmul.f32 %v12117_v9, %v2241_v60  ;;  %v17058_v9 = vmov 1.0   ;;  %v12497_v59 = vld [vmem:[%s12353_s8 + $0x68] sm:$0xff]  ;;  %v12539_v14 = vld [vmem:[%s12353_s8 + $0x98] sm:$0xff]  ;;  %v12542_v44 = vld [vmem:[%s12353_s8 + $0xa0] sm:$0xff] }
 0x1a2   : > { %v2386_v51 = vadd.f32 %v2354_v24, %v2317_v8  ;;  %9571 = vmatpush3.bf16.msra.mxu0 %v2817_v42  ;;  %9582 = vmatprep.mubr.msk.bf16.mxu1 %vm2469_vm5, %v17015_v50  ;;  %v2453_v15 = vadd.f32 %v2421_v36, %v2384_v17  ;;  %v2456_v54 = vadd.f32 %v2424_v30, %v2387_v38  ;;  %v12553_v0 = vld [vmem:[%s12353_s8 + $0xa8] sm:$0xff]  ;;  %v12556_v39 = vld [vmem:[%s12353_s8 + $0xb0] sm:$0xff]  ;;  %v12567_v6 = vld [vmem:[%s12353_s8 + $0xb8] sm:$0xff] }
 0x1a3   : > { %9572 = vmatprep.subr.bf16.mxu0 %v2816_v37  ;;  %v2454_v63 = vadd.f32 %v2422_v49, %v2385_v62  ;;  %v12570_v19 = vld [vmem:[%s12353_s8 + $0xc0] sm:$0xff]  ;;  %v12581_v3 = vld [vmem:[%s12353_s8 + $0xc8] sm:$0xff]  ;;  %v12584_v33 = vld [vmem:[%s12353_s8 + $0xd0] sm:$0xff] }
 0x1a4   : > { %v2455_v25 = vadd.f32 %v2423_v12, %v2386_v51  ;;  %v12595_v11 = vld [vmem:[%s12353_s8 + $0xd8] sm:$0xff]  ;;  %v12598_v20 = vld [vmem:[%s12353_s8 + $0xe0] sm:$0xff]  ;;  %v12609_v24 = vld [vmem:[%s12353_s8 + $0xe8] sm:$0xff] }
 0x1a5   : > { %v2873_v50 = vpack.c.bf16 %v2454_v63, %v2453_v15  ;;  %v12612_v43 = vld [vmem:[%s12353_s8 + $0xf0] sm:$0xff]  ;;  %v12623_v5 = vld [vmem:[%s12353_s8 + $0xf8] sm:$0xff]  ;;  %v12756_v26 = vld [vmem:[%s12353_s8 + $0x100] sm:$0xff] }
 0x1a6   : > { %9573 = vmatpush3.bf16.msra.mxu0 %v2816_v37  ;;  %v2874_v23 = vpack.c.bf16 %v2456_v54, %v2455_v25  ;;  %v12767_v41 = vld [vmem:[%s12353_s8 + $0x108] sm:$0xff]  ;;  %v12770_v57 = vld [vmem:[%s12353_s8 + $0x110] sm:$0xff]  ;;  %v12781_v7 = vld [vmem:[%s12353_s8 + $0x118] sm:$0xff] }
 0x1a7   : > { %9586 = vmatprep.subr.msk.mxu0 %vm10490_vm1, %v17058_v9  ;;  %v12810_v21 = vld [vmem:[%s16624_s5 + $0x10] sm:$0xff]  ;;  %v12826_v42 = vld [vmem:[%s16624_s5 + $0x18] sm:$0xff]  ;;  %v8547_v25 = vld [vmem:[%s16621_s2 + $0x320] sm:$0xff] }
 0x1a8   : > { %9578 = vmatprep.subr.bf16.mxu1 %v2874_v23  ;;  %v12947_v30 = vld [vmem:[%s16621_s2 + $0x148] sm:$0xff] }
 0x1a9   : > { %9575 = vmatmul.mubr.msk.bf16.vlgmr.msra.gmra.mxu0 %vm2469_vm5, %v17012_v18  ;;  %9579 = vmatpush3.bf16.msra.mxu1 %v2874_v23  ;;  %v12883_v23 = vld [vmem:[%s16624_s5] sm:$0xff] }
 0x1aa   : > { %9580 = vmatprep.subr.bf16.mxu1 %v2873_v50  ;;  %9587 = vmatpush3.msk.msra.mxu0 %vm10490_vm1, %v17058_v9 }
 0x1ab   : > { %9588 = vmatprep.subr.msk.mxu0 %vm10494_vm2, %v17058_v9  ;;  %9590 = vmatprep.mubr.msk.f32.mxu0 %vm362_vm0, %v12359_v2 }
 0x1ac   : > { %9589 = vmatpush3.msk.msra.mxu0 %vm10494_vm2, %v17058_v9 }
 0x1ad   : > { %9581 = vmatpush3.bf16.msra.mxu1 %v2873_v50  ;;  %9690 = vmatprep.subr.msk.mxu0 %vm10490_vm1, %v17058_v9  ;;  %v12891_v50 = vld [vmem:[%s16621_s2 + $0x140] sm:$0xff] }
 0x1ae   : > { %9638 = vmatprep.subr.msk.mxu1 %vm10498_vm3, %v17058_v9 }
 0x1b0   : > { %9583 = vmatmul.mubr.msk.bf16.vlgmr.msra.gmra.mxu1 %vm2469_vm5, %v17012_v18  ;;  %v12423_v18 = vld [vmem:[%s12353_s8 + $0x28] sm:$0xff] }
 0x1b1   : > { %9591 = vmatmul.mubr.msk.f32.vlgmr.msra.gmra.mxu0 %vm362_vm0, %v12378_v31  ;;  %9639 = vmatpush3.msk.msra.mxu1 %vm10498_vm3, %v17058_v9 }
 0x1b2   : > { %9593 = vmatprep.mubr.msk.f32.mxu0 %vm362_vm0, %v12384_v34  ;;  %9640 = vmatprep.subr.msk.mxu1 %vm10504_vm4, %v17058_v9 }
 0x1b3   : > { %9641 = vmatpush3.msk.msra.mxu1 %vm10504_vm4, %v17058_v9  ;;  %9642 = vmatprep.mubr.msk.f32.mxu1 %vm362_vm0, %v12359_v2 }
 0x1b4   : > { %9691 = vmatpush3.msk.msra.mxu0 %vm10490_vm1, %v17058_v9  ;;  %9742 = vmatprep.subr.msk.mxu1 %vm10498_vm3, %v17058_v9 }
 0x1b5   : > { %9594 = vmatmul.mubr.msk.f32.gmra.mxu0 %vm362_vm0, %v12396_v58  ;;  %9692 = vmatprep.subr.msk.mxu0 %vm10494_vm2, %v17058_v9 }
 0x1b6   : > { %9596 = vmatprep.mubr.msk.f32.mxu0 %vm362_vm0, %v12402_v16  ;;  %9693 = vmatpush3.msk.msra.mxu0 %vm10494_vm2, %v17058_v9 }
 0x1b7   : > { %9794 = vmatprep.subr.msk.mxu0 %vm10490_vm1, %v17058_v9 }
 0x1b8   : > { %9643 = vmatmul.mubr.msk.f32.vlgmr.msra.gmra.mxu1 %vm362_vm0, %v12378_v31 }
 0x1b9   : > { %9597 = vmatmul.mubr.msk.f32.gmra.mxu0 %vm362_vm0, %v12423_v18  ;;  %9645 = vmatprep.mubr.msk.f32.mxu1 %vm362_vm0, %v12384_v34 }
 0x1ba   : > { %9599 = vmatprep.mubr.msk.f32.mxu0 %vm362_vm0, %v12429_v55  ;;  %9743 = vmatpush3.msk.msra.mxu1 %vm10498_vm3, %v17058_v9 }
 0x1bb   : > { %9744 = vmatprep.subr.msk.mxu1 %vm10504_vm4, %v17058_v9 }
 0x1bc   : > { %9646 = vmatmul.mubr.msk.f32.gmra.mxu1 %vm362_vm0, %v12396_v58 }
 0x1bd   : > { %9600 = vmatmul.mubr.msk.f32.gmra.mxu0 %vm362_vm0, %v12443_v4  ;;  %9648 = vmatprep.mubr.msk.f32.mxu1 %vm362_vm0, %v12402_v16 }
 0x1be   : > { %9602 = vmatprep.mubr.msk.f32.mxu0 %vm362_vm0, %v12449_v28  ;;  %9745 = vmatpush3.msk.msra.mxu1 %vm10504_vm4, %v17058_v9 }
 0x1bf   : > { %9846 = vmatprep.subr.msk.mxu1 %vm10498_vm3, %v17058_v9 }
 0x1c0   : > { %9649 = vmatmul.mubr.msk.f32.gmra.mxu1 %vm362_vm0, %v12423_v18 }
 0x1c1   : > { %9603 = vmatmul.mubr.msk.f32.gmra.mxu0 %vm362_vm0, %v12463_v53  ;;  %9651 = vmatprep.mubr.msk.f32.mxu1 %vm362_vm0, %v12429_v55 }
 0x1c2   : > { %9605 = vmatprep.mubr.msk.f32.mxu0 %vm362_vm0, %v12469_v1 }
 0x1c4   : > { %9652 = vmatmul.mubr.msk.f32.gmra.mxu1 %vm362_vm0, %v12443_v4 }
 0x1c5   : > { %9606 = vmatmul.mubr.msk.f32.gmra.mxu0 %vm362_vm0, %v12483_v22  ;;  %9654 = vmatprep.mubr.msk.f32.mxu1 %vm362_vm0, %v12449_v28 }
 0x1c6   : > { %9608 = vmatprep.mubr.msk.f32.mxu0 %vm362_vm0, %v12486_v56 }
 0x1c8   : > { %9655 = vmatmul.mubr.msk.f32.gmra.mxu1 %vm362_vm0, %v12463_v53 }
 0x1c9   : > { %9609 = vmatmul.mubr.msk.f32.gmra.mxu0 %vm362_vm0, %v12497_v59  ;;  %9657 = vmatprep.mubr.msk.f32.mxu1 %vm362_vm0, %v12469_v1 }
 0x1ca   : > { %9611 = vmatprep.mubr.msk.f32.mxu0 %vm362_vm0, %v12500_v27 }
 0x1cc   : > { %9658 = vmatmul.mubr.msk.f32.gmra.mxu1 %vm362_vm0, %v12483_v22 }
 0x1cd   : > { %9612 = vmatmul.mubr.msk.f32.gmra.mxu0 %vm362_vm0, %v12511_v32  ;;  %9660 = vmatprep.mubr.msk.f32.mxu1 %vm362_vm0, %v12486_v56 }
 0x1ce   : > { %9614 = vmatprep.mubr.msk.f32.mxu0 %vm362_vm0, %v12514_v47 }
 0x1d0   : > { %9661 = vmatmul.mubr.msk.f32.gmra.mxu1 %vm362_vm0, %v12497_v59 }
 0x1d1   : > { %9615 = vmatmul.mubr.msk.f32.gmra.mxu0 %vm362_vm0, %v12525_v48  ;;  %9663 = vmatprep.mubr.msk.f32.mxu1 %vm362_vm0, %v12500_v27 }
 0x1d2   : > { %9617 = vmatprep.mubr.msk.f32.mxu0 %vm362_vm0, %v12528_v46 }
 0x1d4   : > { %9664 = vmatmul.mubr.msk.f32.gmra.mxu1 %vm362_vm0, %v12511_v32 }
 0x1d5   : > { %9618 = vmatmul.mubr.msk.f32.gmra.mxu0 %vm362_vm0, %v12539_v14  ;;  %9666 = vmatprep.mubr.msk.f32.mxu1 %vm362_vm0, %v12514_v47 }
 0x1d6   : > { %9620 = vmatprep.mubr.msk.f32.mxu0 %vm362_vm0, %v12542_v44 }
 0x1d8   : > { %9667 = vmatmul.mubr.msk.f32.gmra.mxu1 %vm362_vm0, %v12525_v48 }
 0x1d9   : > { %9621 = vmatmul.mubr.msk.f32.gmra.mxu0 %vm362_vm0, %v12553_v0  ;;  %9669 = vmatprep.mubr.msk.f32.mxu1 %vm362_vm0, %v12528_v46 }
 0x1da   : > { %9623 = vmatprep.mubr.msk.f32.mxu0 %vm362_vm0, %v12556_v39 }
 0x1dc   : > { %9670 = vmatmul.mubr.msk.f32.gmra.mxu1 %vm362_vm0, %v12539_v14 }
 0x1dd   : > { %9624 = vmatmul.mubr.msk.f32.gmra.mxu0 %vm362_vm0, %v12567_v6  ;;  %9672 = vmatprep.mubr.msk.f32.mxu1 %vm362_vm0, %v12542_v44 }
 0x1de   : > { %9626 = vmatprep.mubr.msk.f32.mxu0 %vm362_vm0, %v12570_v19 }
 0x1e0   : > { %9673 = vmatmul.mubr.msk.f32.gmra.mxu1 %vm362_vm0, %v12553_v0 }
 0x1e1   : > { %9627 = vmatmul.mubr.msk.f32.gmra.mxu0 %vm362_vm0, %v12581_v3  ;;  %9675 = vmatprep.mubr.msk.f32.mxu1 %vm362_vm0, %v12556_v39 }
 0x1e2   : > { %9629 = vmatprep.mubr.msk.f32.mxu0 %vm362_vm0, %v12584_v33 }
 0x1e4   : > { %9676 = vmatmul.mubr.msk.f32.gmra.mxu1 %vm362_vm0, %v12567_v6 }
 0x1e5   : > { %9630 = vmatmul.mubr.msk.f32.gmra.mxu0 %vm362_vm0, %v12595_v11  ;;  %9678 = vmatprep.mubr.msk.f32.mxu1 %vm362_vm0, %v12570_v19 }
 0x1e6   : > { %9632 = vmatprep.mubr.msk.f32.mxu0 %vm362_vm0, %v12598_v20 }
 0x1e8   : > { %9679 = vmatmul.mubr.msk.f32.gmra.mxu1 %vm362_vm0, %v12581_v3 }
 0x1e9   : > { %9633 = vmatmul.mubr.msk.f32.gmra.mxu0 %vm362_vm0, %v12609_v24  ;;  %9681 = vmatprep.mubr.msk.f32.mxu1 %vm362_vm0, %v12584_v33 }
 0x1ea   : > { %9635 = vmatprep.mubr.msk.f32.mxu0 %vm362_vm0, %v12612_v43 }
 0x1ec   : > { %9682 = vmatmul.mubr.msk.f32.gmra.mxu1 %vm362_vm0, %v12595_v11 }
 0x1ed   : > { %9636 = vmatmul.mubr.msk.f32.gmra.mxu0 %vm362_vm0, %v12623_v5  ;;  %9684 = vmatprep.mubr.msk.f32.mxu1 %vm362_vm0, %v12598_v20 }
 0x1ee   : > { %9694 = vmatprep.mubr.msk.f32.mxu0 %vm362_vm0, %v12402_v16 }
 0x1f0   : > { %9685 = vmatmul.mubr.msk.f32.gmra.mxu1 %vm362_vm0, %v12609_v24 }
 0x1f1   : > { %9695 = vmatmul.mubr.msk.f32.vlgmr.msra.gmra.mxu0 %vm362_vm0, %v12423_v18  ;;  %9687 = vmatprep.mubr.msk.f32.mxu1 %vm362_vm0, %v12612_v43 }
 0x1f2   : > { %9697 = vmatprep.mubr.msk.f32.mxu0 %vm362_vm0, %v12429_v55  ;;  %9795 = vmatpush3.msk.msra.mxu0 %vm10490_vm1, %v17058_v9 }
 0x1f3   : > { %9796 = vmatprep.subr.msk.mxu0 %vm10494_vm2, %v17058_v9 }
 0x1f4   : > { %9688 = vmatmul.mubr.msk.f32.gmra.mxu1 %vm362_vm0, %v12623_v5  ;;  %9797 = vmatpush3.msk.msra.mxu0 %vm10494_vm2, %v17058_v9 }
 0x1f5   : > { %9698 = vmatmul.mubr.msk.f32.gmra.mxu0 %vm362_vm0, %v12443_v4  ;;  %9746 = vmatprep.mubr.msk.f32.mxu1 %vm362_vm0, %v12402_v16 }
 0x1f6   : > { %9700 = vmatprep.mubr.msk.f32.mxu0 %vm362_vm0, %v12449_v28 }
 0x1f8   : > { %9747 = vmatmul.mubr.msk.f32.vlgmr.msra.gmra.mxu1 %vm362_vm0, %v12423_v18 }
 0x1f9   : > { %9701 = vmatmul.mubr.msk.f32.gmra.mxu0 %vm362_vm0, %v12463_v53  ;;  %9749 = vmatprep.mubr.msk.f32.mxu1 %vm362_vm0, %v12429_v55 }
 0x1fa   : > { %9703 = vmatprep.mubr.msk.f32.mxu0 %vm362_vm0, %v12469_v1  ;;  %9847 = vmatpush3.msk.msra.mxu1 %vm10498_vm3, %v17058_v9 }
 0x1fb   : > { %9848 = vmatprep.subr.msk.mxu1 %vm10504_vm4, %v17058_v9 }
 0x1fc   : > { %9750 = vmatmul.mubr.msk.f32.gmra.mxu1 %vm362_vm0, %v12443_v4 }
 0x1fd   : > { %9704 = vmatmul.mubr.msk.f32.gmra.mxu0 %vm362_vm0, %v12483_v22  ;;  %9752 = vmatprep.mubr.msk.f32.mxu1 %vm362_vm0, %v12449_v28 }
 0x1fe   : > { %9706 = vmatprep.mubr.msk.f32.mxu0 %vm362_vm0, %v12486_v56  ;;  %9849 = vmatpush3.msk.msra.mxu1 %vm10504_vm4, %v17058_v9 }
 0x200   : > { %9753 = vmatmul.mubr.msk.f32.gmra.mxu1 %vm362_vm0, %v12463_v53 }
 0x201   : > { %9707 = vmatmul.mubr.msk.f32.gmra.mxu0 %vm362_vm0, %v12497_v59  ;;  %9755 = vmatprep.mubr.msk.f32.mxu1 %vm362_vm0, %v12469_v1 }
 0x202   : > { %9709 = vmatprep.mubr.msk.f32.mxu0 %vm362_vm0, %v12500_v27 }
 0x204   : > { %9756 = vmatmul.mubr.msk.f32.gmra.mxu1 %vm362_vm0, %v12483_v22 }
 0x205   : > { %9710 = vmatmul.mubr.msk.f32.gmra.mxu0 %vm362_vm0, %v12511_v32  ;;  %9758 = vmatprep.mubr.msk.f32.mxu1 %vm362_vm0, %v12486_v56 }
 0x206   : > { %9712 = vmatprep.mubr.msk.f32.mxu0 %vm362_vm0, %v12514_v47 }
 0x208   : > { %9759 = vmatmul.mubr.msk.f32.gmra.mxu1 %vm362_vm0, %v12497_v59 }
 0x209   : > { %9713 = vmatmul.mubr.msk.f32.gmra.mxu0 %vm362_vm0, %v12525_v48  ;;  %9761 = vmatprep.mubr.msk.f32.mxu1 %vm362_vm0, %v12500_v27 }
 0x20a   : > { %9715 = vmatprep.mubr.msk.f32.mxu0 %vm362_vm0, %v12528_v46 }
 0x20c   : > { %9762 = vmatmul.mubr.msk.f32.gmra.mxu1 %vm362_vm0, %v12511_v32 }
 0x20d   : > { %9716 = vmatmul.mubr.msk.f32.gmra.mxu0 %vm362_vm0, %v12539_v14  ;;  %9764 = vmatprep.mubr.msk.f32.mxu1 %vm362_vm0, %v12514_v47 }
 0x20e   : > { %9718 = vmatprep.mubr.msk.f32.mxu0 %vm362_vm0, %v12542_v44 }
 0x210   : > { %9765 = vmatmul.mubr.msk.f32.gmra.mxu1 %vm362_vm0, %v12525_v48 }
 0x211   : > { %9719 = vmatmul.mubr.msk.f32.gmra.mxu0 %vm362_vm0, %v12553_v0  ;;  %9767 = vmatprep.mubr.msk.f32.mxu1 %vm362_vm0, %v12528_v46 }
 0x212   : > { %9721 = vmatprep.mubr.msk.f32.mxu0 %vm362_vm0, %v12556_v39 }
 0x214   : > { %9768 = vmatmul.mubr.msk.f32.gmra.mxu1 %vm362_vm0, %v12539_v14 }
 0x215   : > { %9722 = vmatmul.mubr.msk.f32.gmra.mxu0 %vm362_vm0, %v12567_v6  ;;  %9770 = vmatprep.mubr.msk.f32.mxu1 %vm362_vm0, %v12542_v44 }
 0x216   : > { %9724 = vmatprep.mubr.msk.f32.mxu0 %vm362_vm0, %v12570_v19 }
 0x218   : > { %9771 = vmatmul.mubr.msk.f32.gmra.mxu1 %vm362_vm0, %v12553_v0 }
 0x219   : > { %9725 = vmatmul.mubr.msk.f32.gmra.mxu0 %vm362_vm0, %v12581_v3  ;;  %9773 = vmatprep.mubr.msk.f32.mxu1 %vm362_vm0, %v12556_v39 }
 0x21a   : > { %9727 = vmatprep.mubr.msk.f32.mxu0 %vm362_vm0, %v12584_v33 }
 0x21c   : > { %9774 = vmatmul.mubr.msk.f32.gmra.mxu1 %vm362_vm0, %v12567_v6 }
 0x21d   : > { %9728 = vmatmul.mubr.msk.f32.gmra.mxu0 %vm362_vm0, %v12595_v11  ;;  %9776 = vmatprep.mubr.msk.f32.mxu1 %vm362_vm0, %v12570_v19 }
 0x21e   : > { %9730 = vmatprep.mubr.msk.f32.mxu0 %vm362_vm0, %v12598_v20 }
 0x220   : > { %9777 = vmatmul.mubr.msk.f32.gmra.mxu1 %vm362_vm0, %v12581_v3 }
 0x221   : > { %9731 = vmatmul.mubr.msk.f32.gmra.mxu0 %vm362_vm0, %v12609_v24  ;;  %9779 = vmatprep.mubr.msk.f32.mxu1 %vm362_vm0, %v12584_v33 }
 0x222   : > { %9733 = vmatprep.mubr.msk.f32.mxu0 %vm362_vm0, %v12612_v43 }
 0x224   : > { %9780 = vmatmul.mubr.msk.f32.gmra.mxu1 %vm362_vm0, %v12595_v11 }
 0x225   : > { %9734 = vmatmul.mubr.msk.f32.gmra.mxu0 %vm362_vm0, %v12623_v5  ;;  %9782 = vmatprep.mubr.msk.f32.mxu1 %vm362_vm0, %v12598_v20 }
 0x226   : > { %9736 = vmatprep.mubr.msk.f32.mxu0 %vm362_vm0, %v12756_v26 }
 0x228   : > { %9783 = vmatmul.mubr.msk.f32.gmra.mxu1 %vm362_vm0, %v12609_v24 }
 0x229   : > { %9737 = vmatmul.mubr.msk.f32.gmra.mxu0 %vm362_vm0, %v12767_v41  ;;  %9785 = vmatprep.mubr.msk.f32.mxu1 %vm362_vm0, %v12612_v43 }
 0x22a   : > { %9739 = vmatprep.mubr.msk.f32.mxu0 %vm362_vm0, %v12770_v57 }
 0x22c   : > { %9786 = vmatmul.mubr.msk.f32.gmra.mxu1 %vm362_vm0, %v12623_v5 }
 0x22d   : > { %9740 = vmatmul.mubr.msk.f32.gmra.mxu0 %vm362_vm0, %v12781_v7  ;;  %9788 = vmatprep.mubr.msk.f32.mxu1 %vm362_vm0, %v12756_v26 }
 0x22e   : > { %9798 = vmatprep.mubr.msk.f32.mxu0 %vm362_vm0, %v12449_v28 }
 0x230   : > { %9789 = vmatmul.mubr.msk.f32.gmra.mxu1 %vm362_vm0, %v12767_v41 }
 0x231   : > { %9799 = vmatmul.mubr.msk.f32.vlgmr.msra.gmra.mxu0 %vm362_vm0, %v12463_v53  ;;  %9791 = vmatprep.mubr.msk.f32.mxu1 %vm362_vm0, %v12770_v57 }
 0x232   : > { %9801 = vmatprep.mubr.msk.f32.mxu0 %vm362_vm0, %v12469_v1 }
 0x234   : > { %9792 = vmatmul.mubr.msk.f32.gmra.mxu1 %vm362_vm0, %v12781_v7 }
 0x235   : > { %9802 = vmatmul.mubr.msk.f32.gmra.mxu0 %vm362_vm0, %v12483_v22  ;;  %9850 = vmatprep.mubr.msk.f32.mxu1 %vm362_vm0, %v12449_v28 }
 0x236   : > { %9804 = vmatprep.mubr.msk.f32.mxu0 %vm362_vm0, %v12486_v56 }
 0x238   : > { %9851 = vmatmul.mubr.msk.f32.vlgmr.msra.gmra.mxu1 %vm362_vm0, %v12463_v53 }
 0x239   : > { %9805 = vmatmul.mubr.msk.f32.gmra.mxu0 %vm362_vm0, %v12497_v59  ;;  %9853 = vmatprep.mubr.msk.f32.mxu1 %vm362_vm0, %v12469_v1  ;;  %v9528_v61 = vpop.f32.mrf.mxu0 }
 0x23a   : > { %9807 = vmatprep.mubr.msk.f32.mxu0 %vm362_vm0, %v12500_v27  ;;  %v2519_v45 = vadd.f32 %v9528_v61, %v12810_v21  ;;  %v12907_v61 = vld [vmem:[%s16621_s2 + $0x150] sm:$0xff] }
 0x23b   : > { %v12821_v60 = vpop.f32.mrf.mxu0 }
 0x23c   : > { %17063 = vst [vmem:[#allocation49_spill] sm:$0xff] %v12821_v60  ;;  %9854 = vmatmul.mubr.msk.f32.gmra.mxu1 %vm362_vm0, %v12483_v22  ;;  %v12836_v17 = vmul.f32 0.35355338, %v2519_v45  ;;  %v12912_v45 = vld [vmem:[%s16621_s2 + $0x270] sm:$0xff] }
 0x23d   : > { %9808 = vmatmul.mubr.msk.f32.gmra.mxu0 %vm362_vm0, %v12511_v32  ;;  %9856 = vmatprep.mubr.msk.f32.mxu1 %vm362_vm0, %v12486_v56  ;;  %v9529_v13 = vpop.f32.mrf.mxu0  ;;  %v8549_v60 = vld [vmem:[%s16621_s2 + $0x330] sm:$0xff] }
 0x23e   : > { %9810 = vmatprep.mubr.msk.f32.mxu0 %vm362_vm0, %v12514_v47  ;;  %17064 = vst [vmem:[#allocation59_spill] sm:$0xff] %v12836_v17  ;;  %v2522_v8 = vadd.f32 %v9529_v13, %v12826_v42  ;;  %v12976_v17 = vld [vmem:[%s16621_s2 + $0x158] sm:$0xff] }
 0x23f   : > { %v12860_v37 = vpop.f32.mrf.mxu0 }
 0x240   : > { %9857 = vmatmul.mubr.msk.f32.gmra.mxu1 %vm362_vm0, %v12497_v59  ;;  %v12841_v10 = vmul.f32 0.35355338, %v2522_v8  ;;  %17067 = vst [vmem:[#allocation69_spill] sm:$0xff] %v12860_v37  ;;  %v8545_v37 = vld [vmem:[%s16621_s2 + $0x210] sm:$0xff] }
 0x241   : > { %9811 = vmatmul.mubr.msk.f32.gmra.mxu0 %vm362_vm0, %v12525_v48  ;;  %9859 = vmatprep.mubr.msk.f32.mxu1 %vm362_vm0, %v12500_v27  ;;  %v9536_v38 = vpop.f32.mrf.mxu1 }
 0x242   : > { %17065 = vst [vmem:[#allocation21_spill] sm:$0xff] %v12841_v10  ;;  %9813 = vmatprep.mubr.msk.f32.mxu0 %vm362_vm0, %v12528_v46  ;;  %v2576_v49 = vadd.f32 %v9536_v38, %v12810_v21  ;;  %v12922_v38 = vld [vmem:[%s16624_s5 + $0x8] sm:$0xff] }
 0x243   : > { %v12852_v36 = vpop.f32.mrf.mxu1 }
 0x244   : > { %17066 = vst [vmem:[#allocation67_spill] sm:$0xff] %v12852_v36  ;;  %9860 = vmatmul.mubr.msk.f32.gmra.mxu1 %vm362_vm0, %v12511_v32  ;;  %v12864_v51 = vmul.f32 0.35355338, %v2576_v49 }
 0x245   : > { %9814 = vmatmul.mubr.msk.f32.gmra.mxu0 %vm362_vm0, %v12539_v14  ;;  %9862 = vmatprep.mubr.msk.f32.mxu1 %vm362_vm0, %v12514_v47  ;;  %v9537_v62 = vpop.f32.mrf.mxu1 }
 0x246   : > { %9816 = vmatprep.mubr.msk.f32.mxu0 %vm362_vm0, %v12542_v44  ;;  %17068 = vst [vmem:[#allocation68_spill] sm:$0xff] %v12864_v51  ;;  %v2579_v12 = vadd.f32 %v9537_v62, %v12826_v42  ;;  %v12925_v62 = vld [vmem:[%s12353_s8 + $0x120] sm:$0xff]  ;;  %v12951_v51 = vmul.f32 %v12902_v35, %v12359_v2 }
 0x247   : > { %v12897_v40 = vpop.f32.mrf.mxu1 }
 0x248   : > { %9863 = vmatmul.mubr.msk.f32.gmra.mxu1 %vm362_vm0, %v12525_v48  ;;  %v12869_v15 = vmul.f32 0.35355338, %v2579_v12  ;;  %17070 = vst [vmem:[#allocation66_spill] sm:$0xff] %v12897_v40  ;;  %v8543_v12 = vld [vmem:[%s16621_s2 + $0x200] sm:$0xff] }
 0x249   : > { %9817 = vmatmul.mubr.msk.f32.gmra.mxu0 %vm362_vm0, %v12553_v0  ;;  %9865 = vmatprep.mubr.msk.f32.mxu1 %vm362_vm0, %v12528_v46  ;;  %v9544_v54 = vpop.f32.mrf.mxu0  ;;  %v12986_v36 = vmul.f32 %v8543_v12, %v12925_v62 }
 0x24a   : > { %17069 = vst [vmem:[#allocation70_spill] sm:$0xff] %v12869_v15  ;;  %9819 = vmatprep.mubr.msk.f32.mxu0 %vm362_vm0, %v12556_v39  ;;  %v2633_v63 = vadd.f32 %v9544_v54, %v12810_v21  ;;  %v12932_v54 = vmul.f32 %v12891_v50, %v12359_v2  ;;  %v12966_v15 = vld [vmem:[%s12353_s8 + $0x130] sm:$0xff]  ;;  %v12971_v2 = vld [vmem:[%s16621_s2 + $0x268] sm:$0xff] }
 0x24b   : > { %v2624_v9 = vpop.f32.mrf.mxu0  ;;  %17077 = vst [vmem:[#allocation28_spill] sm:$0xff] %v12986_v36  ;;  %v13003_v12 = vmul.f32 %v8545_v37, %v12966_v15 }
 0x24c   : > { %9866 = vmatmul.mubr.msk.f32.gmra.mxu1 %vm362_vm0, %v12539_v14  ;;  %v2625_v52 = vadd.f32 %v2624_v9, %v12883_v23  ;;  %v12916_v13 = vmul.f32 0.35355338, %v2633_v63 }
 0x24d   : > { %9820 = vmatmul.mubr.msk.f32.gmra.mxu0 %vm362_vm0, %v12567_v6  ;;  %9868 = vmatprep.mubr.msk.f32.mxu1 %vm362_vm0, %v12542_v44  ;;  %v9545_v29 = vpop.f32.mrf.mxu0  ;;  %17079 = vst [vmem:[#allocation27_spill] sm:$0xff] %v13003_v12 }
 0x24e   : > { %9822 = vmatprep.mubr.msk.f32.mxu0 %vm362_vm0, %v12570_v19  ;;  %17071 = vst [vmem:[#allocation24_spill] sm:$0xff] %v12916_v13  ;;  %v2636_v8 = vadd.f32 %v9545_v29, %v12826_v42  ;;  %v12936_v63 = vmul.f32 0.35355338, %v2625_v52  ;;  %v12955_v52 = vmul.f32 %v12907_v61, %v12384_v34  ;;  %v13010_v13 = vmul.f32 %v12947_v30, %v12378_v31 }
 0x24f   : > { %v2627_v49 = vpop.f32.mrf.mxu0 }
 0x250   : > { %9869 = vmatmul.mubr.msk.f32.gmra.mxu1 %vm362_vm0, %v12553_v0  ;;  %17072 = vst [vmem:[#allocation79_spill] sm:$0xff] %v12936_v63  ;;  %v12938_v9 = vmul.f32 0.35355338, %v2636_v8  ;;  %v2628_v29 = vadd.f32 %v2627_v49, %v12922_v38  ;;  %17074 = vst [vmem:[#allocation14_spill] sm:$0xff] %v12955_v52  ;;  %v12959_v8 = vmul.f32 %v12912_v45, %v12384_v34 }
 0x251   : > { %9823 = vmatmul.mubr.msk.f32.gmra.mxu0 %vm362_vm0, %v12581_v3  ;;  %9871 = vmatprep.mubr.msk.f32.mxu1 %vm362_vm0, %v12556_v39  ;;  %v9552_v49 = vpop.f32.mrf.mxu1 }
 0x252   : > { %17073 = vst [vmem:[#allocation72_spill] sm:$0xff] %v12938_v9  ;;  %17075 = vst [vmem:[#allocation85_spill] sm:$0xff] %v12959_v8  ;;  %9825 = vmatprep.mubr.msk.f32.mxu0 %vm362_vm0, %v12584_v33  ;;  %v2690_v10 = vadd.f32 %v9552_v49, %v12810_v21  ;;  %v12983_v40 = vmul.f32 0.35355338, %v2628_v29  ;;  %v12997_v8 = vld [vmem:[%s16621_s2 + $0x278] sm:$0xff]  ;;  %v13000_v29 = vmul.f32 %v8547_v25, %v12925_v62 }
 0x253   : > { %v2681_v34 = vpop.f32.mrf.mxu1  ;;  %v13006_v49 = vmul.f32 %v8549_v60, %v12966_v15  ;;  %v13019_v25 = vmul.f32 %v12971_v2, %v12378_v31  ;;  %v13023_v60 = vmul.f32 %v12976_v17, %v12396_v58  ;;  %v13031_v9 = vmul.f32 %v12997_v8, %v12396_v58 }
 0x254   : > { %17076 = vst [vmem:[#allocation58_spill] sm:$0xff] %v12983_v40  ;;  %17078 = vst [vmem:[#allocation20_spill] sm:$0xff] %v13000_v29  ;;  %9872 = vmatmul.mubr.msk.f32.gmra.mxu1 %vm362_vm0, %v12567_v6  ;;  %v2682_v36 = vadd.f32 %v2681_v34, %v12883_v23  ;;  %v13035_v34 = vmul.f32 %v12947_v30, %v12423_v18  ;;  %v13039_v31 = vmul.f32 %v12971_v2, %v12423_v18 }
 0x255   : > { %17080 = vst [vmem:[#allocation73_spill] sm:$0xff] %v13006_v49  ;;  %9826 = vmatmul.mubr.msk.f32.gmra.mxu0 %vm362_vm0, %v12595_v11  ;;  %9874 = vmatprep.mubr.msk.f32.mxu1 %vm362_vm0, %v12570_v19  ;;  %v9553_v37 = vpop.f32.mrf.mxu1  ;;  %v13043_v63 = vmul.f32 0.35355338, %v2690_v10  ;;  %v13048_v49 = vmul.f32 %v12891_v50, %v12402_v16  ;;  %v13052_v58 = vmul.f32 %v12902_v35, %v12402_v16 }
 0x256   : > { %17081 = vst [vmem:[#allocation39_spill] sm:$0xff] %v13035_v34  ;;  %17082 = vst [vmem:[#allocation23_spill] sm:$0xff] %v13039_v31  ;;  %9828 = vmatprep.mubr.msk.f32.mxu0 %vm362_vm0, %v12598_v20  ;;  %v2693_v40 = vadd.f32 %v9553_v37, %v12826_v42  ;;  %v13056_v29 = vmul.f32 %v12976_v17, %v12443_v4  ;;  %v13060_v52 = vmul.f32 %v12997_v8, %v12443_v4 }
 0x257   : > { %17083 = vst [vmem:[#allocation8_spill] sm:$0xff] %v13043_v63  ;;  %17084 = vst [vmem:[#allocation18_spill] sm:$0xff] %v13048_v49  ;;  %v2684_v12 = vpop.f32.mrf.mxu1  ;;  %v13064_v10 = vmul.f32 %v12907_v61, %v12429_v55  ;;  %v13068_v37 = vmul.f32 %v12912_v45, %v12429_v55 }
 0x258   : > { %17085 = vst [vmem:[#allocation74_spill] sm:$0xff] %v13052_v58  ;;  %17086 = vst [vmem:[#allocation90_spill] sm:$0xff] %v13056_v29  ;;  %9875 = vmatmul.mubr.msk.f32.gmra.mxu1 %vm362_vm0, %v12581_v3  ;;  %v13072_v58 = vmul.f32 0.35355338, %v2682_v36  ;;  %v13074_v49 = vmul.f32 0.35355338, %v2693_v40  ;;  %v2685_v29 = vadd.f32 %v2684_v12, %v12922_v38  ;;  %v13091_v36 = vmul.f32 %v12891_v50, %v12449_v28 }
 0x259   : > { %17087 = vst [vmem:[#allocation31_spill] sm:$0xff] %v13060_v52  ;;  %17088 = vst [vmem:[#allocation25_spill] sm:$0xff] %v13064_v10  ;;  %v13079_v52 = vmul.f32 %v12947_v30, %v12463_v53  ;;  %9829 = vmatmul.mubr.msk.f32.gmra.mxu0 %vm362_vm0, %v12609_v24  ;;  %9877 = vmatprep.mubr.msk.f32.mxu1 %vm362_vm0, %v12584_v33  ;;  %v13087_v10 = vmul.f32 %v12971_v2, %v12463_v53 }
 0x25a   : > { %17089 = vst [vmem:[#allocation75_spill] sm:$0xff] %v13068_v37  ;;  %17090 = vst [vmem:[#allocation11_spill] sm:$0xff] %v13072_v58  ;;  %v9560_v37 = vpop.f32.mrf.mxu0  ;;  %v13095_v40 = vmul.f32 %v12902_v35, %v12449_v28  ;;  %9831 = vmatprep.mubr.msk.f32.mxu0 %vm362_vm0, %v12612_v43  ;;  %v13102_v31 = vmul.f32 0.35355338, %v2685_v29  ;;  %v13118_v12 = vmul.f32 %v12912_v45, %v12469_v1 }
 0x25b   : > { %17091 = vst [vmem:[#allocation13_spill] sm:$0xff] %v13074_v49  ;;  %17092 = vst [vmem:[#allocation34_spill] sm:$0xff] %v13079_v52  ;;  %v2747_v52 = vadd.f32 %v9560_v37, %v12810_v21  ;;  %v13122_v29 = vmul.f32 %v12947_v30, %v12497_v59  ;;  %v13131_v49 = vmul.f32 %v12971_v2, %v12497_v59 }
 0x25c   : > { %17093 = vst [vmem:[#allocation76_spill] sm:$0xff] %v13087_v10  ;;  %17094 = vst [vmem:[#allocation33_spill] sm:$0xff] %v13091_v36  ;;  %v13106_v10 = vmul.f32 %v12976_v17, %v12483_v22  ;;  %v2738_v34 = vpop.f32.mrf.mxu0  ;;  %v13110_v36 = vmul.f32 %v12997_v8, %v12483_v22  ;;  %9878 = vmatmul.mubr.msk.f32.gmra.mxu1 %vm362_vm0, %v12595_v11  ;;  %v13143_v37 = vmul.f32 %v12902_v35, %v12486_v56 }
 0x25d   : > { %17095 = vst [vmem:[#allocation93_spill] sm:$0xff] %v13095_v40  ;;  %17096 = vst [vmem:[#allocation96_spill] sm:$0xff] %v13102_v31  ;;  %v13114_v40 = vmul.f32 %v12907_v61, %v12469_v1  ;;  %v2739_v63 = vadd.f32 %v2738_v34, %v12883_v23  ;;  %9832 = vmatmul.mubr.msk.f32.gmra.mxu0 %vm362_vm0, %v12623_v5  ;;  %9880 = vmatprep.mubr.msk.f32.mxu1 %vm362_vm0, %v12598_v20  ;;  %v13153_v31 = vmul.f32 0.35355338, %v2747_v52 }
 0x25e   : > { %17097 = vst [vmem:[#allocation71_spill] sm:$0xff] %v13106_v10  ;;  %17098 = vst [vmem:[#allocation77_spill] sm:$0xff] %v13110_v36  ;;  %v13147_v34 = vmul.f32 %v12976_v17, %v12511_v32  ;;  %v13151_v58 = vmul.f32 %v12997_v8, %v12511_v32  ;;  %9834 = vmatprep.mubr.msk.f32.mxu0 %vm362_vm0, %v12756_v26  ;;  %v13172_v52 = vmul.f32 %v12971_v2, %v12525_v48 }
 0x25f   : > { %17099 = vst [vmem:[#allocation32_spill] sm:$0xff] %v13114_v40  ;;  %17100 = vst [vmem:[#allocation78_spill] sm:$0xff] %v13118_v12  ;;  %v13135_v40 = vmul.f32 %v12891_v50, %v12486_v56  ;;  %v9561_v12 = vpop.f32.mrf.mxu0 }
 0x260   : > { %17101 = vst [vmem:[#allocation45_spill] sm:$0xff] %v13122_v29  ;;  %17102 = vst [vmem:[#allocation87_spill] sm:$0xff] %v13131_v49  ;;  %v13160_v49 = vmul.f32 %v12907_v61, %v12500_v27  ;;  %v13168_v29 = vmul.f32 %v12947_v30, %v12525_v48  ;;  %9881 = vmatmul.mubr.msk.f32.gmra.mxu1 %vm362_vm0, %v12609_v24 }
 0x261   : > { %17103 = vst [vmem:[#allocation88_spill] sm:$0xff] %v13135_v40  ;;  %17104 = vst [vmem:[#allocation86_spill] sm:$0xff] %v13143_v37  ;;  %v2750_v40 = vadd.f32 %v9561_v12, %v12826_v42  ;;  %v13164_v37 = vmul.f32 %v12912_v45, %v12500_v27  ;;  %v13176_v12 = vmul.f32 %v12891_v50, %v12514_v47  ;;  %9835 = vmatmul.mubr.msk.f32.gmra.mxu0 %vm362_vm0, %v12767_v41 }
 0x262   : > { %17105 = vst [vmem:[#allocation91_spill] sm:$0xff] %v13147_v34  ;;  %17106 = vst [vmem:[#allocation64_spill] sm:$0xff] %v13151_v58  ;;  %v2741_v34 = vpop.f32.mrf.mxu0  ;;  %v13182_v58 = vmul.f32 0.35355338, %v2739_v63  ;;  %9883 = vmatprep.mubr.msk.f32.mxu1 %vm362_vm0, %v12612_v43  ;;  %v13199_v63 = vmul.f32 %v12997_v8, %v12539_v14  ;;  %9837 = vmatprep.mubr.msk.f32.mxu0 %vm362_vm0, %v12770_v57 }
 0x263   : > { %17107 = vst [vmem:[#allocation40_spill] sm:$0xff] %v13153_v31  ;;  %17108 = vst [vmem:[#allocation62_spill] sm:$0xff] %v13160_v49  ;;  %v13180_v49 = vmul.f32 %v12902_v35, %v12514_v47 }
 0x264   : > { %17109 = vst [vmem:[#allocation35_spill] sm:$0xff] %v13164_v37  ;;  %17110 = vst [vmem:[#allocation80_spill] sm:$0xff] %v13168_v29  ;;  %v13186_v37 = vmul.f32 0.35355338, %v2750_v40  ;;  %v2742_v29 = vadd.f32 %v2741_v34, %v12922_v38  ;;  %v13203_v40 = vmul.f32 %v12907_v61, %v12528_v46  ;;  %v13207_v34 = vmul.f32 %v12912_v45, %v12528_v46 }
 0x265   : > { %17111 = vst [vmem:[#allocation7_spill] sm:$0xff] %v13172_v52  ;;  %17112 = vst [vmem:[#allocation81_spill] sm:$0xff] %v13176_v12  ;;  %v13191_v52 = vmul.f32 %v12976_v17, %v12539_v14  ;;  %v9568_v12 = vpop.f32.mrf.mxu1  ;;  %9884 = vmatmul.mubr.msk.f32.gmra.mxu1 %vm362_vm0, %v12623_v5  ;;  %9838 = vmatmul.mubr.msk.f32.gmra.mxu0 %vm362_vm0, %v12781_v7 }
 0x266   : > { %17113 = vst [vmem:[#allocation30_spill] sm:$0xff] %v13180_v49  ;;  %17114 = vst [vmem:[#allocation19_spill] sm:$0xff] %v13182_v58  ;;  %v2804_v49 = vadd.f32 %v9568_v12, %v12810_v21  ;;  %v13214_v36 = vmul.f32 0.35355338, %v2742_v29  ;;  %v13230_v12 = vmul.f32 %v12902_v35, %v12542_v44  ;;  %v13234_v29 = vmul.f32 %v12976_v17, %v12567_v6 }
 0x267   : > { %17115 = vst [vmem:[#allocation29_spill] sm:$0xff] %v13186_v37  ;;  %17116 = vst [vmem:[#allocation22_spill] sm:$0xff] %v13191_v52  ;;  %v2795_v10 = vpop.f32.mrf.mxu1  ;;  %v13243_v37 = vmul.f32 %v12997_v8, %v12567_v6  ;;  %9886 = vmatprep.mubr.msk.f32.mxu1 %vm362_vm0, %v12756_v26  ;;  %v13259_v52 = vmul.f32 %v12947_v30, %v12581_v3  ;;  %v13263_v6 = vmul.f32 %v12971_v2, %v12581_v3  ;;  %v13271_v26 = vld [vmem:[%s12353_s8 + $0x128] sm:$0xff] }
 0x268   : > { %17117 = vst [vmem:[#allocation17_spill] sm:$0xff] %v13199_v63  ;;  %17118 = vst [vmem:[#allocation26_spill] sm:$0xff] %v13203_v40  ;;  %v13218_v63 = vmul.f32 %v12947_v30, %v12553_v0  ;;  %v13222_v40 = vmul.f32 %v12971_v2, %v12553_v0  ;;  %v2796_v31 = vadd.f32 %v2795_v10, %v12883_v23  ;;  %v13265_v58 = vmul.f32 0.35355338, %v2804_v49 }
 0x269   : > { %17119 = vst [vmem:[#allocation101_spill] sm:$0xff] %v13207_v34  ;;  %17120 = vst [vmem:[#allocation82_spill] sm:$0xff] %v13214_v36  ;;  %v13226_v34 = vmul.f32 %v12891_v50, %v12542_v44  ;;  %v13247_v44 = vmul.f32 %v12907_v61, %v12556_v39  ;;  %v13255_v10 = vmul.f32 %v12912_v45, %v12556_v39  ;;  %9840 = vmatprep.mubr.msk.f32.mxu0 %vm362_vm0, %v12925_v62 }
 0x26a   : > { %17121 = vst [vmem:[#allocation89_spill] sm:$0xff] %v13218_v63  ;;  %17122 = vst [vmem:[#allocation36_spill] sm:$0xff] %v13222_v40  ;;  %v13275_v39 = vmul.f32 %v12891_v50, %v12570_v19  ;;  %v13283_v49 = vmul.f32 %v12976_v17, %v12595_v11  ;;  %9887 = vmatmul.mubr.msk.f32.gmra.mxu1 %vm362_vm0, %v12767_v41  ;;  %9841 = vmatmul.mubr.msk.f32.gmra.mxu0 %vm362_vm0, %v13271_v26 }
 0x26b   : > { %17123 = vst [vmem:[#allocation94_spill] sm:$0xff] %v13226_v34  ;;  %17124 = vst [vmem:[#allocation92_spill] sm:$0xff] %v13230_v12  ;;  %9889 = vmatprep.mubr.msk.f32.mxu1 %vm362_vm0, %v12770_v57  ;;  %v13322_v41 = vmul.f32 %v12971_v2, %v12609_v24  ;;  %v13340_v57 = vld [vmem:[%s16621_s2 + $0x1a0] sm:$0xff]  ;;  %9843 = vmatprep.mubr.msk.f32.mxu0 %vm362_vm0, %v12966_v15 }
 0x26c   : > { %17125 = vst [vmem:[#allocation97_spill] sm:$0xff] %v13234_v29  ;;  %17126 = vst [vmem:[#allocation46_spill] sm:$0xff] %v13243_v37  ;;  %v9569_v29 = vpop.f32.mrf.mxu1 }
 0x26d   : > { %17127 = vst [vmem:[#allocation83_spill] sm:$0xff] %v13247_v44  ;;  %17128 = vst [vmem:[#allocation44_spill] sm:$0xff] %v13255_v10  ;;  %v2807_v36 = vadd.f32 %v9569_v29, %v12826_v42  ;;  %v13279_v10 = vmul.f32 %v12902_v35, %v12570_v19  ;;  %v13287_v29 = vmul.f32 %v12997_v8, %v12595_v11 }
 0x26e   : > { %17129 = vst [vmem:[#allocation95_spill] sm:$0xff] %v13259_v52  ;;  %17130 = vst [vmem:[#allocation84_spill] sm:$0xff] %v13263_v6  ;;  %v2798_v3 = vpop.f32.mrf.mxu1  ;;  %v13291_v44 = vmul.f32 %v12907_v61, %v12584_v33  ;;  %v13297_v6 = vmul.f32 0.35355338, %v2796_v31  ;;  %v13306_v11 = vmul.f32 %v12947_v30, %v12609_v24  ;;  %v13318_v31 = vld [vmem:[%s12353_s8 + $0x138] sm:$0xff]  ;;  %v13326_v30 = vmul.f32 %v12891_v50, %v12598_v20 }
 0x26f   : > { %17131 = vst [vmem:[#allocation43_spill] sm:$0xff] %v13265_v58  ;;  %17132 = vst [vmem:[#allocation42_spill] sm:$0xff] %v13275_v39  ;;  %v13295_v39 = vmul.f32 %v12912_v45, %v12584_v33  ;;  %v13299_v19 = vmul.f32 0.35355338, %v2807_v36  ;;  %v9576_v33 = vpop.f32.mrf.mxu0  ;;  %v13330_v36 = vmul.f32 %v12902_v35, %v12598_v20  ;;  %v13351_v20 = vmul.f32 %v12976_v17, %v12623_v5  ;;  %v13356_v35 = vld [vmem:[%s16621_s2 + $0x2c0] sm:$0xff]  ;;  %v13361_v24 = vld [vmem:[%s16621_s2 + $0x1b8] sm:$0xff] }
 0x270   : > { %17133 = vst [vmem:[#allocation37_spill] sm:$0xff] %v13279_v10  ;;  %17134 = vst [vmem:[#allocation98_spill] sm:$0xff] %v13283_v49  ;;  %v2799_v10 = vadd.f32 %v2798_v3, %v12922_v38  ;;  %v13335_v3 = vld [vmem:[%s16621_s2 + $0x2c8] sm:$0xff]  ;;  %v2861_v50 = vadd.f32 %v9576_v33, %v12810_v21  ;;  %v13370_v17 = vmul.f32 %v12997_v8, %v12623_v5  ;;  %v13392_v5 = vld [vmem:[%s16621_s2 + $0x2d0] sm:$0xff]  ;;  %9890 = vmatmul.mubr.msk.f32.gmra.mxu1 %vm362_vm0, %v12781_v7 }
 0x271   : > { %17135 = vst [vmem:[#allocation61_spill] sm:$0xff] %v13287_v29  ;;  %17136 = vst [vmem:[#allocation15_spill] sm:$0xff] %v13291_v44  ;;  %v13311_v44 = vld [vmem:[%s16621_s2 + $0x1a8] sm:$0xff]  ;;  %v2852_v33 = vpop.f32.mrf.mxu0  ;;  %v13374_v58 = vmul.f32 %v12907_v61, %v12612_v43  ;;  %v13405_v8 = vmul.f32 %v13340_v57, %v12402_v16  ;;  %9844 = vmatmul.mubr.msk.f32.gmra.mxu0 %vm362_vm0, %v13318_v31  ;;  %9892 = vmatprep.mubr.msk.f32.mxu1 %vm362_vm0, %v12925_v62  ;;  %v17220_v52 = vld [vmem:[#allocation93_spill] sm:$0xff] }
 0x272   : > { %17137 = vst [vmem:[#allocation56_spill] sm:$0xff] %v13295_v39  ;;  %17138 = vst [vmem:[#allocation100_spill] sm:$0xff] %v13297_v6  ;;  %v13344_v2 = vmul.f32 0.35355338, %v2799_v10  ;;  %v13366_v10 = vld [vmem:[%s16621_s2 + $0x2d8] sm:$0xff]  ;;  %v13382_v39 = vmul.f32 %v13311_v44, %v12423_v18  ;;  %v13417_v7 = vmul.f32 %v13361_v24, %v12443_v4 }
 0x273   : > { %17139 = vst [vmem:[#allocation63_spill] sm:$0xff] %v13299_v19  ;;  %17140 = vst [vmem:[#allocation55_spill] sm:$0xff] %v13306_v11  ;;  %v13378_v19 = vmul.f32 %v12912_v45, %v12612_v43  ;;  %v2853_v43 = vadd.f32 %v2852_v33, %v12883_v23  ;;  %v13401_v45 = vmul.f32 %v13335_v3, %v12423_v18  ;;  %v13423_v61 = vmul.f32 0.35355338, %v2861_v50 }
 0x274   : > { %17141 = vst [vmem:[#allocation38_spill] sm:$0xff] %v13322_v41  ;;  %17142 = vst [vmem:[#allocation102_spill] sm:$0xff] %v13326_v30  ;;  %v13413_v33 = vmul.f32 %v13356_v35, %v12402_v16  ;;  %v13421_v18 = vmul.f32 %v13366_v10, %v12443_v4  ;;  %v13432_v16 = vmul.f32 %v13392_v5, %v12429_v55  ;;  %v13442_v4 = vld [vmem:[%s16621_s2 + $0x248] sm:$0xff]  ;;  %9893 = vmatmul.mubr.msk.f32.gmra.mxu1 %vm362_vm0, %v13271_v26 }
 0x275   : > { %17143 = vst [vmem:[#allocation99_spill] sm:$0xff] %v13330_v36  ;;  %17144 = vst [vmem:[#allocation103_spill] sm:$0xff] %v13344_v2  ;;  %v13450_v50 = vmul.f32 %v13335_v3, %v12463_v53  ;;  %v13484_v26 = vld [vmem:[%s16622_s3 + $0x48] sm:$0xff]  ;;  %9895 = vmatprep.mubr.msk.f32.mxu1 %vm362_vm0, %v12966_v15  ;;  %v13510_v15 = vld [vmem:[%s16621_s2 + $0x240] sm:$0xff] }
 0x276   : > { %17145 = vst [vmem:[#allocation52_spill] sm:$0xff] %v13351_v20  ;;  %17146 = vst [vmem:[#allocation6_spill] sm:$0xff] %v13370_v17  ;;  %v13387_v20 = vld [vmem:[%s16621_s2 + $0x1b0] sm:$0xff] }
 0x277   : > { %17147 = vst [vmem:[#allocation12_spill] sm:$0xff] %v13374_v58  ;;  %17148 = vst [vmem:[#allocation47_spill] sm:$0xff] %v13378_v19  ;;  %v9577_v19 = vpop.f32.mrf.mxu0  ;;  %v13428_v2 = vmul.f32 %v13387_v20, %v12429_v55  ;;  %v13454_v55 = vmul.f32 %v13340_v57, %v12449_v28 }
 0x278   : > { %17149 = vst [vmem:[#allocation50_spill] sm:$0xff] %v13382_v39  ;;  %17150 = vst [vmem:[#allocation16_spill] sm:$0xff] %v13401_v45  ;;  %v2864_v6 = vadd.f32 %v9577_v19, %v12826_v42  ;;  %v13446_v19 = vmul.f32 %v13311_v44, %v12463_v53  ;;  %v13467_v53 = vmul.f32 %v13361_v24, %v12483_v22  ;;  %9896 = vmatmul.mubr.msk.f32.gmra.mxu1 %vm362_vm0, %v13318_v31 }
 0x279   : > { %17151 = vst [vmem:[#allocation54_spill] sm:$0xff] %v13405_v8  ;;  %17152 = vst [vmem:[#allocation9_spill] sm:$0xff] %v13413_v33  ;;  %v2855_v62 = vpop.f32.mrf.mxu0  ;;  %v13561_v31 = vmul.f32 %v13356_v35, %v12486_v56 }
 0x27a   : > { %17153 = vst [vmem:[#allocation10_spill] sm:$0xff] %v13417_v7  ;;  %17154 = vst [vmem:[#allocation48_spill] sm:$0xff] %v13421_v18  ;;  %v13437_v7 = vld [vmem:[%s16621_s2 + $0x128] sm:$0xff]  ;;  %v2856_v58 = vadd.f32 %v2855_v62, %v12922_v38  ;;  %v9584_v18 = vpop.f32.mrf.mxu1 }
 0x27b   : > { %17155 = vst [vmem:[#allocation51_spill] sm:$0xff] %v13423_v61  ;;  %17156 = vst [vmem:[#allocation41_spill] sm:$0xff] %v13428_v2  ;;  %v13460_v2 = vmul.f32 0.35355338, %v2864_v6  ;;  %v9592_v6 = vpop.f32.mrf.mxu0  ;;  %v13479_v62 = vld [vmem:[%s16622_s3 + $0x28] sm:$0xff] }
 0x27c   : > { %17157 = vst [vmem:[#allocation65_spill] sm:$0xff] %v13432_v16  ;;  %17158 = vst [vmem:[#allocation53_spill] sm:$0xff] %v13446_v19  ;;  %v13458_v16 = vmul.f32 %v13356_v35, %v12449_v28  ;;  %v2918_v28 = vadd.f32 %v9584_v18, %v12810_v21  ;;  %v13495_v21 = vmul.f32 %v13387_v20, %v12469_v1  ;;  %v2909_v19 = vpop.f32.mrf.mxu1 }
 0x27d   : > { %17159 = vst [vmem:[#allocation57_spill] sm:$0xff] %v13450_v50  ;;  %17160 = vst [vmem:[#allocation60_spill] sm:$0xff] %v13454_v55  ;;  %v13471_v50 = vmul.f32 %v13366_v10, %v12483_v22  ;;  %v13473_v55 = vmul.f32 0.35355338, %v2853_v43  ;;  %v13489_v22 = vld [vmem:[%s16621_s2 + $0x120] sm:$0xff]  ;;  %v13499_v43 = vmul.f32 %v13392_v5, %v12469_v1  ;;  %v3133_v33 = vpop.f32.mrf.mxu0  ;;  %v13516_v1 = vld [vmem:[%s16621_s2 + $0x138] sm:$0xff]  ;;  %v13529_v18 = vmul.f32 %v13335_v3, %v12497_v59 }
 0x27e   : > { %17161 = vst [vmem:[#allocation2_spill] sm:$0xff] %v13458_v16  ;;  %17162 = vst [vmem:[#allocation3_spill] sm:$0xff] %v13460_v2  ;;  %v3597_v16 = vmul.f32 %v9592_v6, %v13442_v4  ;;  %v9585_v8 = vpop.f32.mrf.mxu1 }
 0x27f   : > { %17163 = vst [vmem:[#allocation4_spill] sm:$0xff] %v13467_v53  ;;  %17164 = vst [vmem:[#allocation5_spill] sm:$0xff] %v13471_v50  ;;  %v13503_v50 = vmul.f32 0.35355338, %v2856_v58  ;;  %v3523_v53 = vmul.f32 %v9592_v6, %v13437_v7  ;;  %v13521_v58 = vld [vmem:[%s16621_s2 + $0x258] sm:$0xff]  ;;  %v13525_v6 = vmul.f32 %v13311_v44, %v12497_v59  ;;  %v13545_v59 = vld [vmem:[%s16622_s3 + $0x20] sm:$0xff] }
 0x280   : > { %17165 = vst [vmem:[#allocation104_spill] sm:$0xff] %v13473_v55  ;;  %17166 = vst [vmem:[#allocation105_spill] sm:$0xff] %v13495_v21  ;;  %v2910_v21 = vadd.f32 %v2909_v19, %v12883_v23  ;;  %v13533_v23 = vmul.f32 %v13340_v57, %v12486_v56  ;;  %v3634_v2 = vadd.f32 %v13484_v26, %v3597_v16  ;;  %v13551_v19 = vld [vmem:[%s16622_s3 + $0x40] sm:$0xff]  ;;  %v13557_v55 = vld [vmem:[%s16622_s3 + $0x38] sm:$0xff] }
 0x281   : > { %17167 = vst [vmem:[#allocation106_spill] sm:$0xff] %v13499_v43  ;;  %17168 = vst [vmem:[#allocation107_spill] sm:$0xff] %v13503_v50  ;;  %v3560_v61 = vadd.f32 %v13479_v62, %v3523_v53  ;;  %v3522_v43 = vmul.f32 %v13489_v22, %v3133_v33  ;;  %v2921_v16 = vadd.f32 %v9585_v8, %v12826_v42  ;;  %v9595_v53 = vpop.f32.mrf.mxu0  ;;  %v13567_v50 = vmul.f32 0.35355338, %v2918_v28  ;;  %v2912_v8 = vpop.f32.mrf.mxu1  ;;  %v13579_v56 = vld [vmem:[%s16621_s2 + $0x288] sm:$0xff] }
 0x282   : > { %17169 = vst [vmem:[#allocation108_spill] sm:$0xff] %v13525_v6  ;;  %17170 = vst [vmem:[#allocation109_spill] sm:$0xff] %v13529_v18  ;;  %v3525_v18 = vmul.f32 %v9595_v53, %v13516_v1  ;;  %v3599_v42 = vmul.f32 %v9595_v53, %v13521_v58  ;;  %v13574_v6 = vld [vmem:[%s16621_s2 + $0x168] sm:$0xff]  ;;  %v3772_v39 = vadd.f32 %v13019_v25, %v3634_v2  ;;  %v13592_v17 = vmul.f32 0.35355338, %v2910_v21 }
 0x283   : > { %17171 = vst [vmem:[#allocation110_spill] sm:$0xff] %v13533_v23  ;;  %v3596_v23 = vmul.f32 %v13510_v15, %v3133_v33  ;;  %17172 = vst [vmem:[#allocation111_spill] sm:$0xff] %v13561_v31  ;;  %v13565_v33 = vmul.f32 %v13361_v24, %v12511_v32  ;;  %v13585_v28 = vmul.f32 0.35355338, %v2921_v16  ;;  %v2913_v31 = vadd.f32 %v2912_v8, %v12922_v38  ;;  %v13588_v53 = vpop.f32.mrf.mxu0  ;;  %v9644_v38 = vpop.f32.mrf.mxu1 }
 0x284   : > { %17174 = vst [vmem:[#allocation113_spill] sm:$0xff] %v13567_v50  ;;  %v3703_v45 = vadd.f32 %v13010_v13, %v3560_v61  ;;  %17177 = vst [vmem:[#allocation116_spill] sm:$0xff] %v13592_v17  ;;  %v3559_v36 = vadd.f32 %v13545_v59, %v3522_v43  ;;  %v3562_v41 = vadd.f32 %v13557_v55, %v3525_v18  ;;  %v13612_v18 = vld [vmem:[%s16621_s2 + $0x160] sm:$0xff] }
 0x285   : > { %17173 = vst [vmem:[#allocation112_spill] sm:$0xff] %v13565_v33  ;;  %v13583_v33 = vmul.f32 %v13366_v10, %v12511_v32  ;;  %17176 = vst [vmem:[#allocation115_spill] sm:$0xff] %v13585_v28  ;;  %v3633_v30 = vadd.f32 %v13551_v19, %v3596_v23  ;;  %v13600_v32 = vld [vmem:[%s16622_s3 + $0x58] sm:$0xff]  ;;  %v13604_v13 = vmul.f32 0.35355338, %v2913_v31  ;;  %v9598_v25 = vpop.f32.mrf.mxu0  ;;  %v3809_v2 = vmul.f32 %v9644_v38, %v13574_v6  ;;  %v3358_v43 = vpop.f32.mrf.mxu1  ;;  %v13617_v23 = vld [vmem:[%s16621_s2 + $0x280] sm:$0xff] }
 0x286   : > { %v3878_v61 = vmul.f32 %v9644_v38, %v13579_v56  ;;  %v3527_v21 = vmul.f32 %v9598_v25, %v13437_v7  ;;  %v13621_v31 = vmul.f32 %v13387_v20, %v12500_v27  ;;  %v13625_v8 = vmul.f32 %v13392_v5, %v12500_v27 }
 0x287   : > { %17175 = vst [vmem:[#allocation114_spill] sm:$0xff] %v13583_v33  ;;  %17178 = vst [vmem:[#allocation117_spill] sm:$0xff] %v13604_v13  ;;  %v13629_v38 = vmul.f32 %v13311_v44, %v12525_v48  ;;  %v3636_v16 = vadd.f32 %v13600_v32, %v3599_v42  ;;  %v13634_v28 = vadd.f32 %v3809_v2, %v3703_v45  ;;  %v3153_v11 = vpop.f32.mrf.mxu0  ;;  %v9647_v27 = vpop.f32.mrf.mxu1 }
 0x288   : > { %17179 = vst [vmem:[#allocation118_spill] sm:$0xff] %v13621_v31  ;;  %17180 = vst [vmem:[#allocation119_spill] sm:$0xff] %v13625_v8  ;;  %v13636_v33 = vadd.f32 %v3878_v61, %v3772_v39  ;;  %v3601_v31 = vmul.f32 %v9598_v25, %v13442_v4  ;;  %v3702_v29 = vadd.f32 %v12932_v54, %v3559_v36  ;;  %v13643_v8 = vld [vmem:[%s16621_s2 + $0x178] sm:$0xff] }
 0x289   : > { %17181 = vst [vmem:[#allocation120_spill] sm:$0xff] %v13629_v38  ;;  %17182 = vst [vmem:[#allocation121_spill] sm:$0xff] %v13634_v28  ;;  %v13647_v42 = vmul.f32 %v13335_v3, %v12525_v48  ;;  %v13651_v45 = vmul.f32 %v13340_v57, %v12514_v47  ;;  %v3771_v39 = vadd.f32 %v12951_v51, %v3633_v30  ;;  %v9601_v36 = vpop.f32.mrf.mxu0  ;;  %v13660_v61 = vld [vmem:[%s16621_s2 + $0x298] sm:$0xff]  ;;  %v13665_v48 = vld [vmem:[%s16621_s2 + $0x130] sm:$0xff] }
 0x28a   : > { %17183 = vst [vmem:[#allocation122_spill] sm:$0xff] %v13636_v33  ;;  %v3808_v25 = vmul.f32 %v13612_v18, %v3358_v43  ;;  %v3877_v54 = vmul.f32 %v13617_v23, %v3358_v43  ;;  %v3705_v2 = vadd.f32 %v13023_v60, %v3562_v41  ;;  %v3564_v50 = vadd.f32 %v13479_v62, %v3527_v21  ;;  %v13670_v43 = vpop.f32.mrf.mxu1 }
 0x28b   : > { %17184 = vst [vmem:[#allocation123_spill] sm:$0xff] %v13647_v42  ;;  %17185 = vst [vmem:[#allocation124_spill] sm:$0xff] %v13651_v45  ;;  %v3526_v51 = vmul.f32 %v13489_v22, %v3153_v11  ;;  %v3600_v30 = vmul.f32 %v13510_v15, %v3153_v11  ;;  %v13674_v60 = vmul.f32 %v13356_v35, %v12514_v47  ;;  %v13682_v42 = vpop.f32.mrf.mxu0 }
 0x28c   : > { %v13676_v41 = vadd.f32 %v3808_v25, %v3702_v29  ;;  %v13678_v17 = vadd.f32 %v3877_v54, %v3771_v39  ;;  %v3774_v13 = vadd.f32 %v13031_v9, %v3636_v16  ;;  %v3811_v45 = vmul.f32 %v9647_v27, %v13643_v8  ;;  %v9650_v33 = vpop.f32.mrf.mxu1  ;;  %v13708_v25 = vld [vmem:[%s16621_s2 + $0x250] sm:$0xff] }
 0x28d   : > { %17186 = vst [vmem:[#allocation125_spill] sm:$0xff] %v13674_v60  ;;  %v3638_v21 = vadd.f32 %v13484_v26, %v3601_v31  ;;  %v3529_v11 = vmul.f32 %v9601_v36, %v13516_v1  ;;  %v3880_v38 = vmul.f32 %v9647_v27, %v13660_v61  ;;  %v13689_v47 = vmul.f32 %v13361_v24, %v12539_v14  ;;  %v9604_v39 = vpop.f32.mrf.mxu0  ;;  %v13703_v27 = vld [vmem:[%s16622_s3 + $0x30] sm:$0xff] }
 0x28e   : > { %17187 = vst [vmem:[#allocation126_spill] sm:$0xff] %v13676_v41  ;;  %17188 = vst [vmem:[#allocation127_spill] sm:$0xff] %v13678_v17  ;;  %v3524_v29 = vmul.f32 %v13665_v48, %v13588_v53  ;;  %v3603_v9 = vmul.f32 %v9601_v36, %v13521_v58  ;;  %v13694_v16 = vadd.f32 %v3811_v45, %v3705_v2  ;;  %v3378_v45 = vpop.f32.mrf.mxu1  ;;  %v10351_v41 = vld [vmem:[%s12353_s8 + $0xa0] sm:$0xff] }
 0x28f   : > { %17189 = vst [vmem:[#allocation128_spill] sm:$0xff] %v13689_v47  ;;  %v13698_v31 = vmul.f32 %v13366_v10, %v12539_v14  ;;  %17192 = vst [vmem:[#allocation131_spill] sm:$0xff] %v13703_v27  ;;  %v3563_v54 = vadd.f32 %v13545_v59, %v3526_v51  ;;  %v13711_v36 = vadd.f32 %v3880_v38, %v3774_v13  ;;  %v3173_v60 = vpop.f32.mrf.mxu0  ;;  %v17199_v51 = vld [vmem:[#allocation23_spill] sm:$0xff] }
 0x290   : > { %17190 = vst [vmem:[#allocation129_spill] sm:$0xff] %v13694_v16  ;;  %v13715_v2 = vmul.f32 %v13387_v20, %v12528_v46  ;;  %v13719_v14 = vmul.f32 %v13392_v5, %v12528_v46  ;;  %v3637_v10 = vadd.f32 %v13551_v19, %v3600_v30  ;;  %v13725_v16 = vmul.f32 %v13311_v44, %v12553_v0  ;;  %v9653_v30 = vpop.f32.mrf.mxu1 }
 0x291   : > { %17191 = vst [vmem:[#allocation130_spill] sm:$0xff] %v13698_v31  ;;  %17193 = vst [vmem:[#allocation132_spill] sm:$0xff] %v13711_v36  ;;  %v17196_v31 = vld [vmem:[#allocation39_spill] sm:$0xff]  ;;  %v13729_v13 = vmul.f32 %v13335_v3, %v12553_v0  ;;  %v3566_v20 = vadd.f32 %v13557_v55, %v3529_v11  ;;  %v3531_v38 = vmul.f32 %v9604_v39, %v13437_v7  ;;  %v9607_v0 = vpop.f32.mrf.mxu0 }
 0x292   : > { %17194 = vst [vmem:[#allocation133_spill] sm:$0xff] %v13715_v2  ;;  %17195 = vst [vmem:[#allocation134_spill] sm:$0xff] %v13719_v14  ;;  %v3707_v47 = vadd.f32 %v17196_v31, %v3564_v50  ;;  %v3776_v46 = vadd.f32 %v17199_v51, %v3638_v21  ;;  %v3813_v5 = vmul.f32 %v9650_v33, %v13574_v6  ;;  %v17201_v21 = vld [vmem:[#allocation18_spill] sm:$0xff] }
 0x293   : > { %17197 = vst [vmem:[#allocation39_spill] sm:$0xff] %v13725_v16  ;;  %17198 = vst [vmem:[#allocation135_spill] sm:$0xff] %v13729_v13  ;;  %v3561_v50 = vadd.f32 %v13703_v27, %v3524_v29  ;;  %v3598_v31 = vmul.f32 %v13708_v25, %v13588_v53  ;;  %v3640_v44 = vadd.f32 %v13600_v32, %v3603_v9  ;;  %v13746_v13 = vpop.f32.mrf.mxu1  ;;  %v17203_v16 = vld [vmem:[#allocation74_spill] sm:$0xff]  ;;  %v13753_v36 = vpop.f32.mrf.mxu0 }
 0x294   : > { %v3882_v14 = vmul.f32 %v9650_v33, %v13579_v56  ;;  %v3528_v3 = vmul.f32 %v13665_v48, %v13682_v42  ;;  %v3605_v11 = vmul.f32 %v9604_v39, %v13442_v4  ;;  %v13743_v2 = vadd.f32 %v3813_v5, %v3707_v47 }
 0x295   : > { %v3706_v51 = vadd.f32 %v17201_v21, %v3563_v54  ;;  %v3775_v53 = vadd.f32 %v17203_v16, %v3637_v10  ;;  %v3812_v9 = vmul.f32 %v13612_v18, %v3378_v45  ;;  %v3881_v33 = vmul.f32 %v13617_v23, %v3378_v45  ;;  %v17204_v54 = vld [vmem:[#allocation90_spill] sm:$0xff]  ;;  %v9656_v21 = vpop.f32.mrf.mxu1  ;;  %v13762_v16 = vld [vmem:[%s16622_s3 + $0x50] sm:$0xff]  ;;  %v17207_v10 = vld [vmem:[#allocation31_spill] sm:$0xff] }
 0x296   : > { %17200 = vst [vmem:[#allocation23_spill] sm:$0xff] %v13743_v2  ;;  %v13748_v29 = vadd.f32 %v3882_v14, %v3776_v46  ;;  %v3568_v17 = vadd.f32 %v13479_v62, %v3531_v38  ;;  %v3530_v47 = vmul.f32 %v13489_v22, %v3173_v60  ;;  %v3604_v39 = vmul.f32 %v13510_v15, %v3173_v60 }
 0x297   : > { %v3709_v5 = vadd.f32 %v17204_v54, %v3566_v20  ;;  %v13764_v14 = vadd.f32 %v3812_v9, %v3706_v51  ;;  %v13766_v45 = vadd.f32 %v3881_v33, %v3775_v53  ;;  %v3778_v46 = vadd.f32 %v17207_v10, %v3640_v44  ;;  %v3398_v2 = vpop.f32.mrf.mxu1  ;;  %v10352_v33 = vld [vmem:[%s12353_s8 + $0xb8] sm:$0xff] }
 0x298   : > { %17202 = vst [vmem:[#allocation18_spill] sm:$0xff] %v13748_v29  ;;  %v3815_v38 = vmul.f32 %v9653_v30, %v13643_v8  ;;  %v9610_v29 = vpop.f32.mrf.mxu0  ;;  %v3642_v60 = vadd.f32 %v13484_v26, %v3605_v11  ;;  %v3533_v20 = vmul.f32 %v9607_v0, %v13516_v1  ;;  %v3884_v54 = vmul.f32 %v9653_v30, %v13660_v61 }
 0x299   : > { %17205 = vst [vmem:[#allocation74_spill] sm:$0xff] %v13764_v14  ;;  %17206 = vst [vmem:[#allocation90_spill] sm:$0xff] %v13766_v45  ;;  %v13775_v28 = vmul.f32 %v10351_v41, %v13340_v57  ;;  %v3607_v51 = vmul.f32 %v9607_v0, %v13521_v58  ;;  %v13781_v44 = vmul.f32 %v10351_v41, %v13356_v35  ;;  %v13793_v57 = vld [vmem:[%s16621_s2 + $0x170] sm:$0xff] }
 0x29a   : > { %v13778_v53 = vadd.f32 %v3815_v38, %v3709_v5  ;;  %v3193_v9 = vpop.f32.mrf.mxu0  ;;  %v13785_v11 = vmul.f32 %v10352_v33, %v13361_v24  ;;  %v3635_v10 = vadd.f32 %v13762_v16, %v3598_v31  ;;  %v3602_v30 = vmul.f32 %v13708_v25, %v13682_v42  ;;  %v13798_v0 = vld [vmem:[%s16621_s2 + $0x290] sm:$0xff]  ;;  %v9659_v24 = vpop.f32.mrf.mxu1  ;;  %v17214_v5 = vld [vmem:[#allocation14_spill] sm:$0xff] }
 0x29b   : > { %17208 = vst [vmem:[#allocation31_spill] sm:$0xff] %v13775_v28  ;;  %17210 = vst [vmem:[#allocation137_spill] sm:$0xff] %v13781_v44  ;;  %v3567_v35 = vadd.f32 %v13545_v59, %v3530_v47  ;;  %v13801_v41 = vadd.f32 %v3884_v54, %v3778_v46  ;;  %v3565_v31 = vadd.f32 %v13703_v27, %v3528_v3  ;;  %v17215_v33 = vld [vmem:[#allocation34_spill] sm:$0xff]  ;;  %v17216_v45 = vld [vmem:[#allocation76_spill] sm:$0xff] }
 0x29c   : > { %17209 = vst [vmem:[#allocation136_spill] sm:$0xff] %v13778_v53  ;;  %17211 = vst [vmem:[#allocation138_spill] sm:$0xff] %v13785_v11  ;;  %v3704_v38 = vadd.f32 %v17214_v5, %v3561_v50  ;;  %v3641_v42 = vadd.f32 %v13551_v19, %v3604_v39  ;;  %v3711_v11 = vadd.f32 %v17215_v33, %v3568_v17  ;;  %v9613_v44 = vpop.f32.mrf.mxu0  ;;  %v13811_v46 = vpop.f32.mrf.mxu1  ;;  %v17218_v5 = vld [vmem:[#allocation33_spill] sm:$0xff] }
 0x29d   : > { %17212 = vst [vmem:[#allocation139_spill] sm:$0xff] %v13798_v0  ;;  %17213 = vst [vmem:[#allocation140_spill] sm:$0xff] %v13801_v41  ;;  %v3570_v28 = vadd.f32 %v13557_v55, %v3533_v20  ;;  %v3535_v53 = vmul.f32 %v9610_v29, %v13437_v7  ;;  %v3780_v14 = vadd.f32 %v17216_v45, %v3642_v60 }
 0x29e   : > { %v3817_v47 = vmul.f32 %v9656_v21, %v13574_v6  ;;  %v3810_v3 = vmul.f32 %v13793_v57, %v13670_v43  ;;  %v3879_v50 = vmul.f32 %v13798_v0, %v13670_v43  ;;  %v3644_v39 = vadd.f32 %v13600_v32, %v3607_v51  ;;  %v13819_v54 = vpop.f32.mrf.mxu0  ;;  %v9662_v41 = vpop.f32.mrf.mxu1 }
 0x29f   : > { %v3886_v17 = vmul.f32 %v9656_v21, %v13579_v56  ;;  %v3532_v20 = vmul.f32 %v13665_v48, %v13753_v36  ;;  %v3609_v45 = vmul.f32 %v9610_v29, %v13442_v4  ;;  %v3710_v33 = vadd.f32 %v17218_v5, %v3567_v35 }
 0x2a0   : > { %v13824_v60 = vadd.f32 %v3817_v47, %v3711_v11  ;;  %v3779_v43 = vadd.f32 %v17220_v52, %v3641_v42  ;;  %v3816_v51 = vmul.f32 %v13612_v18, %v3398_v2  ;;  %v3885_v21 = vmul.f32 %v13617_v23, %v3398_v2  ;;  %v9616_v37 = vpop.f32.mrf.mxu0  ;;  %v17221_v11 = vld [vmem:[#allocation71_spill] sm:$0xff]  ;;  %v17225_v2 = vld [vmem:[#allocation85_spill] sm:$0xff] }
 0x2a1   : > { %v13827_v49 = vadd.f32 %v3886_v17, %v3780_v14  ;;  %v3572_v12 = vadd.f32 %v13479_v62, %v3535_v53  ;;  %v3534_v34 = vmul.f32 %v13489_v22, %v3193_v9  ;;  %v3608_v29 = vmul.f32 %v13510_v15, %v3193_v9  ;;  %v17224_v17 = vld [vmem:[#allocation77_spill] sm:$0xff] }
 0x2a2   : > { %17217 = vst [vmem:[#allocation14_spill] sm:$0xff] %v13824_v60  ;;  %v3713_v47 = vadd.f32 %v17221_v11, %v3570_v28  ;;  %v3418_v60 = vpop.f32.mrf.mxu1  ;;  %v13836_v35 = vadd.f32 %v3816_v51, %v3710_v33  ;;  %v13838_v14 = vadd.f32 %v3885_v21, %v3779_v43  ;;  %v3782_v52 = vadd.f32 %v17224_v17, %v3644_v39  ;;  %v3213_v5 = vpop.f32.mrf.mxu0 }
 0x2a3   : > { %17219 = vst [vmem:[#allocation34_spill] sm:$0xff] %v13827_v49  ;;  %v3819_v42 = vmul.f32 %v9659_v24, %v13643_v8  ;;  %v3773_v49 = vadd.f32 %v17225_v2, %v3635_v10  ;;  %v3646_v53 = vadd.f32 %v13484_v26, %v3609_v45  ;;  %v3537_v40 = vmul.f32 %v9613_v44, %v13516_v1 }
 0x2a4   : > { %17222 = vst [vmem:[#allocation76_spill] sm:$0xff] %v13836_v35  ;;  %17223 = vst [vmem:[#allocation33_spill] sm:$0xff] %v13838_v14  ;;  %v3888_v9 = vmul.f32 %v9659_v24, %v13660_v61  ;;  %v9665_v63 = vpop.f32.mrf.mxu1  ;;  %v3639_v28 = vadd.f32 %v13762_v16, %v3602_v30  ;;  %v13847_v33 = vadd.f32 %v3810_v3, %v3704_v38  ;;  %v9619_v39 = vpop.f32.mrf.mxu0  ;;  %v17231_v38 = vld [vmem:[#allocation25_spill] sm:$0xff] }
 0x2a5   : > { %v3611_v43 = vmul.f32 %v9613_v44, %v13521_v58  ;;  %v13850_v51 = vadd.f32 %v3819_v42, %v3713_v47  ;;  %v13852_v21 = vadd.f32 %v3879_v50, %v3773_v49  ;;  %v3606_v10 = vmul.f32 %v13708_v25, %v13753_v36  ;;  %v17232_v47 = vld [vmem:[#allocation45_spill] sm:$0xff]  ;;  %v17233_v50 = vld [vmem:[#allocation87_spill] sm:$0xff] }
 0x2a6   : > { %17226 = vst [vmem:[#allocation93_spill] sm:$0xff] %v13847_v33  ;;  %v3571_v45 = vadd.f32 %v13545_v59, %v3534_v34  ;;  %v13857_v11 = vadd.f32 %v3888_v9, %v3782_v52  ;;  %v13859_v24 = vpop.f32.mrf.mxu1  ;;  %v3569_v30 = vadd.f32 %v13703_v27, %v3532_v20  ;;  %v3708_v3 = vadd.f32 %v17231_v38, %v3565_v31  ;;  %v13865_v42 = vpop.f32.mrf.mxu0 }
 0x2a7   : > { %17227 = vst [vmem:[#allocation71_spill] sm:$0xff] %v13850_v51  ;;  %17228 = vst [vmem:[#allocation77_spill] sm:$0xff] %v13852_v21  ;;  %v3645_v44 = vadd.f32 %v13551_v19, %v3608_v29  ;;  %v3715_v17 = vadd.f32 %v17232_v47, %v3572_v12  ;;  %v3574_v49 = vadd.f32 %v13557_v55, %v3537_v40  ;;  %v17237_v51 = vld [vmem:[#allocation86_spill] sm:$0xff] }
 0x2a8   : > { %17229 = vst [vmem:[#allocation85_spill] sm:$0xff] %v13857_v11  ;;  %17230 = vst [vmem:[#allocation141_spill] sm:$0xff] %v13859_v24  ;;  %v3539_v36 = vmul.f32 %v9616_v37, %v13437_v7  ;;  %v3784_v34 = vadd.f32 %v17233_v50, %v3646_v53  ;;  %v3821_v52 = vmul.f32 %v9662_v41, %v13574_v6  ;;  %v9668_v2 = vpop.f32.mrf.mxu1  ;;  %v9622_v9 = vpop.f32.mrf.mxu0  ;;  %v17235_v53 = vld [vmem:[#allocation88_spill] sm:$0xff] }
 0x2a9   : > { %v3814_v20 = vmul.f32 %v13793_v57, %v13746_v13  ;;  %v3883_v31 = vmul.f32 %v13798_v0, %v13746_v13  ;;  %v3648_v29 = vadd.f32 %v13600_v32, %v3611_v43  ;;  %v3890_v12 = vmul.f32 %v9662_v41, %v13579_v56 }
 0x2aa   : > { %v3643_v40 = vadd.f32 %v13762_v16, %v3606_v10  ;;  %v3613_v38 = vmul.f32 %v9616_v37, %v13442_v4  ;;  %v13879_v47 = vadd.f32 %v3821_v52, %v3715_v17  ;;  %v3714_v50 = vadd.f32 %v17235_v53, %v3571_v45  ;;  %v3438_v21 = vpop.f32.mrf.mxu1  ;;  %v3233_v33 = vpop.f32.mrf.mxu0  ;;  %v17238_v17 = vld [vmem:[#allocation91_spill] sm:$0xff] }
 0x2ab   : > { %v13882_v11 = vadd.f32 %v3890_v12, %v3784_v34  ;;  %v3783_v14 = vadd.f32 %v17237_v51, %v3645_v44  ;;  %v3820_v13 = vmul.f32 %v13612_v18, %v3418_v60  ;;  %v3889_v43 = vmul.f32 %v13617_v23, %v3418_v60  ;;  %v17241_v12 = vld [vmem:[#allocation64_spill] sm:$0xff]  ;;  %v17242_v60 = vld [vmem:[#allocation75_spill] sm:$0xff] }
 0x2ac   : > { %17234 = vst [vmem:[#allocation25_spill] sm:$0xff] %v13879_v47  ;;  %v3576_v41 = vadd.f32 %v13479_v62, %v3539_v36  ;;  %v3538_v10 = vmul.f32 %v13489_v22, %v3213_v5  ;;  %v3612_v37 = vmul.f32 %v13510_v15, %v3213_v5  ;;  %v3717_v52 = vadd.f32 %v17238_v17, %v3574_v49  ;;  %v9671_v47 = vpop.f32.mrf.mxu1  ;;  %v9625_v53 = vpop.f32.mrf.mxu0 }
 0x2ad   : > { %17236 = vst [vmem:[#allocation45_spill] sm:$0xff] %v13882_v11  ;;  %v13891_v45 = vadd.f32 %v3820_v13, %v3714_v50  ;;  %v13893_v34 = vadd.f32 %v3889_v43, %v3783_v14  ;;  %v3786_v51 = vadd.f32 %v17241_v12, %v3648_v29  ;;  %v3823_v44 = vmul.f32 %v9665_v63, %v13643_v8  ;;  %v17248_v12 = vld [vmem:[#allocation78_spill] sm:$0xff] }
 0x2ae   : > { %v3777_v11 = vadd.f32 %v17242_v60, %v3639_v28  ;;  %v3650_v36 = vadd.f32 %v13484_v26, %v3613_v38  ;;  %v3541_v35 = vmul.f32 %v9619_v39, %v13516_v1  ;;  %v3892_v5 = vmul.f32 %v9665_v63, %v13660_v61  ;;  %v13901_v24 = vpop.f32.mrf.mxu1  ;;  %v13910_v13 = vpop.f32.mrf.mxu0 }
 0x2af   : > { %17239 = vst [vmem:[#allocation87_spill] sm:$0xff] %v13891_v45  ;;  %17240 = vst [vmem:[#allocation88_spill] sm:$0xff] %v13893_v34  ;;  %v13903_v49 = vadd.f32 %v3814_v20, %v3708_v3  ;;  %v3536_v14 = vmul.f32 %v13665_v48, %v13819_v54  ;;  %v3615_v29 = vmul.f32 %v9619_v39, %v13521_v58  ;;  %v17247_v20 = vld [vmem:[#allocation32_spill] sm:$0xff] }
 0x2b0   : > { %v13908_v50 = vadd.f32 %v3823_v44, %v3717_v52  ;;  %v13912_v28 = vadd.f32 %v3883_v31, %v3777_v11  ;;  %v3610_v38 = vmul.f32 %v13708_v25, %v13819_v54  ;;  %v3575_v63 = vadd.f32 %v13545_v59, %v3538_v10  ;;  %v13919_v3 = vpop.f32.mrf.mxu1  ;;  %v17249_v52 = vld [vmem:[#allocation80_spill] sm:$0xff]  ;;  %v9628_v11 = vpop.f32.mrf.mxu0 }
 0x2b1   : > { %17243 = vst [vmem:[#allocation86_spill] sm:$0xff] %v13903_v49  ;;  %v13917_v43 = vadd.f32 %v3892_v5, %v3786_v51  ;;  %v3712_v17 = vadd.f32 %v17247_v20, %v3569_v30  ;;  %v13923_v60 = vadd.f32 %v17248_v12, %v3643_v40  ;;  %v3649_v39 = vadd.f32 %v13551_v19, %v3612_v37 }
 0x2b2   : > { %17244 = vst [vmem:[#allocation91_spill] sm:$0xff] %v13908_v50  ;;  %17245 = vst [vmem:[#allocation64_spill] sm:$0xff] %v13912_v28  ;;  %v3719_v44 = vadd.f32 %v17249_v52, %v3576_v41  ;;  %v3578_v31 = vadd.f32 %v13557_v55, %v3541_v35  ;;  %v3543_v54 = vmul.f32 %v9622_v9, %v13437_v7  ;;  %v17250_v28 = vld [vmem:[#allocation7_spill] sm:$0xff]  ;;  %v13931_v5 = vpop.f32.mrf.mxu1  ;;  %v3253_v20 = vpop.f32.mrf.mxu0 }
 0x2b3   : > { %17246 = vst [vmem:[#allocation75_spill] sm:$0xff] %v13917_v43  ;;  %v3788_v10 = vadd.f32 %v17250_v28, %v3650_v36  ;;  %v3825_v51 = vmul.f32 %v9668_v2, %v13574_v6  ;;  %v3573_v30 = vadd.f32 %v13703_v27, %v3536_v14  ;;  %v3818_v40 = vmul.f32 %v13793_v57, %v13811_v46  ;;  %v17252_v36 = vld [vmem:[#allocation81_spill] sm:$0xff]  ;;  %v17254_v14 = vld [vmem:[#allocation30_spill] sm:$0xff] }
 0x2b4   : > { %v3652_v37 = vadd.f32 %v13600_v32, %v3615_v29  ;;  %v3894_v41 = vmul.f32 %v9668_v2, %v13579_v56  ;;  %v3647_v35 = vadd.f32 %v13762_v16, %v3610_v38  ;;  %v3617_v12 = vmul.f32 %v9622_v9, %v13442_v4  ;;  %v13943_v49 = vpop.f32.mrf.mxu1  ;;  %v13950_v2 = vpop.f32.mrf.mxu0 }
 0x2b5   : > { %v13940_v52 = vadd.f32 %v3825_v51, %v3719_v44  ;;  %v3718_v28 = vadd.f32 %v17252_v36, %v3575_v63  ;;  %v3787_v50 = vadd.f32 %v17254_v14, %v3649_v39  ;;  %v3824_v34 = vmul.f32 %v13612_v18, %v3438_v21  ;;  %v17255_v51 = vld [vmem:[#allocation22_spill] sm:$0xff]  ;;  %v17259_v39 = vld [vmem:[#allocation17_spill] sm:$0xff] }
 0x2b6   : > { %v13945_v43 = vadd.f32 %v3894_v41, %v3788_v10  ;;  %v3893_v29 = vmul.f32 %v13617_v23, %v3438_v21  ;;  %v3580_v38 = vadd.f32 %v13479_v62, %v3543_v54  ;;  %v3542_v9 = vmul.f32 %v13489_v22, %v3233_v33  ;;  %v13956_v36 = vpop.f32.mrf.mxu1 }
 0x2b7   : > { %17251 = vst [vmem:[#allocation32_spill] sm:$0xff] %v13940_v52  ;;  %v3616_v44 = vmul.f32 %v13510_v15, %v3233_v33  ;;  %v3721_v63 = vadd.f32 %v17255_v51, %v3578_v31  ;;  %17256 = vst [vmem:[#allocation80_spill] sm:$0xff] %v13956_v36  ;;  %v13958_v10 = vadd.f32 %v3824_v34, %v3718_v28 }
 0x2b8   : > { %17253 = vst [vmem:[#allocation78_spill] sm:$0xff] %v13945_v43  ;;  %v13960_v41 = vadd.f32 %v3893_v29, %v3787_v50  ;;  %v3790_v14 = vadd.f32 %v17259_v39, %v3652_v37  ;;  %v3827_v21 = vmul.f32 %v9671_v47, %v13643_v8  ;;  %v13964_v43 = vpop.f32.mrf.mxu0  ;;  %v3540_v54 = vmul.f32 %v13665_v48, %v13865_v42  ;;  %v13971_v51 = vpop.f32.mrf.mxu1 }
 0x2b9   : > { %17257 = vst [vmem:[#allocation7_spill] sm:$0xff] %v13958_v10  ;;  %17260 = vst [vmem:[#allocation30_spill] sm:$0xff] %v13964_v43  ;;  %v3654_v52 = vadd.f32 %v13484_v26, %v3617_v12  ;;  %v3545_v33 = vmul.f32 %v9625_v53, %v13516_v1  ;;  %v3896_v31 = vmul.f32 %v9671_v47, %v13660_v61  ;;  %v17263_v12 = vld [vmem:[#allocation62_spill] sm:$0xff] }
 0x2ba   : > { %17258 = vst [vmem:[#allocation81_spill] sm:$0xff] %v13960_v41  ;;  %v13973_v34 = vadd.f32 %v3818_v40, %v3712_v17  ;;  %v3887_v50 = vmul.f32 %v13798_v0, %v13811_v46  ;;  %v3619_v37 = vmul.f32 %v9625_v53, %v13521_v58  ;;  %v13978_v28 = vadd.f32 %v3827_v21, %v3721_v63  ;;  %v9634_v29 = vpop.f32.mrf.mxu0  ;;  %v13986_v45 = vpop.f32.mrf.mxu1  ;;  %v17265_v17 = vld [vmem:[#allocation35_spill] sm:$0xff]  ;;  %v17266_v63 = vld [vmem:[#allocation89_spill] sm:$0xff] }
 0x2bb   : > { %v3614_v39 = vmul.f32 %v13708_v25, %v13865_v42  ;;  %v3716_v41 = vadd.f32 %v17263_v12, %v3573_v30  ;;  %v3579_v10 = vadd.f32 %v13545_v59, %v3542_v9  ;;  %v13984_v47 = vadd.f32 %v3896_v31, %v3790_v14  ;;  %v17267_v12 = vld [vmem:[#allocation36_spill] sm:$0xff] }
 0x2bc   : > { %17261 = vst [vmem:[#allocation22_spill] sm:$0xff] %v13973_v34  ;;  %17262 = vst [vmem:[#allocation17_spill] sm:$0xff] %v13978_v28  ;;  %v3785_v40 = vadd.f32 %v17265_v17, %v3647_v35  ;;  %v3653_v46 = vadd.f32 %v13551_v19, %v3616_v44  ;;  %v3547_v53 = vmul.f32 %v9628_v11, %v13437_v7  ;;  %v13992_v34 = vpop.f32.mrf.mxu0  ;;  %v13999_v31 = vpop.f32.mrf.mxu1  ;;  %v17268_v35 = vld [vmem:[#allocation141_spill] sm:$0xff] }
 0x2bd   : > { %17264 = vst [vmem:[#allocation62_spill] sm:$0xff] %v13984_v47  ;;  %v3723_v21 = vadd.f32 %v17266_v63, %v3580_v38  ;;  %v3577_v42 = vadd.f32 %v13703_v27, %v3540_v54  ;;  %v3582_v30 = vadd.f32 %v13557_v55, %v3545_v33  ;;  %v3792_v9 = vadd.f32 %v17267_v12, %v3654_v52  ;;  %v17270_v47 = vld [vmem:[#allocation94_spill] sm:$0xff] }
 0x2be   : > { %v3829_v14 = vmul.f32 %v13919_v3, %v13574_v6  ;;  %v3822_v44 = vmul.f32 %v13793_v57, %v17268_v35  ;;  %v3891_v17 = vmul.f32 %v13798_v0, %v17268_v35  ;;  %v3656_v38 = vadd.f32 %v13600_v32, %v3619_v37  ;;  %v14008_v63 = vpop.f32.mrf.mxu0  ;;  %v14015_v36 = vpop.f32.mrf.mxu1  ;;  %v17272_v35 = vld [vmem:[#allocation92_spill] sm:$0xff] }
 0x2bf   : > { %v3898_v54 = vmul.f32 %v13919_v3, %v13579_v56  ;;  %v3584_v52 = vadd.f32 %v13479_v62, %v3547_v53  ;;  %v3621_v33 = vmul.f32 %v9628_v11, %v13442_v4  ;;  %v3722_v28 = vadd.f32 %v17270_v47, %v3579_v10  ;;  %v17273_v47 = vld [vmem:[#allocation97_spill] sm:$0xff] }
 0x2c0   : > { %v14012_v12 = vadd.f32 %v3829_v14, %v3723_v21  ;;  %v3791_v0 = vadd.f32 %v17272_v35, %v3653_v46  ;;  %v3828_v37 = vmul.f32 %v13612_v18, %v13931_v5  ;;  %v3897_v3 = vmul.f32 %v13617_v23, %v13931_v5  ;;  %v14024_v27 = vpop.f32.mrf.mxu0 }
 0x2c1   : > { %v14017_v43 = vadd.f32 %v3898_v54, %v3792_v9  ;;  %v3546_v11 = vmul.f32 %v13489_v22, %v3253_v20  ;;  %v3620_v53 = vmul.f32 %v13510_v15, %v3253_v20  ;;  %v3549_v10 = vmul.f32 %v13950_v2, %v13516_v1  ;;  %v14031_v9 = vpop.f32.mrf.mxu1  ;;  %v17276_v54 = vld [vmem:[#allocation46_spill] sm:$0xff] }
 0x2c2   : > { %17269 = vst [vmem:[#allocation35_spill] sm:$0xff] %v14012_v12  ;;  %v3725_v21 = vadd.f32 %v17273_v47, %v3582_v30  ;;  %v14033_v46 = vadd.f32 %v3828_v37, %v3722_v28  ;;  %v14035_v14 = vadd.f32 %v3897_v3, %v3791_v0  ;;  %v3794_v35 = vadd.f32 %v17276_v54, %v3656_v38 }
 0x2c3   : > { %17271 = vst [vmem:[#allocation89_spill] sm:$0xff] %v14017_v43  ;;  %v3831_v5 = vmul.f32 %v13943_v49, %v13643_v8  ;;  %v14040_v43 = vpop.f32.mrf.mxu0  ;;  %v14043_v20 = vadd.f32 %v3887_v50, %v13923_v60  ;;  %v3651_v12 = vadd.f32 %v13762_v16, %v3614_v39  ;;  %v3658_v30 = vadd.f32 %v13484_v26, %v3621_v33  ;;  %v14049_v37 = vpop.f32.mrf.mxu1 }
 0x2c4   : > { %17274 = vst [vmem:[#allocation36_spill] sm:$0xff] %v14033_v46  ;;  %17275 = vst [vmem:[#allocation141_spill] sm:$0xff] %v14035_v14  ;;  %v3900_v28 = vmul.f32 %v13943_v49, %v13660_v61  ;;  %v14051_v0 = vadd.f32 %v3822_v44, %v3716_v41  ;;  %v14053_v38 = vadd.f32 %v3891_v17, %v3785_v40  ;;  %v17282_v40 = vld [vmem:[#allocation26_spill] sm:$0xff] }
 0x2c5   : > { %17277 = vst [vmem:[#allocation94_spill] sm:$0xff] %v14043_v20  ;;  %v3623_v3 = vmul.f32 %v13950_v2, %v13521_v58  ;;  %v14057_v47 = vadd.f32 %v3831_v5, %v3725_v21  ;;  %v14059_v60 = vpop.f32.mrf.mxu0  ;;  %v3544_v50 = vmul.f32 %v13665_v48, %v13910_v13  ;;  %v3618_v39 = vmul.f32 %v13708_v25, %v13910_v13  ;;  %v14068_v41 = vpop.f32.mrf.mxu1  ;;  %v17283_v21 = vld [vmem:[#allocation95_spill] sm:$0xff] }
 0x2c6   : > { %17278 = vst [vmem:[#allocation92_spill] sm:$0xff] %v14051_v0  ;;  %17279 = vst [vmem:[#allocation97_spill] sm:$0xff] %v14053_v38  ;;  %v3583_v49 = vadd.f32 %v13545_v59, %v3546_v11  ;;  %v14066_v33 = vadd.f32 %v3900_v28, %v3794_v35  ;;  %v3720_v44 = vadd.f32 %v17282_v40, %v3577_v42  ;;  %v17284_v0 = vld [vmem:[#allocation84_spill] sm:$0xff]  ;;  %v17285_v42 = vld [vmem:[#allocation101_spill] sm:$0xff] }
 0x2c7   : > { %17280 = vst [vmem:[#allocation46_spill] sm:$0xff] %v14057_v47  ;;  %v3657_v2 = vadd.f32 %v13551_v19, %v3620_v53  ;;  %v3586_v17 = vadd.f32 %v13557_v55, %v3549_v10  ;;  %v3727_v54 = vadd.f32 %v17283_v21, %v3584_v52  ;;  %v14074_v5 = vpop.f32.mrf.mxu0  ;;  %v3551_v38 = vmul.f32 %v9634_v29, %v13437_v7  ;;  %v14081_v28 = vpop.f32.mrf.mxu1 }
 0x2c8   : > { %17281 = vst [vmem:[#allocation142_spill] sm:$0xff] %v14066_v33  ;;  %v3625_v13 = vmul.f32 %v9634_v29, %v13442_v4  ;;  %v3796_v11 = vadd.f32 %v17284_v0, %v3658_v30  ;;  %v3833_v35 = vmul.f32 %v13971_v51, %v13574_v6  ;;  %v14084_v40 = vadd.f32 %v17285_v42, %v3651_v12  ;;  %v17287_v12 = vld [vmem:[#allocation42_spill] sm:$0xff] }
 0x2c9   : > { %v3826_v53 = vmul.f32 %v13793_v57, %v13901_v24  ;;  %v3660_v52 = vadd.f32 %v13600_v32, %v3623_v3  ;;  %v3902_v7 = vmul.f32 %v13971_v51, %v13579_v56  ;;  %v14091_v10 = vpop.f32.mrf.mxu0  ;;  %v3550_v29 = vmul.f32 %v13489_v22, %v13992_v34  ;;  %v14100_v21 = vpop.f32.mrf.mxu1  ;;  %v17289_v3 = vld [vmem:[#allocation37_spill] sm:$0xff] }
 0x2ca   : > { %v14093_v4 = vadd.f32 %v3833_v35, %v3727_v54  ;;  %v3624_v30 = vmul.f32 %v13510_v15, %v13992_v34  ;;  %v3726_v0 = vadd.f32 %v17287_v12, %v3583_v49  ;;  %v3795_v20 = vadd.f32 %v17289_v3, %v3657_v2  ;;  %v17290_v49 = vld [vmem:[#allocation98_spill] sm:$0xff]  ;;  %v17293_v3 = vld [vmem:[#allocation61_spill] sm:$0xff] }
 0x2cb   : > { %v14102_v42 = vadd.f32 %v3902_v7, %v3796_v11  ;;  %v3832_v51 = vmul.f32 %v13612_v18, %v13986_v45  ;;  %v3901_v54 = vmul.f32 %v13617_v23, %v13986_v45  ;;  %v14109_v35 = vpop.f32.mrf.mxu0  ;;  %v3588_v22 = vadd.f32 %v13479_v62, %v3551_v38  ;;  %v14116_v7 = vpop.f32.mrf.mxu1  ;;  %v17294_v62 = vld [vmem:[#allocation131_spill] sm:$0xff] }
 0x2cc   : > { %17286 = vst [vmem:[#allocation26_spill] sm:$0xff] %v14093_v4  ;;  %v3662_v15 = vadd.f32 %v13484_v26, %v3625_v13  ;;  %v3553_v34 = vmul.f32 %v14008_v63, %v13516_v1  ;;  %v3729_v11 = vadd.f32 %v17290_v49, %v3586_v17  ;;  %v3835_v45 = vmul.f32 %v13999_v31, %v13643_v8  ;;  %v17295_v38 = vld [vmem:[#allocation139_spill] sm:$0xff] }
 0x2cd   : > { %17288 = vst [vmem:[#allocation95_spill] sm:$0xff] %v14102_v42  ;;  %v14118_v2 = vadd.f32 %v3832_v51, %v3726_v0  ;;  %v14120_v12 = vadd.f32 %v3901_v54, %v3795_v20  ;;  %v3798_v42 = vadd.f32 %v17293_v3, %v3660_v52  ;;  %v14125_v4 = vpop.f32.mrf.mxu0  ;;  %v3581_v26 = vadd.f32 %v17294_v62, %v3544_v50  ;;  %v14134_v20 = vpop.f32.mrf.mxu1  ;;  %v17300_v49 = vld [vmem:[#allocation55_spill] sm:$0xff] }
 0x2ce   : > { %v3895_v1 = vmul.f32 %v17295_v38, %v13901_v24  ;;  %v3627_v17 = vmul.f32 %v14008_v63, %v13521_v58  ;;  %v3904_v13 = vmul.f32 %v13999_v31, %v13660_v61  ;;  %v14137_v52 = vadd.f32 %v13762_v16, %v3618_v39  ;;  %v14146_v24 = vld [vmem:[%s16621_s2 + $0x188] sm:$0xff]  ;;  %v17298_v31 = vld [vmem:[#allocation30_spill] sm:$0xff] }
 0x2cf   : > { %17291 = vst [vmem:[#allocation84_spill] sm:$0xff] %v14118_v2  ;;  %17292 = vst [vmem:[#allocation101_spill] sm:$0xff] %v14120_v12  ;;  %v3587_v0 = vadd.f32 %v13545_v59, %v3550_v29  ;;  %v3661_v51 = vadd.f32 %v13551_v19, %v3624_v30  ;;  %v14141_v54 = vadd.f32 %v3835_v45, %v3729_v11  ;;  %v14148_v58 = vpop.f32.mrf.mxu0  ;;  %v14161_v19 = vld [vmem:[%s16621_s2 + $0x2a8] sm:$0xff]  ;;  %v14163_v29 = vpop.f32.mrf.mxu1  ;;  %v17325_v2 = vld [vmem:[#allocation18_spill] sm:$0xff] }
 0x2d0   : > { %v14150_v63 = vadd.f32 %v3826_v53, %v3720_v44  ;;  %v3548_v50 = vmul.f32 %v13665_v48, %v17298_v31  ;;  %v3622_v39 = vmul.f32 %v13708_v25, %v17298_v31  ;;  %v14156_v59 = vadd.f32 %v3904_v13, %v3798_v42  ;;  %v17301_v53 = vld [vmem:[#allocation38_spill] sm:$0xff] }
 0x2d1   : > { %17296 = vst [vmem:[#allocation42_spill] sm:$0xff] %v14141_v54  ;;  %v3590_v30 = vadd.f32 %v13557_v55, %v3553_v34  ;;  %v3731_v44 = vadd.f32 %v17300_v49, %v3588_v22  ;;  %v3800_v11 = vadd.f32 %v17301_v53, %v3662_v15  ;;  %v3837_v3 = vmul.f32 %v14031_v9, %v13574_v6  ;;  %v14170_v45 = vpop.f32.mrf.mxu0  ;;  %v14182_v22 = vld [vmem:[%s16621_s2 + $0x180] sm:$0xff]  ;;  %v17304_v34 = vld [vmem:[#allocation99_spill] sm:$0xff] }
 0x2d2   : > { %17297 = vst [vmem:[#allocation37_spill] sm:$0xff] %v14150_v63  ;;  %17299 = vst [vmem:[#allocation98_spill] sm:$0xff] %v14156_v59  ;;  %v3664_v42 = vadd.f32 %v13600_v32, %v3627_v17  ;;  %v3552_v13 = vmul.f32 %v13665_v48, %v14024_v27  ;;  %v3906_v31 = vmul.f32 %v14031_v9, %v13579_v56  ;;  %v14187_v6 = vld [vmem:[%s16621_s2 + $0x2a0] sm:$0xff]  ;;  %v14189_v32 = vpop.f32.mrf.mxu1  ;;  %v17306_v59 = vld [vmem:[#allocation121_spill] sm:$0xff] }
 0x2d3   : > { %v4409_v55 = vmul.f32 %v14040_v43, %v14146_v24  ;;  %v14191_v15 = vadd.f32 %v3837_v3, %v3731_v44  ;;  %v4478_v56 = vmul.f32 %v14040_v43, %v14161_v19  ;;  %v17303_v48 = vld [vmem:[#allocation102_spill] sm:$0xff]  ;;  %v3799_v17 = vadd.f32 %v17304_v34, %v3661_v51  ;;  %v14197_v49 = vpop.f32.mrf.mxu0 }
 0x2d4   : > { %v3730_v9 = vadd.f32 %v17303_v48, %v3587_v0  ;;  %v14199_v53 = vadd.f32 %v3906_v31, %v3800_v11  ;;  %v3836_v12 = vmul.f32 %v13612_v18, %v14049_v37  ;;  %v3905_v44 = vmul.f32 %v13617_v23, %v14049_v37  ;;  %v14206_v3 = vpop.f32.mrf.mxu1  ;;  %v17308_v11 = vld [vmem:[#allocation52_spill] sm:$0xff] }
 0x2d5   : > { %17302 = vst [vmem:[#allocation61_spill] sm:$0xff] %v14191_v15  ;;  %v4441_v54 = vadd.f32 %v4409_v55, %v17306_v59  ;;  %v17307_v15 = vld [vmem:[#allocation122_spill] sm:$0xff]  ;;  %v4408_v0 = vmul.f32 %v14182_v22, %v14059_v60  ;;  %v4477_v51 = vmul.f32 %v14187_v6, %v14059_v60  ;;  %v3733_v31 = vadd.f32 %v17308_v11, %v3590_v30  ;;  %v14217_v59 = vld [vmem:[%s16621_s2 + $0x2b8] sm:$0xff]  ;;  %v14219_v18 = vpop.f32.mrf.mxu0  ;;  %v17313_v11 = vld [vmem:[#allocation127_spill] sm:$0xff] }
 0x2d6   : > { %17305 = vst [vmem:[#allocation131_spill] sm:$0xff] %v14199_v53  ;;  %v4510_v43 = vadd.f32 %v4478_v56, %v17307_v15  ;;  %v14221_v23 = vadd.f32 %v3836_v12, %v3730_v9  ;;  %v14223_v37 = vadd.f32 %v3905_v44, %v3799_v17  ;;  %v17311_v55 = vld [vmem:[#allocation6_spill] sm:$0xff]  ;;  %v3839_v56 = vmul.f32 %v14068_v41, %v13643_v8  ;;  %v14228_v48 = vpop.f32.mrf.mxu1 }
 0x2d7   : > { %v3802_v15 = vadd.f32 %v17311_v55, %v3664_v42  ;;  %v3626_v60 = vmul.f32 %v13708_v25, %v14024_v27  ;;  %v17312_v30 = vld [vmem:[#allocation126_spill] sm:$0xff]  ;;  %v4509_v53 = vadd.f32 %v4477_v51, %v17313_v11  ;;  %v3908_v12 = vmul.f32 %v14068_v41, %v13660_v61  ;;  %v14236_v9 = vpop.f32.mrf.mxu0  ;;  %v17315_v42 = vld [vmem:[#allocation83_spill] sm:$0xff] }
 0x2d8   : > { %17309 = vst [vmem:[#allocation139_spill] sm:$0xff] %v14221_v23  ;;  %17310 = vst [vmem:[#allocation30_spill] sm:$0xff] %v14223_v37  ;;  %v4440_v34 = vadd.f32 %v4408_v0, %v17312_v30  ;;  %v14239_v17 = vadd.f32 %v3895_v1, %v14084_v40  ;;  %v3724_v44 = vadd.f32 %v17315_v42, %v3581_v26  ;;  %v14246_v27 = vpop.f32.mrf.mxu1  ;;  %v17318_v0 = vld [vmem:[#allocation80_spill] sm:$0xff]  ;;  %v14258_v40 = vld [vmem:[%s16621_s2 + $0x198] sm:$0xff] }
 0x2d9   : > { %v14242_v8 = vadd.f32 %v3839_v56, %v3733_v31  ;;  %v4480_v55 = vmul.f32 %v14074_v5, %v14217_v59  ;;  %17317 = vst [vmem:[#allocation102_spill] sm:$0xff] %v14246_v27  ;;  %v3585_v25 = vadd.f32 %v17294_v62, %v3548_v50  ;;  %v3830_v51 = vmul.f32 %v13793_v57, %v17318_v0  ;;  %v14260_v26 = vpop.f32.mrf.mxu0  ;;  %v17321_v50 = vld [vmem:[#allocation132_spill] sm:$0xff]  ;;  %v14275_v11 = vld [vmem:[%s16621_s2 + $0x2e8] sm:$0xff] }
 0x2da   : > { %17314 = vst [vmem:[#allocation55_spill] sm:$0xff] %v14239_v17  ;;  %v3899_v61 = vmul.f32 %v17295_v38, %v17318_v0  ;;  %v14253_v41 = vadd.f32 %v3908_v12, %v3802_v15  ;;  %17320 = vst [vmem:[#allocation121_spill] sm:$0xff] %v14260_v26  ;;  %v3659_v1 = vadd.f32 %v13762_v16, %v3622_v39  ;;  %v14270_v15 = vld [vmem:[%s16621_s2 + $0x1c8] sm:$0xff]  ;;  %v14277_v12 = vpop.f32.mrf.mxu1  ;;  %v17324_v37 = vld [vmem:[#allocation16_spill] sm:$0xff] }
 0x2db   : > { %17316 = vst [vmem:[#allocation38_spill] sm:$0xff] %v14242_v8  ;;  %v3589_v31 = vadd.f32 %v17294_v62, %v3552_v13  ;;  %v4512_v56 = vadd.f32 %v4480_v55, %v17321_v50  ;;  %v4413_v30 = vmul.f32 %v14109_v35, %v14146_v24  ;;  %v3663_v39 = vadd.f32 %v13762_v16, %v3626_v60  ;;  %v14289_v55 = vld [vmem:[%s16621_s2 + $0x1c0] sm:$0xff]  ;;  %v14291_v0 = vpop.f32.mrf.mxu0  ;;  %v17322_v16 = vld [vmem:[#allocation23_spill] sm:$0xff] }
 0x2dc   : > { %17319 = vst [vmem:[#allocation99_spill] sm:$0xff] %v14253_v41  ;;  %v3834_v62 = vmul.f32 %v13793_v57, %v14015_v36  ;;  %v3903_v13 = vmul.f32 %v17295_v38, %v14015_v36  ;;  %v4482_v42 = vmul.f32 %v14109_v35, %v14161_v19  ;;  %v4411_v50 = vmul.f32 %v14074_v5, %v14258_v40  ;;  %v17323_v41 = vld [vmem:[#allocation50_spill] sm:$0xff]  ;;  %v14303_v35 = vpop.f32.mrf.mxu1 }
 0x2dd   : > { %v4445_v60 = vadd.f32 %v4413_v30, %v17322_v16  ;;  %v4579_v8 = vadd.f32 %v17323_v41, %v4441_v54  ;;  %v4648_v23 = vadd.f32 %v17324_v37, %v4510_v43  ;;  %v14301_v36 = vld [vmem:[%s16621_s2 + $0x2e0] sm:$0xff]  ;;  %v4685_v47 = vmul.f32 %v14100_v21, %v14270_v15  ;;  %v14312_v41 = vpop.f32.mrf.mxu0  ;;  %v17327_v16 = vld [vmem:[#allocation9_spill] sm:$0xff] }
 0x2de   : > { %v4514_v33 = vadd.f32 %v4482_v42, %v17325_v2  ;;  %v4754_v5 = vmul.f32 %v14100_v21, %v14275_v11  ;;  %v4412_v54 = vmul.f32 %v14182_v22, %v14125_v4  ;;  %v4481_v43 = vmul.f32 %v14187_v6, %v14125_v4  ;;  %v17326_v37 = vld [vmem:[#allocation54_spill] sm:$0xff]  ;;  %v14320_v42 = vpop.f32.mrf.mxu1  ;;  %v14332_v4 = vld [vmem:[%s16621_s2 + $0x2f8] sm:$0xff] }
 0x2df   : > { %v4578_v30 = vadd.f32 %v17326_v37, %v4440_v34  ;;  %v4647_v14 = vadd.f32 %v17327_v16, %v4509_v53  ;;  %v4684_v2 = vmul.f32 %v14289_v55, %v14116_v7  ;;  %17328 = vst [vmem:[#allocation122_spill] sm:$0xff] %v14320_v42  ;;  %v14322_v46 = vadd.f32 %v4685_v47, %v4579_v8  ;;  %v17331_v17 = vld [vmem:[#allocation74_spill] sm:$0xff]  ;;  %v14334_v53 = vpop.f32.mrf.mxu0 }
 0x2e0   : > { %v14324_v21 = vadd.f32 %v4754_v5, %v4648_v23  ;;  %v4444_v63 = vadd.f32 %v4412_v54, %v17331_v17  ;;  %v4753_v27 = vmul.f32 %v14301_v36, %v14116_v7  ;;  %v17332_v34 = vld [vmem:[#allocation90_spill] sm:$0xff]  ;;  %v4415_v47 = vmul.f32 %v14148_v58, %v14258_v40  ;;  %v14343_v17 = vpop.f32.mrf.mxu1  ;;  %v17335_v7 = vld [vmem:[#allocation44_spill] sm:$0xff]  ;;  %v17336_v5 = vld [vmem:[#allocation15_spill] sm:$0xff] }
 0x2e1   : > { %17329 = vst [vmem:[#allocation52_spill] sm:$0xff] %v14322_v46  ;;  %v4513_v37 = vadd.f32 %v4481_v43, %v17332_v34  ;;  %v14337_v16 = vadd.f32 %v4684_v2, %v4578_v30  ;;  %v4484_v23 = vmul.f32 %v14148_v58, %v14217_v59  ;;  %17334 = vst [vmem:[#allocation127_spill] sm:$0xff] %v14343_v17  ;;  %v17337_v46 = vld [vmem:[#allocation56_spill] sm:$0xff]  ;;  %v14351_v43 = vpop.f32.mrf.mxu0 }
 0x2e2   : > { %17330 = vst [vmem:[#allocation6_spill] sm:$0xff] %v14324_v21  ;;  %v3793_v8 = vadd.f32 %v17335_v7, %v14137_v52  ;;  %v3728_v54 = vadd.f32 %v17336_v5, %v3585_v25  ;;  %v3797_v21 = vadd.f32 %v17337_v46, %v3659_v1  ;;  %v14349_v26 = vadd.f32 %v4753_v27, %v4647_v14  ;;  %v14356_v30 = vld [vmem:[%s16621_s2 + $0x190] sm:$0xff]  ;;  %v14363_v25 = vpop.f32.mrf.mxu1 }
 0x2e3   : > { %17333 = vst [vmem:[#allocation126_spill] sm:$0xff] %v14337_v16  ;;  %17339 = vst [vmem:[#allocation80_spill] sm:$0xff] %v14351_v43  ;;  %v17340_v2 = vld [vmem:[#allocation136_spill] sm:$0xff]  ;;  %v4756_v52 = vmul.f32 %v14134_v20, %v14332_v4  ;;  %v14365_v46 = vadd.f32 %v3830_v51, %v3724_v44 }
 0x2e4   : > { %17338 = vst [vmem:[#allocation83_spill] sm:$0xff] %v14349_v26  ;;  %v4447_v58 = vadd.f32 %v4415_v47, %v17340_v2  ;;  %v17341_v34 = vld [vmem:[#allocation140_spill] sm:$0xff]  ;;  %v14367_v14 = vadd.f32 %v3899_v61, %v3793_v8  ;;  %v14369_v27 = vadd.f32 %v3834_v62, %v3728_v54  ;;  %v14371_v1 = vadd.f32 %v3903_v13, %v3797_v21  ;;  %v17349_v2 = vld [vmem:[#allocation47_spill] sm:$0xff]  ;;  %v14387_v61 = vpop.f32.mrf.mxu1  ;;  %v17352_v54 = vld [vmem:[#allocation57_spill] sm:$0xff] }
 0x2e5   : > { %v4516_v16 = vadd.f32 %v4484_v23, %v17341_v34  ;;  %v17342_v17 = vld [vmem:[#allocation48_spill] sm:$0xff]  ;;  %17343 = vst [vmem:[#allocation132_spill] sm:$0xff] %v14365_v46  ;;  %v14378_v23 = vpop.f32.mrf.mxu0  ;;  %v14383_v44 = vadd.f32 %v17349_v2, %v3663_v39  ;;  %v3838_v62 = vmul.f32 %v13793_v57, %v14081_v28  ;;  %v4410_v13 = vmul.f32 %v14356_v30, %v14091_v10  ;;  %v17354_v2 = vld [vmem:[#allocation34_spill] sm:$0xff]  ;;  %v17368_v46 = vld [vmem:[#allocation5_spill] sm:$0xff] }
 0x2e6   : > { %v4650_v42 = vadd.f32 %v17342_v17, %v4512_v56  ;;  %17344 = vst [vmem:[#allocation23_spill] sm:$0xff] %v14367_v14  ;;  %17345 = vst [vmem:[#allocation50_spill] sm:$0xff] %v14369_v27  ;;  %v14376_v47 = vld [vmem:[%s16621_s2 + $0x2b0] sm:$0xff]  ;;  %v17347_v56 = vld [vmem:[#allocation129_spill] sm:$0xff]  ;;  %v4417_v21 = vmul.f32 %v14197_v49, %v14146_v24  ;;  %v4652_v34 = vadd.f32 %v17352_v54, %v4514_v33 }
 0x2e7   : > { %17346 = vst [vmem:[#allocation16_spill] sm:$0xff] %v14371_v1  ;;  %v4443_v17 = vadd.f32 %v4411_v50, %v17347_v56  ;;  %v17348_v7 = vld [vmem:[#allocation12_spill] sm:$0xff]  ;;  %v4486_v50 = vmul.f32 %v14197_v49, %v14161_v19  ;;  %v4479_v39 = vmul.f32 %v14376_v47, %v14091_v10  ;;  %v4689_v57 = vmul.f32 %v14189_v32, %v14270_v15  ;;  %v17353_v56 = vld [vmem:[#allocation14_spill] sm:$0xff] }
 0x2e8   : > { %v3732_v5 = vadd.f32 %v17348_v7, %v3589_v31  ;;  %v14385_v51 = vadd.f32 %v4756_v52, %v4650_v42  ;;  %v14397_v31 = vpop.f32.mrf.mxu0  ;;  %v17351_v42 = vld [vmem:[#allocation53_spill] sm:$0xff]  ;;  %v14405_v52 = vpop.f32.mrf.mxu1  ;;  %v4449_v7 = vadd.f32 %v4417_v21, %v17353_v56  ;;  %v4758_v49 = vmul.f32 %v14189_v32, %v14275_v11  ;;  %v17357_v1 = vld [vmem:[#allocation2_spill] sm:$0xff]  ;;  %v17360_v56 = vld [vmem:[#allocation76_spill] sm:$0xff] }
 0x2e9   : > { %v4583_v8 = vadd.f32 %v17351_v42, %v4445_v60  ;;  %v4416_v26 = vmul.f32 %v14182_v22, %v14219_v18  ;;  %v4485_v33 = vmul.f32 %v14187_v6, %v14219_v18  ;;  %v17356_v42 = vld [vmem:[#allocation60_spill] sm:$0xff]  ;;  %v4651_v27 = vadd.f32 %v17357_v1, %v4513_v37  ;;  %v17362_v37 = vld [vmem:[#allocation33_spill] sm:$0xff] }
 0x2ea   : > { %17350 = vst [vmem:[#allocation18_spill] sm:$0xff] %v14385_v51  ;;  %v4518_v51 = vadd.f32 %v4486_v50, %v17354_v2  ;;  %v14413_v10 = vpop.f32.mrf.mxu0  ;;  %v4582_v54 = vadd.f32 %v17356_v42, %v4444_v63  ;;  %v14421_v21 = vpop.f32.mrf.mxu1  ;;  %v14423_v50 = vadd.f32 %v4758_v49, %v4652_v34  ;;  %v4688_v2 = vmul.f32 %v14289_v55, %v14206_v3  ;;  %v14436_v63 = vld [vmem:[%s16621_s2 + $0x1d8] sm:$0xff] }
 0x2eb   : > { %v14415_v60 = vadd.f32 %v4689_v57, %v4583_v8  ;;  %17358 = vst [vmem:[#allocation9_spill] sm:$0xff] %v14421_v21  ;;  %v4448_v32 = vadd.f32 %v4416_v26, %v17360_v56  ;;  %v4757_v8 = vmul.f32 %v14301_v36, %v14206_v3  ;;  %v4517_v1 = vadd.f32 %v4485_v33, %v17362_v37  ;;  %v17366_v33 = vld [vmem:[#allocation71_spill] sm:$0xff] }
 0x2ec   : > { %17359 = vst [vmem:[#allocation74_spill] sm:$0xff] %v14423_v50  ;;  %v14430_v57 = vpop.f32.mrf.mxu0  ;;  %v4419_v26 = vmul.f32 %v14236_v9, %v14258_v40  ;;  %v4488_v34 = vmul.f32 %v14236_v9, %v14217_v59  ;;  %v14443_v49 = vpop.f32.mrf.mxu1  ;;  %v14445_v3 = vadd.f32 %v4688_v2, %v4582_v54  ;;  %v4691_v56 = vmul.f32 %v14228_v48, %v14436_v63  ;;  %v17367_v50 = vld [vmem:[#allocation85_spill] sm:$0xff] }
 0x2ed   : > { %17355 = vst [vmem:[#allocation54_spill] sm:$0xff] %v14415_v60  ;;  %v17361_v60 = vld [vmem:[#allocation93_spill] sm:$0xff]  ;;  %v14447_v42 = vadd.f32 %v4757_v8, %v4651_v27  ;;  %v4654_v43 = vadd.f32 %v17368_v46, %v4516_v16  ;;  %v4760_v9 = vmul.f32 %v14228_v48, %v14332_v4  ;;  %v14461_v27 = vadd.f32 %v3838_v62, %v3732_v5  ;;  %v17372_v46 = vld [vmem:[#allocation10_spill] sm:$0xff] }
 0x2ee   : > { %v4442_v18 = vadd.f32 %v4410_v13, %v17361_v60  ;;  %17363 = vst [vmem:[#allocation90_spill] sm:$0xff] %v14445_v3  ;;  %v17365_v13 = vld [vmem:[#allocation4_spill] sm:$0xff]  ;;  %v14452_v21 = vpop.f32.mrf.mxu0  ;;  %v4451_v37 = vadd.f32 %v4419_v26, %v17366_v33  ;;  %v4520_v14 = vadd.f32 %v4488_v34, %v17367_v50  ;;  %v14459_v54 = vpop.f32.mrf.mxu1  ;;  %v17370_v2 = vld [vmem:[#allocation77_spill] sm:$0xff]  ;;  %v4581_v48 = vadd.f32 %v17372_v46, %v4443_v17 }
 0x2ef   : > { %17364 = vst [vmem:[#allocation44_spill] sm:$0xff] %v14447_v42  ;;  %v4585_v60 = vadd.f32 %v17365_v13, %v4447_v58  ;;  %17369 = vst [vmem:[#allocation15_spill] sm:$0xff] %v14461_v27  ;;  %v3907_v58 = vmul.f32 %v17295_v38, %v14081_v28  ;;  %v4511_v8 = vadd.f32 %v4479_v39, %v17370_v2  ;;  %v14469_v26 = vld [vmem:[%s16621_s2 + $0x1d0] sm:$0xff]  ;;  %v17375_v34 = vld [vmem:[#allocation41_spill] sm:$0xff] }
 0x2f0   : > { %v14473_v16 = vpop.f32.mrf.mxu0  ;;  %v4687_v5 = vmul.f32 %v14134_v20, %v14436_v63  ;;  %v4414_v62 = vmul.f32 %v14356_v30, %v14170_v45  ;;  %v14480_v28 = vadd.f32 %v4760_v9, %v4654_v43  ;;  %v14482_v38 = vpop.f32.mrf.mxu1  ;;  %v4483_v39 = vmul.f32 %v14376_v47, %v14170_v45  ;;  %v17377_v43 = vld [vmem:[#allocation108_spill] sm:$0xff]  ;;  %v17378_v9 = vld [vmem:[#allocation109_spill] sm:$0xff]  ;;  %v17384_v42 = vld [vmem:[#allocation110_spill] sm:$0xff] }
 0x2f1   : > { %v14471_v50 = vadd.f32 %v4691_v56, %v4585_v60  ;;  %17374 = vst [vmem:[#allocation140_spill] sm:$0xff] %v14482_v38  ;;  %v4580_v13 = vadd.f32 %v17375_v34, %v4442_v18  ;;  %v4421_v60 = vmul.f32 %v14291_v0, %v14146_v24  ;;  %v4490_v17 = vmul.f32 %v14291_v0, %v14161_v19  ;;  %v14504_v18 = vld [vmem:[%s16621_s2 + $0x2f0] sm:$0xff]  ;;  %v17380_v0 = vld [vmem:[#allocation25_spill] sm:$0xff] }
 0x2f2   : > { %17373 = vst [vmem:[#allocation136_spill] sm:$0xff] %v14480_v28  ;;  %v14491_v56 = vpop.f32.mrf.mxu0  ;;  %v4686_v20 = vmul.f32 %v14469_v26, %v14163_v29  ;;  %v4587_v33 = vadd.f32 %v17377_v43, %v4449_v7  ;;  %v4656_v2 = vadd.f32 %v17378_v9, %v4518_v51  ;;  %v4693_v45 = vmul.f32 %v14277_v12, %v14270_v15  ;;  %v14499_v46 = vpop.f32.mrf.mxu1 }
 0x2f3   : > { %17371 = vst [vmem:[#allocation56_spill] sm:$0xff] %v14471_v50  ;;  %17376 = vst [vmem:[#allocation48_spill] sm:$0xff] %v14491_v56  ;;  %v4453_v34 = vadd.f32 %v4421_v60, %v17380_v0  ;;  %v17381_v50 = vld [vmem:[#allocation45_spill] sm:$0xff]  ;;  %v4762_v28 = vmul.f32 %v14277_v12, %v14275_v11  ;;  %v4420_v51 = vmul.f32 %v14182_v22, %v14312_v41 }
 0x2f4   : > { %17379 = vst [vmem:[#allocation129_spill] sm:$0xff] %v14499_v46  ;;  %v4522_v3 = vadd.f32 %v4490_v17, %v17381_v50  ;;  %v14512_v7 = vpop.f32.mrf.mxu0  ;;  %v14514_v43 = vadd.f32 %v4693_v45, %v4587_v33  ;;  %v4489_v9 = vmul.f32 %v14187_v6, %v14312_v41  ;;  %v4586_v27 = vadd.f32 %v17384_v42, %v4448_v32  ;;  %v17385_v46 = vld [vmem:[#allocation111_spill] sm:$0xff]  ;;  %v14520_v60 = vpop.f32.mrf.mxu1  ;;  %v17390_v32 = vld [vmem:[#allocation88_spill] sm:$0xff] }
 0x2f5   : > { %17382 = vst [vmem:[#allocation12_spill] sm:$0xff] %v14512_v7  ;;  %v4655_v38 = vadd.f32 %v17385_v46, %v4517_v1  ;;  %17386 = vst [vmem:[#allocation53_spill] sm:$0xff] %v14520_v60  ;;  %v14522_v50 = vadd.f32 %v4762_v28, %v4656_v2  ;;  %v17388_v17 = vld [vmem:[#allocation87_spill] sm:$0xff]  ;;  %v4692_v0 = vmul.f32 %v14289_v55, %v14303_v35  ;;  %v17397_v7 = vld [vmem:[#allocation114_spill] sm:$0xff] }
 0x2f6   : > { %17383 = vst [vmem:[#allocation47_spill] sm:$0xff] %v14514_v43  ;;  %v4452_v12 = vadd.f32 %v4420_v51, %v17388_v17  ;;  %v4761_v33 = vmul.f32 %v14301_v36, %v14303_v35  ;;  %v14529_v45 = vpop.f32.mrf.mxu0  ;;  %v4755_v41 = vmul.f32 %v14504_v18, %v14163_v29  ;;  %v4521_v42 = vadd.f32 %v4489_v9, %v17390_v32  ;;  %v14538_v2 = vpop.f32.mrf.mxu1  ;;  %v17393_v35 = vld [vmem:[#allocation112_spill] sm:$0xff]  ;;  %v17394_v43 = vld [vmem:[#allocation122_spill] sm:$0xff]  ;;  %v17395_v9 = vld [vmem:[#allocation91_spill] sm:$0xff] }
 0x2f7   : > { %17387 = vst [vmem:[#allocation57_spill] sm:$0xff] %v14522_v50  ;;  %17389 = vst [vmem:[#allocation14_spill] sm:$0xff] %v14529_v45  ;;  %v4423_v1 = vmul.f32 %v14334_v53, %v14258_v40  ;;  %v4492_v28 = vmul.f32 %v14334_v53, %v14217_v59  ;;  %v14540_v46 = vadd.f32 %v4692_v0, %v4586_v27  ;;  %v17396_v60 = vld [vmem:[#allocation75_spill] sm:$0xff]  ;;  %v17400_v0 = vld [vmem:[#allocation65_spill] sm:$0xff] }
 0x2f8   : > { %v14542_v51 = vadd.f32 %v4761_v33, %v4655_v38  ;;  %v4589_v17 = vadd.f32 %v17393_v35, %v4451_v37  ;;  %v4695_v50 = vmul.f32 %v17394_v43, %v14436_v63  ;;  %v14547_v29 = vpop.f32.mrf.mxu0  ;;  %v4658_v56 = vadd.f32 %v17397_v7, %v4520_v14  ;;  %v14554_v27 = vpop.f32.mrf.mxu1 }
 0x2f9   : > { %17391 = vst [vmem:[#allocation34_spill] sm:$0xff] %v14540_v46  ;;  %v4455_v32 = vadd.f32 %v4423_v1, %v17395_v9  ;;  %v4524_v45 = vadd.f32 %v4492_v28, %v17396_v60  ;;  %v4764_v53 = vmul.f32 %v17394_v43, %v14332_v4  ;;  %v14557_v38 = vadd.f32 %v3907_v58, %v14383_v44  ;;  %v17402_v1 = vld [vmem:[#allocation86_spill] sm:$0xff]  ;;  %v17403_v28 = vld [vmem:[#allocation64_spill] sm:$0xff]  ;;  %v17407_v58 = vld [vmem:[#allocation121_spill] sm:$0xff] }
 0x2fa   : > { %17392 = vst [vmem:[#allocation60_spill] sm:$0xff] %v14542_v51  ;;  %v14559_v37 = vadd.f32 %v4687_v5, %v4581_v48  ;;  %v4649_v33 = vadd.f32 %v17400_v0, %v4511_v8  ;;  %v14562_v35 = vadd.f32 %v4695_v50, %v4589_v17  ;;  %v14564_v46 = vpop.f32.mrf.mxu0  ;;  %v4446_v60 = vadd.f32 %v4414_v62, %v17402_v1  ;;  %v14572_v9 = vpop.f32.mrf.mxu1 }
 0x2fb   : > { %17398 = vst [vmem:[#allocation2_spill] sm:$0xff] %v14557_v38  ;;  %v4515_v14 = vadd.f32 %v4483_v39, %v17403_v28  ;;  %v14568_v7 = vadd.f32 %v4686_v20, %v4580_v13  ;;  %v14570_v43 = vadd.f32 %v4764_v53, %v4658_v56  ;;  %v4418_v48 = vmul.f32 %v14356_v30, %v17407_v58  ;;  %v17408_v13 = vld [vmem:[#allocation120_spill] sm:$0xff]  ;;  %v17409_v20 = vld [vmem:[#allocation123_spill] sm:$0xff] }
 0x2fc   : > { %17399 = vst [vmem:[#allocation76_spill] sm:$0xff] %v14559_v37  ;;  %17401 = vst [vmem:[#allocation93_spill] sm:$0xff] %v14562_v35  ;;  %v14574_v44 = vadd.f32 %v4755_v41, %v4649_v33  ;;  %v4425_v8 = vmul.f32 %v14378_v23, %v14146_v24  ;;  %v4494_v5 = vmul.f32 %v14378_v23, %v14161_v19  ;;  %v14582_v62 = vpop.f32.mrf.mxu0  ;;  %v14592_v17 = vpop.f32.mrf.mxu1  ;;  %v17410_v53 = vld [vmem:[#allocation32_spill] sm:$0xff]  ;;  %v17411_v33 = vld [vmem:[#allocation78_spill] sm:$0xff] }
 0x2fd   : > { %17404 = vst [vmem:[#allocation33_spill] sm:$0xff] %v14568_v7  ;;  %17405 = vst [vmem:[#allocation4_spill] sm:$0xff] %v14570_v43  ;;  %v14586_v39 = vmul.f32 %v14376_v47, %v17407_v58  ;;  %v4591_v56 = vadd.f32 %v17408_v13, %v4453_v34  ;;  %v4660_v50 = vadd.f32 %v17409_v20, %v4522_v3  ;;  %v17413_v13 = vld [vmem:[#allocation124_spill] sm:$0xff]  ;;  %v17414_v43 = vld [vmem:[#allocation125_spill] sm:$0xff] }
 0x2fe   : > { %17406 = vst [vmem:[#allocation71_spill] sm:$0xff] %v14574_v44  ;;  %v4697_v41 = vmul.f32 %v14363_v25, %v14270_v15  ;;  %v4457_v0 = vadd.f32 %v4425_v8, %v17410_v53  ;;  %v4526_v1 = vadd.f32 %v4494_v5, %v17411_v33  ;;  %v4766_v23 = vmul.f32 %v14363_v25, %v14275_v11  ;;  %v14600_v58 = vpop.f32.mrf.mxu0  ;;  %v14608_v8 = vpop.f32.mrf.mxu1  ;;  %v17416_v53 = vld [vmem:[#allocation7_spill] sm:$0xff]  ;;  %v17423_v7 = vld [vmem:[#allocation62_spill] sm:$0xff] }
 0x2ff   : > { %v4424_v28 = vmul.f32 %v14182_v22, %v14397_v31  ;;  %v4493_v3 = vmul.f32 %v14187_v6, %v14397_v31  ;;  %v4590_v20 = vadd.f32 %v17413_v13, %v4452_v12  ;;  %v4659_v35 = vadd.f32 %v17414_v43, %v4521_v42  ;;  %v17418_v43 = vld [vmem:[#allocation128_spill] sm:$0xff]  ;;  %v17444_v44 = vld [vmem:[#allocation35_spill] sm:$0xff] }
 0x300   : > { %v14602_v34 = vadd.f32 %v4697_v41, %v4591_v56  ;;  %v14610_v5 = vadd.f32 %v4766_v23, %v4660_v50  ;;  %v4696_v33 = vmul.f32 %v14289_v55, %v14387_v61  ;;  %v4765_v56 = vmul.f32 %v14301_v36, %v14387_v61  ;;  %v14617_v41 = vpop.f32.mrf.mxu0  ;;  %v14625_v23 = vpop.f32.mrf.mxu1 }
 0x301   : > { %v4456_v25 = vadd.f32 %v4424_v28, %v17416_v53  ;;  %v4427_v12 = vmul.f32 %v14413_v10, %v14258_v40  ;;  %v4496_v42 = vmul.f32 %v14413_v10, %v14217_v59  ;;  %v4593_v50 = vadd.f32 %v17418_v43, %v4455_v32  ;;  %v17421_v53 = vld [vmem:[#allocation130_spill] sm:$0xff] }
 0x302   : > { %17412 = vst [vmem:[#allocation85_spill] sm:$0xff] %v14602_v34  ;;  %17415 = vst [vmem:[#allocation5_spill] sm:$0xff] %v14610_v5  ;;  %v17417_v34 = vld [vmem:[#allocation81_spill] sm:$0xff]  ;;  %v14627_v28 = vadd.f32 %v4696_v33, %v4590_v20  ;;  %v14629_v13 = vadd.f32 %v4765_v56, %v4659_v35  ;;  %v4662_v61 = vadd.f32 %v17421_v53, %v4524_v45  ;;  %v14642_v20 = vpop.f32.mrf.mxu1  ;;  %v17427_v45 = vld [vmem:[#allocation106_spill] sm:$0xff] }
 0x303   : > { %v4525_v31 = vadd.f32 %v4493_v3, %v17417_v34  ;;  %v4699_v5 = vmul.f32 %v14405_v52, %v14436_v63  ;;  %v14634_v34 = vpop.f32.mrf.mxu0  ;;  %v17422_v3 = vld [vmem:[#allocation17_spill] sm:$0xff]  ;;  %v4528_v37 = vadd.f32 %v4496_v42, %v17423_v7  ;;  %v4768_v10 = vmul.f32 %v14405_v52, %v14332_v4  ;;  %17424 = vst [vmem:[#allocation41_spill] sm:$0xff] %v14642_v20  ;;  %v17430_v7 = vld [vmem:[#allocation22_spill] sm:$0xff] }
 0x304   : > { %17419 = vst [vmem:[#allocation77_spill] sm:$0xff] %v14627_v28  ;;  %17420 = vst [vmem:[#allocation10_spill] sm:$0xff] %v14629_v13  ;;  %v4459_v51 = vadd.f32 %v4427_v12, %v17422_v3  ;;  %v4426_v32 = vmul.f32 %v14356_v30, %v14430_v57  ;;  %v17425_v35 = vld [vmem:[#allocation105_spill] sm:$0xff]  ;;  %v14648_v56 = vadd.f32 %v17427_v45, %v4515_v14  ;;  %v17432_v52 = vld [vmem:[#allocation102_spill] sm:$0xff]  ;;  %v14667_v14 = vpop.f32.mrf.mxu1 }
 0x305   : > { %v14645_v33 = vadd.f32 %v17425_v35, %v4446_v60  ;;  %v14650_v43 = vadd.f32 %v4699_v5, %v4593_v50  ;;  %v4495_v12 = vmul.f32 %v14376_v47, %v14430_v57  ;;  %v14655_v42 = vadd.f32 %v4418_v48, %v17430_v7  ;;  %17436 = vst [vmem:[#allocation88_spill] sm:$0xff] %v14667_v14  ;;  %v17437_v5 = vld [vmem:[#allocation80_spill] sm:$0xff]  ;;  %v17439_v57 = vld [vmem:[#allocation37_spill] sm:$0xff]  ;;  %v14678_v7 = vpop.f32.mrf.mxu0  ;;  %v17479_v14 = vld [vmem:[#allocation95_spill] sm:$0xff] }
 0x306   : > { %17428 = vst [vmem:[#allocation109_spill] sm:$0xff] %v14648_v56  ;;  %v14659_v53 = vmul.f32 %v14469_v26, %v17432_v52  ;;  %v14663_v3 = vmul.f32 %v14504_v18, %v17432_v52  ;;  %v14665_v60 = vadd.f32 %v4768_v10, %v4662_v61  ;;  %v14671_v50 = vmul.f32 %v14356_v30, %v17437_v5  ;;  %v17441_v52 = vld [vmem:[#allocation55_spill] sm:$0xff] }
 0x307   : > { %17426 = vst [vmem:[#allocation108_spill] sm:$0xff] %v14645_v33  ;;  %17429 = vst [vmem:[#allocation25_spill] sm:$0xff] %v14650_v43  ;;  %v4458_v35 = vadd.f32 %v4426_v32, %v17439_v57  ;;  %v4429_v48 = vmul.f32 %v14452_v21, %v14146_v24  ;;  %v4498_v45 = vmul.f32 %v14452_v21, %v14161_v19  ;;  %v17442_v61 = vld [vmem:[#allocation39_spill] sm:$0xff]  ;;  %v17445_v32 = vld [vmem:[#allocation89_spill] sm:$0xff] }
 0x308   : > { %17431 = vst [vmem:[#allocation45_spill] sm:$0xff] %v14655_v42  ;;  %17433 = vst [vmem:[#allocation110_spill] sm:$0xff] %v14659_v53  ;;  %v4527_v43 = vadd.f32 %v4495_v12, %v17441_v52  ;;  %v4595_v10 = vadd.f32 %v17442_v61, %v4457_v0  ;;  %v4701_v28 = vmul.f32 %v14443_v49, %v14270_v15  ;;  %v14691_v42 = vpop.f32.mrf.mxu1  ;;  %v17449_v52 = vld [vmem:[#allocation137_spill] sm:$0xff]  ;;  %v14751_v53 = vld [vmem:[%s12353_s8 + $0xb0] sm:$0xff] }
 0x309   : > { %17434 = vst [vmem:[#allocation111_spill] sm:$0xff] %v14663_v3  ;;  %17435 = vst [vmem:[#allocation87_spill] sm:$0xff] %v14665_v60  ;;  %v17443_v60 = vld [vmem:[#allocation135_spill] sm:$0xff]  ;;  %v4461_v3 = vadd.f32 %v4429_v48, %v17444_v44  ;;  %v4530_v57 = vadd.f32 %v4498_v45, %v17445_v32  ;;  %v4770_v56 = vmul.f32 %v14443_v49, %v14275_v11  ;;  %v17451_v45 = vld [vmem:[#allocation36_spill] sm:$0xff] }
 0x30a   : > { %17438 = vst [vmem:[#allocation112_spill] sm:$0xff] %v14671_v50  ;;  %17440 = vst [vmem:[#allocation122_spill] sm:$0xff] %v14678_v7  ;;  %v4664_v13 = vadd.f32 %v17443_v60, %v4526_v1  ;;  %v4428_v21 = vmul.f32 %v14182_v22, %v14473_v16  ;;  %v14693_v12 = vadd.f32 %v4701_v28, %v4595_v10  ;;  %v17448_v1 = vld [vmem:[#allocation31_spill] sm:$0xff]  ;;  %v14708_v28 = vpop.f32.mrf.mxu0  ;;  %v17453_v10 = vld [vmem:[#allocation141_spill] sm:$0xff] }
 0x30b   : > { %17446 = vst [vmem:[#allocation91_spill] sm:$0xff] %v14691_v42  ;;  %v4497_v0 = vmul.f32 %v14187_v6, %v14473_v16  ;;  %v4594_v60 = vadd.f32 %v17448_v1, %v4456_v25  ;;  %v4663_v44 = vadd.f32 %v17449_v52, %v4525_v31  ;;  %v4700_v49 = vmul.f32 %v14289_v55, %v14459_v54  ;;  %v17454_v16 = vld [vmem:[#allocation48_spill] sm:$0xff]  ;;  %v14723_v52 = vld [vmem:[%s12353_s8 + $0xb8] sm:$0xff]  ;;  %v17470_v33 = vld [vmem:[#allocation23_spill] sm:$0xff] }
 0x30c   : > { %17447 = vst [vmem:[#allocation75_spill] sm:$0xff] %v14693_v12  ;;  %v14699_v48 = vadd.f32 %v4770_v56, %v4664_v13  ;;  %v14702_v61 = vadd.f32 %v4428_v21, %v17451_v45  ;;  %v4769_v32 = vmul.f32 %v14301_v36, %v14459_v54  ;;  %17452 = vst [vmem:[#allocation65_spill] sm:$0xff] %v14708_v28  ;;  %v17455_v13 = vld [vmem:[#allocation138_spill] sm:$0xff]  ;;  %v14728_v54 = vld [vmem:[%s16621_s2 + $0x2d8] sm:$0xff] }
 0x30d   : > { %v14711_v12 = vadd.f32 %v4497_v0, %v17453_v10  ;;  %v4431_v25 = vmul.f32 %v17454_v16, %v14258_v40  ;;  %v4500_v31 = vmul.f32 %v17454_v16, %v14217_v59  ;;  %v4597_v56 = vadd.f32 %v17455_v13, %v4459_v51  ;;  %17458 = vst [vmem:[#allocation121_spill] sm:$0xff] %v14723_v52  ;;  %v17459_v45 = vld [vmem:[#allocation140_spill] sm:$0xff]  ;;  %v14734_v16 = vpop.f32.mrf.mxu1  ;;  %v17461_v51 = vld [vmem:[#allocation46_spill] sm:$0xff]  ;;  %v14788_v28 = vld [vmem:[%s12353_s8 + $0xc8] sm:$0xff] }
 0x30e   : > { %17450 = vst [vmem:[#allocation114_spill] sm:$0xff] %v14699_v48  ;;  %v14718_v21 = vadd.f32 %v4700_v49, %v4594_v60  ;;  %v14720_v1 = vadd.f32 %v4769_v32, %v4663_v44  ;;  %v4634_v0 = vmul.f32 %v14728_v54, %v14723_v52  ;;  %v4703_v10 = vmul.f32 %v17459_v45, %v14436_v63  ;;  %v17462_v44 = vld [vmem:[#allocation142_spill] sm:$0xff]  ;;  %v17463_v13 = vld [vmem:[#allocation12_spill] sm:$0xff] }
 0x30f   : > { %17460 = vst [vmem:[#allocation120_spill] sm:$0xff] %v14734_v16  ;;  %v14737_v60 = vadd.f32 %v4431_v25, %v17461_v51  ;;  %v14740_v49 = vadd.f32 %v4500_v31, %v17462_v44  ;;  %v4772_v32 = vmul.f32 %v17459_v45, %v14332_v4  ;;  %v4499_v52 = vmul.f32 %v14376_v47, %v17463_v13  ;;  %v14756_v25 = vld [vmem:[%s16621_s2 + $0x1b0] sm:$0xff]  ;;  %v14760_v45 = vpop.f32.mrf.mxu0  ;;  %v14783_v38 = vpop.f32.mrf.mxu1 }
 0x310   : > { %17456 = vst [vmem:[#allocation86_spill] sm:$0xff] %v14718_v21  ;;  %17457 = vst [vmem:[#allocation64_spill] sm:$0xff] %v14720_v1  ;;  %v4430_v1 = vmul.f32 %v14356_v30, %v17463_v13  ;;  %v4666_v21 = vadd.f32 %v4634_v0, %v4528_v37  ;;  %v14746_v48 = vadd.f32 %v4703_v10, %v4597_v56  ;;  %v17467_v51 = vld [vmem:[#allocation132_spill] sm:$0xff]  ;;  %v17468_v10 = vld [vmem:[#allocation129_spill] sm:$0xff] }
 0x311   : > { %17465 = vst [vmem:[#allocation32_spill] sm:$0xff] %v14751_v53  ;;  %v4564_v31 = vmul.f32 %v14756_v25, %v14751_v53  ;;  %17466 = vst [vmem:[#allocation78_spill] sm:$0xff] %v14760_v45  ;;  %v14768_v56 = vld [vmem:[%s16621_s2 + $0x2d0] sm:$0xff]  ;;  %v4702_v44 = vmul.f32 %v14469_v26, %v17468_v10  ;;  %v4771_v13 = vmul.f32 %v14504_v18, %v17468_v10 }
 0x312   : > { %17464 = vst [vmem:[#allocation123_spill] sm:$0xff] %v14746_v48  ;;  %v14763_v37 = vadd.f32 %v4430_v1, %v17467_v51  ;;  %v4633_v0 = vmul.f32 %v14768_v56, %v14751_v53  ;;  %v14776_v48 = vadd.f32 %v4772_v32, %v4666_v21  ;;  %v14779_v16 = vadd.f32 %v4499_v52, %v17470_v33  ;;  %v17471_v51 = vld [vmem:[#allocation14_spill] sm:$0xff]  ;;  %v14793_v21 = vld [vmem:[%s16621_s2 + $0x1a8] sm:$0xff] }
 0x313   : > { %v4596_v1 = vadd.f32 %v4564_v31, %v4458_v35  ;;  %v4433_v45 = vmul.f32 %v17471_v51, %v14146_v24  ;;  %17472 = vst [vmem:[#allocation125_spill] sm:$0xff] %v14783_v38  ;;  %v4502_v53 = vmul.f32 %v17471_v51, %v14161_v19  ;;  %17473 = vst [vmem:[#allocation7_spill] sm:$0xff] %v14788_v28  ;;  %v14800_v35 = vld [vmem:[%s16621_s2 + $0x2c8] sm:$0xff]  ;;  %v17475_v32 = vld [vmem:[#allocation26_spill] sm:$0xff] }
 0x314   : > { %17469 = vst [vmem:[#allocation124_spill] sm:$0xff] %v14776_v48  ;;  %v4665_v42 = vadd.f32 %v4633_v0, %v4527_v43  ;;  %v4567_v33 = vmul.f32 %v14793_v21, %v14788_v28  ;;  %v4636_v43 = vmul.f32 %v14800_v35, %v14788_v28  ;;  %v17476_v0 = vld [vmem:[#allocation53_spill] sm:$0xff]  ;;  %v14813_v48 = vpop.f32.mrf.mxu0 }
 0x315   : > { %v14804_v52 = vadd.f32 %v4702_v44, %v4596_v1  ;;  %v14807_v31 = vadd.f32 %v4433_v45, %v17475_v32  ;;  %v4705_v10 = vmul.f32 %v17476_v0, %v14270_v15  ;;  %v4774_v51 = vmul.f32 %v17476_v0, %v14275_v11  ;;  %17477 = vst [vmem:[#allocation128_spill] sm:$0xff] %v14813_v48  ;;  %v14825_v1 = vld [vmem:[%s12353_s8 + $0xc0] sm:$0xff] }
 0x316   : > { %v14815_v38 = vadd.f32 %v4771_v13, %v4665_v42  ;;  %v14818_v7 = vadd.f32 %v4502_v53, %v17479_v14  ;;  %v4599_v50 = vadd.f32 %v4567_v33, %v4461_v3  ;;  %v4668_v28 = vadd.f32 %v4636_v43, %v4530_v57  ;;  %17480 = vst [vmem:[#allocation17_spill] sm:$0xff] %v14825_v1  ;;  %v14830_v32 = vld [vmem:[%s16621_s2 + $0x1a0] sm:$0xff]  ;;  %v17483_v43 = vld [vmem:[#allocation84_spill] sm:$0xff]  ;;  %v14855_v20 = vpop.f32.mrf.mxu0 }
 0x317   : > { %17474 = vst [vmem:[#allocation81_spill] sm:$0xff] %v14804_v52  ;;  %v4432_v44 = vmul.f32 %v14182_v22, %v14547_v29  ;;  %v4501_v45 = vmul.f32 %v14187_v6, %v14547_v29  ;;  %v4566_v42 = vmul.f32 %v14830_v32, %v14825_v1  ;;  %v14837_v53 = vld [vmem:[%s16621_s2 + $0x2c0] sm:$0xff]  ;;  %v14841_v29 = vpop.f32.mrf.mxu1  ;;  %v4704_v13 = vmul.f32 %v14289_v55, %v14538_v2 }
 0x318   : > { %17478 = vst [vmem:[#allocation130_spill] sm:$0xff] %v14815_v38  ;;  %v4635_v3 = vmul.f32 %v14837_v53, %v14825_v1  ;;  %v14843_v14 = vadd.f32 %v4705_v10, %v4599_v50  ;;  %v14845_v57 = vadd.f32 %v4774_v51, %v4668_v28  ;;  %v4773_v33 = vmul.f32 %v14301_v36, %v14538_v2  ;;  %v17484_v38 = vld [vmem:[#allocation101_spill] sm:$0xff] }
 0x319   : > { %v4464_v0 = vadd.f32 %v4432_v44, %v17483_v43  ;;  %v4533_v52 = vadd.f32 %v4501_v45, %v17484_v38  ;;  %v4598_v48 = vadd.f32 %v4566_v42, %v14702_v61  ;;  %v4435_v50 = vmul.f32 %v14564_v46, %v14258_v40  ;;  %v14862_v10 = vld [vmem:[%s12353_s8 + $0xd8] sm:$0xff]  ;;  %v14881_v45 = vpop.f32.mrf.mxu1  ;;  %v17488_v42 = vld [vmem:[#allocation42_spill] sm:$0xff] }
 0x31a   : > { %17481 = vst [vmem:[#allocation62_spill] sm:$0xff] %v14843_v14  ;;  %17482 = vst [vmem:[#allocation105_spill] sm:$0xff] %v14845_v57  ;;  %v4667_v1 = vadd.f32 %v4635_v3, %v14711_v12  ;;  %v4504_v28 = vmul.f32 %v14564_v46, %v14217_v59  ;;  %v14867_v2 = vld [vmem:[%s16621_s2 + $0x1b8] sm:$0xff]  ;;  %v4638_v12 = vmul.f32 %v14862_v10, %v14728_v54  ;;  %v17489_v43 = vld [vmem:[#allocation98_spill] sm:$0xff] }
 0x31b   : > { %17485 = vst [vmem:[#allocation106_spill] sm:$0xff] %v14862_v10  ;;  %v4569_v38 = vmul.f32 %v14867_v2, %v14862_v10  ;;  %v14873_v61 = vadd.f32 %v4704_v13, %v4598_v48  ;;  %v4707_v46 = vmul.f32 %v14554_v27, %v14436_v63  ;;  %v4776_v44 = vmul.f32 %v14554_v27, %v14332_v4  ;;  %v14892_v13 = vld [vmem:[%s12353_s8 + $0xd0] sm:$0xff] }
 0x31c   : > { %v14875_v51 = vadd.f32 %v4773_v33, %v4667_v1  ;;  %v4467_v3 = vadd.f32 %v4435_v50, %v17488_v42  ;;  %v4536_v57 = vadd.f32 %v4504_v28, %v17489_v43  ;;  %v4670_v10 = vadd.f32 %v4638_v12, %v14740_v49  ;;  %17490 = vst [vmem:[#allocation80_spill] sm:$0xff] %v14892_v13  ;;  %v14898_v50 = vpop.f32.mrf.mxu0  ;;  %v17494_v42 = vld [vmem:[#allocation16_spill] sm:$0xff] }
 0x31d   : > { %17486 = vst [vmem:[#allocation22_spill] sm:$0xff] %v14873_v61  ;;  %v4601_v14 = vadd.f32 %v4569_v38, %v14737_v60  ;;  %v4434_v48 = vmul.f32 %v14356_v30, %v14582_v62  ;;  %v4503_v1 = vmul.f32 %v14376_v47, %v14582_v62  ;;  %v4568_v27 = vmul.f32 %v14892_v13, %v14756_v25  ;;  %v17493_v38 = vld [vmem:[#allocation50_spill] sm:$0xff]  ;;  %v14912_v61 = vpop.f32.mrf.mxu1 }
 0x31e   : > { %17487 = vst [vmem:[#allocation102_spill] sm:$0xff] %v14875_v51  ;;  %v4637_v33 = vmul.f32 %v14892_v13, %v14768_v56  ;;  %v14902_v49 = vadd.f32 %v4776_v44, %v4670_v10  ;;  %v4706_v28 = vmul.f32 %v14469_v26, %v14572_v9  ;;  %v4775_v62 = vmul.f32 %v14504_v18, %v14572_v9 }
 0x31f   : > { %v14900_v60 = vadd.f32 %v4707_v46, %v4601_v14  ;;  %v4466_v12 = vadd.f32 %v4434_v48, %v17493_v38  ;;  %v4535_v43 = vadd.f32 %v4503_v1, %v17494_v42  ;;  %v4600_v51 = vadd.f32 %v4568_v27, %v14763_v37  ;;  %v14919_v46 = vld [vmem:[%s12353_s8 + $0xe8] sm:$0xff]  ;;  %v14933_v1 = vpop.f32.mrf.mxu0 }
 0x320   : > { %17492 = vst [vmem:[#allocation55_spill] sm:$0xff] %v14902_v49  ;;  %v4669_v13 = vadd.f32 %v4637_v33, %v14779_v16  ;;  %v4437_v14 = vmul.f32 %v14600_v58, %v14146_v24  ;;  %v4506_v10 = vmul.f32 %v14600_v58, %v14161_v19  ;;  %17495 = vst [vmem:[#allocation39_spill] sm:$0xff] %v14919_v46  ;;  %v17498_v19 = vld [vmem:[#allocation61_spill] sm:$0xff]  ;;  %v17499_v27 = vld [vmem:[#allocation131_spill] sm:$0xff] }
 0x321   : > { %17491 = vst [vmem:[#allocation37_spill] sm:$0xff] %v14900_v60  ;;  %v4571_v9 = vmul.f32 %v14919_v46, %v14793_v21  ;;  %v4640_v44 = vmul.f32 %v14919_v46, %v14800_v35  ;;  %v14925_v37 = vadd.f32 %v4706_v28, %v4600_v51  ;;  %v4709_v48 = vmul.f32 %v14592_v17, %v14270_v15  ;;  %v14944_v28 = vld [vmem:[%s12353_s8 + $0xe0] sm:$0xff]  ;;  %v15255_v49 = vld [vmem:[%s16621_s2 + $0x228] sm:$0xff]  ;;  %v15270_v60 = vld [vmem:[%s16621_s2 + $0x350] sm:$0xff] }
 0x322   : > { %v14927_v16 = vadd.f32 %v4775_v62, %v4669_v13  ;;  %v4778_v24 = vmul.f32 %v14592_v17, %v14275_v11  ;;  %v4469_v58 = vadd.f32 %v4437_v14, %v17498_v19  ;;  %v4538_v33 = vadd.f32 %v4506_v10, %v17499_v27  ;;  %17500 = vst [vmem:[#allocation89_spill] sm:$0xff] %v14944_v28  ;;  %v14950_v14 = vpop.f32.mrf.mxu1 }
 0x323   : > { %17496 = vst [vmem:[#allocation135_spill] sm:$0xff] %v14925_v37  ;;  %v4603_v38 = vadd.f32 %v4571_v9, %v14807_v31  ;;  %v4672_v42 = vadd.f32 %v4640_v44, %v14818_v7  ;;  %v4436_v51 = vmul.f32 %v14182_v22, %v14617_v41  ;;  %v4505_v13 = vmul.f32 %v14187_v6, %v14617_v41  ;;  %v17503_v41 = vld [vmem:[#allocation139_spill] sm:$0xff]  ;;  %v17504_v9 = vld [vmem:[#allocation30_spill] sm:$0xff]  ;;  %v15237_v37 = vld [vmem:[%s16621_s2 + $0x358] sm:$0xff] }
 0x324   : > { %17497 = vst [vmem:[#allocation35_spill] sm:$0xff] %v14927_v16  ;;  %v4570_v17 = vmul.f32 %v14944_v28, %v14830_v32  ;;  %v4639_v62 = vmul.f32 %v14944_v28, %v14837_v53  ;;  %v4708_v22 = vmul.f32 %v14289_v55, %v14608_v8  ;;  %v4777_v6 = vmul.f32 %v14301_v36, %v14608_v8  ;;  %v14962_v16 = vpop.f32.mrf.mxu0 }
 0x325   : > { %v14952_v31 = vadd.f32 %v4709_v48, %v4603_v38  ;;  %v14954_v7 = vadd.f32 %v4778_v24, %v4672_v42  ;;  %v4468_v10 = vadd.f32 %v4436_v51, %v17503_v41  ;;  %v4537_v44 = vadd.f32 %v4505_v13, %v17504_v9  ;;  %v14969_v38 = vld [vmem:[%s12353_s8 + $0xf8] sm:$0xff]  ;;  %v14983_v13 = vpop.f32.mrf.mxu1 }
 0x326   : > { %v4602_v19 = vadd.f32 %v4570_v17, %v4464_v0  ;;  %v4671_v27 = vadd.f32 %v4639_v62, %v4533_v52  ;;  %v4439_v48 = vmul.f32 %v14634_v34, %v14258_v40  ;;  %v4508_v24 = vmul.f32 %v14634_v34, %v14217_v59  ;;  %17505 = vst [vmem:[#allocation36_spill] sm:$0xff] %v14969_v38  ;;  %v17508_v59 = vld [vmem:[#allocation38_spill] sm:$0xff]  ;;  %v17509_v17 = vld [vmem:[#allocation99_spill] sm:$0xff] }
 0x327   : > { %17501 = vst [vmem:[#allocation31_spill] sm:$0xff] %v14952_v31  ;;  %17502 = vst [vmem:[#allocation137_spill] sm:$0xff] %v14954_v7  ;;  %v4573_v8 = vmul.f32 %v14969_v38, %v14867_v2  ;;  %v4642_v42 = vmul.f32 %v14969_v38, %v14728_v54  ;;  %v4711_v0 = vmul.f32 %v14625_v23, %v14436_v63  ;;  %v17510_v7 = vld [vmem:[#allocation94_spill] sm:$0xff] }
 0x328   : > { %v14975_v51 = vadd.f32 %v4708_v22, %v4602_v19  ;;  %v14977_v52 = vadd.f32 %v4777_v6, %v4671_v27  ;;  %v4780_v40 = vmul.f32 %v14625_v23, %v14332_v4  ;;  %v4471_v34 = vadd.f32 %v4439_v48, %v17508_v59  ;;  %v14996_v19 = vld [vmem:[%s12353_s8 + $0xf0] sm:$0xff]  ;;  %v15002_v48 = vpop.f32.mrf.mxu0  ;;  %17565 = vst [vmem:[#allocation94_spill] sm:$0xff] %v15237_v37 }
 0x329   : > { %v4540_v62 = vadd.f32 %v4508_v24, %v17509_v17  ;;  %v4605_v41 = vadd.f32 %v4573_v8, %v4467_v3  ;;  %v4674_v9 = vadd.f32 %v4642_v42, %v4536_v57  ;;  %v14989_v22 = vadd.f32 %v14586_v39, %v17510_v7  ;;  %17511 = vst [vmem:[#allocation138_spill] sm:$0xff] %v14996_v19  ;;  %v17514_v39 = vld [vmem:[#allocation41_spill] sm:$0xff]  ;;  %v15015_v24 = vld [vmem:[%s16621_s2 + $0x308] sm:$0xff]  ;;  %v17516_v8 = vld [vmem:[#allocation92_spill] sm:$0xff] }
 0x32a   : > { %17506 = vst [vmem:[#allocation141_spill] sm:$0xff] %v14975_v51  ;;  %17507 = vst [vmem:[#allocation48_spill] sm:$0xff] %v14977_v52  ;;  %v14993_v6 = vmul.f32 %v14376_v47, %v17437_v5  ;;  %v4572_v23 = vmul.f32 %v14996_v19, %v14756_v25  ;;  %v4641_v27 = vmul.f32 %v14996_v19, %v14768_v56  ;;  %v17517_v42 = vld [vmem:[#allocation112_spill] sm:$0xff]  ;;  %v17518_v17 = vld [vmem:[#allocation122_spill] sm:$0xff] }
 0x32b   : > { %v15004_v57 = vadd.f32 %v4711_v0, %v4605_v41  ;;  %v15006_v3 = vadd.f32 %v4780_v40, %v4674_v9  ;;  %v4710_v7 = vmul.f32 %v14469_v26, %v17514_v39  ;;  %v4779_v5 = vmul.f32 %v14504_v18, %v17514_v39  ;;  %17515 = vst [vmem:[#allocation142_spill] sm:$0xff] %v15015_v24  ;;  %v15023_v9 = vpop.f32.mrf.mxu1  ;;  %v17520_v19 = vld [vmem:[#allocation88_spill] sm:$0xff]  ;;  %v15228_v51 = vld [vmem:[%s16621_s2 + $0x208] sm:$0xff] }
 0x32c   : > { %v15019_v59 = vadd.f32 %v17517_v42, %v17516_v8  ;;  %v4438_v0 = vmul.f32 %v14356_v30, %v17518_v17  ;;  %v4604_v40 = vadd.f32 %v4572_v23, %v4466_v12  ;;  %v4673_v41 = vadd.f32 %v4641_v27, %v4535_v43  ;;  %v17523_v23 = vld [vmem:[#allocation65_spill] sm:$0xff]  ;;  %17570 = vst [vmem:[#allocation112_spill] sm:$0xff] %v15270_v60 }
 0x32d   : > { %17512 = vst [vmem:[#allocation140_spill] sm:$0xff] %v15004_v57  ;;  %17513 = vst [vmem:[#allocation46_spill] sm:$0xff] %v15006_v3  ;;  %v15026_v3 = vld [vmem:[%s12353_s8 + $0x108] sm:$0xff]  ;;  %v4713_v8 = vmul.f32 %v17520_v19, %v14270_v15  ;;  %v4782_v42 = vmul.f32 %v17520_v19, %v14275_v11  ;;  %v4507_v30 = vmul.f32 %v14376_v47, %v17518_v17  ;;  %v15056_v47 = vld [vmem:[%s16621_s2 + $0x300] sm:$0xff] }
 0x32e   : > { %17519 = vst [vmem:[#allocation12_spill] sm:$0xff] %v15026_v3  ;;  %v4575_v39 = vmul.f32 %v15026_v3, %v14793_v21  ;;  %v4644_v57 = vmul.f32 %v15026_v3, %v14800_v35  ;;  %v15038_v12 = vadd.f32 %v4710_v7, %v4604_v40  ;;  %v15040_v43 = vadd.f32 %v4779_v5, %v4673_v41  ;;  %v15044_v21 = vpop.f32.mrf.mxu0  ;;  %v15047_v3 = vld [vmem:[%s12353_s8 + $0x100] sm:$0xff]  ;;  %v17525_v19 = vld [vmem:[#allocation15_spill] sm:$0xff]  ;;  %v15064_v40 = vpop.f32.mrf.mxu1 }
 0x32f   : > { %v5354_v27 = vmul.f32 %v17523_v23, %v15015_v24  ;;  %17524 = vst [vmem:[#allocation23_spill] sm:$0xff] %v15047_v3  ;;  %v4574_v15 = vmul.f32 %v15047_v3, %v14830_v32  ;;  %v4643_v11 = vmul.f32 %v15047_v3, %v14837_v53  ;;  %v4470_v7 = vadd.f32 %v4438_v0, %v17525_v19  ;;  %v17526_v5 = vld [vmem:[#allocation6_spill] sm:$0xff] }
 0x330   : > { %17521 = vst [vmem:[#allocation132_spill] sm:$0xff] %v15038_v12  ;;  %17522 = vst [vmem:[#allocation129_spill] sm:$0xff] %v15040_v43  ;;  %v4607_v52 = vadd.f32 %v4575_v39, %v4469_v58  ;;  %v4676_v35 = vadd.f32 %v4644_v57, %v4538_v33  ;;  %v17527_v58 = vld [vmem:[#allocation91_spill] sm:$0xff]  ;;  %v17530_v3 = vld [vmem:[#allocation2_spill] sm:$0xff] }
 0x331   : > { %v5386_v17 = vadd.f32 %v5354_v27, %v17526_v5  ;;  %v4712_v33 = vmul.f32 %v14289_v55, %v17527_v58  ;;  %v4781_v57 = vmul.f32 %v14301_v36, %v17527_v58  ;;  %v4606_v41 = vadd.f32 %v4574_v15, %v4468_v10  ;;  %v17531_v12 = vld [vmem:[#allocation78_spill] sm:$0xff]  ;;  %v15074_v27 = vld [vmem:[%s12353_s8 + $0x118] sm:$0xff]  ;;  %v15085_v10 = vpop.f32.mrf.mxu0  ;;  %v15098_v5 = vpop.f32.mrf.mxu1 }
 0x332   : > { %v15066_v32 = vadd.f32 %v4713_v8, %v4607_v52  ;;  %v15068_v53 = vadd.f32 %v4782_v42, %v4676_v35  ;;  %v4675_v39 = vadd.f32 %v4643_v11, %v4537_v44  ;;  %v4539_v43 = vadd.f32 %v4507_v30, %v17530_v3  ;;  %17532 = vst [vmem:[#allocation53_spill] sm:$0xff] %v15074_v27  ;;  %v15083_v52 = vld [vmem:[%s16621_s2 + $0x318] sm:$0xff]  ;;  %v17535_v8 = vld [vmem:[#allocation120_spill] sm:$0xff]  ;;  %v17536_v30 = vld [vmem:[#allocation127_spill] sm:$0xff] }
 0x333   : > { %v5353_v0 = vmul.f32 %v15056_v47, %v17531_v12  ;;  %v4577_v55 = vmul.f32 %v15074_v27, %v14867_v2  ;;  %v4646_v36 = vmul.f32 %v15074_v27, %v14728_v54  ;;  %v15087_v44 = vadd.f32 %v4712_v33, %v4606_v41  ;;  %v17537_v35 = vld [vmem:[#allocation83_spill] sm:$0xff]  ;;  %v17538_v33 = vld [vmem:[#allocation128_spill] sm:$0xff] }
 0x334   : > { %17528 = vst [vmem:[#allocation14_spill] sm:$0xff] %v15066_v32  ;;  %17529 = vst [vmem:[#allocation26_spill] sm:$0xff] %v15068_v53  ;;  %v15089_v3 = vadd.f32 %v4781_v57, %v4675_v39  ;;  %v4715_v42 = vmul.f32 %v17535_v8, %v14436_v63  ;;  %v4784_v2 = vmul.f32 %v17535_v8, %v14332_v4  ;;  %v15105_v41 = vld [vmem:[%s12353_s8 + $0x110] sm:$0xff]  ;;  %v17543_v8 = vld [vmem:[#allocation97_spill] sm:$0xff] }
 0x335   : > { %17533 = vst [vmem:[#allocation95_spill] sm:$0xff] %v15087_v44  ;;  %v4694_v54 = vmul.f32 %v14469_v26, %v17536_v30  ;;  %v5385_v15 = vadd.f32 %v5353_v0, %v17537_v35  ;;  %v4609_v11 = vadd.f32 %v4577_v55, %v4471_v34  ;;  %v4678_v19 = vadd.f32 %v4646_v36, %v4540_v62  ;;  %v15114_v34 = vld [vmem:[%s16621_s2 + $0x1e8] sm:$0xff]  ;;  %v17542_v0 = vld [vmem:[#allocation125_spill] sm:$0xff]  ;;  %v17563_v32 = vld [vmem:[#allocation52_spill] sm:$0xff] }
 0x336   : > { %17534 = vst [vmem:[#allocation84_spill] sm:$0xff] %v15089_v3  ;;  %v4763_v58 = vmul.f32 %v14504_v18, %v17536_v30  ;;  %v5356_v57 = vmul.f32 %v17538_v33, %v15083_v52  ;;  %17539 = vst [vmem:[#allocation101_spill] sm:$0xff] %v15105_v41  ;;  %v4576_v4 = vmul.f32 %v15105_v41, %v14756_v25  ;;  %v15127_v25 = vld [vmem:[%s16621_s2 + $0x328] sm:$0xff]  ;;  %v17544_v30 = vld [vmem:[#allocation18_spill] sm:$0xff] }
 0x337   : > { %v4645_v63 = vmul.f32 %v15105_v41, %v14768_v56  ;;  %v15116_v62 = vadd.f32 %v4715_v42, %v4609_v11  ;;  %v15118_v39 = vadd.f32 %v4784_v2, %v4678_v19  ;;  %v4714_v55 = vmul.f32 %v14469_v26, %v17542_v0  ;;  %v15129_v56 = vpop.f32.mrf.mxu0  ;;  %v17545_v19 = vld [vmem:[#allocation108_spill] sm:$0xff]  ;;  %v17548_v41 = vld [vmem:[#allocation118_spill] sm:$0xff]  ;;  %v17549_v27 = vld [vmem:[#allocation119_spill] sm:$0xff] }
 0x338   : > { %v4783_v36 = vmul.f32 %v14504_v18, %v17542_v0  ;;  %v4523_v42 = vadd.f32 %v14993_v6, %v17543_v8  ;;  %v5388_v2 = vadd.f32 %v5356_v57, %v17544_v30  ;;  %v4608_v35 = vadd.f32 %v4576_v4, %v4470_v7  ;;  %v17547_v0 = vld [vmem:[#allocation45_spill] sm:$0xff]  ;;  %v15147_v6 = vld [vmem:[%s16621_s2 + $0x348] sm:$0xff]  ;;  %v15149_v7 = vpop.f32.mrf.mxu1 }
 0x339   : > { %17540 = vst [vmem:[#allocation42_spill] sm:$0xff] %v15116_v62  ;;  %17541 = vst [vmem:[#allocation98_spill] sm:$0xff] %v15118_v39  ;;  %v4677_v11 = vadd.f32 %v4645_v63, %v4539_v43  ;;  %v17546_v39 = vld [vmem:[#allocation110_spill] sm:$0xff]  ;;  %v4588_v3 = vadd.f32 %v17548_v41, %v17547_v0  ;;  %v4657_v44 = vadd.f32 %v17549_v27, %v14989_v22  ;;  %v15160_v22 = vld [vmem:[%s16621_s2 + $0x310] sm:$0xff] }
 0x33a   : > { %v15136_v62 = vadd.f32 %v17546_v39, %v17545_v19  ;;  %v5358_v53 = vmul.f32 %v14898_v50, %v15015_v24  ;;  %17550 = vst [vmem:[#allocation50_spill] sm:$0xff] %v15149_v7  ;;  %v5285_v43 = vmul.f32 %v17523_v23, %v15114_v34  ;;  %v15153_v57 = vadd.f32 %v4714_v55, %v4608_v35  ;;  %v10375_v27 = vld [vmem:[%s12353_s8 + $0x48] sm:$0xff]  ;;  %v17553_v63 = vld [vmem:[#allocation109_spill] sm:$0xff]  ;;  %v17557_v55 = vld [vmem:[#allocation74_spill] sm:$0xff] }
 0x33b   : > { %v15155_v4 = vadd.f32 %v4783_v36, %v4677_v11  ;;  %v5492_v41 = vmul.f32 %v10375_v27, %v15127_v25  ;;  %v17554_v39 = vld [vmem:[#allocation111_spill] sm:$0xff]  ;;  %v15168_v30 = vadd.f32 %v4694_v54, %v4588_v3  ;;  %v15170_v23 = vadd.f32 %v4763_v58, %v4657_v44  ;;  %v15178_v35 = vld [vmem:[%s16621_s2 + $0x340] sm:$0xff]  ;;  %v15180_v11 = vpop.f32.mrf.mxu0  ;;  %v17559_v19 = vld [vmem:[#allocation133_spill] sm:$0xff] }
 0x33c   : > { %17551 = vst [vmem:[#allocation16_spill] sm:$0xff] %v15153_v57  ;;  %v15166_v8 = vadd.f32 %v17554_v39, %v17553_v63  ;;  %v15173_v36 = vadd.f32 %v5358_v53, %v17557_v55  ;;  %17558 = vst [vmem:[#allocation30_spill] sm:$0xff] %v15180_v11  ;;  %v4592_v0 = vadd.f32 %v17559_v19, %v15019_v59  ;;  %v17560_v63 = vld [vmem:[#allocation134_spill] sm:$0xff]  ;;  %v15193_v53 = vld [vmem:[%s16621_s2 + $0x1f8] sm:$0xff] }
 0x33d   : > { %17552 = vst [vmem:[#allocation61_spill] sm:$0xff] %v15155_v4  ;;  %17555 = vst [vmem:[#allocation131_spill] sm:$0xff] %v15168_v30  ;;  %v4661_v39 = vadd.f32 %v17560_v63, %v4523_v42  ;;  %v15188_v44 = vld [vmem:[%s16621_s2 + $0x1e0] sm:$0xff]  ;;  %v5524_v3 = vadd.f32 %v5492_v41, %v5386_v17  ;;  %v5630_v54 = vmul.f32 %v14841_v29, %v15147_v6  ;;  %v17561_v58 = vld [vmem:[#allocation9_spill] sm:$0xff]  ;;  %v15220_v4 = vpop.f32.mrf.mxu1 }
 0x33e   : > { %17556 = vst [vmem:[#allocation139_spill] sm:$0xff] %v15170_v23  ;;  %v4698_v55 = vmul.f32 %v14469_v26, %v17561_v58  ;;  %v15202_v59 = vld [vmem:[%s16621_s2 + $0x1f0] sm:$0xff]  ;;  %v5355_v42 = vmul.f32 %v15160_v22, %v14855_v20  ;;  %v5357_v19 = vmul.f32 %v15056_v47, %v14933_v1  ;;  %v10376_v63 = vld [vmem:[%s12353_s8 + $0x40] sm:$0xff]  ;;  %v15218_v26 = vld [vmem:[%s16621_s2 + $0x338] sm:$0xff]  ;;  %v4767_v57 = vmul.f32 %v14504_v18, %v17561_v58 }
 0x33f   : > { %v15212_v17 = vld [vmem:[%s16621_s2 + $0x320] sm:$0xff]  ;;  %17562 = vst [vmem:[#allocation38_spill] sm:$0xff] %v15220_v4  ;;  %v5317_v38 = vadd.f32 %v5285_v43, %v17563_v32  ;;  %v15230_v31 = vadd.f32 %v5630_v54, %v5524_v3  ;;  %v5629_v28 = vmul.f32 %v15178_v35, %v14881_v45  ;;  %v5284_v18 = vmul.f32 %v15188_v44, %v17531_v12  ;;  %v17566_v43 = vld [vmem:[#allocation44_spill] sm:$0xff]  ;;  %v15246_v3 = vpop.f32.mrf.mxu0  ;;  %v15272_v23 = vpop.f32.mrf.mxu1  ;;  %v15288_v7 = vld [vmem:[%s16621_s2 + $0x218] sm:$0xff] }
 0x340   : > { %v5491_v41 = vmul.f32 %v15212_v17, %v10376_v63  ;;  %v5287_v32 = vmul.f32 %v17538_v33, %v15193_v53  ;;  %v15244_v58 = vadd.f32 %v5357_v19, %v17566_v43  ;;  %17567 = vst [vmem:[#allocation41_spill] sm:$0xff] %v15246_v3  ;;  %v5286_v54 = vmul.f32 %v15202_v59, %v14855_v20  ;;  %v10378_v33 = vld [vmem:[%s12353_s8 + $0x58] sm:$0xff]  ;;  %v17568_v19 = vld [vmem:[#allocation71_spill] sm:$0xff]  ;;  %v17574_v4 = vld [vmem:[#allocation136_spill] sm:$0xff] }
 0x341   : > { %17564 = vst [vmem:[#allocation99_spill] sm:$0xff] %v15230_v31  ;;  %v5289_v31 = vmul.f32 %v14898_v50, %v15114_v34  ;;  %v5360_v12 = vmul.f32 %v14962_v16, %v15083_v52  ;;  %v5423_v43 = vmul.f32 %v10375_v27, %v15228_v51  ;;  %v5632_v50 = vmul.f32 %v14912_v61, %v15237_v37 }
 0x342   : > { %v5523_v46 = vadd.f32 %v5491_v41, %v5385_v15  ;;  %v5494_v15 = vmul.f32 %v10378_v33, %v15218_v26  ;;  %v5387_v41 = vadd.f32 %v5355_v42, %v17568_v19  ;;  %17571 = vst [vmem:[#allocation122_spill] sm:$0xff] %v15272_v23  ;;  %v15274_v30 = vadd.f32 %v4698_v55, %v4592_v0  ;;  %v17576_v19 = vld [vmem:[#allocation76_spill] sm:$0xff] }
 0x343   : > { %v15276_v3 = vadd.f32 %v4767_v57, %v4661_v39  ;;  %v15279_v42 = vadd.f32 %v5360_v12, %v17574_v4  ;;  %v5561_v11 = vmul.f32 %v14841_v29, %v15255_v49  ;;  %v10379_v0 = vld [vmem:[%s12353_s8 + $0x50] sm:$0xff]  ;;  %v15297_v4 = vpop.f32.mrf.mxu0  ;;  %v17579_v39 = vld [vmem:[#allocation33_spill] sm:$0xff] }
 0x344   : > { %v15263_v20 = vadd.f32 %v5629_v28, %v5523_v46  ;;  %17572 = vst [vmem:[#allocation88_spill] sm:$0xff] %v15274_v30  ;;  %v5526_v27 = vadd.f32 %v5494_v15, %v5388_v2  ;;  %v17575_v46 = vld [vmem:[#allocation126_spill] sm:$0xff]  ;;  %v15294_v57 = vld [vmem:[%s16621_s2 + $0x330] sm:$0xff]  ;;  %17578 = vst [vmem:[#allocation6_spill] sm:$0xff] %v15297_v4  ;;  %v5318_v55 = vadd.f32 %v5286_v54, %v17579_v39  ;;  %v15332_v39 = vpop.f32.mrf.mxu1 }
 0x345   : > { %17573 = vst [vmem:[#allocation65_spill] sm:$0xff] %v15276_v3  ;;  %v5316_v28 = vadd.f32 %v5284_v18, %v17575_v46  ;;  %17577 = vst [vmem:[#allocation15_spill] sm:$0xff] %v15294_v57  ;;  %v5493_v2 = vmul.f32 %v15294_v57, %v10379_v0  ;;  %v17580_v18 = vld [vmem:[#allocation54_spill] sm:$0xff]  ;;  %v15306_v12 = vld [vmem:[%s16621_s2 + $0x230] sm:$0xff]  ;;  %v5631_v15 = vmul.f32 %v15270_v60, %v14950_v14 }
 0x346   : > { %17569 = vst [vmem:[#allocation92_spill] sm:$0xff] %v15263_v20  ;;  %v5319_v20 = vadd.f32 %v5287_v32, %v17576_v19  ;;  %v5321_v32 = vadd.f32 %v5289_v31, %v17580_v18  ;;  %v15301_v29 = vadd.f32 %v5632_v50, %v5526_v27  ;;  %v5455_v46 = vadd.f32 %v5423_v43, %v5317_v38  ;;  %v15313_v19 = vld [vmem:[%s16621_s2 + $0x200] sm:$0xff]  ;;  %v15324_v50 = vld [vmem:[%s16621_s2 + $0x238] sm:$0xff]  ;;  %v15329_v38 = vld [vmem:[%s16621_s2 + $0x210] sm:$0xff] }
 0x347   : > { %v5422_v54 = vmul.f32 %v15313_v19, %v10376_v63  ;;  %v15319_v31 = vld [vmem:[%s16621_s2 + $0x220] sm:$0xff]  ;;  %17582 = vst [vmem:[#allocation2_spill] sm:$0xff] %v15324_v50  ;;  %v5424_v43 = vmul.f32 %v15329_v38, %v10379_v0  ;;  %v5525_v27 = vadd.f32 %v5493_v2, %v5387_v41  ;;  %17583 = vst [vmem:[#allocation78_spill] sm:$0xff] %v15332_v39  ;;  %v15347_v2 = vpop.f32.mrf.mxu0  ;;  %v17586_v39 = vld [vmem:[#allocation57_spill] sm:$0xff] }
 0x348   : > { %17581 = vst [vmem:[#allocation91_spill] sm:$0xff] %v15301_v29  ;;  %v5288_v63 = vmul.f32 %v15188_v44, %v14933_v1  ;;  %v5425_v18 = vmul.f32 %v10378_v33, %v15288_v7  ;;  %v5362_v3 = vmul.f32 %v15044_v21, %v15015_v24  ;;  %v10383_v29 = vld [vmem:[%s12353_s8 + $0x68] sm:$0xff]  ;;  %v5593_v23 = vadd.f32 %v5561_v11, %v5455_v46 }
 0x349   : > { %v5496_v30 = vmul.f32 %v10383_v29, %v15127_v25  ;;  %v5562_v4 = vmul.f32 %v15306_v12, %v14950_v14  ;;  %v15343_v0 = vadd.f32 %v5631_v15, %v5525_v27  ;;  %v5634_v41 = vmul.f32 %v14983_v13, %v15147_v6  ;;  %17585 = vst [vmem:[#allocation127_spill] sm:$0xff] %v15347_v2  ;;  %v10384_v27 = vld [vmem:[%s12353_s8 + $0x60] sm:$0xff]  ;;  %v15361_v2 = vpop.f32.mrf.mxu1 }
 0x34a   : > { %v5560_v1 = vmul.f32 %v15319_v31, %v14881_v45  ;;  %v5563_v33 = vmul.f32 %v14912_v61, %v15324_v50  ;;  %v15354_v24 = vadd.f32 %v5362_v3, %v17586_v39  ;;  %v5454_v46 = vadd.f32 %v5422_v54, %v5316_v28  ;;  %v17588_v28 = vld [vmem:[#allocation60_spill] sm:$0xff] }
 0x34b   : > { %17584 = vst [vmem:[#allocation120_spill] sm:$0xff] %v15343_v0  ;;  %v5528_v11 = vadd.f32 %v5496_v30, %v15173_v36  ;;  %v5456_v14 = vadd.f32 %v5424_v43, %v5318_v55  ;;  %v5361_v15 = vmul.f32 %v15056_v47, %v15085_v10  ;;  %v5495_v0 = vmul.f32 %v10384_v27, %v15212_v17  ;;  %v15374_v43 = vpop.f32.mrf.mxu0 }
 0x34c   : > { %v5457_v45 = vadd.f32 %v5425_v18, %v5319_v20  ;;  %v5359_v61 = vmul.f32 %v15160_v22, %v15002_v48  ;;  %v5633_v30 = vmul.f32 %v15178_v35, %v15023_v9  ;;  %v5427_v3 = vmul.f32 %v10383_v29, %v15228_v51 }
 0x34d   : > { %v15365_v50 = vadd.f32 %v5634_v41, %v5528_v11  ;;  %v5594_v36 = vadd.f32 %v5562_v4, %v5456_v14  ;;  %v15371_v55 = vadd.f32 %v5361_v15, %v17588_v28  ;;  %v5527_v54 = vadd.f32 %v5495_v0, %v15244_v58  ;;  %v10385_v41 = vld [vmem:[%s12353_s8 + $0x78] sm:$0xff] }
 0x34e   : > { %v5291_v20 = vmul.f32 %v14962_v16, %v15193_v53  ;;  %v5595_v39 = vadd.f32 %v5563_v33, %v5457_v45  ;;  %v5290_v18 = vmul.f32 %v15202_v59, %v15002_v48  ;;  %v5498_v11 = vmul.f32 %v10385_v41, %v15218_v26  ;;  %v15390_v16 = vpop.f32.mrf.mxu1 }
 0x34f   : > { %17587 = vst [vmem:[#allocation83_spill] sm:$0xff] %v15365_v50  ;;  %v5293_v4 = vmul.f32 %v15044_v21, %v15114_v34  ;;  %v5565_v29 = vmul.f32 %v14983_v13, %v15255_v49  ;;  %v15386_v58 = vadd.f32 %v5633_v30, %v5527_v54  ;;  %v5636_v0 = vmul.f32 %v15064_v40, %v15237_v37  ;;  %v17590_v21 = vld [vmem:[#allocation90_spill] sm:$0xff]  ;;  %v15398_v54 = vpop.f32.mrf.mxu0  ;;  %v17591_v50 = vld [vmem:[#allocation56_spill] sm:$0xff] }
 0x350   : > { %v5592_v33 = vadd.f32 %v5560_v1, %v5454_v46  ;;  %v5391_v48 = vadd.f32 %v5359_v61, %v15166_v8  ;;  %v5292_v14 = vmul.f32 %v15188_v44, %v15085_v10  ;;  %v5530_v15 = vadd.f32 %v5498_v11, %v15279_v42  ;;  %v10386_v8 = vld [vmem:[%s12353_s8 + $0x70] sm:$0xff]  ;;  %v17593_v46 = vld [vmem:[#allocation47_spill] sm:$0xff] }
 0x351   : > { %17589 = vst [vmem:[#allocation128_spill] sm:$0xff] %v15386_v58  ;;  %v5320_v45 = vadd.f32 %v5288_v63, %v17590_v21  ;;  %v5459_v28 = vadd.f32 %v5427_v3, %v5321_v32  ;;  %v5426_v13 = vmul.f32 %v10384_v27, %v15313_v19  ;;  %v5706_v30 = vpack.c.bf16 %v5595_v39, %v5594_v36  ;;  %v10387_v11 = vld [vmem:[%s12353_s8 + $0x88] sm:$0xff] }
 0x352   : > { %v5323_v58 = vadd.f32 %v5291_v20, %v17591_v50  ;;  %v5322_v37 = vadd.f32 %v5290_v18, %v15136_v62  ;;  %v15402_v1 = vadd.f32 %v5636_v0, %v5530_v15  ;;  %v5497_v10 = vmul.f32 %v10386_v8, %v15294_v57  ;;  %v15413_v50 = vpop.f32.mrf.mxu1  ;;  %v17595_v62 = vld [vmem:[#allocation34_spill] sm:$0xff] }
 0x353   : > { %v5325_v42 = vadd.f32 %v5293_v4, %v17593_v46  ;;  %v15407_v61 = vadd.f32 %v5565_v29, %v5459_v28  ;;  %v5564_v32 = vmul.f32 %v15319_v31, %v15023_v9  ;;  %9898 = vmatprep.subr.bf16.mxu0 %v5706_v30  ;;  %v5635_v63 = vmul.f32 %v15270_v60, %v15098_v5  ;;  %v15424_v29 = vpop.f32.mrf.mxu0  ;;  %v17601_v46 = vld [vmem:[#allocation38_spill] sm:$0xff] }
 0x354   : > { %17592 = vst [vmem:[#allocation125_spill] sm:$0xff] %v15402_v1  ;;  %17594 = vst [vmem:[#allocation97_spill] sm:$0xff] %v15413_v50  ;;  %v15416_v27 = vadd.f32 %v5292_v14, %v17595_v62  ;;  %v5428_v36 = vmul.f32 %v10386_v8, %v15329_v38  ;;  %v5529_v3 = vadd.f32 %v5497_v10, %v5391_v48  ;;  %9899 = vmatpush3.bf16.msra.mxu0 %v5706_v30  ;;  %v15439_v30 = vpop.f32.mrf.mxu1  ;;  %v10388_v8 = vld [vmem:[%s12353_s8 + $0x80] sm:$0xff] }
 0x355   : > { %v5705_v20 = vpack.c.bf16 %v5593_v23, %v5592_v33  ;;  %v5458_v39 = vadd.f32 %v5426_v13, %v5320_v45  ;;  %v5295_v18 = vmul.f32 %v15129_v56, %v15193_v53  ;;  %v5429_v9 = vmul.f32 %v10385_v41, %v15288_v7  ;;  %v17597_v23 = vld [vmem:[#allocation50_spill] sm:$0xff]  ;;  %17600 = vst [vmem:[#allocation108_spill] sm:$0xff] %v15439_v30 }
 0x356   : > { %v5500_v4 = vmul.f32 %v10387_v11, %v15127_v25  ;;  %v5364_v0 = vmul.f32 %v15129_v56, %v15083_v52  ;;  %v5566_v48 = vmul.f32 %v15306_v12, %v15098_v5  ;;  %v15430_v14 = vadd.f32 %v5635_v63, %v5529_v3  ;;  %v17598_v41 = vld [vmem:[#allocation2_spill] sm:$0xff]  ;;  %v17602_v63 = vld [vmem:[#allocation93_spill] sm:$0xff] }
 0x357   : > { %9900 = vmatprep.subr.bf16.mxu0 %v5705_v20  ;;  %v5638_v33 = vmul.f32 %v17597_v23, %v15147_v6  ;;  %v5596_v15 = vadd.f32 %v5564_v32, %v5458_v39  ;;  %v5567_v21 = vmul.f32 %v15064_v40, %v17598_v41  ;;  %v17599_v45 = vld [vmem:[#allocation30_spill] sm:$0xff]  ;;  %v5460_v56 = vadd.f32 %v5428_v36, %v5322_v37  ;;  %v17604_v36 = vld [vmem:[#allocation41_spill] sm:$0xff] }
 0x358   : > { %17596 = vst [vmem:[#allocation18_spill] sm:$0xff] %v15430_v14  ;;  %v5294_v28 = vmul.f32 %v15202_v59, %v17599_v45  ;;  %v5532_v13 = vadd.f32 %v5500_v4, %v15354_v24  ;;  %v5363_v5 = vmul.f32 %v15160_v22, %v17599_v45  ;;  %v5499_v10 = vmul.f32 %v10388_v8, %v15212_v17  ;;  %v8559_v24 = vld [vmem:[%s16623_s4 + $0x20] sm:$0xff]  ;;  %v15454_v4 = vpop.f32.mrf.mxu0  ;;  %v17611_v14 = vld [vmem:[#allocation139_spill] sm:$0xff] }
 0x359   : > { %v5637_v32 = vmul.f32 %v15178_v35, %v17601_v46  ;;  %9901 = vmatpush3.bf16.msra.mxu0 %v5705_v20  ;;  %v5327_v40 = vadd.f32 %v5295_v18, %v17602_v63  ;;  %v5461_v62 = vadd.f32 %v5429_v9, %v5323_v58  ;;  %v5431_v3 = vmul.f32 %v10387_v11, %v15228_v51  ;;  %v17605_v1 = vld [vmem:[#allocation142_spill] sm:$0xff]  ;;  %v8560_v58 = vld [vmem:[%s16623_s4 + $0x28] sm:$0xff]  ;;  %v8561_v9 = vld [vmem:[%s16623_s4 + $0x30] sm:$0xff]  ;;  %v15477_v63 = vpop.f32.mrf.mxu1 }
 0x35a   : > { %v15449_v39 = vadd.f32 %v5638_v33, %v5532_v13  ;;  %v5598_v37 = vadd.f32 %v5566_v48, %v5460_v56  ;;  %v5297_v45 = vmul.f32 %v17604_v36, %v15114_v34  ;;  %v5366_v20 = vmul.f32 %v17604_v36, %v17605_v1  ;;  %v8562_v11 = vld [vmem:[%s16623_s4 + $0x38] sm:$0xff]  ;;  %v17606_v48 = vld [vmem:[#allocation4_spill] sm:$0xff]  ;;  %v17608_v56 = vld [vmem:[#allocation6_spill] sm:$0xff]  ;;  %17609 = vst [vmem:[#allocation118_spill] sm:$0xff] %v15477_v63 }
 0x35b   : > { %v5531_v18 = vadd.f32 %v5499_v10, %v15371_v55  ;;  %v15471_v33 = vadd.f32 %v5364_v0, %v17606_v48  ;;  %v5599_v13 = vadd.f32 %v5567_v21, %v5461_v62  ;;  %v5569_v55 = vmul.f32 %v17597_v23, %v15255_v49  ;;  %v17610_v36 = vld [vmem:[#allocation131_spill] sm:$0xff]  ;;  %v17615_v63 = vld [vmem:[#allocation85_spill] sm:$0xff] }
 0x35c   : > { %17603 = vst [vmem:[#allocation110_spill] sm:$0xff] %v15449_v39  ;;  %v5296_v10 = vmul.f32 %v15188_v44, %v17608_v56  ;;  %v5326_v39 = vadd.f32 %v5294_v28, %v17610_v36  ;;  %v15481_v30 = vadd.f32 %v5363_v5, %v17611_v14  ;;  %v5365_v50 = vmul.f32 %v15056_v47, %v17608_v56  ;;  %v17616_v36 = vld [vmem:[#allocation5_spill] sm:$0xff] }
 0x35d   : > { %17607 = vst [vmem:[#allocation45_spill] sm:$0xff] %v15471_v33  ;;  %v15485_v0 = vadd.f32 %v5637_v32, %v5531_v18  ;;  %v5463_v48 = vadd.f32 %v5431_v3, %v5325_v42  ;;  %v5430_v21 = vmul.f32 %v10388_v8, %v15313_v19  ;;  %v15488_v62 = vpack.c.bf16 %v8560_v58, %v8559_v24  ;;  %v15492_v33 = vpop.f32.mrf.mxu0  ;;  %v10389_v5 = vld [vmem:[%s12353_s8 + $0x98] sm:$0xff]  ;;  %v17618_v24 = vld [vmem:[#allocation127_spill] sm:$0xff] }
 0x35e   : > { %17612 = vst [vmem:[#allocation119_spill] sm:$0xff] %v15481_v30  ;;  %v15490_v23 = vpack.c.bf16 %v8562_v11, %v8561_v9  ;;  %v5329_v28 = vadd.f32 %v5297_v45, %v17615_v63  ;;  %v5398_v14 = vadd.f32 %v5366_v20, %v17616_v36  ;;  %v5433_v30 = vmul.f32 %v10389_v5, %v15288_v7  ;;  %v17617_v42 = vld [vmem:[#allocation77_spill] sm:$0xff]  ;;  %v15509_v45 = vpop.f32.mrf.mxu1  ;;  %v17619_v20 = vld [vmem:[#allocation10_spill] sm:$0xff]  ;;  %v10390_v11 = vld [vmem:[%s12353_s8 + $0x90] sm:$0xff] }
 0x35f   : > { %17613 = vst [vmem:[#allocation109_spill] sm:$0xff] %v15485_v0  ;;  %17614 = vst [vmem:[#allocation111_spill] sm:$0xff] %v15488_v62  ;;  %v5765_v56 = vpack.c.bf16 %v5599_v13, %v5598_v37  ;;  %v15498_v32 = vadd.f32 %v5569_v55, %v5463_v48  ;;  %v15501_v3 = vadd.f32 %v5296_v10, %v17617_v42  ;;  %9902 = vmatprep.mubr.msk.bf16.mxu0 %vm2469_vm5, %v15488_v62  ;;  %v17620_v37 = vld [vmem:[#allocation122_spill] sm:$0xff]  ;;  %v15526_v63 = vpop.f32.mrf.mxu0 }
 0x360   : > { %v5568_v8 = vmul.f32 %v15319_v31, %v17601_v46  ;;  %v5299_v18 = vmul.f32 %v17618_v24, %v15193_v53  ;;  %v5397_v58 = vadd.f32 %v5365_v50, %v17619_v20  ;;  %v5571_v9 = vmul.f32 %v17620_v37, %v17598_v41  ;;  %9903 = vmatmul.mubr.msk.bf16.vlgmr.msra.gmra.mxu0 %vm2469_vm5, %v15490_v23  ;;  %v17623_v42 = vld [vmem:[#allocation78_spill] sm:$0xff]  ;;  %v17637_v37 = vld [vmem:[#allocation64_spill] sm:$0xff] }
 0x361   : > { %9906 = vmatprep.subr.bf16.mxu1 %v5765_v56  ;;  %v5432_v46 = vmul.f32 %v10390_v11, %v15329_v38  ;;  %v5462_v13 = vadd.f32 %v5430_v21, %v15416_v27  ;;  %v15521_v55 = vmul.f32 %v17618_v24, %v15083_v52  ;;  %v5298_v50 = vmul.f32 %v15202_v59, %v15374_v43  ;;  %v17624_v24 = vld [vmem:[#allocation25_spill] sm:$0xff] }
 0x362   : > { %9907 = vmatpush3.bf16.msra.mxu1 %v5765_v56  ;;  %v5764_v10 = vpack.c.bf16 %v15407_v61, %v5596_v15  ;;  %v5465_v48 = vadd.f32 %v5433_v30, %v5327_v40  ;;  %v15529_v36 = vmul.f32 %v10389_v5, %v15218_v26  ;;  %v5570_v20 = vmul.f32 %v15306_v12, %v17623_v42  ;;  %v10391_v15 = vld [vmem:[%s12353_s8 + $0xa8] sm:$0xff]  ;;  %v15544_v40 = vpop.f32.mrf.mxu1 }
 0x363   : > { %17621 = vst [vmem:[#allocation74_spill] sm:$0xff] %v15521_v55  ;;  %v5301_v27 = vmul.f32 %v15398_v54, %v15114_v34  ;;  %9910 = vmatprep.mubr.msk.bf16.mxu1 %vm2469_vm5, %v15488_v62  ;;  %v5600_v21 = vadd.f32 %v5568_v8, %v5462_v13  ;;  %v5331_v56 = vadd.f32 %v5299_v18, %v17624_v24  ;;  %v17626_v18 = vld [vmem:[#allocation88_spill] sm:$0xff] }
 0x364   : > { %17622 = vst [vmem:[#allocation133_spill] sm:$0xff] %v15529_v36  ;;  %v15540_v61 = vmul.f32 %v15160_v22, %v15374_v43  ;;  %9908 = vmatprep.subr.bf16.mxu1 %v5764_v10  ;;  %v5435_v30 = vmul.f32 %v10391_v15, %v15228_v51  ;;  %v5603_v5 = vadd.f32 %v5571_v9, %v5465_v48  ;;  %v4995_v9 = vpop.f32.mrf.mxu0 }
 0x365   : > { %v5464_v55 = vadd.f32 %v5432_v46, %v5326_v39  ;;  %v5370_v36 = vmul.f32 %v15398_v54, %v17605_v1  ;;  %v5504_v8 = vmul.f32 %v10391_v15, %v15127_v25  ;;  %9918 = vmatprep.mubr.msk.bf16.mxu0 %vm2469_vm5, %v15488_v62  ;;  %v5330_v43 = vadd.f32 %v5298_v50, %v17626_v18  ;;  %v17629_v46 = vld [vmem:[#allocation75_spill] sm:$0xff] }
 0x366   : > { %17625 = vst [vmem:[#allocation134_spill] sm:$0xff] %v15540_v61  ;;  %v15553_v13 = vmul.f32 %v10390_v11, %v15294_v57  ;;  %v15557_v24 = vmul.f32 %v15270_v60, %v17623_v42  ;;  %v5573_v39 = vmul.f32 %v15361_v2, %v15255_v49  ;;  %9909 = vmatpush3.bf16.msra.mxu1 %v5764_v10  ;;  %v10392_v42 = vld [vmem:[%s12353_s8 + $0xa0] sm:$0xff]  ;;  %v15571_v10 = vpop.f32.mrf.mxu1  ;;  %v17638_v60 = vld [vmem:[#allocation32_spill] sm:$0xff] }
 0x367   : > { %v5602_v54 = vadd.f32 %v5570_v20, %v5464_v55  ;;  %v5333_v48 = vadd.f32 %v5301_v27, %v17629_v46  ;;  %v5642_v15 = vmul.f32 %v15361_v2, %v15147_v6  ;;  %v5300_v50 = vmul.f32 %v15188_v44, %v15424_v29  ;;  %17630 = vst [vmem:[#allocation44_spill] sm:$0xff] %v15571_v10  ;;  %v17631_v55 = vld [vmem:[#allocation114_spill] sm:$0xff]  ;;  %v17632_v46 = vld [vmem:[#allocation121_spill] sm:$0xff] }
 0x368   : > { %17627 = vst [vmem:[#allocation9_spill] sm:$0xff] %v15553_v13  ;;  %17628 = vst [vmem:[#allocation52_spill] sm:$0xff] %v15557_v24  ;;  %v5467_v11 = vadd.f32 %v5435_v30, %v5329_v28  ;;  %v5369_v18 = vmul.f32 %v15056_v47, %v15424_v29  ;;  %v5434_v24 = vmul.f32 %v10392_v42, %v15313_v19  ;;  %v15599_v10 = vpop.f32.mrf.mxu1 }
 0x369   : > { %v5503_v61 = vmul.f32 %v10392_v42, %v15212_v17  ;;  %v5402_v20 = vadd.f32 %v5370_v36, %v17631_v55  ;;  %v5536_v27 = vadd.f32 %v5504_v8, %v5398_v14  ;;  %v5572_v2 = vmul.f32 %v15319_v31, %v15390_v16  ;;  %9911 = vmatmul.mubr.msk.bf16.vlgmr.msra.gmra.mxu1 %vm2469_vm5, %v15490_v23  ;;  %v9833_v36 = vpop.f32.mrf.mxu0  ;;  %v17635_v42 = vld [vmem:[#allocation86_spill] sm:$0xff] }
 0x36a   : > { %v5437_v13 = vmul.f32 %v17632_v46, %v15288_v7  ;;  %v15580_v29 = vadd.f32 %v5573_v39, %v5467_v11  ;;  %v5641_v28 = vmul.f32 %v15178_v35, %v15390_v16  ;;  %v5303_v30 = vmul.f32 %v15454_v4, %v15193_v53  ;;  %9926 = vmatprep.mubr.msk.bf16.mxu1 %vm2469_vm5, %v15488_v62  ;;  %v17636_v39 = vld [vmem:[#allocation97_spill] sm:$0xff] }
 0x36b   : > { %v5372_v14 = vmul.f32 %v15454_v4, %v15083_v52  ;;  %v15590_v8 = vadd.f32 %v5642_v15, %v5536_v27  ;;  %v5332_v55 = vadd.f32 %v5300_v50, %v17635_v42  ;;  %v5575_v11 = vmul.f32 %v17636_v39, %v17598_v41  ;;  %v17639_v27 = vld [vmem:[#allocation108_spill] sm:$0xff]  ;;  %v17643_v42 = vld [vmem:[#allocation7_spill] sm:$0xff] }
 0x36c   : > { %17633 = vst [vmem:[#allocation71_spill] sm:$0xff] %v15580_v29  ;;  %v5818_v46 = vpack.c.bf16 %v5603_v5, %v5602_v54  ;;  %v5401_v16 = vadd.f32 %v5369_v18, %v17637_v37  ;;  %v5466_v0 = vadd.f32 %v5434_v24, %v15501_v3  ;;  %v5535_v29 = vadd.f32 %v5503_v61, %v5397_v58  ;;  %v17641_v58 = vld [vmem:[#allocation123_spill] sm:$0xff] }
 0x36d   : > { %17634 = vst [vmem:[#allocation136_spill] sm:$0xff] %v15590_v8  ;;  %v5436_v4 = vmul.f32 %v15329_v38, %v17638_v60  ;;  %v5469_v57 = vadd.f32 %v5437_v13, %v5331_v56  ;;  %v5302_v15 = vmul.f32 %v15202_v59, %v15492_v33  ;;  %v5371_v50 = vmul.f32 %v15160_v22, %v15492_v33  ;;  %v17642_v60 = vld [vmem:[#allocation124_spill] sm:$0xff]  ;;  %v5005_v56 = vpop.f32.mrf.mxu0 }
 0x36e   : > { %9914 = vmatprep.subr.bf16.mxu0 %v5818_v46  ;;  %v5574_v5 = vmul.f32 %v15306_v12, %v17639_v27  ;;  %v15607_v37 = vadd.f32 %v5572_v2, %v5466_v0  ;;  %v15609_v3 = vadd.f32 %v5641_v28, %v5535_v29  ;;  %v5335_v61 = vadd.f32 %v5303_v30, %v17641_v58  ;;  %v17644_v29 = vld [vmem:[#allocation118_spill] sm:$0xff]  ;;  %v15624_v30 = vpop.f32.mrf.mxu1  ;;  %v17647_v58 = vld [vmem:[#allocation17_spill] sm:$0xff] }
 0x36f   : > { %v5404_v24 = vadd.f32 %v5372_v14, %v17642_v60  ;;  %9915 = vmatpush3.bf16.msra.mxu0 %v5818_v46  ;;  %v5607_v13 = vadd.f32 %v5575_v11, %v5469_v57  ;;  %v5468_v54 = vadd.f32 %v5436_v4, %v5330_v43  ;;  %v5817_v18 = vpack.c.bf16 %v15498_v32, %v5600_v21  ;;  %v17645_v57 = vld [vmem:[#allocation81_spill] sm:$0xff]  ;;  %v17646_v32 = vld [vmem:[#allocation130_spill] sm:$0xff] }
 0x370   : > { %17640 = vst [vmem:[#allocation126_spill] sm:$0xff] %v15609_v3  ;;  %v5439_v33 = vmul.f32 %v17643_v42, %v15228_v51  ;;  %v5305_v39 = vmul.f32 %v15526_v63, %v15114_v34  ;;  %v5374_v0 = vmul.f32 %v15526_v63, %v17605_v1  ;;  %v5508_v2 = vmul.f32 %v17643_v42, %v15127_v25  ;;  %v9836_v42 = vpop.f32.mrf.mxu0 }
 0x371   : > { %v5577_v28 = vmul.f32 %v17644_v29, %v15255_v49  ;;  %v5334_v43 = vadd.f32 %v5302_v15, %v17645_v57  ;;  %v5403_v21 = vadd.f32 %v5371_v50, %v17646_v32  ;;  %v5606_v14 = vadd.f32 %v5574_v5, %v5468_v54  ;;  %9916 = vmatprep.subr.bf16.mxu0 %v5817_v18  ;;  %v17649_v54 = vld [vmem:[#allocation105_spill] sm:$0xff] }
 0x372   : > { %v5646_v11 = vmul.f32 %v17644_v29, %v15147_v6  ;;  %v5471_v46 = vadd.f32 %v5439_v33, %v5333_v48  ;;  %v5540_v4 = vadd.f32 %v5508_v2, %v5402_v20  ;;  %v5304_v63 = vmul.f32 %v15188_v44, %v4995_v9  ;;  %v17648_v48 = vld [vmem:[#allocation62_spill] sm:$0xff] }
 0x373   : > { %v5438_v60 = vmul.f32 %v15313_v19, %v17647_v58  ;;  %9917 = vmatpush3.bf16.msra.mxu0 %v5817_v18  ;;  %v5373_v27 = vmul.f32 %v15056_v47, %v4995_v9  ;;  %v5507_v15 = vmul.f32 %v15212_v17, %v17647_v58  ;;  %v5576_v50 = vmul.f32 %v15319_v31, %v15509_v45  ;;  %v15646_v18 = vpop.f32.mrf.mxu1  ;;  %v17652_v58 = vld [vmem:[#allocation106_spill] sm:$0xff] }
 0x374   : > { %v5645_v5 = vmul.f32 %v15178_v35, %v15509_v45  ;;  %v5337_v20 = vadd.f32 %v5305_v39, %v17648_v48  ;;  %v5406_v33 = vadd.f32 %v5374_v0, %v17649_v54  ;;  %v15642_v2 = vadd.f32 %v5577_v28, %v5471_v46  ;;  %v17653_v45 = vld [vmem:[#allocation22_spill] sm:$0xff] }
 0x375   : > { %v15644_v29 = vadd.f32 %v5646_v11, %v5540_v4  ;;  %v5470_v9 = vadd.f32 %v5438_v60, %v5332_v55  ;;  %v5539_v57 = vadd.f32 %v5507_v15, %v5401_v16  ;;  %v5307_v32 = vmul.f32 %v9833_v36, %v15193_v53  ;;  %v5015_v55 = vpop.f32.mrf.mxu0  ;;  %v17654_v16 = vld [vmem:[#allocation102_spill] sm:$0xff] }
 0x376   : > { %17650 = vst [vmem:[#allocation76_spill] sm:$0xff] %v15642_v2  ;;  %v5441_v8 = vmul.f32 %v17652_v58, %v15288_v7  ;;  %9919 = vmatmul.mubr.msk.bf16.vlgmr.msra.gmra.mxu0 %vm2469_vm5, %v15490_v23  ;;  %v5336_v39 = vadd.f32 %v5304_v63, %v17653_v45  ;;  %v5376_v0 = vmul.f32 %v9833_v36, %v15083_v52  ;;  %v17656_v15 = vld [vmem:[#allocation94_spill] sm:$0xff]  ;;  %v17657_v36 = vld [vmem:[#allocation37_spill] sm:$0xff] }
 0x377   : > { %17651 = vst [vmem:[#allocation33_spill] sm:$0xff] %v15644_v29  ;;  %v5510_v28 = vmul.f32 %v17652_v58, %v15218_v26  ;;  %v5579_v11 = vmul.f32 %v15544_v40, %v17598_v41  ;;  %9934 = vmatprep.mubr.msk.bf16.mxu0 %vm2469_vm5, %v15488_v62  ;;  %v5405_v46 = vadd.f32 %v5373_v27, %v17654_v16  ;;  %v15669_v29 = vpop.f32.mrf.mxu1  ;;  %v17658_v62 = vld [vmem:[#allocation80_spill] sm:$0xff]  ;;  %v17664_v16 = vld [vmem:[#allocation71_spill] sm:$0xff] }
 0x378   : > { %v15662_v4 = vadd.f32 %v5576_v50, %v5470_v9  ;;  %v15664_v60 = vadd.f32 %v5645_v5, %v5539_v57  ;;  %v5648_v63 = vmul.f32 %v15544_v40, %v17656_v15  ;;  %v5339_v48 = vadd.f32 %v5307_v32, %v17657_v36  ;;  %v17659_v50 = vld [vmem:[#allocation15_spill] sm:$0xff]  ;;  %v17661_v32 = vld [vmem:[#allocation44_spill] sm:$0xff] }
 0x379   : > { %v5473_v54 = vadd.f32 %v5441_v8, %v5335_v61  ;;  %v5542_v58 = vadd.f32 %v5510_v28, %v5404_v24  ;;  %v5871_v45 = vpack.c.bf16 %v5607_v13, %v5606_v14  ;;  %v5306_v3 = vmul.f32 %v15202_v59, %v5005_v56  ;;  %v17660_v9 = vld [vmem:[#allocation55_spill] sm:$0xff]  ;;  %v17662_v61 = vld [vmem:[#allocation112_spill] sm:$0xff]  ;;  %v9839_v13 = vpop.f32.mrf.mxu0 }
 0x37a   : > { %17655 = vst [vmem:[#allocation54_spill] sm:$0xff] %v15664_v60  ;;  %v5375_v2 = vmul.f32 %v15160_v22, %v5005_v56  ;;  %v5440_v27 = vmul.f32 %v15329_v38, %v17658_v62  ;;  %v5509_v5 = vmul.f32 %v17659_v50, %v17658_v62  ;;  %v5408_v57 = vadd.f32 %v5376_v0, %v17660_v9 }
 0x37b   : > { %v5611_v40 = vadd.f32 %v5579_v11, %v5473_v54  ;;  %9922 = vmatprep.subr.bf16.mxu1 %v5871_v45  ;;  %v5578_v8 = vmul.f32 %v15306_v12, %v17661_v32  ;;  %v5647_v24 = vmul.f32 %v17662_v61, %v17661_v32  ;;  %v15682_v14 = vadd.f32 %v5648_v63, %v5542_v58  ;;  %v17665_v11 = vld [vmem:[#allocation39_spill] sm:$0xff]  ;;  %v15692_v32 = vpop.f32.mrf.mxu1 }
 0x37c   : > { %v5472_v56 = vadd.f32 %v5440_v27, %v5334_v43  ;;  %v5541_v28 = vadd.f32 %v5509_v5, %v5403_v21  ;;  %9923 = vmatpush3.bf16.msra.mxu1 %v5871_v45  ;;  %v5870_v36 = vpack.c.bf16 %v17664_v16, %v15607_v37  ;;  %v5309_v62 = vmul.f32 %v9836_v42, %v15114_v34  ;;  %v17667_v63 = vld [vmem:[#allocation135_spill] sm:$0xff] }
 0x37d   : > { %17663 = vst [vmem:[#allocation57_spill] sm:$0xff] %v15682_v14  ;;  %v5378_v0 = vmul.f32 %v9836_v42, %v17605_v1  ;;  %v5443_v54 = vmul.f32 %v17665_v11, %v15228_v51  ;;  %v5512_v9 = vmul.f32 %v17665_v11, %v15127_v25  ;;  %17666 = vst [vmem:[#allocation60_spill] sm:$0xff] %v15692_v32  ;;  %v17668_v43 = vld [vmem:[#allocation35_spill] sm:$0xff]  ;;  %v5025_v11 = vpop.f32.mrf.mxu0 }
 0x37e   : > { %v5338_v58 = vadd.f32 %v5306_v3, %v17667_v63  ;;  %v5407_v21 = vadd.f32 %v5375_v2, %v17668_v43  ;;  %9924 = vmatprep.subr.bf16.mxu1 %v5870_v36  ;;  %v5581_v37 = vmul.f32 %v15599_v10, %v15255_v49  ;;  %v5650_v45 = vmul.f32 %v15599_v10, %v15147_v6  ;;  %v17670_v3 = vld [vmem:[#allocation89_spill] sm:$0xff]  ;;  %v17671_v43 = vld [vmem:[#allocation31_spill] sm:$0xff] }
 0x37f   : > { %v5610_v42 = vadd.f32 %v5578_v8, %v5472_v56  ;;  %v15700_v27 = vadd.f32 %v5647_v24, %v5541_v28  ;;  %v5475_v5 = vadd.f32 %v5443_v54, %v5337_v20  ;;  %v5308_v16 = vmul.f32 %v15188_v44, %v5015_v55  ;;  %v17672_v10 = vld [vmem:[#allocation137_spill] sm:$0xff] }
 0x380   : > { %v5544_v60 = vadd.f32 %v5512_v9, %v5406_v33  ;;  %v5377_v14 = vmul.f32 %v15056_v47, %v5015_v55  ;;  %v5442_v2 = vmul.f32 %v15313_v19, %v17670_v3  ;;  %v5511_v63 = vmul.f32 %v15212_v17, %v17670_v3  ;;  %9925 = vmatpush3.bf16.msra.mxu1 %v5870_v36  ;;  %v5240_v33 = vpop.f32.mrf.mxu1  ;;  %v17675_v28 = vld [vmem:[#allocation141_spill] sm:$0xff] }
 0x381   : > { %17669 = vst [vmem:[#allocation90_spill] sm:$0xff] %v15700_v27  ;;  %v5341_v32 = vadd.f32 %v5309_v62, %v17671_v43  ;;  %v5410_v8 = vadd.f32 %v5378_v0, %v17672_v10  ;;  %v5580_v20 = vmul.f32 %v15319_v31, %v15624_v30  ;;  %v5649_v24 = vmul.f32 %v15178_v35, %v15624_v30  ;;  %v17676_v0 = vld [vmem:[#allocation36_spill] sm:$0xff]  ;;  %v9842_v30 = vpop.f32.mrf.mxu0 }
 0x382   : > { %v15714_v56 = vadd.f32 %v5581_v37, %v5475_v5  ;;  %v15716_v55 = vadd.f32 %v5650_v45, %v5544_v60  ;;  %v15719_v54 = vadd.f32 %v5308_v16, %v17675_v28  ;;  %v5474_v9 = vadd.f32 %v5442_v2, %v5336_v39  ;;  %v17677_v37 = vld [vmem:[#allocation48_spill] sm:$0xff]  ;;  %v17678_v5 = vld [vmem:[#allocation111_spill] sm:$0xff]  ;;  %v9891_v28 = vpop.f32.mrf.mxu1 }
 0x383   : > { %v5543_v36 = vadd.f32 %v5511_v63, %v5405_v46  ;;  %v5311_v62 = vmul.f32 %v9839_v13, %v15193_v53  ;;  %v5445_v3 = vmul.f32 %v17676_v0, %v15288_v7  ;;  %v5514_v43 = vmul.f32 %v17676_v0, %v15218_v26  ;;  %9927 = vmatmul.mubr.msk.bf16.vlgmr.msra.gmra.mxu1 %vm2469_vm5, %v15490_v23 }
 0x384   : > { %17673 = vst [vmem:[#allocation56_spill] sm:$0xff] %v15714_v56  ;;  %17674 = vst [vmem:[#allocation47_spill] sm:$0xff] %v15716_v55  ;;  %v5409_v60 = vadd.f32 %v5377_v14, %v17677_v37  ;;  %v5380_v45 = vmul.f32 %v9839_v13, %v15083_v52  ;;  %v5583_v39 = vmul.f32 %v15646_v18, %v17598_v41  ;;  %9942 = vmatprep.mubr.msk.bf16.mxu1 %vm2469_vm5, %v17678_v5  ;;  %v17681_v13 = vld [vmem:[#allocation138_spill] sm:$0xff] }
 0x385   : > { %v5652_v46 = vmul.f32 %v15646_v18, %v17656_v15  ;;  %v15736_v16 = vadd.f32 %v5580_v20, %v5474_v9  ;;  %v15738_v2 = vadd.f32 %v5649_v24, %v5543_v36  ;;  %v5477_v63 = vadd.f32 %v5445_v3, %v5339_v48  ;;  %v17682_v18 = vld [vmem:[#allocation140_spill] sm:$0xff] }
 0x386   : > { %v5924_v10 = vpack.c.bf16 %v5611_v40, %v5610_v42  ;;  %v5546_v0 = vadd.f32 %v5514_v43, %v5408_v57  ;;  %v5310_v14 = vmul.f32 %v15202_v59, %v5025_v11  ;;  %v5444_v37 = vmul.f32 %v15329_v38, %v17681_v13  ;;  %v5035_v57 = vpop.f32.mrf.mxu0  ;;  %v17683_v40 = vld [vmem:[#allocation46_spill] sm:$0xff]  ;;  %v17684_v3 = vld [vmem:[#allocation132_spill] sm:$0xff] }
 0x387   : > { %17679 = vst [vmem:[#allocation34_spill] sm:$0xff] %v15736_v16  ;;  %17680 = vst [vmem:[#allocation50_spill] sm:$0xff] %v15738_v2  ;;  %v5513_v55 = vmul.f32 %v17659_v50, %v17681_v13  ;;  %v5343_v27 = vadd.f32 %v5311_v62, %v17682_v18  ;;  %v5379_v20 = vmul.f32 %v15160_v22, %v5025_v11  ;;  %v17685_v18 = vld [vmem:[#allocation76_spill] sm:$0xff]  ;;  %v5250_v16 = vpop.f32.mrf.mxu1 }
 0x388   : > { %9930 = vmatprep.subr.bf16.mxu0 %v5924_v10  ;;  %v5582_v24 = vmul.f32 %v15306_v12, %v15669_v29  ;;  %v5651_v48 = vmul.f32 %v17662_v61, %v15669_v29  ;;  %v5412_v42 = vadd.f32 %v5380_v45, %v17683_v40  ;;  %v5615_v9 = vadd.f32 %v5583_v39, %v5477_v63  ;;  %v17686_v2 = vld [vmem:[#allocation12_spill] sm:$0xff]  ;;  %v17688_v63 = vld [vmem:[#allocation129_spill] sm:$0xff]  ;;  %v17690_v40 = vld [vmem:[#allocation14_spill] sm:$0xff] }
 0x389   : > { %v15752_v36 = vadd.f32 %v5652_v46, %v5546_v0  ;;  %v5342_v43 = vadd.f32 %v5310_v14, %v17684_v3  ;;  %9931 = vmatpush3.bf16.msra.mxu0 %v5924_v10  ;;  %v5476_v13 = vadd.f32 %v5444_v37, %v5338_v58  ;;  %v5545_v62 = vadd.f32 %v5513_v55, %v5407_v21  ;;  %v17687_v39 = vld [vmem:[#allocation60_spill] sm:$0xff]  ;;  %v9845_v10 = vpop.f32.mrf.mxu0 }
 0x38a   : > { %v5923_v11 = vpack.c.bf16 %v17685_v18, %v15662_v4  ;;  %v5447_v56 = vmul.f32 %v17686_v2, %v15228_v51  ;;  %v5313_v29 = vmul.f32 %v9842_v30, %v15114_v34  ;;  %v5382_v61 = vmul.f32 %v9842_v30, %v17605_v1  ;;  %v17689_v30 = vld [vmem:[#allocation23_spill] sm:$0xff] }
 0x38b   : > { %v5516_v45 = vmul.f32 %v17686_v2, %v15127_v25  ;;  %v5585_v46 = vmul.f32 %v17687_v39, %v15255_v49  ;;  %v5411_v58 = vadd.f32 %v5379_v20, %v17688_v63  ;;  %v5614_v21 = vadd.f32 %v5582_v24, %v5476_v13 }
 0x38c   : > { %v15766_v55 = vadd.f32 %v5651_v48, %v5545_v62  ;;  %9932 = vmatprep.subr.bf16.mxu0 %v5923_v11  ;;  %v5654_v4 = vmul.f32 %v17687_v39, %v15147_v6  ;;  %v5479_v0 = vadd.f32 %v5447_v56, %v5341_v32  ;;  %v5312_v1 = vmul.f32 %v15188_v44, %v5035_v57  ;;  %v9894_v48 = vpop.f32.mrf.mxu1  ;;  %v17691_v32 = vld [vmem:[#allocation26_spill] sm:$0xff] }
 0x38d   : > { %v5548_v34 = vadd.f32 %v5516_v45, %v5410_v8  ;;  %v5446_v2 = vmul.f32 %v15313_v19, %v17689_v30  ;;  %9933 = vmatpush3.bf16.msra.mxu0 %v5923_v11  ;;  %v5381_v14 = vmul.f32 %v15056_v47, %v5035_v57  ;;  %v5515_v37 = vmul.f32 %v15212_v17, %v17689_v30  ;;  %v17692_v19 = vld [vmem:[#allocation95_spill] sm:$0xff]  ;;  %v17693_v17 = vld [vmem:[#allocation53_spill] sm:$0xff] }
 0x38e   : > { %v5584_v20 = vmul.f32 %v15319_v31, %v5240_v33  ;;  %v5653_v24 = vmul.f32 %v15178_v35, %v5240_v33  ;;  %v5345_v3 = vadd.f32 %v5313_v29, %v17690_v40  ;;  %v5414_v8 = vadd.f32 %v5382_v61, %v17691_v32  ;;  %v5045_v33 = vpop.f32.mrf.mxu0  ;;  %v5260_v63 = vpop.f32.mrf.mxu1  ;;  %v10393_v40 = vld [vmem:[%s12353_s8 + $0x128] sm:$0xff] }
 0x38f   : > { %v15780_v56 = vadd.f32 %v5585_v46, %v5479_v0  ;;  %v15782_v44 = vadd.f32 %v5654_v4, %v5548_v34  ;;  %v5344_v13 = vadd.f32 %v5312_v1, %v17692_v19  ;;  %v5478_v47 = vadd.f32 %v5446_v2, %v15719_v54  ;;  %v17694_v54 = vld [vmem:[#allocation84_spill] sm:$0xff]  ;;  %v17695_v34 = vld [vmem:[#allocation101_spill] sm:$0xff] }
 0x390   : > { %v5547_v57 = vadd.f32 %v5515_v37, %v5409_v60  ;;  %v5449_v62 = vmul.f32 %v17693_v17, %v15288_v7  ;;  %9935 = vmatmul.mubr.msk.bf16.vlgmr.msra.gmra.mxu0 %vm2469_vm5, %v15490_v23  ;;  %v5315_v18 = vmul.f32 %v9845_v10, %v15193_v53  ;;  %v5384_v61 = vmul.f32 %v9845_v10, %v15083_v52  ;;  %v9897_v19 = vpop.f32.mrf.mxu1 }
 0x391   : > { %v5518_v11 = vmul.f32 %v17693_v17, %v15218_v26  ;;  %v5587_v29 = vmul.f32 %v9891_v28, %v17598_v41  ;;  %9950 = vmatprep.mubr.msk.bf16.mxu0 %vm2469_vm5, %v17678_v5  ;;  %v5413_v60 = vadd.f32 %v5381_v14, %v17694_v54  ;;  %v5616_v45 = vadd.f32 %v5584_v20, %v5478_v47  ;;  %v17696_v14 = vld [vmem:[#allocation42_spill] sm:$0xff]  ;;  %v17701_v47 = vld [vmem:[#allocation16_spill] sm:$0xff] }
 0x392   : > { %v15798_v39 = vadd.f32 %v5653_v24, %v5547_v57  ;;  %v5656_v46 = vmul.f32 %v9891_v28, %v17656_v15  ;;  %v5481_v4 = vadd.f32 %v5449_v62, %v5343_v27  ;;  %v5977_v52 = vpack.c.bf16 %v5615_v9, %v5614_v21  ;;  %v17697_v28 = vld [vmem:[#allocation98_spill] sm:$0xff]  ;;  %v17700_v24 = vld [vmem:[#allocation56_spill] sm:$0xff] }
 0x393   : > { %v5550_v53 = vadd.f32 %v5518_v11, %v5412_v42  ;;  %v5314_v10 = vmul.f32 %v15202_v59, %v5045_v33  ;;  %v5383_v0 = vmul.f32 %v15160_v22, %v5045_v33  ;;  %v5448_v1 = vmul.f32 %v15329_v38, %v17695_v34  ;;  %v17698_v42 = vld [vmem:[#allocation112_spill] sm:$0xff]  ;;  %v17699_v22 = vld [vmem:[#allocation34_spill] sm:$0xff] }
 0x394   : > { %v5517_v30 = vmul.f32 %v17659_v50, %v17695_v34  ;;  %v5586_v2 = vmul.f32 %v15306_v12, %v5250_v16  ;;  %v5347_v37 = vadd.f32 %v5315_v18, %v17696_v14  ;;  %v5416_v20 = vadd.f32 %v5384_v61, %v17697_v28  ;;  %9938 = vmatprep.subr.bf16.mxu1 %v5977_v52  ;;  %v17703_v11 = vld [vmem:[#allocation28_spill] sm:$0xff]  ;;  %v17708_v28 = vld [vmem:[#allocation91_spill] sm:$0xff] }
 0x395   : > { %v5619_v27 = vadd.f32 %v5587_v29, %v5481_v4  ;;  %v5655_v9 = vmul.f32 %v17698_v42, %v5250_v16  ;;  %v15811_v21 = vadd.f32 %v5656_v46, %v5550_v53  ;;  %v5480_v59 = vadd.f32 %v5448_v1, %v5342_v43  ;;  %9939 = vmatpush3.bf16.msra.mxu1 %v5977_v52  ;;  %v17702_v16 = vld [vmem:[#allocation61_spill] sm:$0xff]  ;;  %v17704_v52 = vld [vmem:[#allocation20_spill] sm:$0xff] }
 0x396   : > { %v5976_v38 = vpack.c.bf16 %v17700_v24, %v17699_v22  ;;  %v5451_v32 = vmul.f32 %v10393_v40, %v15228_v51  ;;  %v5346_v57 = vadd.f32 %v5314_v10, %v17701_v47  ;;  %v5549_v17 = vadd.f32 %v5517_v30, %v5411_v58  ;;  %v10394_v4 = vld [vmem:[%s12353_s8 + $0x138] sm:$0xff]  ;;  %v17705_v30 = vld [vmem:[#allocation27_spill] sm:$0xff]  ;;  %v8583_v24 = vld [vmem:[%s16623_s4 + $0x40] sm:$0xff] }
 0x397   : > { %v5520_v62 = vmul.f32 %v10393_v40, %v15127_v25  ;;  %v5589_v33 = vmul.f32 %v9894_v48, %v15255_v49  ;;  %v5415_v18 = vadd.f32 %v5383_v0, %v17702_v16  ;;  %v5618_v61 = vadd.f32 %v5586_v2, %v5480_v59  ;;  %v5270_v0 = vpop.f32.mrf.mxu1  ;;  %v17710_v59 = vld [vmem:[#allocation99_spill] sm:$0xff] }
 0x398   : > { %9940 = vmatprep.subr.bf16.mxu1 %v5976_v38  ;;  %v5658_v43 = vmul.f32 %v9894_v48, %v15147_v6  ;;  %v5482_v29 = vadd.f32 %v17703_v11, %v5344_v13  ;;  %v5687_v54 = vadd.f32 %v5655_v9, %v5549_v17  ;;  %v5483_v46 = vadd.f32 %v5451_v32, %v5345_v3  ;;  %v17714_v17 = vld [vmem:[#allocation83_spill] sm:$0xff]  ;;  %v17717_v11 = vld [vmem:[#allocation90_spill] sm:$0xff] }
 0x399   : > { %v5588_v51 = vmul.f32 %v15319_v31, %v5260_v63  ;;  %v5453_v53 = vmul.f32 %v10394_v4, %v15288_v7  ;;  %v5552_v58 = vadd.f32 %v5520_v62, %v5414_v8  ;;  %v5551_v25 = vadd.f32 %v17704_v52, %v5413_v60  ;;  %9941 = vmatpush3.bf16.msra.mxu1 %v5976_v38  ;;  %v17706_v8 = vld [vmem:[#allocation73_spill] sm:$0xff] }
 0x39a   : > { %v5657_v49 = vmul.f32 %v15178_v35, %v5260_v63  ;;  %v5522_v10 = vmul.f32 %v10394_v4, %v15218_v26  ;;  %v5621_v34 = vadd.f32 %v5589_v33, %v5483_v46  ;;  %v5591_v48 = vmul.f32 %v9897_v19, %v17598_v41  ;;  %v17707_v41 = vld [vmem:[#allocation120_spill] sm:$0xff]  ;;  %v17722_v52 = vld [vmem:[#allocation33_spill] sm:$0xff] }
 0x39b   : > { %v5620_v6 = vadd.f32 %v5588_v51, %v5482_v29  ;;  %v5660_v3 = vmul.f32 %v9897_v19, %v17656_v15  ;;  %v5690_v13 = vadd.f32 %v5658_v43, %v5552_v58  ;;  %v5485_v31 = vadd.f32 %v5453_v53, %v5347_v37  ;;  %v17718_v29 = vld [vmem:[#allocation57_spill] sm:$0xff]  ;;  %v17719_v51 = vld [vmem:[#allocation126_spill] sm:$0xff]  ;;  %v17720_v4 = vld [vmem:[#allocation136_spill] sm:$0xff] }
 0x39c   : > { %v6030_v1 = vpack.c.bf16 %v5619_v27, %v5618_v61  ;;  %v5484_v7 = vadd.f32 %v17705_v30, %v5346_v57  ;;  %9943 = vmatmul.mubr.msk.bf16.vlgmr.msra.gmra.mxu1 %vm2469_vm5, %v15490_v23  ;;  %v5553_v35 = vadd.f32 %v17706_v8, %v5415_v18  ;;  %v5590_v60 = vmul.f32 %v15306_v12, %v5270_v0  ;;  %v17709_v27 = vld [vmem:[#allocation92_spill] sm:$0xff]  ;;  %v8584_v12 = vld [vmem:[%s16623_s4 + $0x48] sm:$0xff]  ;;  %v17715_v18 = vld [vmem:[#allocation109_spill] sm:$0xff] }
 0x39d   : > { %v5659_v63 = vmul.f32 %v17698_v42, %v5270_v0  ;;  %v6029_v2 = vpack.c.bf16 %v15780_v56, %v5616_v45  ;;  %v5554_v14 = vadd.f32 %v5522_v10, %v5416_v20  ;;  %v6148_v9 = vpack.c.bf16 %v17708_v28, %v17707_v41  ;;  %v17711_v45 = vld [vmem:[#allocation18_spill] sm:$0xff]  ;;  %v17712_v20 = vld [vmem:[#allocation125_spill] sm:$0xff]  ;;  %9958 = vmatprep.mubr.msk.bf16.mxu1 %vm2469_vm5, %v17678_v5  ;;  %v17713_v57 = vld [vmem:[#allocation128_spill] sm:$0xff] }
 0x39e   : > { %9946 = vmatprep.subr.bf16.mxu0 %v6030_v1  ;;  %v6082_v37 = vpack.c.bf16 %v5621_v34, %v5620_v6  ;;  %v6147_v22 = vpack.c.bf16 %v17710_v59, %v17709_v27  ;;  %v5623_v38 = vadd.f32 %v5591_v48, %v5485_v31  ;;  %v5622_v40 = vadd.f32 %v5590_v60, %v5484_v7  ;;  %v17716_v61 = vld [vmem:[#allocation110_spill] sm:$0xff]  ;;  %v17724_v0 = vld [vmem:[#allocation47_spill] sm:$0xff]  ;;  %v17727_v31 = vld [vmem:[#allocation9_spill] sm:$0xff] }
 0x39f   : > { %v5691_v56 = vadd.f32 %v5659_v63, %v5553_v35  ;;  %9947 = vmatpush3.bf16.msra.mxu0 %v6030_v1  ;;  %v6207_v32 = vpack.c.bf16 %v17712_v20, %v17711_v45  ;;  %v5689_v19 = vadd.f32 %v5657_v49, %v5551_v25  ;;  %v5692_v47 = vadd.f32 %v5660_v3, %v5554_v14  ;;  %v17721_v58 = vld [vmem:[#allocation54_spill] sm:$0xff]  ;;  %v17728_v1 = vld [vmem:[#allocation65_spill] sm:$0xff]  ;;  %v10395_v8 = vld [vmem:[%s12353_s8 + $0xb0] sm:$0xff] }
 0x3a0   : > { %9948 = vmatprep.subr.bf16.mxu0 %v6029_v2  ;;  %v6206_v62 = vpack.c.bf16 %v17714_v17, %v17713_v57  ;;  %v6083_v33 = vpack.c.bf16 %v5623_v38, %v5622_v40  ;;  %v15854_v16 = vpack.c.bf16 %v8584_v12, %v8583_v24  ;;  %v6259_v43 = vpack.c.bf16 %v17716_v61, %v17715_v18  ;;  %v17723_v10 = vld [vmem:[#allocation50_spill] sm:$0xff]  ;;  %v17732_v63 = vld [vmem:[#allocation52_spill] sm:$0xff]  ;;  %v17733_v14 = vld [vmem:[#allocation87_spill] sm:$0xff] }
 0x3a1   : > { %v6366_v46 = vpack.c.bf16 %v17718_v29, %v17717_v11  ;;  %v6312_v53 = vpack.c.bf16 %v17720_v4, %v17719_v51  ;;  %v15864_v25 = vpack.c.bf16 %v17722_v52, %v17721_v58  ;;  %v15868_v5 = vpack.c.bf16 %v15752_v36, %v15766_v55  ;;  %v17725_v3 = vld [vmem:[#allocation122_spill] sm:$0xff]  ;;  %v17726_v55 = vld [vmem:[#allocation119_spill] sm:$0xff]  ;;  %v17735_v59 = vld [vmem:[#allocation108_spill] sm:$0xff] }
 0x3a2   : > { %v15871_v49 = vpack.c.bf16 %v15811_v21, %v5687_v54  ;;  %9954 = vmatprep.subr.bf16.mxu1 %v6083_v33  ;;  %v15875_v34 = vpack.c.bf16 %v17724_v0, %v17723_v10  ;;  %v15879_v6 = vpack.c.bf16 %v15782_v44, %v15798_v39  ;;  %v15881_v48 = vpack.c.bf16 %v5692_v47, %v5691_v56  ;;  %v17729_v30 = vld [vmem:[#allocation134_spill] sm:$0xff]  ;;  %v17730_v44 = vld [vmem:[#allocation45_spill] sm:$0xff] }
 0x3a3   : > { %9949 = vmatpush3.bf16.msra.mxu0 %v6029_v2  ;;  %v5640_v36 = vmul.f32 %v17725_v3, %v17656_v15  ;;  %v5533_v21 = vadd.f32 %v17727_v31, %v17726_v55  ;;  %9955 = vmatpush3.bf16.msra.mxu1 %v6083_v33  ;;  %v15887_v54 = vpack.c.bf16 %v5690_v13, %v5689_v19  ;;  %v17731_v39 = vld [vmem:[#allocation133_spill] sm:$0xff]  ;;  %v17734_v41 = vld [vmem:[#allocation74_spill] sm:$0xff]  ;;  %v17739_v33 = vld [vmem:[#allocation67_spill] sm:$0xff] }
 0x3a4   : > { %9962 = vmatprep.subr.bf16.mxu0 %v6148_v9  ;;  %v5399_v7 = vadd.f32 %v17729_v30, %v17728_v1  ;;  %v5505_v35 = vmul.f32 %v10395_v8, %v17659_v50  ;;  %9956 = vmatprep.subr.bf16.mxu1 %v6082_v37  ;;  %v5534_v60 = vadd.f32 %v17731_v39, %v17730_v44  ;;  %v10396_v13 = vld [vmem:[%s12353_s8 + $0xb8] sm:$0xff]  ;;  %v8585_v50 = vld [vmem:[%s16623_s4 + $0x50] sm:$0xff]  ;;  %v17740_v61 = vld [vmem:[#allocation66_spill] sm:$0xff]  ;;  %s8641_s8 = sshll.u32 %s17788_s21, 8 }
 0x3a5   : > { %v5671_v2 = vadd.f32 %v17732_v63, %v5533_v21  ;;  %v5400_v28 = vadd.f32 %v17734_v41, %v17733_v14  ;;  %v5506_v27 = vmul.f32 %v10396_v13, %v15218_v26  ;;  %v5643_v24 = vmul.f32 %v17698_v42, %v17735_v59  ;;  %v8586_v12 = vld [vmem:[%s16623_s4 + $0x58] sm:$0xff]  ;;  %v15977_v52 = vld [vmem:[%s16624_s5 + $0x20] sm:$0xff]  ;;  %s16544_s9 = scalar_lea.vmem %s16625_s6, %s8641_s8 }
 0x3a6   : > { %9951 = vmatmul.mubr.msk.bf16.vlgmr.msra.gmra.mxu0 %vm2469_vm5, %v15490_v23  ;;  %v5672_v38 = vadd.f32 %v5640_v36, %v5534_v60  ;;  %v17736_v26 = vld [vmem:[#allocation97_spill] sm:$0xff]  ;;  %v5537_v56 = vadd.f32 %v5505_v35, %v5399_v7 }
 0x3a7   : > { %9963 = vmatpush3.bf16.msra.mxu0 %v6148_v9  ;;  %9966 = vmatprep.mubr.msk.bf16.mxu0 %vm2469_vm5, %v15854_v16  ;;  %v5644_v40 = vmul.f32 %v17736_v26, %v17656_v15  ;;  %v6141_v9 = vpack.c.bf16 %v8586_v12, %v8585_v50  ;;  %v5538_v45 = vadd.f32 %v5506_v27, %v5400_v28  ;;  %v17738_v47 = vld [vmem:[#allocation69_spill] sm:$0xff]  ;;  %v17742_v27 = vld [vmem:[#allocation59_spill] sm:$0xff]  ;;  %v17744_v50 = vld [vmem:[#allocation58_spill] sm:$0xff] }
 0x3a8   : > { %9964 = vmatprep.subr.bf16.mxu0 %v6147_v22  ;;  %9957 = vmatpush3.bf16.msra.mxu1 %v6082_v37  ;;  %v6260_v42 = vpack.c.bf16 %v5672_v38, %v5671_v2  ;;  %v5675_v20 = vadd.f32 %v5643_v24, %v5537_v56  ;;  %v17737_v37 = vld [vmem:[#allocation49_spill] sm:$0xff]  ;;  %v17745_v12 = vld [vmem:[#allocation79_spill] sm:$0xff] }
 0x3a9   : > { %9970 = vmatprep.subr.bf16.mxu1 %v6207_v32  ;;  %v5676_v19 = vadd.f32 %v5644_v40, %v5538_v45  ;;  %v15972_v58 = vld [vmem:[%s16624_s5 + $0x38] sm:$0xff]  ;;  %v17746_v38 = vpack.c.bf16 %v17744_v50, %v17745_v12 }
 0x3aa   : > { %v17741_v13 = vld [vmem:[#allocation21_spill] sm:$0xff] }
 0x3ab   : > { %9965 = vmatpush3.bf16.msra.mxu0 %v6147_v22  ;;  %9959 = vmatmul.mubr.msk.bf16.vlgmr.msra.gmra.mxu1 %vm2469_vm5, %v15490_v23  ;;  %v6313_v15 = vpack.c.bf16 %v5676_v19, %v5675_v20  ;;  %v10397_v23 = vld [vmem:[%s16624_s5] sm:$0xff]  ;;  %v17743_v59 = vpack.c.bf16 %v17741_v13, %v17742_v27 }
 0x3ac   : > { %9978 = vmatprep.subr.bf16.mxu0 %v6260_v42  ;;  %9971 = vmatpush3.bf16.msra.mxu1 %v6207_v32  ;;  %v2511_v22 = vadd.f32 %v10397_v23, %v17737_v37  ;;  %v10398_v32 = vld [vmem:[%s16624_s5 + $0x8] sm:$0xff]  ;;  %v2568_v18 = vadd.f32 %v10397_v23, %v17739_v33  ;;  %v17747_v19 = vld [vmem:[#allocation70_spill] sm:$0xff]  ;;  %v17750_v37 = vld [vmem:[#allocation96_spill] sm:$0xff] }
 0x3ad   : > { %9972 = vmatprep.subr.bf16.mxu1 %v6206_v62  ;;  %9974 = vmatprep.mubr.msk.bf16.mxu1 %vm2469_vm5, %v15854_v16  ;;  %v2514_v57 = vadd.f32 %v10398_v32, %v17738_v47 }
 0x3ae   : > { %9967 = vmatmul.mubr.msk.bf16.vlgmr.msra.gmra.mxu0 %vm2469_vm5, %v6141_v9  ;;  %v2525_v17 = vmul.f32 0.35355338, %v2511_v22  ;;  %v2582_v29 = vmul.f32 0.35355338, %v2568_v18  ;;  %v17751_v22 = vld [vmem:[#allocation11_spill] sm:$0xff] }
 0x3af   : > { %9979 = vmatpush3.bf16.msra.mxu0 %v6260_v42  ;;  %9982 = vmatprep.mubr.msk.bf16.mxu0 %vm2469_vm5, %v15854_v16 }
 0x3b0   : > { %9980 = vmatprep.subr.bf16.mxu0 %v6259_v43  ;;  %9973 = vmatpush3.bf16.msra.mxu1 %v6206_v62  ;;  %v2526_v62 = vmul.f32 0.35355338, %v2514_v57 }
 0x3b1   : > { %9986 = vmatprep.subr.bf16.mxu1 %v6313_v15 }
 0x3b2   : > { %v2529_v11 = vpack.c.bf16 %v2526_v62, %v2525_v17 }
 0x3b3   : > { %9981 = vmatpush3.bf16.msra.mxu0 %v6259_v43  ;;  %9975 = vmatmul.mubr.msk.bf16.vlgmr.msra.gmra.mxu1 %vm2469_vm5, %v6141_v9  ;;  %v2571_v43 = vadd.f32 %v10398_v32, %v17740_v61  ;;  %v17752_v32 = vpack.c.bf16 %v17750_v37, %v17751_v22 }
 0x3b4   : > { %9994 = vmatprep.subr.bf16.mxu0 %v6366_v46  ;;  %9987 = vmatpush3.bf16.msra.mxu1 %v6313_v15  ;;  %v17748_v15 = vld [vmem:[#allocation68_spill] sm:$0xff] }
 0x3b5   : > { %9988 = vmatprep.subr.bf16.mxu1 %v6312_v53  ;;  %9990 = vmatprep.mubr.msk.bf16.mxu1 %vm2469_vm5, %v15854_v16  ;;  %v17749_v23 = vpack.c.bf16 %v17747_v19, %v17748_v15  ;;  %v17769_v19 = vld [vmem:[#allocation104_spill] sm:$0xff] }
 0x3b6   : > { %9983 = vmatmul.mubr.msk.bf16.vlgmr.msra.gmra.mxu0 %vm2469_vm5, %v6141_v9 }
 0x3b7   : > { %9995 = vmatpush3.bf16.msra.mxu0 %v6366_v46  ;;  %9998 = vmatprep.mubr.msk.bf16.mxu0 %vm2469_vm5, %v15854_v16  ;;  %v2583_v46 = vmul.f32 0.35355338, %v2571_v43 }
 0x3b8   : > { %9996 = vmatprep.subr.bf16.mxu0 %v15864_v25  ;;  %9989 = vmatpush3.bf16.msra.mxu1 %v6312_v53 }
 0x3b9   : > { %10002 = vmatprep.subr.bf16.mxu1 %v15868_v5  ;;  %v2586_v51 = vpack.c.bf16 %v2583_v46, %v2582_v29 }
 0x3bb   : > { %9997 = vmatpush3.bf16.msra.mxu0 %v15864_v25  ;;  %9991 = vmatmul.mubr.msk.bf16.vlgmr.msra.gmra.mxu1 %vm2469_vm5, %v6141_v9 }
 0x3bc   : > { %10010 = vmatprep.subr.bf16.mxu0 %v15871_v49  ;;  %10003 = vmatpush3.bf16.msra.mxu1 %v15868_v5  ;;  %v15982_v5 = vld [vmem:[%s16624_s5 + $0x28] sm:$0xff] }
 0x3bd   : > { %10004 = vmatprep.subr.bf16.mxu1 %v15875_v34  ;;  %10006 = vmatprep.mubr.msk.bf16.mxu1 %vm2469_vm5, %v15854_v16 }
 0x3be   : > { %9999 = vmatmul.mubr.msk.bf16.vlgmr.msra.gmra.mxu0 %vm2469_vm5, %v6141_v9 }
 0x3bf   : > { %10011 = vmatpush3.bf16.msra.mxu0 %v15871_v49  ;;  %10014 = vmatprep.mubr.msk.bf16.mxu0 %vm2469_vm5, %v15854_v16 }
 0x3c0   : > { %10012 = vmatprep.subr.bf16.mxu0 %v15879_v6  ;;  %10005 = vmatpush3.bf16.msra.mxu1 %v15875_v34 }
 0x3c1   : > { %10018 = vmatprep.subr.bf16.mxu1 %v15881_v48 }
 0x3c3   : > { %10013 = vmatpush3.bf16.msra.mxu0 %v15879_v6  ;;  %10007 = vmatmul.mubr.msk.bf16.vlgmr.msra.gmra.mxu1 %vm2469_vm5, %v6141_v9 }
 0x3c4   : > { %10019 = vmatpush3.bf16.msra.mxu1 %v15881_v48  ;;  %10022 = vmatprep.mubr.msk.bf16.mxu1 %vm2469_vm5, %v15854_v16  ;;  %v15967_v16 = vld [vmem:[%s16624_s5 + $0x30] sm:$0xff] }
 0x3c5   : > { %10020 = vmatprep.subr.bf16.mxu1 %v15887_v54 }
 0x3c6   : > { %10015 = vmatmul.mubr.msk.bf16.vlgmr.msra.gmra.mxu0 %vm2469_vm5, %v6141_v9 }
 0x3c7   : > { %10030 = vmatprep.mubr.msk.bf16.mxu0 %vm362_vm0, %v2529_v11 }
 0x3c8   : > { %10021 = vmatpush3.bf16.msra.mxu1 %v15887_v54 }
 0x3cb   : > { %10023 = vmatmul.mubr.msk.bf16.vlgmr.msra.gmra.mxu1 %vm2469_vm5, %v6141_v9 }
 0x3cc   : > { %10038 = vmatprep.mubr.msk.bf16.mxu1 %vm362_vm0, %v2586_v51 }
 0x420   : > { %v9904_v4 = vpop.f32.mrf.mxu0 }
 0x421   : > { %v5756_v49 = vadd.f32 %v9904_v4, %v15967_v16  ;;  %v17753_v4 = vld [vmem:[#allocation72_spill] sm:$0xff] }
 0x422   : > { %v5747_v53 = vpop.f32.mrf.mxu0 }
 0x423   : > { %v5748_v34 = vadd.f32 %v15977_v52, %v5747_v53  ;;  %v17754_v53 = vld [vmem:[#allocation24_spill] sm:$0xff] }
 0x424   : > { %v9905_v25 = vpop.f32.mrf.mxu0 }
 0x425   : > { %v5759_v10 = vadd.f32 %v9905_v25, %v15972_v58  ;;  %v17755_v25 = vpack.c.bf16 %v17753_v4, %v17754_v53  ;;  %v16088_v53 = vld [vmem:[%s16624_s5 + $0x58] sm:$0xff] }
 0x426   : > { %v5750_v0 = vpop.f32.mrf.mxu0 }
 0x427   : > { %v5763_v6 = vpack.c.bf16 %v5759_v10, %v5756_v49  ;;  %v5751_v48 = vadd.f32 %v15982_v5, %v5750_v0  ;;  %v17756_v49 = vld [vmem:[#allocation82_spill] sm:$0xff]  ;;  %v17757_v10 = vld [vmem:[#allocation19_spill] sm:$0xff] }
 0x428   : > { %v17758_v0 = vpack.c.bf16 %v17756_v49, %v17757_v10 }
 0x429   : > { %v9912_v3 = vpop.f32.mrf.mxu1  ;;  %10154 = vmatprep.subr.msk.bf16.mxu0 %vm362_vm0, %v5763_v6  ;;  %v6587_v36 = vsel %vm362_vm0, %v5763_v6, 0  ;;  %v5762_v55 = vpack.c.bf16 %v5751_v48, %v5748_v34 }
 0x42a   : > { %10027 = vmatpush3.bf16.xpose.msra.mxu0 %v6587_v36  ;;  %v5809_v54 = vadd.f32 %v9912_v3, %v15967_v16 }
 0x42b   : > { %v5800_v31 = vpop.f32.mrf.mxu1  ;;  %10155 = vmatprep.subr.msk.bf16.mxu0 %vm362_vm0, %v5762_v55  ;;  %v6584_v44 = vsel %vm362_vm0, %v5762_v55, 0 }
 0x42c   : > { %v5801_v7 = vadd.f32 %v15977_v52, %v5800_v31 }
 0x42d   : > { %v9913_v21 = vpop.f32.mrf.mxu1 }
 0x42e   : > { %v5812_v1 = vadd.f32 %v9913_v21, %v15972_v58 }
 0x42f   : > { %v5803_v30 = vpop.f32.mrf.mxu1 }
 0x430   : > { %v5816_v8 = vpack.c.bf16 %v5812_v1, %v5809_v54  ;;  %v5804_v35 = vadd.f32 %v15982_v5, %v5803_v30 }
 0x432   : > { %10156 = vmatprep.subr.msk.bf16.mxu1 %vm362_vm0, %v5816_v8  ;;  %v6648_v39 = vsel %vm362_vm0, %v5816_v8, 0  ;;  %v5815_v60 = vpack.c.bf16 %v5804_v35, %v5801_v7  ;;  %10029 = vmatpush3.bf16.xpose.msra.mxu0 %v6584_v44  ;;  %v17759_v8 = vld [vmem:[#allocation13_spill] sm:$0xff]  ;;  %v17760_v35 = vld [vmem:[#allocation8_spill] sm:$0xff] }
 0x433   : > { %10035 = vmatpush3.bf16.xpose.msra.mxu1 %v6648_v39  ;;  %v17761_v44 = vpack.c.bf16 %v17759_v8, %v17760_v35  ;;  %v17762_v39 = vld [vmem:[#allocation103_spill] sm:$0xff]  ;;  %v17774_v8 = vld [vmem:[#allocation117_spill] sm:$0xff]  ;;  %v17775_v35 = vld [vmem:[#allocation116_spill] sm:$0xff] }
 0x434   : > { %10157 = vmatprep.subr.msk.bf16.mxu1 %vm362_vm0, %v5815_v60  ;;  %v6645_v24 = vsel %vm362_vm0, %v5815_v60, 0  ;;  %v17763_v60 = vld [vmem:[#allocation100_spill] sm:$0xff] }
 0x436   : > { %v9920_v63 = vpop.f32.mrf.mxu0 }
 0x437   : > { %v5862_v41 = vadd.f32 %v9920_v63, %v15967_v16  ;;  %v17764_v63 = vpack.c.bf16 %v17762_v39, %v17763_v60 }
 0x438   : > { %v5853_v2 = vpop.f32.mrf.mxu0 }
 0x439   : > { %10031 = vmatmul.mubr.msk.bf16.vlgmr.msra.gmra.mxu0 %vm362_vm0, %v17743_v59  ;;  %v5854_v40 = vadd.f32 %v15977_v52, %v5853_v2 }
 0x43a   : > { %v9921_v14 = vpop.f32.mrf.mxu0  ;;  %10046 = vmatprep.mubr.msk.bf16.mxu0 %vm362_vm0, %v17746_v38 }
 0x43b   : > { %v5865_v28 = vadd.f32 %v9921_v14, %v15972_v58  ;;  %10037 = vmatpush3.bf16.xpose.msra.mxu1 %v6645_v24 }
 0x43c   : > { %v5856_v26 = vpop.f32.mrf.mxu0 }
 0x43d   : > { %v5869_v56 = vpack.c.bf16 %v5865_v28, %v5862_v41  ;;  %v5857_v42 = vadd.f32 %v15982_v5, %v5856_v26 }
 0x43f   : > { %10158 = vmatprep.subr.msk.bf16.mxu0 %vm362_vm0, %v5869_v56  ;;  %v6709_v9 = vsel %vm362_vm0, %v5869_v56, 0  ;;  %v5868_v45 = vpack.c.bf16 %v5857_v42, %v5854_v40  ;;  %v17765_v56 = vld [vmem:[#allocation29_spill] sm:$0xff]  ;;  %v17766_v42 = vld [vmem:[#allocation40_spill] sm:$0xff] }
 0x440   : > { %10043 = vmatpush3.bf16.xpose.msra.mxu0 %v6709_v9  ;;  %v17767_v9 = vpack.c.bf16 %v17765_v56, %v17766_v42 }
 0x441   : > { %10159 = vmatprep.subr.msk.bf16.mxu0 %vm362_vm0, %v5868_v45  ;;  %v6706_v17 = vsel %vm362_vm0, %v5868_v45, 0 }
 0x442   : > { %10039 = vmatmul.mubr.msk.bf16.vlgmr.msra.gmra.mxu1 %vm362_vm0, %v17749_v23 }
 0x443   : > { %v9928_v20 = vpop.f32.mrf.mxu1  ;;  %10054 = vmatprep.mubr.msk.bf16.mxu1 %vm362_vm0, %v17752_v32 }
 0x444   : > { %v5915_v62 = vadd.f32 %v9928_v20, %v15967_v16  ;;  %v17768_v20 = vld [vmem:[#allocation107_spill] sm:$0xff] }
 0x445   : > { %v5906_v47 = vpop.f32.mrf.mxu1  ;;  %v17770_v15 = vpack.c.bf16 %v17768_v20, %v17769_v19  ;;  %v17777_v19 = vld [vmem:[#allocation3_spill] sm:$0xff] }
 0x446   : > { %v5907_v61 = vadd.f32 %v15977_v52, %v5906_v47 }
 0x447   : > { %v9929_v57 = vpop.f32.mrf.mxu1 }
 0x448   : > { %v5918_v33 = vadd.f32 %v9929_v57, %v15972_v58  ;;  %10045 = vmatpush3.bf16.xpose.msra.mxu0 %v6706_v17 }
 0x449   : > { %v5909_v18 = vpop.f32.mrf.mxu1 }
 0x44a   : > { %v5922_v43 = vpack.c.bf16 %v5918_v33, %v5915_v62  ;;  %v5910_v11 = vadd.f32 %v15982_v5, %v5909_v18  ;;  %v16079_v18 = vld [vmem:[%s16624_s5 + $0x50] sm:$0xff] }
 0x44c   : > { %10160 = vmatprep.subr.msk.bf16.mxu1 %vm362_vm0, %v5922_v43  ;;  %v6770_v29 = vsel %vm362_vm0, %v5922_v43, 0  ;;  %v5921_v46 = vpack.c.bf16 %v5910_v11, %v5907_v61 }
 0x44d   : > { %10051 = vmatpush3.bf16.xpose.msra.mxu1 %v6770_v29 }
 0x44e   : > { %10161 = vmatprep.subr.msk.bf16.mxu1 %vm362_vm0, %v5921_v46  ;;  %v6767_v36 = vsel %vm362_vm0, %v5921_v46, 0 }
 0x44f   : > { %10047 = vmatmul.mubr.msk.bf16.vlgmr.msra.gmra.mxu0 %vm362_vm0, %v17755_v25 }
 0x450   : > { %v9936_v51 = vpop.f32.mrf.mxu0  ;;  %10062 = vmatprep.mubr.msk.bf16.mxu0 %vm362_vm0, %v17758_v0 }
 0x451   : > { %v5968_v48 = vadd.f32 %v9936_v51, %v15967_v16 }
 0x452   : > { %v5959_v34 = vpop.f32.mrf.mxu0 }
 0x453   : > { %v5960_v31 = vadd.f32 %v15977_v52, %v5959_v34 }
 0x454   : > { %v9937_v6 = vpop.f32.mrf.mxu0 }
 0x455   : > { %v5971_v3 = vadd.f32 %v9937_v6, %v15972_v58  ;;  %10053 = vmatpush3.bf16.xpose.msra.mxu1 %v6767_v36 }
 0x456   : > { %v5962_v55 = vpop.f32.mrf.mxu0 }
 0x457   : > { %v5975_v21 = vpack.c.bf16 %v5971_v3, %v5968_v48  ;;  %v5963_v54 = vadd.f32 %v15982_v5, %v5962_v55 }
 0x459   : > { %10162 = vmatprep.subr.msk.bf16.mxu0 %vm362_vm0, %v5975_v21  ;;  %v6831_v1 = vsel %vm362_vm0, %v5975_v21, 0  ;;  %v5974_v30 = vpack.c.bf16 %v5963_v54, %v5960_v31  ;;  %v17771_v21 = vld [vmem:[#allocation63_spill] sm:$0xff] }
 0x45a   : > { %10059 = vmatpush3.bf16.xpose.msra.mxu0 %v6831_v1  ;;  %v17772_v54 = vld [vmem:[#allocation43_spill] sm:$0xff] }
 0x45b   : > { %10163 = vmatprep.subr.msk.bf16.mxu0 %vm362_vm0, %v5974_v30  ;;  %v6828_v41 = vsel %vm362_vm0, %v5974_v30, 0  ;;  %v17773_v1 = vpack.c.bf16 %v17771_v21, %v17772_v54 }
 0x45c   : > { %v9944_v7 = vpop.f32.mrf.mxu1  ;;  %10055 = vmatmul.mubr.msk.bf16.vlgmr.msra.gmra.mxu1 %vm362_vm0, %v17761_v44  ;;  %v17776_v44 = vpack.c.bf16 %v17774_v8, %v17775_v35 }
 0x45d   : > { %10070 = vmatprep.mubr.msk.bf16.mxu1 %vm362_vm0, %v17764_v63  ;;  %v6021_v28 = vadd.f32 %v9944_v7, %v15967_v16 }
 0x45e   : > { %v6012_v2 = vpop.f32.mrf.mxu1 }
 0x45f   : > { %v6013_v59 = vadd.f32 %v15977_v52, %v6012_v2 }
 0x460   : > { %v9945_v14 = vpop.f32.mrf.mxu1 }
 0x461   : > { %v6024_v13 = vadd.f32 %v9945_v14, %v15972_v58 }
 0x462   : > { %10061 = vmatpush3.bf16.xpose.msra.mxu0 %v6828_v41  ;;  %v6015_v27 = vpop.f32.mrf.mxu1 }
 0x463   : > { %v6028_v24 = vpack.c.bf16 %v6024_v13, %v6021_v28  ;;  %v6016_v50 = vadd.f32 %v15982_v5, %v6015_v27 }
 0x465   : > { %10164 = vmatprep.subr.msk.bf16.mxu1 %vm362_vm0, %v6028_v24  ;;  %v6892_v38 = vsel %vm362_vm0, %v6028_v24, 0  ;;  %v6027_v26 = vpack.c.bf16 %v6016_v50, %v6013_v59 }
 0x466   : > { %v9952_v12 = vpop.f32.mrf.mxu0  ;;  %10067 = vmatpush3.bf16.xpose.msra.mxu1 %v6892_v38 }
 0x467   : > { %10165 = vmatprep.subr.msk.bf16.mxu1 %vm362_vm0, %v6027_v26  ;;  %v6074_v23 = vadd.f32 %v9952_v12, %v15967_v16  ;;  %v6889_v33 = vsel %vm362_vm0, %v6027_v26, 0 }
 0x468   : > { %v6065_v40 = vpop.f32.mrf.mxu0 }
 0x469   : > { %10063 = vmatmul.mubr.msk.bf16.vlgmr.msra.gmra.mxu0 %vm362_vm0, %v17767_v9  ;;  %v6066_v47 = vadd.f32 %v15977_v52, %v6065_v40 }
 0x46a   : > { %v9953_v45 = vpop.f32.mrf.mxu0  ;;  %10078 = vmatprep.mubr.msk.bf16.mxu0 %vm362_vm0, %v17770_v15  ;;  %v17778_v15 = vld [vmem:[#allocation51_spill] sm:$0xff] }
 0x46b   : > { %v6077_v37 = vadd.f32 %v9953_v45, %v15972_v58  ;;  %v9960_v22 = vpop.f32.mrf.mxu1 }
 0x46c   : > { %v6068_v32 = vpop.f32.mrf.mxu0  ;;  %v6127_v46 = vadd.f32 %v9960_v22, %v15967_v16 }
 0x46d   : > { %v6081_v57 = vpack.c.bf16 %v6077_v37, %v6074_v23  ;;  %v6118_v17 = vpop.f32.mrf.mxu1  ;;  %v6069_v62 = vadd.f32 %v15982_v5, %v6068_v32  ;;  %v17779_v23 = vpack.c.bf16 %v17777_v19, %v17778_v15 }
 0x46e   : > { %v9968_v61 = vpop.f32.mrf.mxu0  ;;  %10069 = vmatpush3.bf16.xpose.msra.mxu1 %v6889_v33  ;;  %v6119_v10 = vadd.f32 %v15977_v52, %v6118_v17  ;;  %v16104_v52 = vld [vmem:[%s16624_s5 + $0x40] sm:$0xff] }
 0x46f   : > { %10166 = vmatprep.subr.msk.bf16.mxu0 %vm362_vm0, %v6081_v57  ;;  %v6953_v43 = vsel %vm362_vm0, %v6081_v57, 0  ;;  %v6080_v11 = vpack.c.bf16 %v6069_v62, %v6066_v47  ;;  %v9961_v29 = vpop.f32.mrf.mxu1  ;;  %v6198_v49 = vadd.f32 %v9968_v61, %v16079_v18 }
 0x470   : > { %10075 = vmatpush3.bf16.xpose.msra.mxu0 %v6953_v43  ;;  %v6130_v51 = vadd.f32 %v9961_v29, %v15972_v58  ;;  %v6189_v4 = vpop.f32.mrf.mxu0 }
 0x471   : > { %10167 = vmatprep.subr.msk.bf16.mxu0 %vm362_vm0, %v6080_v11  ;;  %v6121_v25 = vpop.f32.mrf.mxu1  ;;  %v6950_v7 = vsel %vm362_vm0, %v6080_v11, 0  ;;  %v6190_v14 = vadd.f32 %v16104_v52, %v6189_v4 }
 0x472   : > { %v6134_v0 = vpack.c.bf16 %v6130_v51, %v6127_v46  ;;  %v6122_v34 = vadd.f32 %v15982_v5, %v6121_v25  ;;  %v9969_v16 = vpop.f32.mrf.mxu0  ;;  %v16109_v5 = vld [vmem:[%s16624_s5 + $0x48] sm:$0xff] }
 0x473   : > { %v6201_v6 = vadd.f32 %v9969_v16, %v16088_v53  ;;  %v9976_v58 = vpop.f32.mrf.mxu1 }
 0x474   : > { %10168 = vmatprep.subr.msk.bf16.mxu1 %vm362_vm0, %v6134_v0  ;;  %v7014_v48 = vsel %vm362_vm0, %v6134_v0, 0  ;;  %v6133_v3 = vpack.c.bf16 %v6122_v34, %v6119_v10  ;;  %v6192_v36 = vpop.f32.mrf.mxu0  ;;  %v6251_v60 = vadd.f32 %v9976_v58, %v16079_v18  ;;  %v17781_v58 = vld [vmem:[#allocation113_spill] sm:$0xff] }
 0x475   : > { %v6205_v55 = vpack.c.bf16 %v6201_v6, %v6198_v49  ;;  %v6242_v31 = vpop.f32.mrf.mxu1  ;;  %10071 = vmatmul.mubr.msk.bf16.vlgmr.msra.gmra.mxu1 %vm362_vm0, %v17773_v1  ;;  %v6193_v41 = vadd.f32 %v16109_v5, %v6192_v36  ;;  %v17780_v6 = vld [vmem:[#allocation115_spill] sm:$0xff] }
 0x476   : > { %v9984_v30 = vpop.f32.mrf.mxu0  ;;  %10083 = vmatpush3.bf16.xpose.msra.mxu1 %v7014_v48  ;;  %10086 = vmatprep.mubr.msk.bf16.mxu1 %vm362_vm0, %v17776_v44  ;;  %v7011_v42 = vsel %vm362_vm0, %v6133_v3, 0  ;;  %v6243_v9 = vadd.f32 %v16104_v52, %v6242_v31  ;;  %v17782_v48 = vpack.c.bf16 %v17780_v6, %v17781_v58 }
 0x477   : > { %v9977_v39 = vpop.f32.mrf.mxu1  ;;  %10169 = vmatprep.subr.msk.bf16.mxu1 %vm362_vm0, %v6133_v3  ;;  %v6204_v12 = vpack.c.bf16 %v6193_v41, %v6190_v14  ;;  %v6304_v38 = vadd.f32 %v9984_v30, %v16079_v18 }
 0x478   : > { %10077 = vmatpush3.bf16.xpose.msra.mxu0 %v6950_v7  ;;  %v6295_v63 = vpop.f32.mrf.mxu0  ;;  %v6254_v2 = vadd.f32 %v9977_v39, %v16088_v53 }
 0x479   : > { %v6296_v28 = vadd.f32 %v16104_v52, %v6295_v63  ;;  %v6245_v13 = vpop.f32.mrf.mxu1  ;;  %10090 = vmatprep.subr.bf16.mxu0 %v6205_v55 }
 0x47a   : > { %v9985_v27 = vpop.f32.mrf.mxu0  ;;  %v6258_v24 = vpack.c.bf16 %v6254_v2, %v6251_v60  ;;  %v6246_v37 = vadd.f32 %v16109_v5, %v6245_v13 }
 0x47b   : > { %v9992_v59 = vpop.f32.mrf.mxu1  ;;  %v6307_v26 = vadd.f32 %v9985_v27, %v16088_v53 }
 0x47c   : > { %v6298_v50 = vpop.f32.mrf.mxu0  ;;  %v6257_v11 = vpack.c.bf16 %v6246_v37, %v6243_v9  ;;  %v6357_v51 = vadd.f32 %v9992_v59, %v16079_v18 }
 0x47d   : > { %v6299_v40 = vadd.f32 %v16109_v5, %v6298_v50  ;;  %v6348_v56 = vpop.f32.mrf.mxu1  ;;  %v16136_v17 = vpack.c.bf16 %v6307_v26, %v6304_v38 }
 0x47e   : > { %v10000_v45 = vpop.f32.mrf.mxu0  ;;  %v6349_v20 = vadd.f32 %v16104_v52, %v6348_v56  ;;  %10085 = vmatpush3.bf16.xpose.msra.mxu1 %v7011_v42 }
 0x47f   : > { %10079 = vmatmul.mubr.msk.bf16.vlgmr.msra.gmra.mxu0 %vm362_vm0, %v17779_v23  ;;  %v16133_v22 = vpack.c.bf16 %v6299_v40, %v6296_v28  ;;  %v6410_v32 = vadd.f32 %v10000_v45, %v16079_v18  ;;  %v9993_v47 = vpop.f32.mrf.mxu1  ;;  %10098 = vmatprep.subr.bf16.mxu1 %v6258_v24 }
 0x480   : > { %v6401_v57 = vpop.f32.mrf.mxu0  ;;  %10091 = vmatpush3.bf16.msra.mxu0 %v6205_v55  ;;  %v6360_v4 = vadd.f32 %v9993_v47, %v16088_v53 }
 0x481   : > { %v6402_v62 = vadd.f32 %v16104_v52, %v6401_v57  ;;  %v6351_v33 = vpop.f32.mrf.mxu1  ;;  %10092 = vmatprep.subr.bf16.mxu0 %v6204_v12 }
 0x482   : > { %v10001_v61 = vpop.f32.mrf.mxu0  ;;  %v6352_v43 = vadd.f32 %v16109_v5, %v6351_v33  ;;  %v16158_v54 = vpack.c.bf16 %v6360_v4, %v6357_v51 }
 0x483   : > { %v6413_v29 = vadd.f32 %v10001_v61, %v16088_v53  ;;  %v10008_v46 = vpop.f32.mrf.mxu1 }
 0x484   : > { %v16143_v25 = vpack.c.bf16 %v6352_v43, %v6349_v20  ;;  %v6404_v49 = vpop.f32.mrf.mxu0  ;;  %v6463_v10 = vadd.f32 %v10008_v46, %v16079_v18  ;;  %10093 = vmatpush3.bf16.msra.mxu0 %v6204_v12 }
 0x485   : > { %v16146_v0 = vpack.c.bf16 %v6413_v29, %v6410_v32  ;;  %v6405_v34 = vadd.f32 %v16109_v5, %v6404_v49  ;;  %v6454_v16 = vpop.f32.mrf.mxu1  ;;  %10106 = vmatprep.subr.bf16.mxu0 %v16136_v17  ;;  %10087 = vmatmul.mubr.msk.bf16.vlgmr.msra.gmra.mxu1 %vm362_vm0, %v17782_v48 }
 0x486   : > { %v10016_v3 = vpop.f32.mrf.mxu0  ;;  %v6455_v36 = vadd.f32 %v16104_v52, %v6454_v16  ;;  %10099 = vmatpush3.bf16.msra.mxu1 %v6258_v24 }
 0x487   : > { %v16155_v55 = vpack.c.bf16 %v6405_v34, %v6402_v62  ;;  %v6516_v31 = vadd.f32 %v10016_v3, %v16079_v18  ;;  %v10009_v21 = vpop.f32.mrf.mxu1  ;;  %10100 = vmatprep.subr.bf16.mxu1 %v6257_v11 }
 0x488   : > { %v6507_v1 = vpop.f32.mrf.mxu0  ;;  %v6466_v30 = vadd.f32 %v10009_v21, %v16088_v53 }
 0x489   : > { %v6508_v7 = vadd.f32 %v16104_v52, %v6507_v1  ;;  %v6457_v8 = vpop.f32.mrf.mxu1 }
 0x48a   : > { %v16162_v35 = vpack.c.bf16 %v6466_v30, %v6463_v10  ;;  %v10017_v44 = vpop.f32.mrf.mxu0  ;;  %v6458_v39 = vadd.f32 %v16109_v5, %v6457_v8  ;;  %10101 = vmatpush3.bf16.msra.mxu1 %v6257_v11 }
 0x48b   : > { %v6519_v60 = vadd.f32 %v10017_v44, %v16088_v53  ;;  %v10024_v63 = vpop.f32.mrf.mxu1  ;;  %10114 = vmatprep.subr.bf16.mxu1 %v16158_v54 }
 0x48c   : > { %v16166_v2 = vpack.c.bf16 %v6458_v39, %v6455_v36  ;;  %v6510_v14 = vpop.f32.mrf.mxu0  ;;  %v6569_v41 = vadd.f32 %v10024_v63, %v16079_v18 }
 0x48d   : > { %v16170_v28 = vpack.c.bf16 %v6519_v60, %v6516_v31  ;;  %v6511_v13 = vadd.f32 %v16109_v5, %v6510_v14  ;;  %v6560_v27 = vpop.f32.mrf.mxu1 }
 0x48e   : > { %v6561_v59 = vadd.f32 %v16104_v52, %v6560_v27 }
 0x48f   : > { %v16174_v24 = vpack.c.bf16 %v6511_v13, %v6508_v7  ;;  %v10025_v50 = vpop.f32.mrf.mxu1 }
 0x490   : > { %v6572_v12 = vadd.f32 %v10025_v50, %v16088_v53 }
 0x491   : > { %v6563_v38 = vpop.f32.mrf.mxu1 }
 0x492   : > { %v16177_v26 = vpack.c.bf16 %v6572_v12, %v6569_v41  ;;  %v6564_v40 = vadd.f32 %v16109_v5, %v6563_v38 }
 0x494   : > { %v16180_v18 = vpack.c.bf16 %v6564_v40, %v6561_v59 }
 0x4f9   : > { %v16182_v56 = vpop.f32.mrf.mxu0 }
 0x4fa   : > { %v7071_v42 = vsel %vm2469_vm5, %v16182_v56, -inf }
 0x4fb   : > { %7072 = vmax.xlane.f32.xlu0 %v7071_v42  ;;  %v16186_v9 = vpop.f32.mrf.mxu0 }
 0x4fc   : > { %v7065_v53 = vsel %vm2469_vm5, %v16186_v9, -inf }
 0x4fd   : > { %v16188_v52 = vpop.f32.mrf.mxu0 }
 0x4fe   : > { %v7074_v45 = vsel %vm2469_vm5, %v16188_v52, -inf }
 0x4ff   : > { %7066 = vmax.xlane.f32.xlu0 %v7065_v53  ;;  %7075 = vmax.xlane.f32.xlu1 %v7074_v45  ;;  %v16194_v5 = vpop.f32.mrf.mxu0 }
 0x500   : > { %v7068_v19 = vsel %vm2469_vm5, %v16194_v5, -inf }
 0x502   : > { %v16196_v20 = vpop.f32.mrf.mxu1 }
 0x503   : > { %7069 = vmax.xlane.f32.xlu0 %v7068_v19  ;;  %v7083_v32 = vsel %vm2469_vm5, %v16196_v20, -inf }
 0x504   : > { %v16200_v15 = vpop.f32.mrf.mxu1 }
 0x505   : > { %v7077_v23 = vsel %vm2469_vm5, %v16200_v15, -inf }
 0x506   : > { %7078 = vmax.xlane.f32.xlu1 %v7077_v23  ;;  %v16204_v37 = vpop.f32.mrf.mxu1 }
 0x507   : > { %7084 = vmax.xlane.f32.xlu0 %v7083_v32  ;;  %v7086_v47 = vsel %vm2469_vm5, %v16204_v37, -inf }
 0x508   : > { %v16210_v57 = vpop.f32.mrf.mxu1 }
 0x509   : > { %v7080_v62 = vsel %vm2469_vm5, %v16210_v57, -inf }
 0x50a   : > { %7087 = vmax.xlane.f32.xlu1 %v7086_v47 }
 0x50e   : > { %7081 = vmax.xlane.f32.xlu1 %v7080_v62 }
 0x50f   : > { %v16214_v33 = vpop.f32.mrf.mxu0 }
 0x510   : > { %v7095_v61 = vsel %vm2469_vm5, %v16214_v33, -inf }
 0x511   : > { %v16218_v43 = vpop.f32.mrf.mxu0  ;;  %7096 = vmax.xlane.f32.xlu0 %v7095_v61 }
 0x512   : > { %v7089_v29 = vsel %vm2469_vm5, %v16218_v43, -inf }
 0x513   : > { %v16220_v11 = vpop.f32.mrf.mxu0 }
 0x514   : > { %v7098_v46 = vsel %vm2469_vm5, %v16220_v11, -inf }
 0x515   : > { %v16226_v51 = vpop.f32.mrf.mxu0  ;;  %7090 = vmax.xlane.f32.xlu0 %v7089_v29  ;;  %7099 = vmax.xlane.f32.xlu1 %v7098_v46 }
 0x516   : > { %v7092_v4 = vsel %vm2469_vm5, %v16226_v51, -inf }
 0x519   : > { %7093 = vmax.xlane.f32.xlu1 %v7092_v4 }
 0x51c   : > { %v16230_v49 = vpop.f32.mrf.mxu1 }
 0x51d   : > { %v7107_v10 = vsel %vm2469_vm5, %v16230_v49, -inf }
 0x51e   : > { %7108 = vmax.xlane.f32.xlu0 %v7107_v10  ;;  %v16234_v34 = vpop.f32.mrf.mxu1 }
 0x51f   : > { %v7101_v6 = vsel %vm2469_vm5, %v16234_v34, -inf }
 0x520   : > { %v16236_v16 = vpop.f32.mrf.mxu1 }
 0x521   : > { %v7110_v58 = vsel %vm2469_vm5, %v16236_v16, -inf }
 0x522   : > { %7102 = vmax.xlane.f32.xlu0 %v7101_v6  ;;  %v16242_v48 = vpop.f32.mrf.mxu1  ;;  %7111 = vmax.xlane.f32.xlu1 %v7110_v58 }
 0x523   : > { %v7104_v3 = vsel %vm2469_vm5, %v16242_v48, -inf }
 0x526   : > { %7105 = vmax.xlane.f32.xlu1 %v7104_v3 }
 0x529   : > { %v16246_v36 = vpop.f32.mrf.mxu0 }
 0x52a   : > { %v7119_v31 = vsel %vm2469_vm5, %v16246_v36, -inf }
 0x52b   : > { %v16250_v21 = vpop.f32.mrf.mxu0  ;;  %7120 = vmax.xlane.f32.xlu0 %v7119_v31 }
 0x52c   : > { %v7113_v30 = vsel %vm2469_vm5, %v16250_v21, -inf }
 0x52d   : > { %v16252_v1 = vpop.f32.mrf.mxu0 }
 0x52e   : > { %v7122_v7 = vsel %vm2469_vm5, %v16252_v1, -inf }
 0x52f   : > { %v16258_v8 = vpop.f32.mrf.mxu0  ;;  %7114 = vmax.xlane.f32.xlu0 %v7113_v30  ;;  %7123 = vmax.xlane.f32.xlu1 %v7122_v7 }
 0x530   : > { %v7116_v44 = vsel %vm2469_vm5, %v16258_v8, -inf }
 0x533   : > { %7117 = vmax.xlane.f32.xlu1 %v7116_v44 }
 0x535   : > { %v16262_v39 = vpop.f32.mrf.mxu1 }
 0x536   : > { %v7131_v60 = vsel %vm2469_vm5, %v16262_v39, -inf }
 0x537   : > { %7132 = vmax.xlane.f32.xlu0 %v7131_v60  ;;  %v16266_v63 = vpop.f32.mrf.mxu1 }
 0x538   : > { %v7125_v41 = vsel %vm2469_vm5, %v16266_v63, -inf }
 0x539   : > { %v16268_v14 = vpop.f32.mrf.mxu1 }
 0x53a   : > { %v7134_v13 = vsel %vm2469_vm5, %v16268_v14, -inf }
 0x53b   : > { %7126 = vmax.xlane.f32.xlu0 %v7125_v41  ;;  %v16274_v27 = vpop.f32.mrf.mxu1  ;;  %7135 = vmax.xlane.f32.xlu1 %v7134_v13 }
 0x53c   : > { %v7128_v50 = vsel %vm2469_vm5, %v16274_v27, -inf }
 0x53f   : > { %v16276_v59 = vpop.f32.mrf.mxu0  ;;  %7129 = vmax.xlane.f32.xlu1 %v7128_v50 }
 0x540   : > { %v7143_v12 = vsel %vm2469_vm5, %v16276_v59, -inf }
 0x541   : > { %v16282_v38 = vpop.f32.mrf.mxu0  ;;  %7144 = vmax.xlane.f32.xlu0 %v7143_v12 }
 0x542   : > { %v7137_v42 = vsel %vm2469_vm5, %v16282_v38, -inf }
 0x543   : > { %v16284_v40 = vpop.f32.mrf.mxu0 }
 0x544   : > { %v7146_v53 = vsel %vm2469_vm5, %v16284_v40, -inf }
 0x545   : > { %v16290_v45 = vpop.f32.mrf.mxu0  ;;  %7138 = vmax.xlane.f32.xlu0 %v7137_v42  ;;  %7147 = vmax.xlane.f32.xlu1 %v7146_v53  ;;  %v16292_v19 = vpop.f32.mrf.mxu1 }
 0x546   : > { %v7140_v32 = vsel %vm2469_vm5, %v16290_v45, -inf  ;;  %v7155_v29 = vsel %vm2469_vm5, %v16292_v19, -inf }
 0x547   : > { %v16294_v23 = vpop.f32.mrf.mxu1 }
 0x548   : > { %v7149_v47 = vsel %vm2469_vm5, %v16294_v23, -inf }
 0x549   : > { %7141 = vmax.xlane.f32.xlu1 %v7140_v32  ;;  %7150 = vmax.xlane.f32.xlu0 %v7149_v47  ;;  %v16300_v62 = vpop.f32.mrf.mxu1 }
 0x54a   : > { %v7158_v4 = vsel %vm2469_vm5, %v16300_v62, -inf }
 0x54b   : > { %v16302_v61 = vpop.f32.mrf.mxu1 }
 0x54c   : > { %v7152_v46 = vsel %vm2469_vm5, %v16302_v61, -inf }
 0x54d   : > { %7156 = vmax.xlane.f32.xlu0 %v7155_v29  ;;  %7153 = vmax.xlane.f32.xlu1 %v7152_v46 }
 0x551   : > { %7159 = vmax.xlane.f32.xlu1 %v7158_v4 }
 0x584   : > { %v7073_v10 = vpop.xlane.xlu0 %7072 }
 0x585   : > { %v7163_v6 = vsub.f32 %v16182_v56, %v7073_v10 }
 0x587   : > { %v7197_v58 = vmul.f32 1.442695, %v7163_v6 }
 0x588   : > { %v7067_v3 = vpop.xlane.xlu0 %7066  ;;  %v7076_v31 = vpop.xlane.xlu1 %7075 }
 0x589   : > { %10196 = vpow2.f32 %v7197_v58  ;;  %v7161_v30 = vsub.f32 %v16186_v9, %v7067_v3  ;;  %v7164_v7 = vsub.f32 %v16188_v52, %v7076_v31 }
 0x58b   : > { %v7193_v44 = vmul.f32 1.442695, %v7161_v30  ;;  %v7199_v60 = vmul.f32 1.442695, %v7164_v7 }
 0x58c   : > { %v7070_v41 = vpop.xlane.xlu0 %7069 }
 0x58d   : > { %10198 = vpow2.f32 %v7193_v44  ;;  %v7162_v13 = vsub.f32 %v16194_v5, %v7070_v41 }
 0x58e   : > { %10200 = vpow2.f32 %v7199_v60 }
 0x58f   : > { %v7079_v50 = vpop.xlane.xlu1 %7078  ;;  %v7195_v12 = vmul.f32 1.442695, %v7162_v13 }
 0x590   : > { %v7165_v42 = vsub.f32 %v16200_v15, %v7079_v50  ;;  %v7085_v56 = vpop.xlane.xlu0 %7084 }
 0x591   : > { %10202 = vpow2.f32 %v7195_v12  ;;  %v7167_v53 = vsub.f32 %v16196_v20, %v7085_v56 }
 0x592   : > { %v7201_v32 = vmul.f32 1.442695, %v7165_v42 }
 0x593   : > { %v7088_v47 = vpop.xlane.xlu1 %7087  ;;  %v7205_v9 = vmul.f32 1.442695, %v7167_v53 }
 0x594   : > { %v7168_v52 = vsub.f32 %v16204_v37, %v7088_v47 }
 0x595   : > { %10204 = vpow2.f32 %v7205_v9 }
 0x596   : > { %v7207_v29 = vmul.f32 1.442695, %v7168_v52  ;;  %v16317_v46 = vpop.eup %10196  ;;  %10206 = vpow2.f32 %v7201_v32 }
 0x597   : > { %v7082_v5 = vpop.xlane.xlu1 %7081  ;;  %v7263_v15 = vsel %vm2469_vm5, %v16317_v46, 0.0 }
 0x598   : > { %10208 = vpow2.f32 %v7207_v29  ;;  %v7166_v4 = vsub.f32 %v16210_v57, %v7082_v5  ;;  %7264 = vadd.xlane.f32.xlu0 %v7263_v15 }
 0x59a   : > { %v7097_v10 = vpop.xlane.xlu0 %7096  ;;  %v7203_v6 = vmul.f32 1.442695, %v7166_v4  ;;  %v16323_v58 = vpop.eup %10198 }
 0x59b   : > { %v7171_v20 = vsub.f32 %v16214_v33, %v7097_v10  ;;  %v16325_v37 = vpop.eup %10200  ;;  %v7257_v31 = vsel %vm2469_vm5, %v16323_v58, 0.0 }
 0x59c   : > { %10210 = vpow2.f32 %v7203_v6  ;;  %7258 = vadd.xlane.f32.xlu0 %v7257_v31  ;;  %v7266_v57 = vsel %vm2469_vm5, %v16325_v37, 0.0 }
 0x59d   : > { %v7213_v3 = vmul.f32 1.442695, %v7171_v20  ;;  %7267 = vadd.xlane.f32.xlu1 %v7266_v57 }
 0x59e   : > { %v7091_v30 = vpop.xlane.xlu0 %7090  ;;  %v7100_v7 = vpop.xlane.xlu1 %7099 }
 0x59f   : > { %10212 = vpow2.f32 %v7213_v3  ;;  %v7169_v44 = vsub.f32 %v16218_v43, %v7091_v30  ;;  %v7172_v33 = vsub.f32 %v16220_v11, %v7100_v7  ;;  %v16333_v60 = vpop.eup %10202 }
 0x5a0   : > { %v7260_v50 = vsel %vm2469_vm5, %v16333_v60, 0.0 }
 0x5a1   : > { %v7209_v41 = vmul.f32 1.442695, %v7169_v44  ;;  %v7215_v13 = vmul.f32 1.442695, %v7172_v33  ;;  %7261 = vadd.xlane.f32.xlu1 %v7260_v50 }
 0x5a2   : > { %v7094_v12 = vpop.xlane.xlu1 %7093  ;;  %v16338_v56 = vpop.eup %10204 }
 0x5a3   : > { %10214 = vpow2.f32 %v7209_v41  ;;  %v7170_v42 = vsub.f32 %v16226_v51, %v7094_v12  ;;  %v16340_v53 = vpop.eup %10206  ;;  %v7275_v11 = vsel %vm2469_vm5, %v16338_v56, 0.0 }
 0x5a4   : > { %10216 = vpow2.f32 %v7215_v13  ;;  %7276 = vadd.xlane.f32.xlu0 %v7275_v11  ;;  %v7269_v52 = vsel %vm2469_vm5, %v16340_v53, 0.0 }
 0x5a5   : > { %v7211_v43 = vmul.f32 1.442695, %v7170_v42  ;;  %v16344_v32 = vpop.eup %10208 }
 0x5a6   : > { %v7278_v9 = vsel %vm2469_vm5, %v16344_v32, 0.0 }
 0x5a7   : > { %v7109_v47 = vpop.xlane.xlu0 %7108  ;;  %10218 = vpow2.f32 %v7211_v43  ;;  %7279 = vadd.xlane.f32.xlu1 %v7278_v9 }
 0x5a8   : > { %v7175_v51 = vsub.f32 %v16230_v49, %v7109_v47  ;;  %7270 = vadd.xlane.f32.xlu0 %v7269_v52 }
 0x5a9   : > { %v16351_v29 = vpop.eup %10210 }
 0x5aa   : > { %v7221_v5 = vmul.f32 1.442695, %v7175_v51  ;;  %v7272_v10 = vsel %vm2469_vm5, %v16351_v29, 0.0 }
 0x5ab   : > { %v7103_v4 = vpop.xlane.xlu0 %7102  ;;  %v7112_v15 = vpop.xlane.xlu1 %7111  ;;  %7273 = vadd.xlane.f32.xlu1 %v7272_v10 }
 0x5ac   : > { %v16355_v20 = vpop.eup %10212  ;;  %10220 = vpow2.f32 %v7221_v5  ;;  %v7173_v6 = vsub.f32 %v16234_v34, %v7103_v4  ;;  %v7176_v49 = vsub.f32 %v16236_v16, %v7112_v15 }
 0x5ad   : > { %v7287_v3 = vsel %vm2469_vm5, %v16355_v20, 0.0 }
 0x5ae   : > { %v7217_v31 = vmul.f32 1.442695, %v7173_v6  ;;  %v7223_v30 = vmul.f32 1.442695, %v7176_v49  ;;  %7288 = vadd.xlane.f32.xlu0 %v7287_v3 }
 0x5af   : > { %v7106_v7 = vpop.xlane.xlu1 %7105 }
 0x5b0   : > { %v16361_v57 = vpop.eup %10214  ;;  %10222 = vpow2.f32 %v7217_v31  ;;  %v7174_v44 = vsub.f32 %v16242_v48, %v7106_v7 }
 0x5b1   : > { %v16364_v33 = vpop.eup %10216  ;;  %10224 = vpow2.f32 %v7223_v30  ;;  %v7281_v34 = vsel %vm2469_vm5, %v16361_v57, 0.0 }
 0x5b2   : > { %v7219_v16 = vmul.f32 1.442695, %v7174_v44  ;;  %v7290_v41 = vsel %vm2469_vm5, %v16364_v33, 0.0  ;;  %7282 = vadd.xlane.f32.xlu0 %v7281_v34 }
 0x5b3   : > { %7291 = vadd.xlane.f32.xlu1 %v7290_v41 }
 0x5b4   : > { %v7121_v13 = vpop.xlane.xlu0 %7120  ;;  %v16370_v50 = vpop.eup %10218  ;;  %10226 = vpow2.f32 %v7219_v16 }
 0x5b5   : > { %v7179_v12 = vsub.f32 %v16246_v36, %v7121_v13  ;;  %v7284_v48 = vsel %vm2469_vm5, %v16370_v50, 0.0 }
 0x5b7   : > { %v7229_v42 = vmul.f32 1.442695, %v7179_v12  ;;  %7285 = vadd.xlane.f32.xlu1 %v7284_v48 }
 0x5b8   : > { %v7115_v43 = vpop.xlane.xlu0 %7114  ;;  %v7124_v11 = vpop.xlane.xlu1 %7123 }
 0x5b9   : > { %10228 = vpow2.f32 %v7229_v42  ;;  %v7177_v47 = vsub.f32 %v16250_v21, %v7115_v43  ;;  %v7180_v9 = vsub.f32 %v16252_v1, %v7124_v11  ;;  %v16377_v51 = vpop.eup %10220 }
 0x5ba   : > { %v7299_v36 = vsel %vm2469_vm5, %v16377_v51, 0.0 }
 0x5bb   : > { %v7225_v52 = vmul.f32 1.442695, %v7177_v47  ;;  %v7231_v5 = vmul.f32 1.442695, %v7180_v9  ;;  %7300 = vadd.xlane.f32.xlu0 %v7299_v36 }
 0x5bc   : > { %v7118_v4 = vpop.xlane.xlu1 %7117 }
 0x5bd   : > { %10230 = vpow2.f32 %v7225_v52  ;;  %v7178_v15 = vsub.f32 %v16258_v8, %v7118_v4  ;;  %v16382_v10 = vpop.eup %10222 }
 0x5be   : > { %10232 = vpow2.f32 %v7231_v5  ;;  %v16384_v6 = vpop.eup %10224  ;;  %v7293_v1 = vsel %vm2469_vm5, %v16382_v10, 0.0 }
 0x5bf   : > { %v7227_v21 = vmul.f32 1.442695, %v7178_v15  ;;  %v7302_v49 = vsel %vm2469_vm5, %v16384_v6, 0.0  ;;  %7294 = vadd.xlane.f32.xlu0 %v7293_v1 }
 0x5c0   : > { %v7133_v3 = vpop.xlane.xlu0 %7132  ;;  %7303 = vadd.xlane.f32.xlu1 %v7302_v49 }
 0x5c1   : > { %10234 = vpow2.f32 %v7227_v21  ;;  %v16390_v31 = vpop.eup %10226  ;;  %v7183_v8 = vsub.f32 %v16262_v39, %v7133_v3 }
 0x5c2   : > { %v7296_v30 = vsel %vm2469_vm5, %v16390_v31, 0.0 }
 0x5c3   : > { %v7237_v7 = vmul.f32 1.442695, %v7183_v8 }
 0x5c4   : > { %v7127_v44 = vpop.xlane.xlu0 %7126  ;;  %v7136_v34 = vpop.xlane.xlu1 %7135  ;;  %7297 = vadd.xlane.f32.xlu1 %v7296_v30 }
 0x5c5   : > { %10236 = vpow2.f32 %v7237_v7  ;;  %v7181_v41 = vsub.f32 %v16266_v63, %v7127_v44  ;;  %v7184_v13 = vsub.f32 %v16268_v14, %v7136_v34 }
 0x5c6   : > { %v16395_v16 = vpop.eup %10228 }
 0x5c7   : > { %v7311_v12 = vsel %vm2469_vm5, %v16395_v16, 0.0  ;;  %v7233_v48 = vmul.f32 1.442695, %v7181_v41  ;;  %v7239_v42 = vmul.f32 1.442695, %v7184_v13 }
 0x5c8   : > { %7312 = vadd.xlane.f32.xlu0 %v7311_v12  ;;  %v7130_v39 = vpop.xlane.xlu1 %7129 }
 0x5c9   : > { %10238 = vpow2.f32 %v7233_v48  ;;  %v7182_v47 = vsub.f32 %v16274_v27, %v7130_v39 }
 0x5ca   : > { %v16401_v43 = vpop.eup %10230  ;;  %v7145_v11 = vpop.xlane.xlu0 %7144  ;;  %10240 = vpow2.f32 %v7239_v42 }
 0x5cb   : > { %v16404_v9 = vpop.eup %10232  ;;  %v7187_v63 = vsub.f32 %v16276_v59, %v7145_v11  ;;  %v7305_v14 = vsel %vm2469_vm5, %v16401_v43, 0.0  ;;  %v7235_v52 = vmul.f32 1.442695, %v7182_v47 }
 0x5cc   : > { %v7314_v5 = vsel %vm2469_vm5, %v16404_v9, 0.0  ;;  %7306 = vadd.xlane.f32.xlu0 %v7305_v14 }
 0x5cd   : > { %v7245_v36 = vmul.f32 1.442695, %v7187_v63  ;;  %7315 = vadd.xlane.f32.xlu1 %v7314_v5  ;;  %10242 = vpow2.f32 %v7235_v52 }
 0x5ce   : > { %v16411_v4 = vpop.eup %10234  ;;  %v7139_v15 = vpop.xlane.xlu0 %7138 }
 0x5cf   : > { %v7148_v27 = vpop.xlane.xlu1 %7147  ;;  %10244 = vpow2.f32 %v7245_v36  ;;  %v7185_v21 = vsub.f32 %v16282_v38, %v7139_v15  ;;  %v7308_v1 = vsel %vm2469_vm5, %v16411_v4, 0.0 }
 0x5d0   : > { %v7188_v59 = vsub.f32 %v16284_v40, %v7148_v27 }
 0x5d1   : > { %v7241_v49 = vmul.f32 1.442695, %v7185_v21  ;;  %7309 = vadd.xlane.f32.xlu1 %v7308_v1 }
 0x5d2   : > { %v7247_v3 = vmul.f32 1.442695, %v7188_v59  ;;  %v16417_v30 = vpop.eup %10236  ;;  %v7151_v44 = vpop.xlane.xlu0 %7150 }
 0x5d3   : > { %v7142_v8 = vpop.xlane.xlu1 %7141  ;;  %10246 = vpow2.f32 %v7241_v49  ;;  %v7189_v34 = vsub.f32 %v16294_v23, %v7151_v44  ;;  %v7323_v38 = vsel %vm2469_vm5, %v16417_v30, 0.0 }
 0x5d4   : > { %v7186_v7 = vsub.f32 %v16290_v45, %v7142_v8  ;;  %10248 = vpow2.f32 %v7247_v3  ;;  %7324 = vadd.xlane.f32.xlu0 %v7323_v38 }
 0x5d5   : > { %v7249_v41 = vmul.f32 1.442695, %v7189_v34 }
 0x5d6   : > { %v7243_v40 = vmul.f32 1.442695, %v7186_v7  ;;  %v16423_v13 = vpop.eup %10238  ;;  %v7157_v12 = vpop.xlane.xlu0 %7156 }
 0x5d7   : > { %v7154_v48 = vpop.xlane.xlu1 %7153  ;;  %v16425_v42 = vpop.eup %10240  ;;  %v7191_v45 = vsub.f32 %v16292_v19, %v7157_v12  ;;  %v7317_v23 = vsel %vm2469_vm5, %v16423_v13, 0.0 }
 0x5d8   : > { %10250 = vpow2.f32 %v7243_v40  ;;  %v7190_v39 = vsub.f32 %v16302_v61, %v7154_v48  ;;  %v7326_v11 = vsel %vm2469_vm5, %v16425_v42, 0.0  ;;  %7318 = vadd.xlane.f32.xlu0 %v7317_v23 }
 0x5d9   : > { %10252 = vpow2.f32 %v7249_v41  ;;  %v7253_v47 = vmul.f32 1.442695, %v7191_v45  ;;  %7327 = vadd.xlane.f32.xlu1 %v7326_v11 }
 0x5da   : > { %v7251_v63 = vmul.f32 1.442695, %v7190_v39  ;;  %v16433_v14 = vpop.eup %10242 }
 0x5db   : > { %v7160_v52 = vpop.xlane.xlu1 %7159  ;;  %10254 = vpow2.f32 %v7253_v47  ;;  %v7320_v61 = vsel %vm2469_vm5, %v16433_v14, 0.0 }
 0x5dc   : > { %v16435_v5 = vpop.eup %10244  ;;  %v7192_v19 = vsub.f32 %v16300_v62, %v7160_v52  ;;  %10256 = vpow2.f32 %v7251_v63 }
 0x5dd   : > { %v7335_v36 = vsel %vm2469_vm5, %v16435_v5, 0.0  ;;  %7321 = vadd.xlane.f32.xlu1 %v7320_v61 }
 0x5de   : > { %v7255_v15 = vmul.f32 1.442695, %v7192_v19  ;;  %7336 = vadd.xlane.f32.xlu0 %v7335_v36 }
 0x5e0   : > { %v16442_v27 = vpop.eup %10246  ;;  %10258 = vpow2.f32 %v7255_v15 }
 0x5e1   : > { %v16444_v21 = vpop.eup %10248  ;;  %v7329_v59 = vsel %vm2469_vm5, %v16442_v27, 0.0 }
 0x5e2   : > { %v7338_v62 = vsel %vm2469_vm5, %v16444_v21, 0.0  ;;  %7330 = vadd.xlane.f32.xlu0 %v7329_v59 }
 0x5e3   : > { %7339 = vadd.xlane.f32.xlu1 %v7338_v62 }
 0x5e5   : > { %v16450_v1 = vpop.eup %10250 }
 0x5e6   : > { %v16452_v49 = vpop.eup %10252  ;;  %v7332_v3 = vsel %vm2469_vm5, %v16450_v1, 0.0 }
 0x5e7   : > { %v7341_v8 = vsel %vm2469_vm5, %v16452_v49, 0.0  ;;  %7333 = vadd.xlane.f32.xlu1 %v7332_v3 }
 0x5e8   : > { %7342 = vadd.xlane.f32.xlu0 %v7341_v8  ;;  %v16458_v7 = vpop.eup %10254 }
 0x5e9   : > { %v16460_v44 = vpop.eup %10256  ;;  %v7347_v34 = vsel %vm2469_vm5, %v16458_v7, 0.0 }
 0x5ea   : > { %v7344_v38 = vsel %vm2469_vm5, %v16460_v44, 0.0 }
 0x5eb   : > { %7345 = vadd.xlane.f32.xlu1 %v7344_v38 }
 0x5ec   : > { %7348 = vadd.xlane.f32.xlu0 %v7347_v34 }
 0x5ed   : > { %v16466_v40 = vpop.eup %10258 }
 0x5ee   : > { %v7350_v41 = vsel %vm2469_vm5, %v16466_v40, 0.0 }
 0x5ef   : > { %7351 = vadd.xlane.f32.xlu1 %v7350_v41 }
 0x621   : > { %v7265_v12 = vpop.xlane.xlu0 %7264 }
 0x625   : > { %v7259_v48 = vpop.xlane.xlu0 %7258 }
 0x626   : > { %v7268_v45 = vpop.xlane.xlu1 %7267 }
 0x627   : > { %10260 = vrcp.f32 %v7268_v45 }
 0x628   : > { %10262 = vrcp.f32 %v7259_v48 }
 0x629   : > { %10264 = vrcp.f32 %v7265_v12 }
 0x62a   : > { %v7262_v39 = vpop.xlane.xlu1 %7261 }
 0x62b   : > { %10266 = vrcp.f32 %v7262_v39 }
 0x62d   : > { %v7277_v23 = vpop.xlane.xlu0 %7276 }
 0x630   : > { %v7280_v11 = vpop.xlane.xlu1 %7279 }
 0x631   : > { %10268 = vrcp.f32 %v7280_v11  ;;  %v7271_v47 = vpop.xlane.xlu0 %7270 }
 0x632   : > { %10270 = vrcp.f32 %v7271_v47 }
 0x633   : > { %10272 = vrcp.f32 %v7277_v23 }
 0x634   : > { %v7274_v63 = vpop.xlane.xlu1 %7273  ;;  %v10261_v52 = vpop.eup %10260 }
 0x635   : > { %10274 = vrcp.f32 %v7274_v63  ;;  %v10263_v61 = vpop.eup %10262  ;;  %v7388_v59 = vmul.f32 %v10261_v52, %v16325_v37 }
 0x636   : > { %v10265_v36 = vpop.eup %10264  ;;  %v7385_v62 = vmul.f32 %v10263_v61, %v16323_v58 }
 0x637   : > { %v7289_v19 = vpop.xlane.xlu0 %7288  ;;  %v7387_v8 = vmul.f32 %v10265_v36, %v16317_v46 }
 0x638   : > { %v10267_v15 = vpop.eup %10266 }
 0x639   : > { %v7386_v3 = vmul.f32 %v10267_v15, %v16333_v60  ;;  %v7418_v12 = vpack.c.bf16 %v7388_v59, %v7387_v8 }
 0x63b   : > { %v7283_v38 = vpop.xlane.xlu0 %7282  ;;  %v7417_v41 = vpack.c.bf16 %v7386_v3, %v7385_v62 }
 0x63c   : > { %v7292_v34 = vpop.xlane.xlu1 %7291 }
 0x63d   : > { %10276 = vrcp.f32 %v7292_v34  ;;  %10094 = vmatprep.mubr.msk.bf16.mxu0 %vm2469_vm5, %v7417_v41 }
 0x63e   : > { %10278 = vrcp.f32 %v7283_v38  ;;  %v10269_v48 = vpop.eup %10268  ;;  %10095 = vmatmul.mubr.msk.bf16.vlgmr.msra.gmra.mxu0 %vm2469_vm5, %v7418_v12 }
 0x63f   : > { %10280 = vrcp.f32 %v7289_v19  ;;  %v10271_v37 = vpop.eup %10270  ;;  %10107 = vmatpush3.bf16.msra.mxu0 %v16136_v17  ;;  %v7392_v60 = vmul.f32 %v10269_v48, %v16344_v32 }
 0x640   : > { %v7286_v45 = vpop.xlane.xlu1 %7285  ;;  %v10273_v58 = vpop.eup %10272  ;;  %10108 = vmatprep.subr.bf16.mxu0 %v16133_v22  ;;  %v7389_v23 = vmul.f32 %v10271_v37, %v16340_v53 }
 0x641   : > { %10282 = vrcp.f32 %v7286_v45  ;;  %v7391_v47 = vmul.f32 %v10273_v58, %v16338_v56 }
 0x642   : > { %v10275_v46 = vpop.eup %10274 }
 0x643   : > { %v7390_v11 = vmul.f32 %v10275_v46, %v16351_v29  ;;  %10109 = vmatpush3.bf16.msra.mxu0 %v16133_v22  ;;  %v7420_v52 = vpack.c.bf16 %v7392_v60, %v7391_v47 }
 0x644   : > { %v7301_v39 = vpop.xlane.xlu0 %7300  ;;  %10122 = vmatprep.subr.bf16.mxu0 %v16146_v0 }
 0x645   : > { %v7419_v63 = vpack.c.bf16 %v7390_v11, %v7389_v23 }
 0x647   : > { %10102 = vmatprep.mubr.msk.bf16.mxu1 %vm2469_vm5, %v7419_v63 }
 0x648   : > { %v7295_v19 = vpop.xlane.xlu0 %7294  ;;  %10103 = vmatmul.mubr.msk.bf16.vlgmr.msra.gmra.mxu1 %vm2469_vm5, %v7420_v52 }
 0x649   : > { %v7304_v17 = vpop.xlane.xlu1 %7303  ;;  %10115 = vmatpush3.bf16.msra.mxu1 %v16158_v54 }
 0x64a   : > { %v10277_v32 = vpop.eup %10276  ;;  %10284 = vrcp.f32 %v7304_v17  ;;  %10116 = vmatprep.subr.bf16.mxu1 %v16143_v25 }
 0x64b   : > { %v10279_v53 = vpop.eup %10278  ;;  %10286 = vrcp.f32 %v7295_v19  ;;  %v7396_v61 = vmul.f32 %v10277_v32, %v16364_v33 }
 0x64c   : > { %v10281_v56 = vpop.eup %10280  ;;  %10288 = vrcp.f32 %v7301_v39  ;;  %v7393_v36 = vmul.f32 %v10279_v53, %v16361_v57 }
 0x64d   : > { %v7298_v22 = vpop.xlane.xlu1 %7297  ;;  %10117 = vmatpush3.bf16.msra.mxu1 %v16143_v25  ;;  %v7395_v15 = vmul.f32 %v10281_v56, %v16355_v20 }
 0x64e   : > { %v10283_v29 = vpop.eup %10282  ;;  %10290 = vrcp.f32 %v7298_v22  ;;  %10130 = vmatprep.subr.bf16.mxu1 %v16162_v35 }
 0x64f   : > { %v7394_v54 = vmul.f32 %v10283_v29, %v16370_v50  ;;  %v7422_v3 = vpack.c.bf16 %v7396_v61, %v7395_v15 }
 0x651   : > { %v7313_v59 = vpop.xlane.xlu0 %7312  ;;  %v7421_v62 = vpack.c.bf16 %v7394_v54, %v7393_v36 }
 0x653   : > { %10110 = vmatprep.mubr.msk.bf16.mxu0 %vm2469_vm5, %v7421_v62 }
 0x654   : > { %10111 = vmatmul.mubr.msk.bf16.vlgmr.msra.gmra.mxu0 %vm2469_vm5, %v7422_v3 }
 0x655   : > { %v7307_v33 = vpop.xlane.xlu0 %7306  ;;  %10123 = vmatpush3.bf16.msra.mxu0 %v16146_v0 }
 0x656   : > { %v7316_v8 = vpop.xlane.xlu1 %7315  ;;  %10124 = vmatprep.subr.bf16.mxu0 %v16155_v55 }
 0x657   : > { %10292 = vrcp.f32 %v7316_v8  ;;  %v10285_v25 = vpop.eup %10284 }
 0x658   : > { %10294 = vrcp.f32 %v7307_v33  ;;  %v10287_v57 = vpop.eup %10286  ;;  %v7400_v38 = vmul.f32 %v10285_v25, %v16384_v6 }
 0x659   : > { %10296 = vrcp.f32 %v7313_v59  ;;  %10125 = vmatpush3.bf16.msra.mxu0 %v16155_v55  ;;  %v10289_v20 = vpop.eup %10288  ;;  %v7397_v41 = vmul.f32 %v10287_v57, %v16382_v10 }
 0x65a   : > { %v7310_v50 = vpop.xlane.xlu1 %7309  ;;  %10138 = vmatprep.subr.bf16.mxu0 %v16170_v28  ;;  %v7399_v12 = vmul.f32 %v10289_v20, %v16377_v51 }
 0x65b   : > { %10298 = vrcp.f32 %v7310_v50  ;;  %v10291_v34 = vpop.eup %10290 }
 0x65c   : > { %v7398_v0 = vmul.f32 %v10291_v34, %v16390_v31  ;;  %v7424_v37 = vpack.c.bf16 %v7400_v38, %v7399_v12 }
 0x65d   : > { %v7325_v48 = vpop.xlane.xlu0 %7324 }
 0x65e   : > { %v7423_v45 = vpack.c.bf16 %v7398_v0, %v7397_v41 }
 0x660   : > { %10118 = vmatprep.mubr.msk.bf16.mxu1 %vm2469_vm5, %v7423_v45 }
 0x661   : > { %v7319_v58 = vpop.xlane.xlu0 %7318  ;;  %10119 = vmatmul.mubr.msk.bf16.vlgmr.msra.gmra.mxu1 %vm2469_vm5, %v7424_v37 }
 0x662   : > { %v7328_v55 = vpop.xlane.xlu1 %7327  ;;  %10131 = vmatpush3.bf16.msra.mxu1 %v16162_v35 }
 0x663   : > { %10132 = vmatprep.subr.bf16.mxu1 %v16166_v2  ;;  %10300 = vrcp.f32 %v7328_v55 }
 0x664   : > { %v10293_v6 = vpop.eup %10292  ;;  %10302 = vrcp.f32 %v7319_v58 }
 0x665   : > { %v10295_v10 = vpop.eup %10294  ;;  %10304 = vrcp.f32 %v7325_v48  ;;  %v7404_v39 = vmul.f32 %v10293_v6, %v16404_v9 }
 0x666   : > { %v10297_v31 = vpop.eup %10296  ;;  %v7322_v51 = vpop.xlane.xlu1 %7321  ;;  %10133 = vmatpush3.bf16.msra.mxu1 %v16166_v2  ;;  %v7401_v35 = vmul.f32 %v10295_v10, %v16401_v43 }
 0x667   : > { %v7337_v46 = vpop.xlane.xlu0 %7336  ;;  %10306 = vrcp.f32 %v7322_v51  ;;  %10146 = vmatprep.subr.bf16.mxu1 %v16177_v26  ;;  %v7403_v11 = vmul.f32 %v10297_v31, %v16395_v16 }
 0x668   : > { %v10299_v60 = vpop.eup %10298 }
 0x669   : > { %v7402_v23 = vmul.f32 %v10299_v60, %v16411_v4  ;;  %v7426_v52 = vpack.c.bf16 %v7404_v39, %v7403_v11 }
 0x66b   : > { %v7331_v47 = vpop.xlane.xlu0 %7330  ;;  %v7425_v63 = vpack.c.bf16 %v7402_v23, %v7401_v35 }
 0x66c   : > { %v7340_v17 = vpop.xlane.xlu1 %7339 }
 0x66d   : > { %10126 = vmatprep.mubr.msk.bf16.mxu0 %vm2469_vm5, %v7425_v63  ;;  %10308 = vrcp.f32 %v7340_v17 }
 0x66e   : > { %10127 = vmatmul.mubr.msk.bf16.vlgmr.msra.gmra.mxu0 %vm2469_vm5, %v7426_v52  ;;  %10310 = vrcp.f32 %v7331_v47 }
 0x66f   : > { %10139 = vmatpush3.bf16.msra.mxu0 %v16170_v28  ;;  %10312 = vrcp.f32 %v7337_v46 }
 0x670   : > { %v7334_v2 = vpop.xlane.xlu1 %7333  ;;  %10140 = vmatprep.subr.bf16.mxu0 %v16174_v24  ;;  %v10301_v43 = vpop.eup %10300 }
 0x671   : > { %v7343_v9 = vpop.xlane.xlu0 %7342  ;;  %10314 = vrcp.f32 %v7334_v2  ;;  %v10303_v16 = vpop.eup %10302  ;;  %v7408_v32 = vmul.f32 %v10301_v43, %v16425_v42 }
 0x672   : > { %v10305_v4 = vpop.eup %10304  ;;  %10316 = vrcp.f32 %v7343_v9  ;;  %v7405_v28 = vmul.f32 %v10303_v16, %v16423_v13 }
 0x673   : > { %10141 = vmatpush3.bf16.msra.mxu0 %v16174_v24  ;;  %v7407_v29 = vmul.f32 %v10305_v4, %v16417_v30 }
 0x674   : > { %v10307_v19 = vpop.eup %10306  ;;  %v7346_v53 = vpop.xlane.xlu1 %7345 }
 0x675   : > { %v7349_v56 = vpop.xlane.xlu0 %7348  ;;  %10318 = vrcp.f32 %v7346_v53  ;;  %v7406_v22 = vmul.f32 %v10307_v19, %v16433_v14  ;;  %v7428_v36 = vpack.c.bf16 %v7408_v32, %v7407_v29 }
 0x676   : > { %10320 = vrcp.f32 %v7349_v56 }
 0x677   : > { %v7427_v61 = vpack.c.bf16 %v7406_v22, %v7405_v28 }
 0x678   : > { %v7352_v54 = vpop.xlane.xlu1 %7351 }
 0x679   : > { %10322 = vrcp.f32 %v7352_v54  ;;  %10134 = vmatprep.mubr.msk.bf16.mxu1 %vm2469_vm5, %v7427_v61 }
 0x67a   : > { %v10309_v24 = vpop.eup %10308  ;;  %10135 = vmatmul.mubr.msk.bf16.vlgmr.msra.gmra.mxu1 %vm2469_vm5, %v7428_v36 }
 0x67b   : > { %v10311_v42 = vpop.eup %10310  ;;  %10147 = vmatpush3.bf16.msra.mxu1 %v16177_v26  ;;  %v7412_v14 = vmul.f32 %v10309_v24, %v16444_v21 }
 0x67c   : > { %v10313_v15 = vpop.eup %10312  ;;  %10148 = vmatprep.subr.bf16.mxu1 %v16180_v18  ;;  %v7409_v30 = vmul.f32 %v10311_v42, %v16442_v27 }
 0x67d   : > { %v7411_v62 = vmul.f32 %v10313_v15, %v16435_v5 }
 0x67e   : > { %v10315_v13 = vpop.eup %10314 }
 0x67f   : > { %v7410_v59 = vmul.f32 %v10315_v13, %v16450_v1  ;;  %10149 = vmatpush3.bf16.msra.mxu1 %v16180_v18  ;;  %v10317_v3 = vpop.eup %10316  ;;  %v7430_v33 = vpack.c.bf16 %v7412_v14, %v7411_v62 }
 0x680   : > { %v7413_v26 = vmul.f32 %v10317_v3, %v16452_v49 }
 0x681   : > { %v7429_v8 = vpack.c.bf16 %v7410_v59, %v7409_v30 }
 0x682   : > { %v10319_v25 = vpop.eup %10318 }
 0x683   : > { %10142 = vmatprep.mubr.msk.bf16.mxu0 %vm2469_vm5, %v7429_v8  ;;  %v7414_v21 = vmul.f32 %v10319_v25, %v16460_v44  ;;  %v10321_v27 = vpop.eup %10320 }
 0x684   : > { %10143 = vmatmul.mubr.msk.bf16.vlgmr.msra.gmra.mxu0 %vm2469_vm5, %v7430_v33  ;;  %v7415_v5 = vmul.f32 %v10321_v27, %v16458_v7 }
 0x685   : > { %v7431_v57 = vpack.c.bf16 %v7414_v21, %v7413_v26 }
 0x686   : > { %v10323_v1 = vpop.eup %10322 }
 0x687   : > { %v7416_v18 = vmul.f32 %v10323_v1, %v16466_v40  ;;  %10150 = vmatprep.mubr.msk.bf16.mxu1 %vm2469_vm5, %v7431_v57 }
 0x689   : > { %v7432_v50 = vpack.c.bf16 %v7416_v18, %v7415_v5 }
 0x68b   : > { %10151 = vmatmul.mubr.msk.bf16.vlgmr.msra.gmra.mxu1 %vm2469_vm5, %v7432_v50 }
 0x6fe   : > { %v10096_v49 = vpop.f32.mrf.mxu0 }
 0x6ff   : > { %7875 = vst.msk [vmem:[%s16544_s9 + $0x10] sm:$0xff] %vm362_vm0, %v10096_v49 }
 0x700   : > { %v7473_v7 = vpop.f32.mrf.mxu0 }
 0x701   : > { %7873 = vst.msk [vmem:[%s16544_s9] sm:$0xff] %vm362_vm0, %v7473_v7 }
 0x702   : > { %v10097_v44 = vpop.f32.mrf.mxu0 }
 0x703   : > { %7876 = vst.msk [vmem:[%s16544_s9 + $0x18] sm:$0xff] %vm362_vm0, %v10097_v44 }
 0x704   : > { %v7476_v40 = vpop.f32.mrf.mxu0 }
 0x705   : > { %7874 = vst.msk [vmem:[%s16544_s9 + $0x8] sm:$0xff] %vm362_vm0, %v7476_v40 }
 0x708   : > { %v10104_v20 = vpop.f32.mrf.mxu1 }
 0x709   : > { %7879 = vst.msk [vmem:[%s16544_s9 + $0x30] sm:$0xff] %vm362_vm0, %v10104_v20 }
 0x70a   : > { %v7528_v34 = vpop.f32.mrf.mxu1 }
 0x70b   : > { %7877 = vst.msk [vmem:[%s16544_s9 + $0x20] sm:$0xff] %vm362_vm0, %v7528_v34 }
 0x70c   : > { %v10105_v38 = vpop.f32.mrf.mxu1 }
 0x70d   : > { %7880 = vst.msk [vmem:[%s16544_s9 + $0x38] sm:$0xff] %vm362_vm0, %v10105_v38 }
 0x70e   : > { %v7531_v41 = vpop.f32.mrf.mxu1 }
 0x70f   : > { %7878 = vst.msk [vmem:[%s16544_s9 + $0x28] sm:$0xff] %vm362_vm0, %v7531_v41 }
 0x714   : > { %v10112_v0 = vpop.f32.mrf.mxu0 }
 0x715   : > { %7883 = vst.msk [vmem:[%s16544_s9 + $0x50] sm:$0xff] %vm362_vm0, %v10112_v0 }
 0x716   : > { %v7583_v12 = vpop.f32.mrf.mxu0 }
 0x717   : > { %7881 = vst.msk [vmem:[%s16544_s9 + $0x40] sm:$0xff] %vm362_vm0, %v7583_v12 }
 0x718   : > { %v10113_v48 = vpop.f32.mrf.mxu0 }
 0x719   : > { %7884 = vst.msk [vmem:[%s16544_s9 + $0x58] sm:$0xff] %vm362_vm0, %v10113_v48 }
 0x71a   : > { %v7586_v45 = vpop.f32.mrf.mxu0 }
 0x71b   : > { %7882 = vst.msk [vmem:[%s16544_s9 + $0x48] sm:$0xff] %vm362_vm0, %v7586_v45 }
 0x721   : > { %v10120_v37 = vpop.f32.mrf.mxu1 }
 0x722   : > { %7887 = vst.msk [vmem:[%s16544_s9 + $0x70] sm:$0xff] %vm362_vm0, %v10120_v37 }
 0x723   : > { %v7638_v58 = vpop.f32.mrf.mxu1 }
 0x724   : > { %7885 = vst.msk [vmem:[%s16544_s9 + $0x60] sm:$0xff] %vm362_vm0, %v7638_v58 }
 0x725   : > { %v10121_v55 = vpop.f32.mrf.mxu1 }
 0x726   : > { %7888 = vst.msk [vmem:[%s16544_s9 + $0x78] sm:$0xff] %vm362_vm0, %v10121_v55 }
 0x727   : > { %v7641_v6 = vpop.f32.mrf.mxu1 }
 0x728   : > { %7886 = vst.msk [vmem:[%s16544_s9 + $0x68] sm:$0xff] %vm362_vm0, %v7641_v6 }
 0x72e   : > { %v10128_v10 = vpop.f32.mrf.mxu0 }
 0x72f   : > { %7891 = vst.msk [vmem:[%s16544_s9 + $0x90] sm:$0xff] %vm362_vm0, %v10128_v10 }
 0x730   : > { %v7693_v31 = vpop.f32.mrf.mxu0 }
 0x731   : > { %7889 = vst.msk [vmem:[%s16544_s9 + $0x80] sm:$0xff] %vm362_vm0, %v7693_v31 }
 0x732   : > { %v10129_v51 = vpop.f32.mrf.mxu0 }
 0x733   : > { %7892 = vst.msk [vmem:[%s16544_s9 + $0x98] sm:$0xff] %vm362_vm0, %v10129_v51 }
 0x734   : > { %v7696_v46 = vpop.f32.mrf.mxu0 }
 0x735   : > { %7890 = vst.msk [vmem:[%s16544_s9 + $0x88] sm:$0xff] %vm362_vm0, %v7696_v46 }
 0x73a   : > { %v10136_v60 = vpop.f32.mrf.mxu1 }
 0x73b   : > { %7895 = vst.msk [vmem:[%s16544_s9 + $0xb0] sm:$0xff] %vm362_vm0, %v10136_v60 }
 0x73c   : > { %v7748_v39 = vpop.f32.mrf.mxu1 }
 0x73d   : > { %7893 = vst.msk [vmem:[%s16544_s9 + $0xa0] sm:$0xff] %vm362_vm0, %v7748_v39 }
 0x73e   : > { %v10137_v35 = vpop.f32.mrf.mxu1 }
 0x73f   : > { %7896 = vst.msk [vmem:[%s16544_s9 + $0xb8] sm:$0xff] %vm362_vm0, %v10137_v35 }
 0x740   : > { %v7751_v23 = vpop.f32.mrf.mxu1 }
 0x741   : > { %7894 = vst.msk [vmem:[%s16544_s9 + $0xa8] sm:$0xff] %vm362_vm0, %v7751_v23 }
 0x744   : > { %v10144_v11 = vpop.f32.mrf.mxu0 }
 0x745   : > { %7899 = vst.msk [vmem:[%s16544_s9 + $0xd0] sm:$0xff] %vm362_vm0, %v10144_v11 }
 0x746   : > { %v7803_v47 = vpop.f32.mrf.mxu0 }
 0x747   : > { %7897 = vst.msk [vmem:[%s16544_s9 + $0xc0] sm:$0xff] %vm362_vm0, %v7803_v47 }
 0x748   : > { %v10145_v63 = vpop.f32.mrf.mxu0 }
 0x749   : > { %7900 = vst.msk [vmem:[%s16544_s9 + $0xd8] sm:$0xff] %vm362_vm0, %v10145_v63 }
 0x74a   : > { %v7806_v52 = vpop.f32.mrf.mxu0 }
 0x74b   : > { %7898 = vst.msk [vmem:[%s16544_s9 + $0xc8] sm:$0xff] %vm362_vm0, %v7806_v52  ;;  %v10152_v17 = vpop.f32.mrf.mxu1 }
 0x74c   : > { %7903 = vst.msk [vmem:[%s16544_s9 + $0xf0] sm:$0xff] %vm362_vm0, %v10152_v17 }
 0x74d   : > { %v7858_v2 = vpop.f32.mrf.mxu1 }
 0x74e   : > { %7901 = vst.msk [vmem:[%s16544_s9 + $0xe0] sm:$0xff] %vm362_vm0, %v7858_v2 }
 0x74f   : > { %v10153_v9 = vpop.f32.mrf.mxu1 }
 0x750   : > { %7904 = vst.msk [vmem:[%s16544_s9 + $0xf8] sm:$0xff] %vm362_vm0, %v10153_v9 }
 0x751   : > { %v7861_v43 = vpop.f32.mrf.mxu1 }
 0x752   : > { %7902 = vst.msk [vmem:[%s16544_s9 + $0xe8] sm:$0xff] %vm362_vm0, %v7861_v43 }
 0x753 PF: > { %s16_s23 = sadd.s32 1, %s10421_s23   ;;  %s17783_s21 = smov %s10417_s22 }
 0x754   : > { %p13_p5 = scmp.ge.s32.totalorder %s16_s23, 4   ;;  %s17784_s22 = smov %s17786_s24 }
 0x756   :  { %15 = sbr.rel (!%p13_p5) target bundleno = 2 (0x2), region = 111 }

</bundles_post_ra>
